<compile_context>
chip_gen: v6e
topology: v6e:2x2x1
jax: 0.10.0
libtpu: 0.0.40
codegen_flags: <defaults>
</compile_context>

<pallas_src>
import functools
import math

import jax
import jax.numpy as jnp
from jax.experimental import pallas as pl
from jax.experimental.pallas import tpu as pltpu

EPS = 1e-5              # BatchNorm eps
NEG_SLOPE = 0.2         # assumed eu.MLP activation: LeakyReLU(0.2)
VMEM_LIMIT = 48 * 1024 * 1024   # <= v7x 64 MiB budget; > default 32 MiB on v5e/v6e


def _leaky_relu(x):
    # 2 VALU ops (mul+max) instead of cmp+mul+select.
    return jnp.maximum(x, NEG_SLOPE * x)


def _pspec(shape):
    nd = len(shape)
    return pl.BlockSpec(shape, lambda b, t, _nd=nd: (0,) * _nd)


def _choose_tile(n):
    # Lane-dense point tile, multiple of 128; keeps per-step one-hot bounded and
    # gives >= 2 parallel grid steps on v7x whenever bs * N / TN >= 2.
    for t in (256, 128):
        if n % t == 0:
            return t
    # TODO(synk): point counts not divisible by 128 fall back to a full-N tile.
    return n


def _choose_k_block(n, tn, k, budget=6 * 1024 * 1024):
    # Cap the batched one-hot [N, k_block*TN] bf16 footprint (VMEM friendly on v7x).
    per_j = max(n * tn * 2, 1)
    return max(1, min(k, budget // per_j))


def _round_up(x, m):
    return ((x + m - 1) // m) * m


# ---------------------------------------------------------------------------
# Pallas kernels
# ---------------------------------------------------------------------------

def _edgeconv_core(n_all, c_tile, idx, w2, b2, *, k, tn, k_block):
    """Shared fused edge-conv body (batched one-hot gather + MLP + max over k).

    n_all:  [C1, N]  bf16   neighbor-branch projection (Wa @ x, all points)
    c_tile: [C1, TN] f32    center-branch projection ((Wb-Wa) @ x_ctr + b1)
    idx:    [k, TN]  int32  global knn indices for this tile's points
    returns [C2, TN] f32    max_j LeakyReLU(W2 @ LeakyReLU(n_all[:, idx_j] + c_tile) + b2)
    """
    n_pts = n_all.shape[-1]
    iota_col = jax.lax.broadcasted_iota(jnp.int32, (n_pts, 1), 0)   # [N, 1] only

    acc = None
    for j0 in range(0, k, k_block):
        kb = min(k_block, k - j0)
        # Batched one-hot gather matrix for this neighbor chunk: [N, kb*TN] bf16.
        oh = jnp.concatenate(
            [(iota_col == idx[j0 + jj, :][None, :]).astype(jnp.bfloat16)
             for jj in range(kb)],
            axis=1)
        nbr = jnp.dot(n_all, oh, preferred_element_type=jnp.float32)    # [C1, kb*TN]
        ctr = c_tile if kb == 1 else jnp.concatenate([c_tile] * kb, axis=1)
        h = _leaky_relu(nbr + ctr)                                      # [C1, kb*TN] f32
        g = jnp.dot(w2, h.astype(jnp.bfloat16),
                    preferred_element_type=jnp.float32) + b2            # [C2, kb*TN]
        g = _leaky_relu(g)
        for jj in range(kb):                                            # cheap lane-slice max
            gj = g[:, jj * tn:(jj + 1) * tn]
            acc = gj if acc is None else jnp.maximum(acc, gj)
    return acc


def _edgeconv_kernel(nall_ref, xc_ref, idx_ref, wd_ref, b1_ref, w2_ref, b2_ref,
                     out_ref, *, k, tn, k_block):
    """First DGCNN edge conv (gather + 2-layer MLP + max over k), channels-first."""
    n_all = nall_ref[0]                                                 # [C1, N] bf16
    x_tile = xc_ref[0]                                                  # [Cin, TN] bf16
    c_tile = jnp.dot(wd_ref[...], x_tile,
                     preferred_element_type=jnp.float32) + b1_ref[...]  # [C1, TN] f32
    acc = _edgeconv_core(n_all, c_tile, idx_ref[0], w2_ref[...], b2_ref[...],
                         k=k, tn=tn, k_block=k_block)
    out_ref[0] = acc.astype(out_ref.dtype)


def _edgeconv_mlp_kernel(nall_ref, x1_ref, idx_ref, wd_ref, b1_ref, w2_ref, b2_ref,
                         w3a_ref, w3b_ref, b31_ref, w32_ref, b32_ref,
                         out_ref, *, k, tn, k_block):
    """Second edge conv fused with conv3 (pointwise MLP on concat([x1, x2]))."""
    n_all = nall_ref[0]                                                 # [C21, N] bf16
    x1_tile = x1_ref[0]                                                 # [C1, TN] bf16
    c_tile = jnp.dot(wd_ref[...], x1_tile,
                     preferred_element_type=jnp.float32) + b1_ref[...]
    acc = _edgeconv_core(n_all, c_tile, idx_ref[0], w2_ref[...], b2_ref[...],
                         k=k, tn=tn, k_block=k_block)
    x2_tile = acc.astype(jnp.bfloat16)                                  # [C2, TN]

    # conv3 on concat([x1, x2], channels) without materializing the concat:
    h3 = (jnp.dot(w3a_ref[...], x1_tile, preferred_element_type=jnp.float32)
          + jnp.dot(w3b_ref[...], x2_tile, preferred_element_type=jnp.float32)
          + b31_ref[...])
    h3 = _leaky_relu(h3).astype(jnp.bfloat16)
    out = jnp.dot(w32_ref[...], h3, preferred_element_type=jnp.float32) + b32_ref[...]
    out_ref[0] = _leaky_relu(out).astype(out_ref.dtype)


# ---------------------------------------------------------------------------
# pallas_call wrappers
# ---------------------------------------------------------------------------

def edgeconv(n_all, x_cf, idx_kt, p, out_dtype=jnp.bfloat16):
    """n_all: [bs, C1, N] bf16 (precomputed Wa@x), x_cf: [bs, Cin, N] bf16,
    idx_kt: [bs, k, N] int32 -> [bs, C_out, N]."""
    bs, c1, n = n_all.shape
    c_in = x_cf.shape[1]
    k = idx_kt.shape[1]
    tn = _choose_tile(n)
    kb = _choose_k_block(n, tn, k)
    c_out = p['w2'].shape[0]
    kernel = functools.partial(_edgeconv_kernel, k=k, tn=tn, k_block=kb)
    return pl.pallas_call(
        kernel,
        out_shape=jax.ShapeDtypeStruct((bs, c_out, n), out_dtype),
        grid=(bs, n // tn),
        in_specs=[
            pl.BlockSpec((1, c1, n), lambda b, t: (b, 0, 0)),    # gather source (full N)
            pl.BlockSpec((1, c_in, tn), lambda b, t: (b, 0, t)),  # center tile
            pl.BlockSpec((1, k, tn), lambda b, t: (b, 0, t)),
            _pspec(p['wd'].shape), _pspec(p['b1'].shape),
            _pspec(p['w2'].shape), _pspec(p['b2'].shape),
        ],
        out_specs=pl.BlockSpec((1, c_out, tn), lambda b, t: (b, 0, t)),
        compiler_params=pltpu.CompilerParams(
            dimension_semantics=("parallel", "parallel"),
            vmem_limit_bytes=VMEM_LIMIT),
    )(n_all, x_cf, idx_kt, p['wd'], p['b1'], p['w2'], p['b2'])


def edgeconv_mlp(n_all, x1_cf, idx_kt, p2, p3, out_dtype=jnp.float32):
    """Second edge conv + conv3 fused. -> [bs, emb_out_padded, N] f32."""
    bs, c21, n = n_all.shape
    c1 = x1_cf.shape[1]
    k = idx_kt.shape[1]
    tn = _choose_tile(n)
    kb = _choose_k_block(n, tn, k)
    c_out = p3['w32'].shape[0]
    kernel = functools.partial(_edgeconv_mlp_kernel, k=k, tn=tn, k_block=kb)
    return pl.pallas_call(
        kernel,
        out_shape=jax.ShapeDtypeStruct((bs, c_out, n), out_dtype),
        grid=(bs, n // tn),
        in_specs=[
            pl.BlockSpec((1, c21, n), lambda b, t: (b, 0, 0)),
            pl.BlockSpec((1, c1, tn), lambda b, t: (b, 0, t)),
            pl.BlockSpec((1, k, tn), lambda b, t: (b, 0, t)),
            _pspec(p2['wd'].shape), _pspec(p2['b1'].shape),
            _pspec(p2['w2'].shape), _pspec(p2['b2'].shape),
            _pspec(p3['w3a'].shape), _pspec(p3['w3b'].shape), _pspec(p3['b31'].shape),
            _pspec(p3['w32'].shape), _pspec(p3['b32'].shape),
        ],
        out_specs=pl.BlockSpec((1, c_out, tn), lambda b, t: (b, 0, t)),
        compiler_params=pltpu.CompilerParams(
            dimension_semantics=("parallel", "parallel"),
            vmem_limit_bytes=VMEM_LIMIT),
    )(n_all, x1_cf, idx_kt,
      p2['wd'], p2['b1'], p2['w2'], p2['b2'],
      p3['w3a'], p3['w3b'], p3['b31'], p3['w32'], p3['b32'])


# ---------------------------------------------------------------------------
# JAX glue: knn (top-k over squared Euclidean distance; self included)
# ---------------------------------------------------------------------------

def knn_cf(x_cf, k):
    """x_cf: [bs, C, N] channels-first -> [bs, k, N] int32 nearest-neighbor indices."""
    xf = x_cf.astype(jnp.float32)
    sq = jnp.sum(xf * xf, axis=1)                               # [bs, N]
    inner = jnp.einsum('bcn,bcm->bnm', xf, xf)                  # [bs, N, N]
    neg_dist = 2.0 * inner - sq[:, :, None] - sq[:, None, :]    # -||xi - xj||^2
    _, idx = jax.lax.top_k(neg_dist, k)                         # [bs, N, k]
    return jnp.transpose(idx, (0, 2, 1)).astype(jnp.int32)      # [bs, k, N]


# ---------------------------------------------------------------------------
# Parameter construction (deterministic, synthetic) with BN/bias folding
# ---------------------------------------------------------------------------

def _init_folded_layer(key, cin, cout):
    """Conv1x1 + BatchNorm(eval) + LeakyReLU layer; BN and conv bias folded into (W, b)."""
    key, kw, kb, kg, kbe, km, kv = jax.random.split(key, 7)
    bound = 1.0 / math.sqrt(cin)
    w = jax.random.uniform(kw, (cin, cout), jnp.float32, -bound, bound)
    b = jax.random.uniform(kb, (cout,), jnp.float32, -bound, bound)
    gamma = 1.0 + 0.05 * jax.random.normal(kg, (cout,), jnp.float32)
    beta = 0.05 * jax.random.normal(kbe, (cout,), jnp.float32)
    rmean = 0.05 * jax.random.normal(km, (cout,), jnp.float32)
    rvar = 1.0 + 0.05 * jnp.abs(jax.random.normal(kv, (cout,), jnp.float32))
    scale = gamma / jnp.sqrt(rvar + EPS)
    w_f = w * scale[None, :]                 # fold BN scale into weight columns
    b_f = scale * (b - rmean) + beta         # fold conv bias + BN shift
    return key, w_f, b_f


def _wpad(w_t, rows, cols):
    """Zero-pad a pre-transposed [C_out, C_in] weight to padded widths, cast bf16."""
    return jnp.pad(w_t, ((0, rows - w_t.shape[0]), (0, cols - w_t.shape[1]))
                   ).astype(jnp.bfloat16)


def _bpad(b, rows):
    return jnp.pad(b, (0, rows - b.shape[0])).reshape(-1, 1).astype(jnp.float32)


def make_gcn_encoder(key, emb_in, emb_out, n_near=10):
    """Builds folded + channel-padded params and a forward fn reproducing GCNEncoder."""
    emb_inc = (emb_out / (4 * emb_in)) ** 0.25
    l1_0 = emb_in * 2
    l1_1 = int(l1_0 * emb_inc)
    l1_2 = int(l1_0 * emb_inc ** 2)
    l2_0 = l1_2 * 2
    l2_1 = int(l2_0 * emb_inc)
    l2_2 = emb_out
    l3_0 = l2_2 + l1_2
    l3_1 = int((emb_out / l3_0) ** 0.5 * l3_0)
    l3_2 = emb_out

    # Zero-padded channel widths (numerics on real channels unchanged).
    pin = _round_up(emb_in, 8)
    p11, p12 = _round_up(l1_1, 16), _round_up(l1_2, 16)
    p21, p22 = _round_up(l2_1, 16), _round_up(l2_2, 16)
    p31, p32 = _round_up(l3_1, 16), _round_up(l3_2, 16)

    # conv1 (edge conv #1): input [nbr - ctr ; ctr] -> split & re-fold W1.
    key, w11, b11 = _init_folded_layer(key, l1_0, l1_1)
    key, w12, b12 = _init_folded_layer(key, l1_1, l1_2)
    p1 = dict(
        wa=_wpad(w11[:emb_in].T, p11, pin),                    # acts on the neighbor
        wd=_wpad((w11[emb_in:] - w11[:emb_in]).T, p11, pin),   # (Wb - Wa): on the center
        b1=_bpad(b11, p11),
        w2=_wpad(w12.T, p12, p11),
        b2=_bpad(b12, p12),
    )
    # conv2 (edge conv #2)
    key, w21, b21 = _init_folded_layer(key, l2_0, l2_1)
    key, w22, b22 = _init_folded_layer(key, l2_1, l2_2)
    p2 = dict(
        wa=_wpad(w21[:l1_2].T, p21, p12),
        wd=_wpad((w21[l1_2:] - w21[:l1_2]).T, p21, p12),
        b1=_bpad(b21, p21),
        w2=_wpad(w22.T, p22, p21),
        b2=_bpad(b22, p22),
    )
    # conv3 (pointwise MLP on concat([x1, x2])) -- W split by row blocks.
    key, w31, b31 = _init_folded_layer(key, l3_0, l3_1)
    key, w32, b32 = _init_folded_layer(key, l3_1, l3_2)
    p3 = dict(
        w3a=_wpad(w31[:l1_2].T, p31, p12),                     # rows acting on x1
        w3b=_wpad(w31[l1_2:].T, p31, p22),                     # rows acting on x2
        b31=_bpad(b31, p31),
        w32=_wpad(w32.T, p32, p31),
        b32=_bpad(b32, p32),
    )
    params = dict(conv1=p1, conv2=p2, conv3=p3)

    def forward(x):
        # x: [bs, emb_in, n_point]  (channels-first, as in the PyTorch module)
        bs, c, n = x.shape
        xp = jnp.pad(x, ((0, 0), (0, pin - c), (0, 0))).astype(jnp.bfloat16)
        idx1 = knn_cf(x, n_near)                                # graph on raw coords
        # neighbor-branch projection precomputed ONCE per batch (reused by all tiles)
        nall1 = jnp.einsum('oc,bcn->bon', p1['wa'], xp,
                           preferred_element_type=jnp.float32).astype(jnp.bfloat16)
        x1 = edgeconv(nall1, xp, idx1, p1)                      # [bs, p12, N] bf16
        idx2 = knn_cf(x1, n_near)                               # dynamic graph on features
        nall2 = jnp.einsum('oc,bcn->bon', p2['wa'], x1,
                           preferred_element_type=jnp.float32).astype(jnp.bfloat16)
        out = edgeconv_mlp(nall2, x1, idx2, p2, p3)             # [bs, p32, N] f32
        return out[:, :emb_out, :]                              # drop channel padding

    return forward, params


if __name__ == "__main__":
    key = jax.random.PRNGKey(0)
    bs, emb_in, emb_out = 2, 4, 32
    n_point, n_near = 256, 10

    key, kparam, kdata = jax.random.split(key, 3)
    forward, _params = make_gcn_encoder(kparam, emb_in, emb_out, n_near)

    x = jax.random.normal(kdata, (bs, emb_in, n_point), jnp.float32)

    out = jax.jit(forward)(x)
    out = jax.block_until_ready(out)
    assert out.shape == (bs, emb_out, n_point), out.shape
    assert bool(jnp.all(jnp.isfinite(out)))
    print("KERNEL_OK")
</pallas_src>

<mosaic_0001>
module attributes {stable_mosaic.version = 11 : i64} {
  func.func @_edgeconv_kernel(%arg0: i32, %arg1: i32, %arg2: memref<1x16x256xbf16, #tpu.memory_space<vmem>>, %arg3: memref<1x8x256xbf16, #tpu.memory_space<vmem>>, %arg4: memref<1x10x256xi32, #tpu.memory_space<vmem>>, %arg5: memref<16x8xbf16, #tpu.memory_space<vmem>>, %arg6: memref<16x1xf32, #tpu.memory_space<vmem>>, %arg7: memref<16x16xbf16, #tpu.memory_space<vmem>>, %arg8: memref<16x1xf32, #tpu.memory_space<vmem>>, %arg9: memref<1x16x256xbf16, #tpu.memory_space<vmem>>) attributes {dimension_semantics = [#tpu.dimension_semantics<parallel>, #tpu.dimension_semantics<parallel>], iteration_bounds = array<i64: 2, 1>, scalar_prefetch = 0 : i64, scratch_operands = 0 : i64, tpu.core_type = #tpu.core_type<tc>, window_params = [{transform_indices = @transform_0, window_bounds = array<i64: 1, 16, 256>}, {transform_indices = @transform_1, window_bounds = array<i64: 1, 8, 256>}, {transform_indices = @transform_2, window_bounds = array<i64: 1, 10, 256>}, {pipeline_mode = #tpu.pipeline_mode<synchronous>, transform_indices = @transform_3, window_bounds = array<i64: 16, 8>}, {pipeline_mode = #tpu.pipeline_mode<synchronous>, transform_indices = @transform_4, window_bounds = array<i64: 16, 1>}, {pipeline_mode = #tpu.pipeline_mode<synchronous>, transform_indices = @transform_5, window_bounds = array<i64: 16, 16>}, {pipeline_mode = #tpu.pipeline_mode<synchronous>, transform_indices = @transform_6, window_bounds = array<i64: 16, 1>}, {transform_indices = @transform_7, window_bounds = array<i64: 1, 16, 256>}]} {
    %c0 = arith.constant 0 : index
    %c0_0 = arith.constant 0 : index
    %c0_1 = arith.constant 0 : index
    %0 = vector.load %arg2[%c0, %c0_0, %c0_1] : memref<1x16x256xbf16, #tpu.memory_space<vmem>>, vector<1x16x256xbf16>
    %1 = vector.shape_cast %0 : vector<1x16x256xbf16> to vector<16x256xbf16>
    %c0_2 = arith.constant 0 : index
    %c0_3 = arith.constant 0 : index
    %c0_4 = arith.constant 0 : index
    %2 = vector.load %arg3[%c0_2, %c0_3, %c0_4] : memref<1x8x256xbf16, #tpu.memory_space<vmem>>, vector<1x8x256xbf16>
    %3 = vector.shape_cast %2 : vector<1x8x256xbf16> to vector<8x256xbf16>
    %c0_5 = arith.constant 0 : index
    %c0_6 = arith.constant 0 : index
    %4 = vector.load %arg5[%c0_5, %c0_6] : memref<16x8xbf16, #tpu.memory_space<vmem>>, vector<16x8xbf16>
    %cst = arith.constant dense<0.000000e+00> : vector<16x256xf32>
    %5 = tpu.matmul %4, %3, %cst {dimension_numbers = #tpu.dot_dimension_numbers<[1], [0], [0], [1], [0, 0, 1, 1], [], []>} : vector<16x8xbf16>, vector<8x256xbf16>, vector<16x256xf32> -> vector<16x256xf32>
    %c0_7 = arith.constant 0 : index
    %c0_8 = arith.constant 0 : index
    %6 = vector.load %arg6[%c0_7, %c0_8] : memref<16x1xf32, #tpu.memory_space<vmem>>, vector<16x1xf32>
    %7 = vector.broadcast %6 : vector<16x1xf32> to vector<16x256xf32>
    %8 = arith.addf %5, %7 : vector<16x256xf32>
    %c0_9 = arith.constant 0 : index
    %c0_10 = arith.constant 0 : index
    %c0_11 = arith.constant 0 : index
    %9 = vector.load %arg4[%c0_9, %c0_10, %c0_11] : memref<1x10x256xi32, #tpu.memory_space<vmem>>, vector<1x10x256xi32>
    %10 = vector.shape_cast %9 : vector<1x10x256xi32> to vector<10x256xi32>
    %c0_12 = arith.constant 0 : index
    %c0_13 = arith.constant 0 : index
    %11 = vector.load %arg7[%c0_12, %c0_13] : memref<16x16xbf16, #tpu.memory_space<vmem>>, vector<16x16xbf16>
    %c0_14 = arith.constant 0 : index
    %c0_15 = arith.constant 0 : index
    %12 = vector.load %arg8[%c0_14, %c0_15] : memref<16x1xf32, #tpu.memory_space<vmem>>, vector<16x1xf32>
    %13 = tpu.iota {dimensions = array<i32: 0>} : vector<256x1xi32>
    %14 = vector.extract_strided_slice %10 {offsets = [0, 0], sizes = [1, 256], strides = [1, 1]} : vector<10x256xi32> to vector<1x256xi32>
    %15 = vector.shape_cast %14 : vector<1x256xi32> to vector<256xi32>
    %16 = vector.shape_cast %15 : vector<256xi32> to vector<1x256xi32>
    %17 = vector.broadcast %13 : vector<256x1xi32> to vector<256x256xi32>
    %18 = vector.broadcast %16 : vector<1x256xi32> to vector<256x256xi32>
    %19 = arith.cmpi eq, %17, %18 : vector<256x256xi32>
    %20 = arith.extui %19 : vector<256x256xi1> to vector<256x256xi32>
    %21 = arith.sitofp %20 : vector<256x256xi32> to vector<256x256xf32>
    %22 = arith.truncf %21 : vector<256x256xf32> to vector<256x256xbf16>
    %23 = vector.extract_strided_slice %10 {offsets = [1, 0], sizes = [1, 256], strides = [1, 1]} : vector<10x256xi32> to vector<1x256xi32>
    %24 = vector.shape_cast %23 : vector<1x256xi32> to vector<256xi32>
    %25 = vector.shape_cast %24 : vector<256xi32> to vector<1x256xi32>
    %26 = vector.broadcast %13 : vector<256x1xi32> to vector<256x256xi32>
    %27 = vector.broadcast %25 : vector<1x256xi32> to vector<256x256xi32>
    %28 = arith.cmpi eq, %26, %27 : vector<256x256xi32>
    %29 = arith.extui %28 : vector<256x256xi1> to vector<256x256xi32>
    %30 = arith.sitofp %29 : vector<256x256xi32> to vector<256x256xf32>
    %31 = arith.truncf %30 : vector<256x256xf32> to vector<256x256xbf16>
    %32 = vector.extract_strided_slice %10 {offsets = [2, 0], sizes = [1, 256], strides = [1, 1]} : vector<10x256xi32> to vector<1x256xi32>
    %33 = vector.shape_cast %32 : vector<1x256xi32> to vector<256xi32>
    %34 = vector.shape_cast %33 : vector<256xi32> to vector<1x256xi32>
    %35 = vector.broadcast %13 : vector<256x1xi32> to vector<256x256xi32>
    %36 = vector.broadcast %34 : vector<1x256xi32> to vector<256x256xi32>
    %37 = arith.cmpi eq, %35, %36 : vector<256x256xi32>
    %38 = arith.extui %37 : vector<256x256xi1> to vector<256x256xi32>
    %39 = arith.sitofp %38 : vector<256x256xi32> to vector<256x256xf32>
    %40 = arith.truncf %39 : vector<256x256xf32> to vector<256x256xbf16>
    %41 = vector.extract_strided_slice %10 {offsets = [3, 0], sizes = [1, 256], strides = [1, 1]} : vector<10x256xi32> to vector<1x256xi32>
    %42 = vector.shape_cast %41 : vector<1x256xi32> to vector<256xi32>
    %43 = vector.shape_cast %42 : vector<256xi32> to vector<1x256xi32>
    %44 = vector.broadcast %13 : vector<256x1xi32> to vector<256x256xi32>
    %45 = vector.broadcast %43 : vector<1x256xi32> to vector<256x256xi32>
    %46 = arith.cmpi eq, %44, %45 : vector<256x256xi32>
    %47 = arith.extui %46 : vector<256x256xi1> to vector<256x256xi32>
    %48 = arith.sitofp %47 : vector<256x256xi32> to vector<256x256xf32>
    %49 = arith.truncf %48 : vector<256x256xf32> to vector<256x256xbf16>
    %50 = vector.extract_strided_slice %10 {offsets = [4, 0], sizes = [1, 256], strides = [1, 1]} : vector<10x256xi32> to vector<1x256xi32>
    %51 = vector.shape_cast %50 : vector<1x256xi32> to vector<256xi32>
    %52 = vector.shape_cast %51 : vector<256xi32> to vector<1x256xi32>
    %53 = vector.broadcast %13 : vector<256x1xi32> to vector<256x256xi32>
    %54 = vector.broadcast %52 : vector<1x256xi32> to vector<256x256xi32>
    %55 = arith.cmpi eq, %53, %54 : vector<256x256xi32>
    %56 = arith.extui %55 : vector<256x256xi1> to vector<256x256xi32>
    %57 = arith.sitofp %56 : vector<256x256xi32> to vector<256x256xf32>
    %58 = arith.truncf %57 : vector<256x256xf32> to vector<256x256xbf16>
    %59 = vector.extract_strided_slice %10 {offsets = [5, 0], sizes = [1, 256], strides = [1, 1]} : vector<10x256xi32> to vector<1x256xi32>
    %60 = vector.shape_cast %59 : vector<1x256xi32> to vector<256xi32>
    %61 = vector.shape_cast %60 : vector<256xi32> to vector<1x256xi32>
    %62 = vector.broadcast %13 : vector<256x1xi32> to vector<256x256xi32>
    %63 = vector.broadcast %61 : vector<1x256xi32> to vector<256x256xi32>
    %64 = arith.cmpi eq, %62, %63 : vector<256x256xi32>
    %65 = arith.extui %64 : vector<256x256xi1> to vector<256x256xi32>
    %66 = arith.sitofp %65 : vector<256x256xi32> to vector<256x256xf32>
    %67 = arith.truncf %66 : vector<256x256xf32> to vector<256x256xbf16>
    %68 = vector.extract_strided_slice %10 {offsets = [6, 0], sizes = [1, 256], strides = [1, 1]} : vector<10x256xi32> to vector<1x256xi32>
    %69 = vector.shape_cast %68 : vector<1x256xi32> to vector<256xi32>
    %70 = vector.shape_cast %69 : vector<256xi32> to vector<1x256xi32>
    %71 = vector.broadcast %13 : vector<256x1xi32> to vector<256x256xi32>
    %72 = vector.broadcast %70 : vector<1x256xi32> to vector<256x256xi32>
    %73 = arith.cmpi eq, %71, %72 : vector<256x256xi32>
    %74 = arith.extui %73 : vector<256x256xi1> to vector<256x256xi32>
    %75 = arith.sitofp %74 : vector<256x256xi32> to vector<256x256xf32>
    %76 = arith.truncf %75 : vector<256x256xf32> to vector<256x256xbf16>
    %77 = vector.extract_strided_slice %10 {offsets = [7, 0], sizes = [1, 256], strides = [1, 1]} : vector<10x256xi32> to vector<1x256xi32>
    %78 = vector.shape_cast %77 : vector<1x256xi32> to vector<256xi32>
    %79 = vector.shape_cast %78 : vector<256xi32> to vector<1x256xi32>
    %80 = vector.broadcast %13 : vector<256x1xi32> to vector<256x256xi32>
    %81 = vector.broadcast %79 : vector<1x256xi32> to vector<256x256xi32>
    %82 = arith.cmpi eq, %80, %81 : vector<256x256xi32>
    %83 = arith.extui %82 : vector<256x256xi1> to vector<256x256xi32>
    %84 = arith.sitofp %83 : vector<256x256xi32> to vector<256x256xf32>
    %85 = arith.truncf %84 : vector<256x256xf32> to vector<256x256xbf16>
    %86 = vector.extract_strided_slice %10 {offsets = [8, 0], sizes = [1, 256], strides = [1, 1]} : vector<10x256xi32> to vector<1x256xi32>
    %87 = vector.shape_cast %86 : vector<1x256xi32> to vector<256xi32>
    %88 = vector.shape_cast %87 : vector<256xi32> to vector<1x256xi32>
    %89 = vector.broadcast %13 : vector<256x1xi32> to vector<256x256xi32>
    %90 = vector.broadcast %88 : vector<1x256xi32> to vector<256x256xi32>
    %91 = arith.cmpi eq, %89, %90 : vector<256x256xi32>
    %92 = arith.extui %91 : vector<256x256xi1> to vector<256x256xi32>
    %93 = arith.sitofp %92 : vector<256x256xi32> to vector<256x256xf32>
    %94 = arith.truncf %93 : vector<256x256xf32> to vector<256x256xbf16>
    %95 = vector.extract_strided_slice %10 {offsets = [9, 0], sizes = [1, 256], strides = [1, 1]} : vector<10x256xi32> to vector<1x256xi32>
    %96 = vector.shape_cast %95 : vector<1x256xi32> to vector<256xi32>
    %97 = vector.shape_cast %96 : vector<256xi32> to vector<1x256xi32>
    %98 = vector.broadcast %13 : vector<256x1xi32> to vector<256x256xi32>
    %99 = vector.broadcast %97 : vector<1x256xi32> to vector<256x256xi32>
    %100 = arith.cmpi eq, %98, %99 : vector<256x256xi32>
    %101 = arith.extui %100 : vector<256x256xi1> to vector<256x256xi32>
    %102 = arith.sitofp %101 : vector<256x256xi32> to vector<256x256xf32>
    %103 = arith.truncf %102 : vector<256x256xf32> to vector<256x256xbf16>
    %104 = tpu.concatenate %22, %31, %40, %49, %58, %67, %76, %85, %94, %103 in 1 : vector<256x256xbf16>, vector<256x256xbf16>, vector<256x256xbf16>, vector<256x256xbf16>, vector<256x256xbf16>, vector<256x256xbf16>, vector<256x256xbf16>, vector<256x256xbf16>, vector<256x256xbf16>, vector<256x256xbf16> -> vector<256x2560xbf16>
    %cst_16 = arith.constant dense<0.000000e+00> : vector<16x2560xf32>
    %105 = tpu.matmul %1, %104, %cst_16 {dimension_numbers = #tpu.dot_dimension_numbers<[1], [0], [0], [1], [0, 0, 1, 1], [], []>} : vector<16x256xbf16>, vector<256x2560xbf16>, vector<16x2560xf32> -> vector<16x2560xf32>
    %106 = tpu.concatenate %8, %8, %8, %8, %8, %8, %8, %8, %8, %8 in 1 : vector<16x256xf32>, vector<16x256xf32>, vector<16x256xf32>, vector<16x256xf32>, vector<16x256xf32>, vector<16x256xf32>, vector<16x256xf32>, vector<16x256xf32>, vector<16x256xf32>, vector<16x256xf32> -> vector<16x2560xf32>
    %107 = arith.addf %105, %106 : vector<16x2560xf32>
    %cst_17 = arith.constant 2.000000e-01 : f32
    %108 = vector.broadcast %cst_17 : f32 to vector<16x2560xf32>
    %109 = arith.mulf %108, %107 : vector<16x2560xf32>
    %110 = arith.maximumf %107, %109 : vector<16x2560xf32>
    %111 = arith.truncf %110 : vector<16x2560xf32> to vector<16x2560xbf16>
    %cst_18 = arith.constant dense<0.000000e+00> : vector<16x2560xf32>
    %112 = tpu.matmul %11, %111, %cst_18 {dimension_numbers = #tpu.dot_dimension_numbers<[1], [0], [0], [1], [0, 0, 1, 1], [], []>} : vector<16x16xbf16>, vector<16x2560xbf16>, vector<16x2560xf32> -> vector<16x2560xf32>
    %113 = vector.broadcast %12 : vector<16x1xf32> to vector<16x2560xf32>
    %114 = arith.addf %112, %113 : vector<16x2560xf32>
    %cst_19 = arith.constant 2.000000e-01 : f32
    %115 = vector.broadcast %cst_19 : f32 to vector<16x2560xf32>
    %116 = arith.mulf %115, %114 : vector<16x2560xf32>
    %117 = arith.maximumf %114, %116 : vector<16x2560xf32>
    %118 = vector.extract_strided_slice %117 {offsets = [0, 0], sizes = [16, 256], strides = [1, 1]} : vector<16x2560xf32> to vector<16x256xf32>
    %119 = vector.extract_strided_slice %117 {offsets = [0, 256], sizes = [16, 256], strides = [1, 1]} : vector<16x2560xf32> to vector<16x256xf32>
    %120 = arith.maximumf %118, %119 : vector<16x256xf32>
    %121 = vector.extract_strided_slice %117 {offsets = [0, 512], sizes = [16, 256], strides = [1, 1]} : vector<16x2560xf32> to vector<16x256xf32>
    %122 = arith.maximumf %120, %121 : vector<16x256xf32>
    %123 = vector.extract_strided_slice %117 {offsets = [0, 768], sizes = [16, 256], strides = [1, 1]} : vector<16x2560xf32> to vector<16x256xf32>
    %124 = arith.maximumf %122, %123 : vector<16x256xf32>
    %125 = vector.extract_strided_slice %117 {offsets = [0, 1024], sizes = [16, 256], strides = [1, 1]} : vector<16x2560xf32> to vector<16x256xf32>
    %126 = arith.maximumf %124, %125 : vector<16x256xf32>
    %127 = vector.extract_strided_slice %117 {offsets = [0, 1280], sizes = [16, 256], strides = [1, 1]} : vector<16x2560xf32> to vector<16x256xf32>
    %128 = arith.maximumf %126, %127 : vector<16x256xf32>
    %129 = vector.extract_strided_slice %117 {offsets = [0, 1536], sizes = [16, 256], strides = [1, 1]} : vector<16x2560xf32> to vector<16x256xf32>
    %130 = arith.maximumf %128, %129 : vector<16x256xf32>
    %131 = vector.extract_strided_slice %117 {offsets = [0, 1792], sizes = [16, 256], strides = [1, 1]} : vector<16x2560xf32> to vector<16x256xf32>
    %132 = arith.maximumf %130, %131 : vector<16x256xf32>
    %133 = vector.extract_strided_slice %117 {offsets = [0, 2048], sizes = [16, 256], strides = [1, 1]} : vector<16x2560xf32> to vector<16x256xf32>
    %134 = arith.maximumf %132, %133 : vector<16x256xf32>
    %135 = vector.extract_strided_slice %117 {offsets = [0, 2304], sizes = [16, 256], strides = [1, 1]} : vector<16x2560xf32> to vector<16x256xf32>
    %136 = arith.maximumf %134, %135 : vector<16x256xf32>
    %137 = arith.truncf %136 : vector<16x256xf32> to vector<16x256xbf16>
    %c0_20 = arith.constant 0 : index
    %c0_21 = arith.constant 0 : index
    %c0_22 = arith.constant 0 : index
    %138 = vector.load %arg9[%c0_20, %c0_21, %c0_22] : memref<1x16x256xbf16, #tpu.memory_space<vmem>>, vector<1x16x256xbf16>
    %139 = vector.shape_cast %138 : vector<1x16x256xbf16> to vector<16x256xbf16>
    %140 = vector.shape_cast %137 : vector<16x256xbf16> to vector<1x16x256xbf16>
    tpu.vector_store %arg9[%c0_20, %c0_21, %c0_22], %140 {strides = array<i32>} : memref<1x16x256xbf16, #tpu.memory_space<vmem>>, vector<1x16x256xbf16>,
    return
  }
  func.func @transform_0(%arg0: i32, %arg1: i32) -> (i32, i32, i32) {
    %c0_i32 = arith.constant 0 : i32
    %c0_i32_0 = arith.constant 0 : i32
    %c0_i32_1 = arith.constant 0 : i32
    return %arg0, %c0_i32, %c0_i32_0 : i32, i32, i32
  }
  func.func @transform_1(%arg0: i32, %arg1: i32) -> (i32, i32, i32) {
    %c0_i32 = arith.constant 0 : i32
    %c0_i32_0 = arith.constant 0 : i32
    return %arg0, %c0_i32, %arg1 : i32, i32, i32
  }
  func.func @transform_2(%arg0: i32, %arg1: i32) -> (i32, i32, i32) {
    %c0_i32 = arith.constant 0 : i32
    %c0_i32_0 = arith.constant 0 : i32
    return %arg0, %c0_i32, %arg1 : i32, i32, i32
  }
  func.func @transform_3(%arg0: i32, %arg1: i32) -> (i32, i32) {
    %c0_i32 = arith.constant 0 : i32
    %c0_i32_0 = arith.constant 0 : i32
    %c0_i32_1 = arith.constant 0 : i32
    return %c0_i32, %c0_i32_0 : i32, i32
  }
  func.func @transform_4(%arg0: i32, %arg1: i32) -> (i32, i32) {
    %c0_i32 = arith.constant 0 : i32
    %c0_i32_0 = arith.constant 0 : i32
    %c0_i32_1 = arith.constant 0 : i32
    return %c0_i32, %c0_i32_0 : i32, i32
  }
  func.func @transform_5(%arg0: i32, %arg1: i32) -> (i32, i32) {
    %c0_i32 = arith.constant 0 : i32
    %c0_i32_0 = arith.constant 0 : i32
    %c0_i32_1 = arith.constant 0 : i32
    return %c0_i32, %c0_i32_0 : i32, i32
  }
  func.func @transform_6(%arg0: i32, %arg1: i32) -> (i32, i32) {
    %c0_i32 = arith.constant 0 : i32
    %c0_i32_0 = arith.constant 0 : i32
    %c0_i32_1 = arith.constant 0 : i32
    return %c0_i32, %c0_i32_0 : i32, i32
  }
  func.func @transform_7(%arg0: i32, %arg1: i32) -> (i32, i32, i32) {
    %c0_i32 = arith.constant 0 : i32
    %c0_i32_0 = arith.constant 0 : i32
    return %arg0, %c0_i32, %arg1 : i32, i32, i32
  }
}

module attributes {stable_mosaic.version = 11 : i64} {
  func.func @_edgeconv_mlp_kernel(%arg0: i32, %arg1: i32, %arg2: memref<1x32x256xbf16, #tpu.memory_space<vmem>>, %arg3: memref<1x16x256xbf16, #tpu.memory_space<vmem>>, %arg4: memref<1x10x256xi32, #tpu.memory_space<vmem>>, %arg5: memref<32x16xbf16, #tpu.memory_space<vmem>>, %arg6: memref<32x1xf32, #tpu.memory_space<vmem>>, %arg7: memref<32x32xbf16, #tpu.memory_space<vmem>>, %arg8: memref<32x1xf32, #tpu.memory_space<vmem>>, %arg9: memref<48x16xbf16, #tpu.memory_space<vmem>>, %arg10: memref<48x32xbf16, #tpu.memory_space<vmem>>, %arg11: memref<48x1xf32, #tpu.memory_space<vmem>>, %arg12: memref<32x48xbf16, #tpu.memory_space<vmem>>, %arg13: memref<32x1xf32, #tpu.memory_space<vmem>>, %arg14: memref<1x32x256xf32, #tpu.memory_space<vmem>>) attributes {dimension_semantics = [#tpu.dimension_semantics<parallel>, #tpu.dimension_semantics<parallel>], iteration_bounds = array<i64: 2, 1>, scalar_prefetch = 0 : i64, scratch_operands = 0 : i64, tpu.core_type = #tpu.core_type<tc>, window_params = [{transform_indices = @transform_0, window_bounds = array<i64: 1, 32, 256>}, {transform_indices = @transform_1, window_bounds = array<i64: 1, 16, 256>}, {transform_indices = @transform_2, window_bounds = array<i64: 1, 10, 256>}, {pipeline_mode = #tpu.pipeline_mode<synchronous>, transform_indices = @transform_3, window_bounds = array<i64: 32, 16>}, {pipeline_mode = #tpu.pipeline_mode<synchronous>, transform_indices = @transform_4, window_bounds = array<i64: 32, 1>}, {pipeline_mode = #tpu.pipeline_mode<synchronous>, transform_indices = @transform_5, window_bounds = array<i64: 32, 32>}, {pipeline_mode = #tpu.pipeline_mode<synchronous>, transform_indices = @transform_6, window_bounds = array<i64: 32, 1>}, {pipeline_mode = #tpu.pipeline_mode<synchronous>, transform_indices = @transform_7, window_bounds = array<i64: 48, 16>}, {pipeline_mode = #tpu.pipeline_mode<synchronous>, transform_indices = @transform_8, window_bounds = array<i64: 48, 32>}, {pipeline_mode = #tpu.pipeline_mode<synchronous>, transform_indices = @transform_9, window_bounds = array<i64: 48, 1>}, {pipeline_mode = #tpu.pipeline_mode<synchronous>, transform_indices = @transform_10, window_bounds = array<i64: 32, 48>}, {pipeline_mode = #tpu.pipeline_mode<synchronous>, transform_indices = @transform_11, window_bounds = array<i64: 32, 1>}, {transform_indices = @transform_12, window_bounds = array<i64: 1, 32, 256>}]} {
    %c0 = arith.constant 0 : index
    %c0_0 = arith.constant 0 : index
    %c0_1 = arith.constant 0 : index
    %0 = vector.load %arg2[%c0, %c0_0, %c0_1] : memref<1x32x256xbf16, #tpu.memory_space<vmem>>, vector<1x32x256xbf16>
    %1 = vector.shape_cast %0 : vector<1x32x256xbf16> to vector<32x256xbf16>
    %c0_2 = arith.constant 0 : index
    %c0_3 = arith.constant 0 : index
    %c0_4 = arith.constant 0 : index
    %2 = vector.load %arg3[%c0_2, %c0_3, %c0_4] : memref<1x16x256xbf16, #tpu.memory_space<vmem>>, vector<1x16x256xbf16>
    %3 = vector.shape_cast %2 : vector<1x16x256xbf16> to vector<16x256xbf16>
    %c0_5 = arith.constant 0 : index
    %c0_6 = arith.constant 0 : index
    %4 = vector.load %arg5[%c0_5, %c0_6] : memref<32x16xbf16, #tpu.memory_space<vmem>>, vector<32x16xbf16>
    %cst = arith.constant dense<0.000000e+00> : vector<32x256xf32>
    %5 = tpu.matmul %4, %3, %cst {dimension_numbers = #tpu.dot_dimension_numbers<[1], [0], [0], [1], [0, 0, 1, 1], [], []>} : vector<32x16xbf16>, vector<16x256xbf16>, vector<32x256xf32> -> vector<32x256xf32>
    %c0_7 = arith.constant 0 : index
    %c0_8 = arith.constant 0 : index
    %6 = vector.load %arg6[%c0_7, %c0_8] : memref<32x1xf32, #tpu.memory_space<vmem>>, vector<32x1xf32>
    %7 = vector.broadcast %6 : vector<32x1xf32> to vector<32x256xf32>
    %8 = arith.addf %5, %7 : vector<32x256xf32>
    %c0_9 = arith.constant 0 : index
    %c0_10 = arith.constant 0 : index
    %c0_11 = arith.constant 0 : index
    %9 = vector.load %arg4[%c0_9, %c0_10, %c0_11] : memref<1x10x256xi32, #tpu.memory_space<vmem>>, vector<1x10x256xi32>
    %10 = vector.shape_cast %9 : vector<1x10x256xi32> to vector<10x256xi32>
    %c0_12 = arith.constant 0 : index
    %c0_13 = arith.constant 0 : index
    %11 = vector.load %arg7[%c0_12, %c0_13] : memref<32x32xbf16, #tpu.memory_space<vmem>>, vector<32x32xbf16>
    %c0_14 = arith.constant 0 : index
    %c0_15 = arith.constant 0 : index
    %12 = vector.load %arg8[%c0_14, %c0_15] : memref<32x1xf32, #tpu.memory_space<vmem>>, vector<32x1xf32>
    %13 = tpu.iota {dimensions = array<i32: 0>} : vector<256x1xi32>
    %14 = vector.extract_strided_slice %10 {offsets = [0, 0], sizes = [1, 256], strides = [1, 1]} : vector<10x256xi32> to vector<1x256xi32>
    %15 = vector.shape_cast %14 : vector<1x256xi32> to vector<256xi32>
    %16 = vector.shape_cast %15 : vector<256xi32> to vector<1x256xi32>
    %17 = vector.broadcast %13 : vector<256x1xi32> to vector<256x256xi32>
    %18 = vector.broadcast %16 : vector<1x256xi32> to vector<256x256xi32>
    %19 = arith.cmpi eq, %17, %18 : vector<256x256xi32>
    %20 = arith.extui %19 : vector<256x256xi1> to vector<256x256xi32>
    %21 = arith.sitofp %20 : vector<256x256xi32> to vector<256x256xf32>
    %22 = arith.truncf %21 : vector<256x256xf32> to vector<256x256xbf16>
    %23 = vector.extract_strided_slice %10 {offsets = [1, 0], sizes = [1, 256], strides = [1, 1]} : vector<10x256xi32> to vector<1x256xi32>
    %24 = vector.shape_cast %23 : vector<1x256xi32> to vector<256xi32>
    %25 = vector.shape_cast %24 : vector<256xi32> to vector<1x256xi32>
    %26 = vector.broadcast %13 : vector<256x1xi32> to vector<256x256xi32>
    %27 = vector.broadcast %25 : vector<1x256xi32> to vector<256x256xi32>
    %28 = arith.cmpi eq, %26, %27 : vector<256x256xi32>
    %29 = arith.extui %28 : vector<256x256xi1> to vector<256x256xi32>
    %30 = arith.sitofp %29 : vector<256x256xi32> to vector<256x256xf32>
    %31 = arith.truncf %30 : vector<256x256xf32> to vector<256x256xbf16>
    %32 = vector.extract_strided_slice %10 {offsets = [2, 0], sizes = [1, 256], strides = [1, 1]} : vector<10x256xi32> to vector<1x256xi32>
    %33 = vector.shape_cast %32 : vector<1x256xi32> to vector<256xi32>
    %34 = vector.shape_cast %33 : vector<256xi32> to vector<1x256xi32>
    %35 = vector.broadcast %13 : vector<256x1xi32> to vector<256x256xi32>
    %36 = vector.broadcast %34 : vector<1x256xi32> to vector<256x256xi32>
    %37 = arith.cmpi eq, %35, %36 : vector<256x256xi32>
    %38 = arith.extui %37 : vector<256x256xi1> to vector<256x256xi32>
    %39 = arith.sitofp %38 : vector<256x256xi32> to vector<256x256xf32>
    %40 = arith.truncf %39 : vector<256x256xf32> to vector<256x256xbf16>
    %41 = vector.extract_strided_slice %10 {offsets = [3, 0], sizes = [1, 256], strides = [1, 1]} : vector<10x256xi32> to vector<1x256xi32>
    %42 = vector.shape_cast %41 : vector<1x256xi32> to vector<256xi32>
    %43 = vector.shape_cast %42 : vector<256xi32> to vector<1x256xi32>
    %44 = vector.broadcast %13 : vector<256x1xi32> to vector<256x256xi32>
    %45 = vector.broadcast %43 : vector<1x256xi32> to vector<256x256xi32>
    %46 = arith.cmpi eq, %44, %45 : vector<256x256xi32>
    %47 = arith.extui %46 : vector<256x256xi1> to vector<256x256xi32>
    %48 = arith.sitofp %47 : vector<256x256xi32> to vector<256x256xf32>
    %49 = arith.truncf %48 : vector<256x256xf32> to vector<256x256xbf16>
    %50 = vector.extract_strided_slice %10 {offsets = [4, 0], sizes = [1, 256], strides = [1, 1]} : vector<10x256xi32> to vector<1x256xi32>
    %51 = vector.shape_cast %50 : vector<1x256xi32> to vector<256xi32>
    %52 = vector.shape_cast %51 : vector<256xi32> to vector<1x256xi32>
    %53 = vector.broadcast %13 : vector<256x1xi32> to vector<256x256xi32>
    %54 = vector.broadcast %52 : vector<1x256xi32> to vector<256x256xi32>
    %55 = arith.cmpi eq, %53, %54 : vector<256x256xi32>
    %56 = arith.extui %55 : vector<256x256xi1> to vector<256x256xi32>
    %57 = arith.sitofp %56 : vector<256x256xi32> to vector<256x256xf32>
    %58 = arith.truncf %57 : vector<256x256xf32> to vector<256x256xbf16>
    %59 = vector.extract_strided_slice %10 {offsets = [5, 0], sizes = [1, 256], strides = [1, 1]} : vector<10x256xi32> to vector<1x256xi32>
    %60 = vector.shape_cast %59 : vector<1x256xi32> to vector<256xi32>
    %61 = vector.shape_cast %60 : vector<256xi32> to vector<1x256xi32>
    %62 = vector.broadcast %13 : vector<256x1xi32> to vector<256x256xi32>
    %63 = vector.broadcast %61 : vector<1x256xi32> to vector<256x256xi32>
    %64 = arith.cmpi eq, %62, %63 : vector<256x256xi32>
    %65 = arith.extui %64 : vector<256x256xi1> to vector<256x256xi32>
    %66 = arith.sitofp %65 : vector<256x256xi32> to vector<256x256xf32>
    %67 = arith.truncf %66 : vector<256x256xf32> to vector<256x256xbf16>
    %68 = vector.extract_strided_slice %10 {offsets = [6, 0], sizes = [1, 256], strides = [1, 1]} : vector<10x256xi32> to vector<1x256xi32>
    %69 = vector.shape_cast %68 : vector<1x256xi32> to vector<256xi32>
    %70 = vector.shape_cast %69 : vector<256xi32> to vector<1x256xi32>
    %71 = vector.broadcast %13 : vector<256x1xi32> to vector<256x256xi32>
    %72 = vector.broadcast %70 : vector<1x256xi32> to vector<256x256xi32>
    %73 = arith.cmpi eq, %71, %72 : vector<256x256xi32>
    %74 = arith.extui %73 : vector<256x256xi1> to vector<256x256xi32>
    %75 = arith.sitofp %74 : vector<256x256xi32> to vector<256x256xf32>
    %76 = arith.truncf %75 : vector<256x256xf32> to vector<256x256xbf16>
    %77 = vector.extract_strided_slice %10 {offsets = [7, 0], sizes = [1, 256], strides = [1, 1]} : vector<10x256xi32> to vector<1x256xi32>
    %78 = vector.shape_cast %77 : vector<1x256xi32> to vector<256xi32>
    %79 = vector.shape_cast %78 : vector<256xi32> to vector<1x256xi32>
    %80 = vector.broadcast %13 : vector<256x1xi32> to vector<256x256xi32>
    %81 = vector.broadcast %79 : vector<1x256xi32> to vector<256x256xi32>
    %82 = arith.cmpi eq, %80, %81 : vector<256x256xi32>
    %83 = arith.extui %82 : vector<256x256xi1> to vector<256x256xi32>
    %84 = arith.sitofp %83 : vector<256x256xi32> to vector<256x256xf32>
    %85 = arith.truncf %84 : vector<256x256xf32> to vector<256x256xbf16>
    %86 = vector.extract_strided_slice %10 {offsets = [8, 0], sizes = [1, 256], strides = [1, 1]} : vector<10x256xi32> to vector<1x256xi32>
    %87 = vector.shape_cast %86 : vector<1x256xi32> to vector<256xi32>
    %88 = vector.shape_cast %87 : vector<256xi32> to vector<1x256xi32>
    %89 = vector.broadcast %13 : vector<256x1xi32> to vector<256x256xi32>
    %90 = vector.broadcast %88 : vector<1x256xi32> to vector<256x256xi32>
    %91 = arith.cmpi eq, %89, %90 : vector<256x256xi32>
    %92 = arith.extui %91 : vector<256x256xi1> to vector<256x256xi32>
    %93 = arith.sitofp %92 : vector<256x256xi32> to vector<256x256xf32>
    %94 = arith.truncf %93 : vector<256x256xf32> to vector<256x256xbf16>
    %95 = vector.extract_strided_slice %10 {offsets = [9, 0], sizes = [1, 256], strides = [1, 1]} : vector<10x256xi32> to vector<1x256xi32>
    %96 = vector.shape_cast %95 : vector<1x256xi32> to vector<256xi32>
    %97 = vector.shape_cast %96 : vector<256xi32> to vector<1x256xi32>
    %98 = vector.broadcast %13 : vector<256x1xi32> to vector<256x256xi32>
    %99 = vector.broadcast %97 : vector<1x256xi32> to vector<256x256xi32>
    %100 = arith.cmpi eq, %98, %99 : vector<256x256xi32>
    %101 = arith.extui %100 : vector<256x256xi1> to vector<256x256xi32>
    %102 = arith.sitofp %101 : vector<256x256xi32> to vector<256x256xf32>
    %103 = arith.truncf %102 : vector<256x256xf32> to vector<256x256xbf16>
    %104 = tpu.concatenate %22, %31, %40, %49, %58, %67, %76, %85, %94, %103 in 1 : vector<256x256xbf16>, vector<256x256xbf16>, vector<256x256xbf16>, vector<256x256xbf16>, vector<256x256xbf16>, vector<256x256xbf16>, vector<256x256xbf16>, vector<256x256xbf16>, vector<256x256xbf16>, vector<256x256xbf16> -> vector<256x2560xbf16>
    %cst_16 = arith.constant dense<0.000000e+00> : vector<32x2560xf32>
    %105 = tpu.matmul %1, %104, %cst_16 {dimension_numbers = #tpu.dot_dimension_numbers<[1], [0], [0], [1], [0, 0, 1, 1], [], []>} : vector<32x256xbf16>, vector<256x2560xbf16>, vector<32x2560xf32> -> vector<32x2560xf32>
    %106 = tpu.concatenate %8, %8, %8, %8, %8, %8, %8, %8, %8, %8 in 1 : vector<32x256xf32>, vector<32x256xf32>, vector<32x256xf32>, vector<32x256xf32>, vector<32x256xf32>, vector<32x256xf32>, vector<32x256xf32>, vector<32x256xf32>, vector<32x256xf32>, vector<32x256xf32> -> vector<32x2560xf32>
    %107 = arith.addf %105, %106 : vector<32x2560xf32>
    %cst_17 = arith.constant 2.000000e-01 : f32
    %108 = vector.broadcast %cst_17 : f32 to vector<32x2560xf32>
    %109 = arith.mulf %108, %107 : vector<32x2560xf32>
    %110 = arith.maximumf %107, %109 : vector<32x2560xf32>
    %111 = arith.truncf %110 : vector<32x2560xf32> to vector<32x2560xbf16>
    %cst_18 = arith.constant dense<0.000000e+00> : vector<32x2560xf32>
    %112 = tpu.matmul %11, %111, %cst_18 {dimension_numbers = #tpu.dot_dimension_numbers<[1], [0], [0], [1], [0, 0, 1, 1], [], []>} : vector<32x32xbf16>, vector<32x2560xbf16>, vector<32x2560xf32> -> vector<32x2560xf32>
    %113 = vector.broadcast %12 : vector<32x1xf32> to vector<32x2560xf32>
    %114 = arith.addf %112, %113 : vector<32x2560xf32>
    %cst_19 = arith.constant 2.000000e-01 : f32
    %115 = vector.broadcast %cst_19 : f32 to vector<32x2560xf32>
    %116 = arith.mulf %115, %114 : vector<32x2560xf32>
    %117 = arith.maximumf %114, %116 : vector<32x2560xf32>
    %118 = vector.extract_strided_slice %117 {offsets = [0, 0], sizes = [32, 256], strides = [1, 1]} : vector<32x2560xf32> to vector<32x256xf32>
    %119 = vector.extract_strided_slice %117 {offsets = [0, 256], sizes = [32, 256], strides = [1, 1]} : vector<32x2560xf32> to vector<32x256xf32>
    %120 = arith.maximumf %118, %119 : vector<32x256xf32>
    %121 = vector.extract_strided_slice %117 {offsets = [0, 512], sizes = [32, 256], strides = [1, 1]} : vector<32x2560xf32> to vector<32x256xf32>
    %122 = arith.maximumf %120, %121 : vector<32x256xf32>
    %123 = vector.extract_strided_slice %117 {offsets = [0, 768], sizes = [32, 256], strides = [1, 1]} : vector<32x2560xf32> to vector<32x256xf32>
    %124 = arith.maximumf %122, %123 : vector<32x256xf32>
    %125 = vector.extract_strided_slice %117 {offsets = [0, 1024], sizes = [32, 256], strides = [1, 1]} : vector<32x2560xf32> to vector<32x256xf32>
    %126 = arith.maximumf %124, %125 : vector<32x256xf32>
    %127 = vector.extract_strided_slice %117 {offsets = [0, 1280], sizes = [32, 256], strides = [1, 1]} : vector<32x2560xf32> to vector<32x256xf32>
    %128 = arith.maximumf %126, %127 : vector<32x256xf32>
    %129 = vector.extract_strided_slice %117 {offsets = [0, 1536], sizes = [32, 256], strides = [1, 1]} : vector<32x2560xf32> to vector<32x256xf32>
    %130 = arith.maximumf %128, %129 : vector<32x256xf32>
    %131 = vector.extract_strided_slice %117 {offsets = [0, 1792], sizes = [32, 256], strides = [1, 1]} : vector<32x2560xf32> to vector<32x256xf32>
    %132 = arith.maximumf %130, %131 : vector<32x256xf32>
    %133 = vector.extract_strided_slice %117 {offsets = [0, 2048], sizes = [32, 256], strides = [1, 1]} : vector<32x2560xf32> to vector<32x256xf32>
    %134 = arith.maximumf %132, %133 : vector<32x256xf32>
    %135 = vector.extract_strided_slice %117 {offsets = [0, 2304], sizes = [32, 256], strides = [1, 1]} : vector<32x2560xf32> to vector<32x256xf32>
    %136 = arith.maximumf %134, %135 : vector<32x256xf32>
    %137 = arith.truncf %136 : vector<32x256xf32> to vector<32x256xbf16>
    %c0_20 = arith.constant 0 : index
    %c0_21 = arith.constant 0 : index
    %138 = vector.load %arg9[%c0_20, %c0_21] : memref<48x16xbf16, #tpu.memory_space<vmem>>, vector<48x16xbf16>
    %cst_22 = arith.constant dense<0.000000e+00> : vector<48x256xf32>
    %139 = tpu.matmul %138, %3, %cst_22 {dimension_numbers = #tpu.dot_dimension_numbers<[1], [0], [0], [1], [0, 0, 1, 1], [], []>} : vector<48x16xbf16>, vector<16x256xbf16>, vector<48x256xf32> -> vector<48x256xf32>
    %c0_23 = arith.constant 0 : index
    %c0_24 = arith.constant 0 : index
    %140 = vector.load %arg10[%c0_23, %c0_24] : memref<48x32xbf16, #tpu.memory_space<vmem>>, vector<48x32xbf16>
    %cst_25 = arith.constant dense<0.000000e+00> : vector<48x256xf32>
    %141 = tpu.matmul %140, %137, %cst_25 {dimension_numbers = #tpu.dot_dimension_numbers<[1], [0], [0], [1], [0, 0, 1, 1], [], []>} : vector<48x32xbf16>, vector<32x256xbf16>, vector<48x256xf32> -> vector<48x256xf32>
    %142 = arith.addf %139, %141 : vector<48x256xf32>
    %c0_26 = arith.constant 0 : index
    %c0_27 = arith.constant 0 : index
    %143 = vector.load %arg11[%c0_26, %c0_27] : memref<48x1xf32, #tpu.memory_space<vmem>>, vector<48x1xf32>
    %144 = vector.broadcast %143 : vector<48x1xf32> to vector<48x256xf32>
    %145 = arith.addf %142, %144 : vector<48x256xf32>
    %cst_28 = arith.constant 2.000000e-01 : f32
    %146 = vector.broadcast %cst_28 : f32 to vector<48x256xf32>
    %147 = arith.mulf %146, %145 : vector<48x256xf32>
    %148 = arith.maximumf %145, %147 : vector<48x256xf32>
    %149 = arith.truncf %148 : vector<48x256xf32> to vector<48x256xbf16>
    %c0_29 = arith.constant 0 : index
    %c0_30 = arith.constant 0 : index
    %150 = vector.load %arg12[%c0_29, %c0_30] : memref<32x48xbf16, #tpu.memory_space<vmem>>, vector<32x48xbf16>
    %cst_31 = arith.constant dense<0.000000e+00> : vector<32x256xf32>
    %151 = tpu.matmul %150, %149, %cst_31 {dimension_numbers = #tpu.dot_dimension_numbers<[1], [0], [0], [1], [0, 0, 1, 1], [], []>} : vector<32x48xbf16>, vector<48x256xbf16>, vector<32x256xf32> -> vector<32x256xf32>
    %c0_32 = arith.constant 0 : index
    %c0_33 = arith.constant 0 : index
    %152 = vector.load %arg13[%c0_32, %c0_33] : memref<32x1xf32, #tpu.memory_space<vmem>>, vector<32x1xf32>
    %153 = vector.broadcast %152 : vector<32x1xf32> to vector<32x256xf32>
    %154 = arith.addf %151, %153 : vector<32x256xf32>
    %cst_34 = arith.constant 2.000000e-01 : f32
    %155 = vector.broadcast %cst_34 : f32 to vector<32x256xf32>
    %156 = arith.mulf %155, %154 : vector<32x256xf32>
    %157 = arith.maximumf %154, %156 : vector<32x256xf32>
    %c0_35 = arith.constant 0 : index
    %c0_36 = arith.constant 0 : index
    %c0_37 = arith.constant 0 : index
    %158 = vector.load %arg14[%c0_35, %c0_36, %c0_37] : memref<1x32x256xf32, #tpu.memory_space<vmem>>, vector<1x32x256xf32>
    %159 = vector.shape_cast %158 : vector<1x32x256xf32> to vector<32x256xf32>
    %160 = vector.shape_cast %157 : vector<32x256xf32> to vector<1x32x256xf32>
    tpu.vector_store %arg14[%c0_35, %c0_36, %c0_37], %160 {strides = array<i32>} : memref<1x32x256xf32, #tpu.memory_space<vmem>>, vector<1x32x256xf32>,
    return
  }
  func.func @transform_0(%arg0: i32, %arg1: i32) -> (i32, i32, i32) {
    %c0_i32 = arith.constant 0 : i32
    %c0_i32_0 = arith.constant 0 : i32
    %c0_i32_1 = arith.constant 0 : i32
    return %arg0, %c0_i32, %c0_i32_0 : i32, i32, i32
  }
  func.func @transform_1(%arg0: i32, %arg1: i32) -> (i32, i32, i32) {
    %c0_i32 = arith.constant 0 : i32
    %c0_i32_0 = arith.constant 0 : i32
    return %arg0, %c0_i32, %arg1 : i32, i32, i32
  }
  func.func @transform_2(%arg0: i32, %arg1: i32) -> (i32, i32, i32) {
    %c0_i32 = arith.constant 0 : i32
    %c0_i32_0 = arith.constant 0 : i32
    return %arg0, %c0_i32, %arg1 : i32, i32, i32
  }
  func.func @transform_3(%arg0: i32, %arg1: i32) -> (i32, i32) {
    %c0_i32 = arith.constant 0 : i32
    %c0_i32_0 = arith.constant 0 : i32
    %c0_i32_1 = arith.constant 0 : i32
    return %c0_i32, %c0_i32_0 : i32, i32
  }
  func.func @transform_4(%arg0: i32, %arg1: i32) -> (i32, i32) {
    %c0_i32 = arith.constant 0 : i32
    %c0_i32_0 = arith.constant 0 : i32
    %c0_i32_1 = arith.constant 0 : i32
    return %c0_i32, %c0_i32_0 : i32, i32
  }
  func.func @transform_5(%arg0: i32, %arg1: i32) -> (i32, i32) {
    %c0_i32 = arith.constant 0 : i32
    %c0_i32_0 = arith.constant 0 : i32
    %c0_i32_1 = arith.constant 0 : i32
    return %c0_i32, %c0_i32_0 : i32, i32
  }
  func.func @transform_6(%arg0: i32, %arg1: i32) -> (i32, i32) {
    %c0_i32 = arith.constant 0 : i32
    %c0_i32_0 = arith.constant 0 : i32
    %c0_i32_1 = arith.constant 0 : i32
    return %c0_i32, %c0_i32_0 : i32, i32
  }
  func.func @transform_7(%arg0: i32, %arg1: i32) -> (i32, i32) {
    %c0_i32 = arith.constant 0 : i32
    %c0_i32_0 = arith.constant 0 : i32
    %c0_i32_1 = arith.constant 0 : i32
    return %c0_i32, %c0_i32_0 : i32, i32
  }
  func.func @transform_8(%arg0: i32, %arg1: i32) -> (i32, i32) {
    %c0_i32 = arith.constant 0 : i32
    %c0_i32_0 = arith.constant 0 : i32
    %c0_i32_1 = arith.constant 0 : i32
    return %c0_i32, %c0_i32_0 : i32, i32
  }
  func.func @transform_9(%arg0: i32, %arg1: i32) -> (i32, i32) {
    %c0_i32 = arith.constant 0 : i32
    %c0_i32_0 = arith.constant 0 : i32
    %c0_i32_1 = arith.constant 0 : i32
    return %c0_i32, %c0_i32_0 : i32, i32
  }
  func.func @transform_10(%arg0: i32, %arg1: i32) -> (i32, i32) {
    %c0_i32 = arith.constant 0 : i32
    %c0_i32_0 = arith.constant 0 : i32
    %c0_i32_1 = arith.constant 0 : i32
    return %c0_i32, %c0_i32_0 : i32, i32
  }
  func.func @transform_11(%arg0: i32, %arg1: i32) -> (i32, i32) {
    %c0_i32 = arith.constant 0 : i32
    %c0_i32_0 = arith.constant 0 : i32
    %c0_i32_1 = arith.constant 0 : i32
    return %c0_i32, %c0_i32_0 : i32, i32
  }
  func.func @transform_12(%arg0: i32, %arg1: i32) -> (i32, i32, i32) {
    %c0_i32 = arith.constant 0 : i32
    %c0_i32_0 = arith.constant 0 : i32
    return %arg0, %c0_i32, %arg1 : i32, i32, i32
  }
}

</mosaic_0001>

<bundles_post_ra>
// kernel: forward.2
= control target key start
LH: loop header
LB: loop body
LE: loop exit
PB: predicated region body
PF: predicated region fallthrough
CT: control target
= control target key end

     0   :  { %s5481_s24 = smov 0   ;;  %s5483_s25 = smov 0   ;;  %s7626_s0 = inlined_call_operand.vmem [shape: bf16[2,16,256], index: 0, kind: input, shape index: {}]   ;;  %s7627_s1 = inlined_call_operand.vmem [shape: bf16[2,8,256], index: 1, kind: input, shape index: {}]   ;;  %s7628_s2 = inlined_call_operand.vmem [shape: s32[2,10,256], index: 2, kind: input, shape index: {}]   ;;  %s7629_s3 = inlined_call_operand.vmem [shape: bf16[16,8], index: 3, kind: input, shape index: {}]   ;;  %s7630_s4 = inlined_call_operand.vmem [shape: f32[16,1], index: 4, kind: input, shape index: {}]   ;;  %s7631_s5 = inlined_call_operand.vmem [shape: bf16[16,16], index: 5, kind: input, shape index: {}]   ;;  %s7632_s6 = inlined_call_operand.vmem [shape: f32[16,1], index: 6, kind: input, shape index: {}]   ;;  %s7633_s7 = inlined_call_operand.vmem [shape: bf16[2,16,256], index: 7, kind: output, shape index: {}]  }
   0x1   :  { %s5485_s26 = smov 0  }
   0x2 LB: > { %s29_s27 = sadd.s32 1, %s5433_s25  ;;  %p4057_p0 = scmp.ge.s32.totalorder %s5437_s26, 1  ;;  %s5437_s26 = sphi %s5485_s26, %s17_s26   ;;  %s5433_s25 = sphi %s5483_s25, %s7635_s25   ;;  %s5429_s24 = sphi %s5481_s24, %s7634_s24  }
   0x3   : > { %p31_p1 = scmp.ge.s32.totalorder %s29_s27, 2  ;;  %p285_p2 = scmp.lt.s32.totalorder %s5437_s26, 3 }
   0x5   : > { %s7637_s27 = smov (%p31_p1, %s29_s27), 0  ;;  %p286_p3 = pnand %p4057_p0, %p285_p2 }
   0x6   : > { %p339_p4 = scmp.lt.s32.totalorder (!%p286_p3), %s5429_s24, 1 }
   0x7   : > { %289 = sbr.rel (%p286_p3) target bundleno = 767 (0x2ff), region = 48 }
   0xc   : > { %v464_v0 = vlaneseq  ;;  %v5439_v1 = vmov 0   ;;  %v380_v2 = vld [vmem:[%s7630_s4] sm:$0xff]  ;;  %s7639_s24 = smov (!%p339_p4, %s5429_s24), 1  ;;  %v381_v4 = vld [vmem:[%s7630_s4 + $0x8] sm:$0xff]  ;;  %vm406_vm0 = vcmask 1043456   ;;  %vm402_vm1 = vcmask 64512  }
   0xd   : > { %445 = vmatprep.mubr.bf16.mxu0 %v5439_v1  ;;  %5400 = vset.pattern.permute.xlu0 %v5439_v1  ;;  %s5368_s9 = sshll.u32 %s7639_s24, 4  ;;  %s5369_s10 = sshll.u32 %s7639_s24, 3  ;;  %v5407_v29 = vld [vmem:[%s7629_s3] sm:$0xff]   ;;  %v5440_v30 = vmov 1.0|1.0  }
   0xe   : > { %v5506_v3 = vshrl.u32 %v464_v0, 7  ;;  %384 = vperm.xlu0 %5400, %v380_v2   ;;  %5401 = vset.pattern.permute.xlu1 %v5439_v1  ;;  %s5519_s13 = scalar_lea.vmem %s7626_s0, %s5368_s9  ;;  %s352_s16 = scalar_lea.vmem %s7627_s1, %s5369_s10 }
   0xf   : > { %s5370_s17 = sshll.u32 %s7639_s24, 5  ;;  %v377_v5 = vld [vmem:[%s352_s16] sm:$0xff] }
  0x10   : > { %v499_v6 = vsub.s32 0, %v5506_v3  ;;  %s5529_s20 = scalar_lea.vmem %s7628_s2, %s5370_s17  ;;  %v4068_v7 = vcombine.high %v377_v5, %v377_v5  ;;  %v731_v8 = vsub.s32 1, %v5506_v3  ;;  %v5533_v9 = vld [vmem:[%s5519_s13 + $0x4] ss:$8 sps:$4 sm:$0xff]   ;;  %v5543_v12 = vadd.s32 112, %v5506_v3 }
  0x11   : > { %v5536_v10 = vld [vmem:[%s5529_s20] sm:$0xff]  ;;  %v5539_v11 = vld [vmem:[%s5529_s20 + $0x8] sm:$0xff]  ;;  %v458_v13 = vld [vmem:[%s5529_s20 + $0x10] sm:$0x3]  ;;  %v4067_v17 = vcombine.low %v377_v5, %v377_v5  ;;  %v5554_v18 = vadd.s32 120, %v5506_v3  ;;  %2859 = vmatprep.mubr.bf16.mxu1 %v5533_v9  ;;  %v5564_v21 = vadd.s32 96, %v5506_v3 }
  0x12   : > { %389 = vperm.xlu0 %5400, %v381_v4   ;;  %4069 = vmatprep.subr.msk.bf16.mxu0 %vm406_vm0, %v4068_v7  ;;  %v459_v14 = vld [vmem:[%s5529_s20 + $0x18] sm:$0x3]  ;;  %v5548_v15 = vrot.slane %v5536_v10, %v499_v6  ;;  %v5551_v16 = vrot.slane %v5539_v11, %v499_v6  ;;  %v5558_v19 = vrot.slane %v5536_v10, %v731_v8  ;;  %v5567_v22 = vadd.s32 104, %v5506_v3  ;;  %v5995_v63 = vld [vmem:[%s5519_s13] ss:$8 sps:$4 sm:$0xff]  }
  0x13   : > { %v5561_v20 = vrot.slane %v5539_v11, %v731_v8  ;;  %v5570_v23 = vadd.s32 80, %v5506_v3  ;;  %v5572_v24 = vrot.slane %v458_v13, %v499_v6  ;;  %v5574_v25 = vrot.slane %v459_v14, %v499_v6  ;;  %v6304_v4 = vld [vmem:[%s5529_s20 + $0x8] sm:$0xff]  ;;  %v6315_v6 = vld [vmem:[%s5529_s20] sm:$0xff] }
  0x14   : > { %v5576_v26 = vrot.slane %v458_v13, %v731_v8  ;;  %v5578_v27 = vrot.slane %v459_v14, %v731_v8  ;;  %v408_v28 = vsel %vm406_vm0, %v4067_v17, 0  ;;  %vm534_vm2 = vcmp.eq.s32.totalorder %v5543_v12, %v5551_v16 }
  0x15   : > { %vm536_vm3 = vcmp.eq.s32.totalorder %v5554_v18, %v5551_v16  ;;  %vm533_vm4 = vcmp.eq.s32.totalorder %v5543_v12, %v5548_v15  ;;  %428 = vmatpush1.bf16.msra.mxu0 %v408_v28  ;;  %vm535_vm6 = vcmp.eq.s32.totalorder %v5554_v18, %v5548_v15  ;;  %vm766_vm7 = vcmp.eq.s32.totalorder %v5543_v12, %v5561_v20 }
  0x16   : > { %vm4713_vm5 = vmpackc.low %vm536_vm3, %vm534_vm2  ;;  %vm768_vm8 = vcmp.eq.s32.totalorder %v5554_v18, %v5561_v20  ;;  %vm765_vm9 = vcmp.eq.s32.totalorder %v5543_v12, %v5558_v19  ;;  %vm767_vm11 = vcmp.eq.s32.totalorder %v5554_v18, %v5558_v19  ;;  %vm530_vm12 = vcmp.eq.s32.totalorder %v5564_v21, %v5551_v16 }
  0x17   : > { %4714 = vmatprep.subr.msk.bf16.mxu1 %vm4713_vm5, %v5440_v30  ;;  %vm4715_vm10 = vmpackc.low %vm535_vm6, %vm533_vm4  ;;  %vm532_vm13 = vcmp.eq.s32.totalorder %v5567_v22, %v5551_v16  ;;  %v5606_v31 = vadd.s32 88, %v5506_v3  ;;  %vm529_vm15 = vcmp.eq.s32.totalorder %v5564_v21, %v5548_v15  ;;  %vm531_vm0 = vcmp.eq.s32.totalorder %v5567_v22, %v5548_v15 }
  0x18   : > { %4716 = vmatpush1.bf16.msk.msra.mxu1 %vm4715_vm10, %v5440_v30  ;;  %vm4777_vm14 = vmpackc.low %vm768_vm8, %vm766_vm7  ;;  %4070 = vmatmul.mubr.msk.bf16.vlgmr.msra.gmra.mxu0 %vm402_vm1, %v5407_v29  ;;  %vm762_vm3 = vcmp.eq.s32.totalorder %v5564_v21, %v5561_v20  ;;  %vm764_vm4 = vcmp.eq.s32.totalorder %v5567_v22, %v5561_v20  ;;  %vm761_vm6 = vcmp.eq.s32.totalorder %v5564_v21, %v5558_v19  ;;  %v5630_v32 = vadd.s32 64, %v5506_v3 }
  0x19   : > { %4778 = vmatprep.subr.msk.bf16.mxu0 %vm4777_vm14, %v5440_v30  ;;  %vm4779_vm2 = vmpackc.low %vm767_vm11, %vm765_vm9  ;;  %vm763_vm7 = vcmp.eq.s32.totalorder %v5567_v22, %v5558_v19  ;;  %vm526_vm8 = vcmp.eq.s32.totalorder %v5570_v23, %v5551_v16  ;;  %vm528_vm9 = vcmp.eq.s32.totalorder %v5606_v31, %v5551_v16  ;;  %v5633_v33 = vadd.s32 72, %v5506_v3  ;;  %2902 = vmatprep.mubr.bf16.mxu0 %v5533_v9 }
  0x1a   : > { %4780 = vmatpush1.bf16.msk.msra.mxu0 %vm4779_vm2, %v5440_v30  ;;  %vm4717_vm5 = vmpackc.low %vm532_vm13, %vm530_vm12  ;;  %vm525_vm11 = vcmp.eq.s32.totalorder %v5570_v23, %v5548_v15  ;;  %vm527_vm12 = vcmp.eq.s32.totalorder %v5606_v31, %v5548_v15  ;;  %vm758_vm14 = vcmp.eq.s32.totalorder %v5570_v23, %v5561_v20  ;;  %vm757_vm2 = vcmp.eq.s32.totalorder %v5570_v23, %v5558_v19 }
  0x1b   : > { %4718 = vmatprep.subr.msk.bf16.mxu1 %vm4717_vm5, %v5440_v30  ;;  %vm4719_vm1 = vmpackc.low %vm531_vm0, %vm529_vm15  ;;  %vm760_vm15 = vcmp.eq.s32.totalorder %v5606_v31, %v5561_v20  ;;  %vm522_vm5 = vcmp.eq.s32.totalorder %v5630_v32, %v5551_v16  ;;  %v5657_v34 = vadd.s32 48, %v5506_v3  ;;  %v5660_v35 = vadd.s32 56, %v5506_v3 }
  0x1c   : > { %4720 = vmatpush1.bf16.msk.msra.mxu1 %vm4719_vm1, %v5440_v30  ;;  %vm4781_vm10 = vmpackc.low %vm764_vm4, %vm762_vm3  ;;  %vm759_vm3 = vcmp.eq.s32.totalorder %v5606_v31, %v5558_v19  ;;  %vm521_vm1 = vcmp.eq.s32.totalorder %v5630_v32, %v5548_v15  ;;  %v5683_v36 = vadd.s32 32, %v5506_v3  ;;  %v5686_v37 = vadd.s32 40, %v5506_v3 }
  0x1d   : > { %4782 = vmatprep.subr.msk.bf16.mxu0 %vm4781_vm10, %v5440_v30  ;;  %vm4783_vm13 = vmpackc.low %vm763_vm7, %vm761_vm6  ;;  %vm524_vm6 = vcmp.eq.s32.totalorder %v5633_v33, %v5551_v16  ;;  %vm754_vm10 = vcmp.eq.s32.totalorder %v5630_v32, %v5561_v20  ;;  %v5709_v38 = vadd.s32 16, %v5506_v3  ;;  %v5712_v39 = vadd.s32 24, %v5506_v3 }
  0x1e   : > { %4784 = vmatpush1.bf16.msk.msra.mxu0 %vm4783_vm13, %v5440_v30  ;;  %vm4721_vm0 = vmpackc.low %vm528_vm9, %vm526_vm8  ;;  %vm523_vm8 = vcmp.eq.s32.totalorder %v5633_v33, %v5548_v15  ;;  %vm753_vm13 = vcmp.eq.s32.totalorder %v5630_v32, %v5558_v19  ;;  %v5735_v40 = vadd.s32 8, %v5506_v3  ;;  %v5758_v41 = vadd.s32 240, %v5506_v3 }
  0x1f   : > { %4722 = vmatprep.subr.msk.bf16.mxu1 %vm4721_vm0, %v5440_v30  ;;  %vm4723_vm4 = vmpackc.low %vm527_vm12, %vm525_vm11  ;;  %vm756_vm11 = vcmp.eq.s32.totalorder %v5633_v33, %v5561_v20  ;;  %vm518_vm0 = vcmp.eq.s32.totalorder %v5657_v34, %v5551_v16  ;;  %v5761_v42 = vadd.s32 248, %v5506_v3  ;;  %v5784_v43 = vadd.s32 224, %v5506_v3 }
  0x20   : > { %4724 = vmatpush1.bf16.msk.msra.mxu1 %vm4723_vm4, %v5440_v30  ;;  %vm4785_vm7 = vmpackc.low %vm760_vm15, %vm758_vm14  ;;  %vm755_vm14 = vcmp.eq.s32.totalorder %v5633_v33, %v5558_v19  ;;  %vm517_vm4 = vcmp.eq.s32.totalorder %v5657_v34, %v5548_v15  ;;  %v5787_v44 = vadd.s32 232, %v5506_v3  ;;  %v5810_v45 = vadd.s32 208, %v5506_v3 }
  0x21   : > { %4786 = vmatprep.subr.msk.bf16.mxu0 %vm4785_vm7, %v5440_v30  ;;  %vm4787_vm9 = vmpackc.low %vm759_vm3, %vm757_vm2  ;;  %vm520_vm2 = vcmp.eq.s32.totalorder %v5660_v35, %v5551_v16  ;;  %vm750_vm7 = vcmp.eq.s32.totalorder %v5657_v34, %v5561_v20  ;;  %v5813_v46 = vadd.s32 216, %v5506_v3  ;;  %v5836_v47 = vadd.s32 192, %v5506_v3 }
  0x22   : > { %4788 = vmatpush1.bf16.msk.msra.mxu0 %vm4787_vm9, %v5440_v30  ;;  %vm4725_vm12 = vmpackc.low %vm524_vm6, %vm522_vm5  ;;  %vm519_vm5 = vcmp.eq.s32.totalorder %v5660_v35, %v5548_v15  ;;  %vm749_vm9 = vcmp.eq.s32.totalorder %v5657_v34, %v5558_v19  ;;  %v5839_v48 = vadd.s32 200, %v5506_v3  ;;  %v5862_v49 = vadd.s32 176, %v5506_v3 }
  0x23   : > { %4726 = vmatprep.subr.msk.bf16.mxu1 %vm4725_vm12, %v5440_v30  ;;  %vm4727_vm15 = vmpackc.low %vm523_vm8, %vm521_vm1  ;;  %vm752_vm1 = vcmp.eq.s32.totalorder %v5660_v35, %v5561_v20  ;;  %vm514_vm12 = vcmp.eq.s32.totalorder %v5683_v36, %v5551_v16  ;;  %v5865_v50 = vadd.s32 184, %v5506_v3  ;;  %v5888_v51 = vadd.s32 160, %v5506_v3 }
  0x24   : > { %4728 = vmatpush1.bf16.msk.msra.mxu1 %vm4727_vm15, %v5440_v30  ;;  %vm4789_vm3 = vmpackc.low %vm756_vm11, %vm754_vm10  ;;  %vm751_vm10 = vcmp.eq.s32.totalorder %v5660_v35, %v5558_v19  ;;  %vm513_vm15 = vcmp.eq.s32.totalorder %v5683_v36, %v5548_v15  ;;  %v5891_v52 = vadd.s32 168, %v5506_v3  ;;  %v5914_v53 = vadd.s32 144, %v5506_v3 }
  0x25   : > { %4790 = vmatprep.subr.msk.bf16.mxu0 %vm4789_vm3, %v5440_v30  ;;  %vm4791_vm6 = vmpackc.low %vm755_vm14, %vm753_vm13  ;;  %vm516_vm13 = vcmp.eq.s32.totalorder %v5686_v37, %v5551_v16  ;;  %vm746_vm3 = vcmp.eq.s32.totalorder %v5683_v36, %v5561_v20  ;;  %v5917_v54 = vadd.s32 152, %v5506_v3  ;;  %v963_v55 = vsub.s32 2, %v5506_v3 }
  0x26   : > { %4792 = vmatpush1.bf16.msk.msra.mxu0 %vm4791_vm6, %v5440_v30  ;;  %vm4729_vm8 = vmpackc.low %vm520_vm2, %vm518_vm0  ;;  %vm515_vm0 = vcmp.eq.s32.totalorder %v5686_v37, %v5548_v15  ;;  %vm745_vm6 = vcmp.eq.s32.totalorder %v5683_v36, %v5558_v19  ;;  %v5941_v56 = vadd.s32 128, %v5506_v3  ;;  %v5944_v57 = vadd.s32 136, %v5506_v3 }
  0x27   : > { %4730 = vmatprep.subr.msk.bf16.mxu1 %vm4729_vm8, %v5440_v30  ;;  %vm4731_vm11 = vmpackc.low %vm519_vm5, %vm517_vm4  ;;  %vm748_vm4 = vcmp.eq.s32.totalorder %v5686_v37, %v5561_v20  ;;  %vm510_vm8 = vcmp.eq.s32.totalorder %v5709_v38, %v5551_v16  ;;  %v1195_v58 = vsub.s32 3, %v5506_v3  ;;  %v5963_v59 = vrot.slane %v5539_v11, %v963_v55 }
  0x28   : > { %4732 = vmatpush1.bf16.msk.msra.mxu1 %vm4731_vm11, %v5440_v30  ;;  %vm4793_vm14 = vmpackc.low %vm752_vm1, %vm750_vm7  ;;  %vm747_vm7 = vcmp.eq.s32.totalorder %v5686_v37, %v5558_v19  ;;  %vm509_vm11 = vcmp.eq.s32.totalorder %v5709_v38, %v5548_v15  ;;  %v5971_v60 = vrot.slane %v5536_v10, %v963_v55  ;;  %v1427_v0 = vsub.s32 4, %v5506_v3 }
  0x29   : > { %4794 = vmatprep.subr.msk.bf16.mxu0 %vm4793_vm14, %v5440_v30  ;;  %vm4795_vm2 = vmpackc.low %vm751_vm10, %vm749_vm9  ;;  %vm512_vm9 = vcmp.eq.s32.totalorder %v5712_v39, %v5551_v16  ;;  %vm742_vm14 = vcmp.eq.s32.totalorder %v5709_v38, %v5561_v20  ;;  %v5979_v61 = vrot.slane %v5539_v11, %v1195_v58  ;;  %v5987_v62 = vrot.slane %v5536_v10, %v1195_v58  ;;  %v6385_v10 = vld [vmem:[%s5519_s13 + $0x4] ss:$8 sps:$4 sm:$0xff]  }
  0x2a   : > { %4796 = vmatpush1.bf16.msk.msra.mxu0 %vm4795_vm2, %v5440_v30  ;;  %vm4733_vm5 = vmpackc.low %vm516_vm13, %vm514_vm12  ;;  %vm511_vm12 = vcmp.eq.s32.totalorder %v5712_v39, %v5548_v15  ;;  %vm741_vm2 = vcmp.eq.s32.totalorder %v5709_v38, %v5558_v19  ;;  %v1659_v2 = vsub.s32 5, %v5506_v3  ;;  %v6307_v5 = vrot.slane %v6304_v4, %v1427_v0 }
  0x2b   : > { %4734 = vmatprep.subr.msk.bf16.mxu1 %vm4733_vm5, %v5440_v30  ;;  %vm4735_vm1 = vmpackc.low %vm515_vm0, %vm513_vm15  ;;  %vm744_vm15 = vcmp.eq.s32.totalorder %v5712_v39, %v5561_v20  ;;  %vm506_vm5 = vcmp.eq.s32.totalorder %v5506_v3, %v5551_v16  ;;  %v6318_v7 = vrot.slane %v6315_v6, %v1427_v0  ;;  %v1891_v11 = vsub.s32 6, %v5506_v3 }
  0x2c   : > { %4736 = vmatpush1.bf16.msk.msra.mxu1 %vm4735_vm1, %v5440_v30  ;;  %vm4797_vm10 = vmpackc.low %vm748_vm4, %vm746_vm3  ;;  %vm743_vm3 = vcmp.eq.s32.totalorder %v5712_v39, %v5558_v19  ;;  %vm505_vm1 = vcmp.eq.s32.totalorder %v5506_v3, %v5548_v15  ;;  %v6329_v8 = vrot.slane %v6304_v4, %v1659_v2  ;;  %v2123_v13 = vsub.s32 7, %v5506_v3 }
  0x2d   : > { %4798 = vmatprep.subr.msk.bf16.mxu0 %vm4797_vm10, %v5440_v30  ;;  %vm4799_vm13 = vmpackc.low %vm747_vm7, %vm745_vm6  ;;  %vm508_vm6 = vcmp.eq.s32.totalorder %v5735_v40, %v5551_v16  ;;  %vm738_vm10 = vcmp.eq.s32.totalorder %v5506_v3, %v5561_v20  ;;  %v6669_v14 = vrot.slane %v6304_v4, %v1891_v11 }
  0x2e   : > { %4800 = vmatpush1.bf16.msk.msra.mxu0 %vm4799_vm13, %v5440_v30  ;;  %vm4737_vm0 = vmpackc.low %vm512_vm9, %vm510_vm8  ;;  %vm507_vm8 = vcmp.eq.s32.totalorder %v5735_v40, %v5548_v15  ;;  %vm737_vm13 = vcmp.eq.s32.totalorder %v5506_v3, %v5558_v19  ;;  %v6693_v17 = vrot.slane %v6315_v6, %v2123_v13 }
  0x2f   : > { %4738 = vmatprep.subr.msk.bf16.mxu1 %vm4737_vm0, %v5440_v30  ;;  %vm4739_vm4 = vmpackc.low %vm511_vm12, %vm509_vm11  ;;  %vm740_vm11 = vcmp.eq.s32.totalorder %v5735_v40, %v5561_v20  ;;  %vm566_vm0 = vcmp.eq.s32.totalorder %v5758_v41, %v5551_v16 }
  0x30   : > { %4740 = vmatpush1.bf16.msk.msra.mxu1 %vm4739_vm4, %v5440_v30  ;;  %vm4801_vm7 = vmpackc.low %vm744_vm15, %vm742_vm14  ;;  %vm739_vm14 = vcmp.eq.s32.totalorder %v5735_v40, %v5558_v19  ;;  %vm565_vm4 = vcmp.eq.s32.totalorder %v5758_v41, %v5548_v15 }
  0x31   : > { %4802 = vmatprep.subr.msk.bf16.mxu0 %vm4801_vm7, %v5440_v30  ;;  %vm4803_vm9 = vmpackc.low %vm743_vm3, %vm741_vm2  ;;  %vm568_vm2 = vcmp.eq.s32.totalorder %v5761_v42, %v5551_v16  ;;  %vm798_vm7 = vcmp.eq.s32.totalorder %v5758_v41, %v5561_v20 }
  0x32   : > { %4804 = vmatpush1.bf16.msk.msra.mxu0 %vm4803_vm9, %v5440_v30  ;;  %vm4741_vm12 = vmpackc.low %vm508_vm6, %vm506_vm5  ;;  %vm567_vm5 = vcmp.eq.s32.totalorder %v5761_v42, %v5548_v15  ;;  %vm797_vm9 = vcmp.eq.s32.totalorder %v5758_v41, %v5558_v19 }
  0x33   : > { %4742 = vmatprep.subr.msk.bf16.mxu1 %vm4741_vm12, %v5440_v30  ;;  %vm4743_vm15 = vmpackc.low %vm507_vm8, %vm505_vm1  ;;  %vm800_vm1 = vcmp.eq.s32.totalorder %v5761_v42, %v5561_v20  ;;  %vm562_vm12 = vcmp.eq.s32.totalorder %v5784_v43, %v5551_v16 }
  0x34   : > { %4744 = vmatpush1.bf16.msk.msra.mxu1 %vm4743_vm15, %v5440_v30  ;;  %vm4805_vm3 = vmpackc.low %vm740_vm11, %vm738_vm10  ;;  %vm799_vm10 = vcmp.eq.s32.totalorder %v5761_v42, %v5558_v19  ;;  %vm561_vm15 = vcmp.eq.s32.totalorder %v5784_v43, %v5548_v15 }
  0x35   : > { %4806 = vmatprep.subr.msk.bf16.mxu0 %vm4805_vm3, %v5440_v30  ;;  %vm4807_vm6 = vmpackc.low %vm739_vm14, %vm737_vm13  ;;  %vm564_vm13 = vcmp.eq.s32.totalorder %v5787_v44, %v5551_v16  ;;  %vm794_vm3 = vcmp.eq.s32.totalorder %v5784_v43, %v5561_v20 }
  0x36   : > { %4808 = vmatpush1.bf16.msk.msra.mxu0 %vm4807_vm6, %v5440_v30  ;;  %vm4745_vm8 = vmpackc.low %vm568_vm2, %vm566_vm0  ;;  %vm563_vm0 = vcmp.eq.s32.totalorder %v5787_v44, %v5548_v15  ;;  %vm793_vm6 = vcmp.eq.s32.totalorder %v5784_v43, %v5558_v19 }
  0x37   : > { %4746 = vmatprep.subr.msk.bf16.mxu1 %vm4745_vm8, %v5440_v30  ;;  %vm4747_vm11 = vmpackc.low %vm567_vm5, %vm565_vm4  ;;  %vm796_vm4 = vcmp.eq.s32.totalorder %v5787_v44, %v5561_v20  ;;  %vm558_vm8 = vcmp.eq.s32.totalorder %v5810_v45, %v5551_v16 }
  0x38   : > { %4748 = vmatpush2.bf16.msk.msra.mxu1 %vm4747_vm11, %v5440_v30  ;;  %vm4809_vm14 = vmpackc.low %vm800_vm1, %vm798_vm7  ;;  %vm795_vm7 = vcmp.eq.s32.totalorder %v5787_v44, %v5558_v19  ;;  %vm557_vm11 = vcmp.eq.s32.totalorder %v5810_v45, %v5548_v15 }
  0x39   : > { %4810 = vmatprep.subr.msk.bf16.mxu0 %vm4809_vm14, %v5440_v30  ;;  %vm4811_vm2 = vmpackc.low %vm799_vm10, %vm797_vm9  ;;  %vm560_vm9 = vcmp.eq.s32.totalorder %v5813_v46, %v5551_v16  ;;  %vm790_vm14 = vcmp.eq.s32.totalorder %v5810_v45, %v5561_v20 }
  0x3a   : > { %4812 = vmatpush2.bf16.msk.msra.mxu0 %vm4811_vm2, %v5440_v30  ;;  %vm4749_vm5 = vmpackc.low %vm564_vm13, %vm562_vm12  ;;  %vm559_vm12 = vcmp.eq.s32.totalorder %v5813_v46, %v5548_v15  ;;  %vm789_vm2 = vcmp.eq.s32.totalorder %v5810_v45, %v5558_v19 }
  0x3b   : > { %4750 = vmatprep.subr.msk.bf16.mxu1 %vm4749_vm5, %v5440_v30  ;;  %vm4751_vm1 = vmpackc.low %vm563_vm0, %vm561_vm15  ;;  %vm792_vm15 = vcmp.eq.s32.totalorder %v5813_v46, %v5561_v20  ;;  %vm554_vm5 = vcmp.eq.s32.totalorder %v5836_v47, %v5551_v16 }
  0x3c   : > { %4752 = vmatpush2.bf16.msk.msra.mxu1 %vm4751_vm1, %v5440_v30  ;;  %vm4813_vm10 = vmpackc.low %vm796_vm4, %vm794_vm3  ;;  %vm791_vm3 = vcmp.eq.s32.totalorder %v5813_v46, %v5558_v19  ;;  %vm553_vm1 = vcmp.eq.s32.totalorder %v5836_v47, %v5548_v15 }
  0x3d   : > { %4814 = vmatprep.subr.msk.bf16.mxu0 %vm4813_vm10, %v5440_v30  ;;  %vm4815_vm13 = vmpackc.low %vm795_vm7, %vm793_vm6  ;;  %vm556_vm6 = vcmp.eq.s32.totalorder %v5839_v48, %v5551_v16  ;;  %vm786_vm10 = vcmp.eq.s32.totalorder %v5836_v47, %v5561_v20 }
  0x3e   : > { %4816 = vmatpush2.bf16.msk.msra.mxu0 %vm4815_vm13, %v5440_v30  ;;  %vm4753_vm0 = vmpackc.low %vm560_vm9, %vm558_vm8  ;;  %vm555_vm8 = vcmp.eq.s32.totalorder %v5839_v48, %v5548_v15  ;;  %vm785_vm13 = vcmp.eq.s32.totalorder %v5836_v47, %v5558_v19 }
  0x3f   : > { %4754 = vmatprep.subr.msk.bf16.mxu1 %vm4753_vm0, %v5440_v30  ;;  %vm4755_vm4 = vmpackc.low %vm559_vm12, %vm557_vm11  ;;  %vm788_vm11 = vcmp.eq.s32.totalorder %v5839_v48, %v5561_v20  ;;  %vm550_vm0 = vcmp.eq.s32.totalorder %v5862_v49, %v5551_v16 }
  0x40   : > { %4756 = vmatpush2.bf16.msk.msra.mxu1 %vm4755_vm4, %v5440_v30  ;;  %vm4817_vm7 = vmpackc.low %vm792_vm15, %vm790_vm14  ;;  %vm787_vm14 = vcmp.eq.s32.totalorder %v5839_v48, %v5558_v19  ;;  %vm549_vm4 = vcmp.eq.s32.totalorder %v5862_v49, %v5548_v15 }
  0x41   : > { %4818 = vmatprep.subr.msk.bf16.mxu0 %vm4817_vm7, %v5440_v30  ;;  %vm4819_vm9 = vmpackc.low %vm791_vm3, %vm789_vm2  ;;  %vm552_vm2 = vcmp.eq.s32.totalorder %v5865_v50, %v5551_v16  ;;  %vm782_vm7 = vcmp.eq.s32.totalorder %v5862_v49, %v5561_v20 }
  0x42   : > { %4820 = vmatpush2.bf16.msk.msra.mxu0 %vm4819_vm9, %v5440_v30  ;;  %vm4757_vm12 = vmpackc.low %vm556_vm6, %vm554_vm5  ;;  %vm551_vm5 = vcmp.eq.s32.totalorder %v5865_v50, %v5548_v15  ;;  %vm781_vm9 = vcmp.eq.s32.totalorder %v5862_v49, %v5558_v19 }
  0x43   : > { %4758 = vmatprep.subr.msk.bf16.mxu1 %vm4757_vm12, %v5440_v30  ;;  %vm4759_vm15 = vmpackc.low %vm555_vm8, %vm553_vm1  ;;  %vm784_vm1 = vcmp.eq.s32.totalorder %v5865_v50, %v5561_v20  ;;  %vm546_vm12 = vcmp.eq.s32.totalorder %v5888_v51, %v5551_v16 }
  0x44   : > { %4760 = vmatpush2.bf16.msk.msra.mxu1 %vm4759_vm15, %v5440_v30  ;;  %vm4821_vm3 = vmpackc.low %vm788_vm11, %vm786_vm10  ;;  %vm783_vm10 = vcmp.eq.s32.totalorder %v5865_v50, %v5558_v19  ;;  %vm545_vm15 = vcmp.eq.s32.totalorder %v5888_v51, %v5548_v15 }
  0x45   : > { %4822 = vmatprep.subr.msk.bf16.mxu0 %vm4821_vm3, %v5440_v30  ;;  %vm4823_vm6 = vmpackc.low %vm787_vm14, %vm785_vm13  ;;  %vm548_vm13 = vcmp.eq.s32.totalorder %v5891_v52, %v5551_v16  ;;  %vm778_vm3 = vcmp.eq.s32.totalorder %v5888_v51, %v5561_v20 }
  0x46   : > { %4824 = vmatpush2.bf16.msk.msra.mxu0 %vm4823_vm6, %v5440_v30  ;;  %vm4761_vm8 = vmpackc.low %vm552_vm2, %vm550_vm0  ;;  %vm547_vm0 = vcmp.eq.s32.totalorder %v5891_v52, %v5548_v15  ;;  %vm777_vm6 = vcmp.eq.s32.totalorder %v5888_v51, %v5558_v19 }
  0x47   : > { %4762 = vmatprep.subr.msk.bf16.mxu1 %vm4761_vm8, %v5440_v30  ;;  %vm4763_vm11 = vmpackc.low %vm551_vm5, %vm549_vm4  ;;  %vm780_vm4 = vcmp.eq.s32.totalorder %v5891_v52, %v5561_v20  ;;  %vm542_vm8 = vcmp.eq.s32.totalorder %v5914_v53, %v5551_v16 }
  0x48   : > { %4764 = vmatpush2.bf16.msk.msra.mxu1 %vm4763_vm11, %v5440_v30  ;;  %vm4825_vm14 = vmpackc.low %vm784_vm1, %vm782_vm7  ;;  %vm779_vm7 = vcmp.eq.s32.totalorder %v5891_v52, %v5558_v19  ;;  %vm541_vm11 = vcmp.eq.s32.totalorder %v5914_v53, %v5548_v15 }
  0x49   : > { %4826 = vmatprep.subr.msk.bf16.mxu0 %vm4825_vm14, %v5440_v30  ;;  %vm4827_vm2 = vmpackc.low %vm783_vm10, %vm781_vm9  ;;  %vm544_vm9 = vcmp.eq.s32.totalorder %v5917_v54, %v5551_v16  ;;  %vm774_vm14 = vcmp.eq.s32.totalorder %v5914_v53, %v5561_v20 }
  0x4a   : > { %4828 = vmatpush2.bf16.msk.msra.mxu0 %vm4827_vm2, %v5440_v30  ;;  %vm4765_vm5 = vmpackc.low %vm548_vm13, %vm546_vm12  ;;  %vm543_vm12 = vcmp.eq.s32.totalorder %v5917_v54, %v5548_v15  ;;  %vm773_vm2 = vcmp.eq.s32.totalorder %v5914_v53, %v5558_v19 }
  0x4b   : > { %4766 = vmatprep.subr.msk.bf16.mxu1 %vm4765_vm5, %v5440_v30  ;;  %vm4767_vm1 = vmpackc.low %vm547_vm0, %vm545_vm15  ;;  %vm776_vm15 = vcmp.eq.s32.totalorder %v5917_v54, %v5561_v20  ;;  %vm538_vm5 = vcmp.eq.s32.totalorder %v5941_v56, %v5551_v16 }
  0x4c   : > { %4768 = vmatpush2.bf16.msk.msra.mxu1 %vm4767_vm1, %v5440_v30  ;;  %vm4829_vm10 = vmpackc.low %vm780_vm4, %vm778_vm3  ;;  %vm775_vm3 = vcmp.eq.s32.totalorder %v5917_v54, %v5558_v19  ;;  %vm537_vm1 = vcmp.eq.s32.totalorder %v5941_v56, %v5548_v15 }
  0x4d   : > { %4830 = vmatprep.subr.msk.bf16.mxu0 %vm4829_vm10, %v5440_v30  ;;  %vm4831_vm13 = vmpackc.low %vm779_vm7, %vm777_vm6  ;;  %vm540_vm6 = vcmp.eq.s32.totalorder %v5944_v57, %v5551_v16  ;;  %vm770_vm10 = vcmp.eq.s32.totalorder %v5941_v56, %v5561_v20  ;;  %v6685_v16 = vrot.slane %v6304_v4, %v2123_v13 }
  0x4e   : > { %4832 = vmatpush2.bf16.msk.msra.mxu0 %vm4831_vm13, %v5440_v30  ;;  %vm4769_vm0 = vmpackc.low %vm544_vm9, %vm542_vm8  ;;  %vm539_vm8 = vcmp.eq.s32.totalorder %v5944_v57, %v5548_v15  ;;  %vm769_vm13 = vcmp.eq.s32.totalorder %v5941_v56, %v5558_v19  ;;  %v6677_v15 = vrot.slane %v6315_v6, %v1891_v11 }
  0x4f   : > { %4770 = vmatprep.subr.msk.bf16.mxu1 %vm4769_vm0, %v5440_v30  ;;  %vm4771_vm4 = vmpackc.low %vm543_vm12, %vm541_vm11  ;;  %vm772_vm11 = vcmp.eq.s32.totalorder %v5944_v57, %v5561_v20  ;;  %vm998_vm0 = vcmp.eq.s32.totalorder %v5543_v12, %v5963_v59 }
  0x50   : > { %4772 = vmatpush2.bf16.msk.msra.mxu1 %vm4771_vm4, %v5440_v30  ;;  %vm4833_vm7 = vmpackc.low %vm776_vm15, %vm774_vm14  ;;  %vm771_vm14 = vcmp.eq.s32.totalorder %v5944_v57, %v5558_v19  ;;  %vm997_vm4 = vcmp.eq.s32.totalorder %v5543_v12, %v5971_v60  ;;  %v6721_v19 = vld [vmem:[%s5519_s13] ss:$8 sps:$4 sm:$0xff]  }
  0x51   : > { %4834 = vmatprep.subr.msk.bf16.mxu0 %vm4833_vm7, %v5440_v30  ;;  %vm4835_vm9 = vmpackc.low %vm775_vm3, %vm773_vm2  ;;  %vm1000_vm2 = vcmp.eq.s32.totalorder %v5554_v18, %v5963_v59  ;;  %vm1230_vm7 = vcmp.eq.s32.totalorder %v5543_v12, %v5979_v61 }
  0x52   : > { %4836 = vmatpush2.bf16.msk.msra.mxu0 %vm4835_vm9, %v5440_v30  ;;  %vm4773_vm12 = vmpackc.low %vm540_vm6, %vm538_vm5  ;;  %vm999_vm5 = vcmp.eq.s32.totalorder %v5554_v18, %v5971_v60  ;;  %vm1229_vm9 = vcmp.eq.s32.totalorder %v5543_v12, %v5987_v62 }
  0x53   : > { %4774 = vmatprep.subr.msk.bf16.mxu1 %vm4773_vm12, %v5440_v30  ;;  %vm4775_vm15 = vmpackc.low %vm539_vm8, %vm537_vm1  ;;  %vm1232_vm1 = vcmp.eq.s32.totalorder %v5554_v18, %v5979_v61  ;;  %vm994_vm12 = vcmp.eq.s32.totalorder %v5564_v21, %v5963_v59 }
  0x54   : > { %4776 = vmatpush2.bf16.msk.msra.mxu1 %vm4775_vm15, %v5440_v30  ;;  %vm4837_vm3 = vmpackc.low %vm772_vm11, %vm770_vm10  ;;  %vm1231_vm10 = vcmp.eq.s32.totalorder %v5554_v18, %v5987_v62  ;;  %vm993_vm15 = vcmp.eq.s32.totalorder %v5564_v21, %v5971_v60 }
  0x55   : > { %4838 = vmatprep.subr.msk.bf16.mxu0 %vm4837_vm3, %v5440_v30  ;;  %vm4839_vm6 = vmpackc.low %vm771_vm14, %vm769_vm13  ;;  %vm996_vm13 = vcmp.eq.s32.totalorder %v5567_v22, %v5963_v59  ;;  %vm1226_vm3 = vcmp.eq.s32.totalorder %v5564_v21, %v5979_v61 }
  0x56   : > { %4840 = vmatpush2.bf16.msk.msra.mxu0 %vm4839_vm6, %v5440_v30  ;;  %vm4841_vm8 = vmpackc.low %vm1000_vm2, %vm998_vm0  ;;  %vm995_vm0 = vcmp.eq.s32.totalorder %v5567_v22, %v5971_v60  ;;  %vm1225_vm6 = vcmp.eq.s32.totalorder %v5564_v21, %v5987_v62 }
  0x57   : > { %2860 = vmatmul.mubr.bf16.vlgmr.msra.gmra.mxu1 %v5995_v63  ;;  %4842 = vmatprep.subr.msk.bf16.mxu1 %vm4841_vm8, %v5440_v30  ;;  %vm4843_vm11 = vmpackc.low %vm999_vm5, %vm997_vm4  ;;  %vm1228_vm4 = vcmp.eq.s32.totalorder %v5567_v22, %v5979_v61  ;;  %vm990_vm8 = vcmp.eq.s32.totalorder %v5570_v23, %v5963_v59 }
  0x58   : > { %4844 = vmatpush1.bf16.msk.msra.mxu1 %vm4843_vm11, %v5440_v30  ;;  %vm4905_vm14 = vmpackc.low %vm1232_vm1, %vm1230_vm7  ;;  %vm1227_vm7 = vcmp.eq.s32.totalorder %v5567_v22, %v5987_v62  ;;  %2945 = vmatprep.mubr.bf16.mxu1 %v5533_v9  ;;  %vm989_vm11 = vcmp.eq.s32.totalorder %v5570_v23, %v5971_v60 }
  0x59   : > { %2903 = vmatmul.mubr.bf16.vlgmr.msra.gmra.mxu0 %v5995_v63  ;;  %4906 = vmatprep.subr.msk.bf16.mxu0 %vm4905_vm14, %v5440_v30  ;;  %vm4907_vm2 = vmpackc.low %vm1231_vm10, %vm1229_vm9  ;;  %vm992_vm9 = vcmp.eq.s32.totalorder %v5606_v31, %v5963_v59  ;;  %vm1222_vm14 = vcmp.eq.s32.totalorder %v5570_v23, %v5979_v61 }
  0x5a   : > { %4908 = vmatpush1.bf16.msk.msra.mxu0 %vm4907_vm2, %v5440_v30  ;;  %vm4845_vm5 = vmpackc.low %vm996_vm13, %vm994_vm12  ;;  %vm991_vm12 = vcmp.eq.s32.totalorder %v5606_v31, %v5971_v60  ;;  %2988 = vmatprep.mubr.bf16.mxu0 %v5533_v9  ;;  %vm1221_vm2 = vcmp.eq.s32.totalorder %v5570_v23, %v5987_v62  ;;  %v6343_v9 = vrot.slane %v6315_v6, %v1659_v2 }
  0x5b   : > { %4846 = vmatprep.subr.msk.bf16.mxu1 %vm4845_vm5, %v5440_v30  ;;  %vm4847_vm1 = vmpackc.low %vm995_vm0, %vm993_vm15  ;;  %vm1224_vm15 = vcmp.eq.s32.totalorder %v5606_v31, %v5979_v61  ;;  %vm986_vm5 = vcmp.eq.s32.totalorder %v5630_v32, %v5963_v59 }
  0x5c   : > { %4848 = vmatpush1.bf16.msk.msra.mxu1 %vm4847_vm1, %v5440_v30  ;;  %vm4909_vm10 = vmpackc.low %vm1228_vm4, %vm1226_vm3  ;;  %vm1223_vm3 = vcmp.eq.s32.totalorder %v5606_v31, %v5987_v62  ;;  %vm985_vm1 = vcmp.eq.s32.totalorder %v5630_v32, %v5971_v60 }
  0x5d   : > { %4910 = vmatprep.subr.msk.bf16.mxu0 %vm4909_vm10, %v5440_v30  ;;  %vm4911_vm13 = vmpackc.low %vm1227_vm7, %vm1225_vm6  ;;  %vm988_vm6 = vcmp.eq.s32.totalorder %v5633_v33, %v5963_v59  ;;  %vm1218_vm10 = vcmp.eq.s32.totalorder %v5630_v32, %v5979_v61 }
  0x5e   : > { %4912 = vmatpush1.bf16.msk.msra.mxu0 %vm4911_vm13, %v5440_v30  ;;  %vm4849_vm0 = vmpackc.low %vm992_vm9, %vm990_vm8  ;;  %vm987_vm8 = vcmp.eq.s32.totalorder %v5633_v33, %v5971_v60  ;;  %vm1217_vm13 = vcmp.eq.s32.totalorder %v5630_v32, %v5987_v62 }
  0x5f   : > { %4850 = vmatprep.subr.msk.bf16.mxu1 %vm4849_vm0, %v5440_v30  ;;  %vm4851_vm4 = vmpackc.low %vm991_vm12, %vm989_vm11  ;;  %vm1220_vm11 = vcmp.eq.s32.totalorder %v5633_v33, %v5979_v61  ;;  %vm982_vm0 = vcmp.eq.s32.totalorder %v5657_v34, %v5963_v59 }
  0x60   : > { %4852 = vmatpush1.bf16.msk.msra.mxu1 %vm4851_vm4, %v5440_v30  ;;  %vm4913_vm7 = vmpackc.low %vm1224_vm15, %vm1222_vm14  ;;  %vm1219_vm14 = vcmp.eq.s32.totalorder %v5633_v33, %v5987_v62  ;;  %vm981_vm4 = vcmp.eq.s32.totalorder %v5657_v34, %v5971_v60 }
  0x61   : > { %4914 = vmatprep.subr.msk.bf16.mxu0 %vm4913_vm7, %v5440_v30  ;;  %vm4915_vm9 = vmpackc.low %vm1223_vm3, %vm1221_vm2  ;;  %vm984_vm2 = vcmp.eq.s32.totalorder %v5660_v35, %v5963_v59  ;;  %vm1214_vm7 = vcmp.eq.s32.totalorder %v5657_v34, %v5979_v61 }
  0x62   : > { %4916 = vmatpush1.bf16.msk.msra.mxu0 %vm4915_vm9, %v5440_v30  ;;  %vm4853_vm12 = vmpackc.low %vm988_vm6, %vm986_vm5  ;;  %vm983_vm5 = vcmp.eq.s32.totalorder %v5660_v35, %v5971_v60  ;;  %vm1213_vm9 = vcmp.eq.s32.totalorder %v5657_v34, %v5987_v62 }
  0x63   : > { %4854 = vmatprep.subr.msk.bf16.mxu1 %vm4853_vm12, %v5440_v30  ;;  %vm4855_vm15 = vmpackc.low %vm987_vm8, %vm985_vm1  ;;  %vm1216_vm1 = vcmp.eq.s32.totalorder %v5660_v35, %v5979_v61  ;;  %vm978_vm12 = vcmp.eq.s32.totalorder %v5683_v36, %v5963_v59 }
  0x64   : > { %4856 = vmatpush1.bf16.msk.msra.mxu1 %vm4855_vm15, %v5440_v30  ;;  %vm4917_vm3 = vmpackc.low %vm1220_vm11, %vm1218_vm10  ;;  %vm1215_vm10 = vcmp.eq.s32.totalorder %v5660_v35, %v5987_v62  ;;  %vm977_vm15 = vcmp.eq.s32.totalorder %v5683_v36, %v5971_v60 }
  0x65   : > { %4918 = vmatprep.subr.msk.bf16.mxu0 %vm4917_vm3, %v5440_v30  ;;  %vm4919_vm6 = vmpackc.low %vm1219_vm14, %vm1217_vm13  ;;  %vm980_vm13 = vcmp.eq.s32.totalorder %v5686_v37, %v5963_v59  ;;  %vm1210_vm3 = vcmp.eq.s32.totalorder %v5683_v36, %v5979_v61 }
  0x66   : > { %4920 = vmatpush1.bf16.msk.msra.mxu0 %vm4919_vm6, %v5440_v30  ;;  %vm4857_vm8 = vmpackc.low %vm984_vm2, %vm982_vm0  ;;  %vm979_vm0 = vcmp.eq.s32.totalorder %v5686_v37, %v5971_v60  ;;  %vm1209_vm6 = vcmp.eq.s32.totalorder %v5683_v36, %v5987_v62 }
  0x67   : > { %4858 = vmatprep.subr.msk.bf16.mxu1 %vm4857_vm8, %v5440_v30  ;;  %vm4859_vm11 = vmpackc.low %vm983_vm5, %vm981_vm4  ;;  %vm1212_vm4 = vcmp.eq.s32.totalorder %v5686_v37, %v5979_v61  ;;  %vm974_vm8 = vcmp.eq.s32.totalorder %v5709_v38, %v5963_v59 }
  0x68   : > { %4860 = vmatpush1.bf16.msk.msra.mxu1 %vm4859_vm11, %v5440_v30  ;;  %vm4921_vm14 = vmpackc.low %vm1216_vm1, %vm1214_vm7  ;;  %vm1211_vm7 = vcmp.eq.s32.totalorder %v5686_v37, %v5987_v62  ;;  %vm973_vm11 = vcmp.eq.s32.totalorder %v5709_v38, %v5971_v60 }
  0x69   : > { %4922 = vmatprep.subr.msk.bf16.mxu0 %vm4921_vm14, %v5440_v30  ;;  %vm4923_vm2 = vmpackc.low %vm1215_vm10, %vm1213_vm9  ;;  %vm976_vm9 = vcmp.eq.s32.totalorder %v5712_v39, %v5963_v59  ;;  %vm1206_vm14 = vcmp.eq.s32.totalorder %v5709_v38, %v5979_v61 }
  0x6a   : > { %4924 = vmatpush1.bf16.msk.msra.mxu0 %vm4923_vm2, %v5440_v30  ;;  %vm4861_vm5 = vmpackc.low %vm980_vm13, %vm978_vm12  ;;  %vm975_vm12 = vcmp.eq.s32.totalorder %v5712_v39, %v5971_v60  ;;  %vm1205_vm2 = vcmp.eq.s32.totalorder %v5709_v38, %v5987_v62 }
  0x6b   : > { %4862 = vmatprep.subr.msk.bf16.mxu1 %vm4861_vm5, %v5440_v30  ;;  %vm4863_vm1 = vmpackc.low %vm979_vm0, %vm977_vm15  ;;  %vm1208_vm15 = vcmp.eq.s32.totalorder %v5712_v39, %v5979_v61  ;;  %vm970_vm5 = vcmp.eq.s32.totalorder %v5506_v3, %v5963_v59 }
  0x6c   : > { %4864 = vmatpush1.bf16.msk.msra.mxu1 %vm4863_vm1, %v5440_v30  ;;  %vm4925_vm10 = vmpackc.low %vm1212_vm4, %vm1210_vm3  ;;  %vm1207_vm3 = vcmp.eq.s32.totalorder %v5712_v39, %v5987_v62  ;;  %vm969_vm1 = vcmp.eq.s32.totalorder %v5506_v3, %v5971_v60 }
  0x6d   : > { %4926 = vmatprep.subr.msk.bf16.mxu0 %vm4925_vm10, %v5440_v30  ;;  %vm4927_vm13 = vmpackc.low %vm1211_vm7, %vm1209_vm6  ;;  %vm972_vm6 = vcmp.eq.s32.totalorder %v5735_v40, %v5963_v59  ;;  %vm1202_vm10 = vcmp.eq.s32.totalorder %v5506_v3, %v5979_v61 }
  0x6e   : > { %4928 = vmatpush1.bf16.msk.msra.mxu0 %vm4927_vm13, %v5440_v30  ;;  %vm4865_vm0 = vmpackc.low %vm976_vm9, %vm974_vm8  ;;  %vm971_vm8 = vcmp.eq.s32.totalorder %v5735_v40, %v5971_v60  ;;  %vm1201_vm13 = vcmp.eq.s32.totalorder %v5506_v3, %v5987_v62 }
  0x6f   : > { %4866 = vmatprep.subr.msk.bf16.mxu1 %vm4865_vm0, %v5440_v30  ;;  %vm4867_vm4 = vmpackc.low %vm975_vm12, %vm973_vm11  ;;  %vm1204_vm11 = vcmp.eq.s32.totalorder %v5735_v40, %v5979_v61  ;;  %vm1030_vm0 = vcmp.eq.s32.totalorder %v5758_v41, %v5963_v59 }
  0x70   : > { %4868 = vmatpush1.bf16.msk.msra.mxu1 %vm4867_vm4, %v5440_v30  ;;  %vm4929_vm7 = vmpackc.low %vm1208_vm15, %vm1206_vm14  ;;  %vm1203_vm14 = vcmp.eq.s32.totalorder %v5735_v40, %v5987_v62  ;;  %vm1029_vm4 = vcmp.eq.s32.totalorder %v5758_v41, %v5971_v60 }
  0x71   : > { %4930 = vmatprep.subr.msk.bf16.mxu0 %vm4929_vm7, %v5440_v30  ;;  %vm4931_vm9 = vmpackc.low %vm1207_vm3, %vm1205_vm2  ;;  %vm1032_vm2 = vcmp.eq.s32.totalorder %v5761_v42, %v5963_v59  ;;  %vm1262_vm7 = vcmp.eq.s32.totalorder %v5758_v41, %v5979_v61 }
  0x72   : > { %4932 = vmatpush1.bf16.msk.msra.mxu0 %vm4931_vm9, %v5440_v30  ;;  %vm4869_vm12 = vmpackc.low %vm972_vm6, %vm970_vm5  ;;  %vm1031_vm5 = vcmp.eq.s32.totalorder %v5761_v42, %v5971_v60  ;;  %vm1261_vm9 = vcmp.eq.s32.totalorder %v5758_v41, %v5987_v62 }
  0x73   : > { %4870 = vmatprep.subr.msk.bf16.mxu1 %vm4869_vm12, %v5440_v30  ;;  %vm4871_vm15 = vmpackc.low %vm971_vm8, %vm969_vm1  ;;  %vm1264_vm1 = vcmp.eq.s32.totalorder %v5761_v42, %v5979_v61  ;;  %vm1026_vm12 = vcmp.eq.s32.totalorder %v5784_v43, %v5963_v59 }
  0x74   : > { %4872 = vmatpush1.bf16.msk.msra.mxu1 %vm4871_vm15, %v5440_v30  ;;  %vm4933_vm3 = vmpackc.low %vm1204_vm11, %vm1202_vm10  ;;  %vm1263_vm10 = vcmp.eq.s32.totalorder %v5761_v42, %v5987_v62  ;;  %vm1025_vm15 = vcmp.eq.s32.totalorder %v5784_v43, %v5971_v60 }
  0x75   : > { %4934 = vmatprep.subr.msk.bf16.mxu0 %vm4933_vm3, %v5440_v30  ;;  %vm4935_vm6 = vmpackc.low %vm1203_vm14, %vm1201_vm13  ;;  %vm1028_vm13 = vcmp.eq.s32.totalorder %v5787_v44, %v5963_v59  ;;  %vm1258_vm3 = vcmp.eq.s32.totalorder %v5784_v43, %v5979_v61 }
  0x76   : > { %4936 = vmatpush1.bf16.msk.msra.mxu0 %vm4935_vm6, %v5440_v30  ;;  %vm4873_vm8 = vmpackc.low %vm1032_vm2, %vm1030_vm0  ;;  %vm1027_vm0 = vcmp.eq.s32.totalorder %v5787_v44, %v5971_v60  ;;  %vm1257_vm6 = vcmp.eq.s32.totalorder %v5784_v43, %v5987_v62 }
  0x77   : > { %4874 = vmatprep.subr.msk.bf16.mxu1 %vm4873_vm8, %v5440_v30  ;;  %vm4875_vm11 = vmpackc.low %vm1031_vm5, %vm1029_vm4  ;;  %vm1260_vm4 = vcmp.eq.s32.totalorder %v5787_v44, %v5979_v61  ;;  %vm1022_vm8 = vcmp.eq.s32.totalorder %v5810_v45, %v5963_v59 }
  0x78   : > { %4876 = vmatpush2.bf16.msk.msra.mxu1 %vm4875_vm11, %v5440_v30  ;;  %vm4937_vm14 = vmpackc.low %vm1264_vm1, %vm1262_vm7  ;;  %vm1259_vm7 = vcmp.eq.s32.totalorder %v5787_v44, %v5987_v62  ;;  %vm1021_vm11 = vcmp.eq.s32.totalorder %v5810_v45, %v5971_v60 }
  0x79   : > { %4938 = vmatprep.subr.msk.bf16.mxu0 %vm4937_vm14, %v5440_v30  ;;  %vm4939_vm2 = vmpackc.low %vm1263_vm10, %vm1261_vm9  ;;  %vm1024_vm9 = vcmp.eq.s32.totalorder %v5813_v46, %v5963_v59  ;;  %vm1254_vm14 = vcmp.eq.s32.totalorder %v5810_v45, %v5979_v61 }
  0x7a   : > { %4940 = vmatpush2.bf16.msk.msra.mxu0 %vm4939_vm2, %v5440_v30  ;;  %vm4877_vm5 = vmpackc.low %vm1028_vm13, %vm1026_vm12  ;;  %vm1023_vm12 = vcmp.eq.s32.totalorder %v5813_v46, %v5971_v60  ;;  %vm1253_vm2 = vcmp.eq.s32.totalorder %v5810_v45, %v5987_v62 }
  0x7b   : > { %4878 = vmatprep.subr.msk.bf16.mxu1 %vm4877_vm5, %v5440_v30  ;;  %vm4879_vm1 = vmpackc.low %vm1027_vm0, %vm1025_vm15  ;;  %vm1256_vm15 = vcmp.eq.s32.totalorder %v5813_v46, %v5979_v61  ;;  %vm1018_vm5 = vcmp.eq.s32.totalorder %v5836_v47, %v5963_v59 }
  0x7c   : > { %4880 = vmatpush2.bf16.msk.msra.mxu1 %vm4879_vm1, %v5440_v30  ;;  %vm4941_vm10 = vmpackc.low %vm1260_vm4, %vm1258_vm3  ;;  %vm1255_vm3 = vcmp.eq.s32.totalorder %v5813_v46, %v5987_v62  ;;  %vm1017_vm1 = vcmp.eq.s32.totalorder %v5836_v47, %v5971_v60 }
  0x7d   : > { %4942 = vmatprep.subr.msk.bf16.mxu0 %vm4941_vm10, %v5440_v30  ;;  %vm4943_vm13 = vmpackc.low %vm1259_vm7, %vm1257_vm6  ;;  %vm1020_vm6 = vcmp.eq.s32.totalorder %v5839_v48, %v5963_v59  ;;  %vm1250_vm10 = vcmp.eq.s32.totalorder %v5836_v47, %v5979_v61 }
  0x7e   : > { %4944 = vmatpush2.bf16.msk.msra.mxu0 %vm4943_vm13, %v5440_v30  ;;  %vm4881_vm0 = vmpackc.low %vm1024_vm9, %vm1022_vm8  ;;  %vm1019_vm8 = vcmp.eq.s32.totalorder %v5839_v48, %v5971_v60  ;;  %vm1249_vm13 = vcmp.eq.s32.totalorder %v5836_v47, %v5987_v62 }
  0x7f   : > { %4882 = vmatprep.subr.msk.bf16.mxu1 %vm4881_vm0, %v5440_v30  ;;  %vm4883_vm4 = vmpackc.low %vm1023_vm12, %vm1021_vm11  ;;  %vm1252_vm11 = vcmp.eq.s32.totalorder %v5839_v48, %v5979_v61  ;;  %vm1014_vm0 = vcmp.eq.s32.totalorder %v5862_v49, %v5963_v59 }
  0x80   : > { %4884 = vmatpush2.bf16.msk.msra.mxu1 %vm4883_vm4, %v5440_v30  ;;  %vm4945_vm7 = vmpackc.low %vm1256_vm15, %vm1254_vm14  ;;  %vm1251_vm14 = vcmp.eq.s32.totalorder %v5839_v48, %v5987_v62  ;;  %vm1013_vm4 = vcmp.eq.s32.totalorder %v5862_v49, %v5971_v60 }
  0x81   : > { %4946 = vmatprep.subr.msk.bf16.mxu0 %vm4945_vm7, %v5440_v30  ;;  %vm4947_vm9 = vmpackc.low %vm1255_vm3, %vm1253_vm2  ;;  %vm1016_vm2 = vcmp.eq.s32.totalorder %v5865_v50, %v5963_v59  ;;  %vm1246_vm7 = vcmp.eq.s32.totalorder %v5862_v49, %v5979_v61 }
  0x82   : > { %4948 = vmatpush2.bf16.msk.msra.mxu0 %vm4947_vm9, %v5440_v30  ;;  %vm4885_vm12 = vmpackc.low %vm1020_vm6, %vm1018_vm5  ;;  %vm1015_vm5 = vcmp.eq.s32.totalorder %v5865_v50, %v5971_v60  ;;  %vm1245_vm9 = vcmp.eq.s32.totalorder %v5862_v49, %v5987_v62 }
  0x83   : > { %4886 = vmatprep.subr.msk.bf16.mxu1 %vm4885_vm12, %v5440_v30  ;;  %vm4887_vm15 = vmpackc.low %vm1019_vm8, %vm1017_vm1  ;;  %vm1248_vm1 = vcmp.eq.s32.totalorder %v5865_v50, %v5979_v61  ;;  %vm1010_vm12 = vcmp.eq.s32.totalorder %v5888_v51, %v5963_v59 }
  0x84   : > { %4888 = vmatpush2.bf16.msk.msra.mxu1 %vm4887_vm15, %v5440_v30  ;;  %vm4949_vm3 = vmpackc.low %vm1252_vm11, %vm1250_vm10  ;;  %vm1247_vm10 = vcmp.eq.s32.totalorder %v5865_v50, %v5987_v62  ;;  %vm1009_vm15 = vcmp.eq.s32.totalorder %v5888_v51, %v5971_v60 }
  0x85   : > { %4950 = vmatprep.subr.msk.bf16.mxu0 %vm4949_vm3, %v5440_v30  ;;  %vm4951_vm6 = vmpackc.low %vm1251_vm14, %vm1249_vm13  ;;  %vm1012_vm13 = vcmp.eq.s32.totalorder %v5891_v52, %v5963_v59  ;;  %vm1242_vm3 = vcmp.eq.s32.totalorder %v5888_v51, %v5979_v61 }
  0x86   : > { %4952 = vmatpush2.bf16.msk.msra.mxu0 %vm4951_vm6, %v5440_v30  ;;  %vm4889_vm8 = vmpackc.low %vm1016_vm2, %vm1014_vm0  ;;  %vm1011_vm0 = vcmp.eq.s32.totalorder %v5891_v52, %v5971_v60  ;;  %vm1241_vm6 = vcmp.eq.s32.totalorder %v5888_v51, %v5987_v62 }
  0x87   : > { %4890 = vmatprep.subr.msk.bf16.mxu1 %vm4889_vm8, %v5440_v30  ;;  %vm4891_vm11 = vmpackc.low %vm1015_vm5, %vm1013_vm4  ;;  %vm1244_vm4 = vcmp.eq.s32.totalorder %v5891_v52, %v5979_v61  ;;  %vm1006_vm8 = vcmp.eq.s32.totalorder %v5914_v53, %v5963_v59 }
  0x88   : > { %4892 = vmatpush2.bf16.msk.msra.mxu1 %vm4891_vm11, %v5440_v30  ;;  %vm4953_vm14 = vmpackc.low %vm1248_vm1, %vm1246_vm7  ;;  %vm1243_vm7 = vcmp.eq.s32.totalorder %v5891_v52, %v5987_v62  ;;  %vm1005_vm11 = vcmp.eq.s32.totalorder %v5914_v53, %v5971_v60 }
  0x89   : > { %4954 = vmatprep.subr.msk.bf16.mxu0 %vm4953_vm14, %v5440_v30  ;;  %vm4955_vm2 = vmpackc.low %vm1247_vm10, %vm1245_vm9  ;;  %vm1008_vm9 = vcmp.eq.s32.totalorder %v5917_v54, %v5963_v59  ;;  %vm1238_vm14 = vcmp.eq.s32.totalorder %v5914_v53, %v5979_v61  ;;  %v385_v29 = vpop.permute.xlu0 %384 }
  0x8a   : > { %4956 = vmatpush2.bf16.msk.msra.mxu0 %vm4955_vm2, %v5440_v30  ;;  %vm4893_vm5 = vmpackc.low %vm1012_vm13, %vm1010_vm12  ;;  %vm1007_vm12 = vcmp.eq.s32.totalorder %v5917_v54, %v5971_v60  ;;  %vm1237_vm2 = vcmp.eq.s32.totalorder %v5914_v53, %v5987_v62 }
  0x8b   : > { %4894 = vmatprep.subr.msk.bf16.mxu1 %vm4893_vm5, %v5440_v30  ;;  %vm4895_vm1 = vmpackc.low %vm1011_vm0, %vm1009_vm15  ;;  %vm1240_vm15 = vcmp.eq.s32.totalorder %v5917_v54, %v5979_v61  ;;  %vm1002_vm5 = vcmp.eq.s32.totalorder %v5941_v56, %v5963_v59 }
  0x8c   : > { %4896 = vmatpush2.bf16.msk.msra.mxu1 %vm4895_vm1, %v5440_v30  ;;  %vm4957_vm10 = vmpackc.low %vm1244_vm4, %vm1242_vm3  ;;  %vm1239_vm3 = vcmp.eq.s32.totalorder %v5917_v54, %v5987_v62  ;;  %vm1001_vm1 = vcmp.eq.s32.totalorder %v5941_v56, %v5971_v60 }
  0x8d   : > { %4958 = vmatprep.subr.msk.bf16.mxu0 %vm4957_vm10, %v5440_v30  ;;  %vm4959_vm13 = vmpackc.low %vm1243_vm7, %vm1241_vm6  ;;  %vm1004_vm6 = vcmp.eq.s32.totalorder %v5944_v57, %v5963_v59  ;;  %vm1234_vm10 = vcmp.eq.s32.totalorder %v5941_v56, %v5979_v61 }
  0x8e   : > { %4960 = vmatpush2.bf16.msk.msra.mxu0 %vm4959_vm13, %v5440_v30  ;;  %vm4897_vm0 = vmpackc.low %vm1008_vm9, %vm1006_vm8  ;;  %vm1003_vm8 = vcmp.eq.s32.totalorder %v5944_v57, %v5971_v60  ;;  %vm1233_vm13 = vcmp.eq.s32.totalorder %v5941_v56, %v5987_v62 }
  0x8f   : > { %4898 = vmatprep.subr.msk.bf16.mxu1 %vm4897_vm0, %v5440_v30  ;;  %vm4899_vm4 = vmpackc.low %vm1007_vm12, %vm1005_vm11  ;;  %vm1236_vm11 = vcmp.eq.s32.totalorder %v5944_v57, %v5979_v61  ;;  %vm1462_vm0 = vcmp.eq.s32.totalorder %v5543_v12, %v6307_v5 }
  0x90   : > { %4900 = vmatpush2.bf16.msk.msra.mxu1 %vm4899_vm4, %v5440_v30  ;;  %vm4961_vm7 = vmpackc.low %vm1240_vm15, %vm1238_vm14  ;;  %vm1235_vm14 = vcmp.eq.s32.totalorder %v5944_v57, %v5987_v62  ;;  %vm1461_vm4 = vcmp.eq.s32.totalorder %v5543_v12, %v6318_v7 }
  0x91   : > { %4962 = vmatprep.subr.msk.bf16.mxu0 %vm4961_vm7, %v5440_v30  ;;  %vm4963_vm9 = vmpackc.low %vm1239_vm3, %vm1237_vm2  ;;  %vm1464_vm2 = vcmp.eq.s32.totalorder %v5554_v18, %v6307_v5  ;;  %vm1694_vm7 = vcmp.eq.s32.totalorder %v5543_v12, %v6329_v8 }
  0x92   : > { %4964 = vmatpush2.bf16.msk.msra.mxu0 %vm4963_vm9, %v5440_v30  ;;  %vm4901_vm12 = vmpackc.low %vm1004_vm6, %vm1002_vm5  ;;  %vm1463_vm5 = vcmp.eq.s32.totalorder %v5554_v18, %v6318_v7  ;;  %vm1693_vm9 = vcmp.eq.s32.totalorder %v5543_v12, %v6343_v9 }
  0x93   : > { %4902 = vmatprep.subr.msk.bf16.mxu1 %vm4901_vm12, %v5440_v30  ;;  %vm4903_vm15 = vmpackc.low %vm1003_vm8, %vm1001_vm1  ;;  %vm1696_vm1 = vcmp.eq.s32.totalorder %v5554_v18, %v6329_v8  ;;  %vm1458_vm12 = vcmp.eq.s32.totalorder %v5564_v21, %v6307_v5 }
  0x94   : > { %4904 = vmatpush2.bf16.msk.msra.mxu1 %vm4903_vm15, %v5440_v30  ;;  %vm4965_vm3 = vmpackc.low %vm1236_vm11, %vm1234_vm10  ;;  %vm1695_vm10 = vcmp.eq.s32.totalorder %v5554_v18, %v6343_v9  ;;  %vm1457_vm15 = vcmp.eq.s32.totalorder %v5564_v21, %v6318_v7 }
  0x95   : > { %4966 = vmatprep.subr.msk.bf16.mxu0 %vm4965_vm3, %v5440_v30  ;;  %vm4967_vm6 = vmpackc.low %vm1235_vm14, %vm1233_vm13  ;;  %vm1460_vm13 = vcmp.eq.s32.totalorder %v5567_v22, %v6307_v5  ;;  %vm1690_vm3 = vcmp.eq.s32.totalorder %v5564_v21, %v6329_v8 }
  0x96   : > { %4968 = vmatpush2.bf16.msk.msra.mxu0 %vm4967_vm6, %v5440_v30  ;;  %vm4969_vm8 = vmpackc.low %vm1464_vm2, %vm1462_vm0  ;;  %vm1459_vm0 = vcmp.eq.s32.totalorder %v5567_v22, %v6318_v7  ;;  %vm1689_vm6 = vcmp.eq.s32.totalorder %v5564_v21, %v6343_v9 }
  0x97   : > { %2946 = vmatmul.mubr.bf16.vlgmr.msra.gmra.mxu1 %v5995_v63  ;;  %4970 = vmatprep.subr.msk.bf16.mxu1 %vm4969_vm8, %v5440_v30  ;;  %vm4971_vm11 = vmpackc.low %vm1463_vm5, %vm1461_vm4  ;;  %vm1692_vm4 = vcmp.eq.s32.totalorder %v5567_v22, %v6329_v8  ;;  %vm1454_vm8 = vcmp.eq.s32.totalorder %v5570_v23, %v6307_v5 }
  0x98   : > { %4972 = vmatpush1.bf16.msk.msra.mxu1 %vm4971_vm11, %v5440_v30  ;;  %vm5033_vm14 = vmpackc.low %vm1696_vm1, %vm1694_vm7  ;;  %3031 = vmatprep.mubr.bf16.mxu1 %v6385_v10  ;;  %vm1691_vm7 = vcmp.eq.s32.totalorder %v5567_v22, %v6343_v9  ;;  %vm1453_vm11 = vcmp.eq.s32.totalorder %v5570_v23, %v6318_v7 }
  0x99   : > { %2989 = vmatmul.mubr.bf16.vlgmr.msra.gmra.mxu0 %v5995_v63  ;;  %5034 = vmatprep.subr.msk.bf16.mxu0 %vm5033_vm14, %v5440_v30  ;;  %vm5035_vm2 = vmpackc.low %vm1695_vm10, %vm1693_vm9  ;;  %vm1456_vm9 = vcmp.eq.s32.totalorder %v5606_v31, %v6307_v5  ;;  %vm1686_vm14 = vcmp.eq.s32.totalorder %v5570_v23, %v6329_v8 }
  0x9a   : > { %5036 = vmatpush1.bf16.msk.msra.mxu0 %vm5035_vm2, %v5440_v30  ;;  %vm4973_vm5 = vmpackc.low %vm1460_vm13, %vm1458_vm12  ;;  %3074 = vmatprep.mubr.bf16.mxu0 %v6385_v10  ;;  %vm1455_vm12 = vcmp.eq.s32.totalorder %v5606_v31, %v6318_v7  ;;  %vm1685_vm2 = vcmp.eq.s32.totalorder %v5570_v23, %v6343_v9 }
  0x9b   : > { %4974 = vmatprep.subr.msk.bf16.mxu1 %vm4973_vm5, %v5440_v30  ;;  %vm4975_vm1 = vmpackc.low %vm1459_vm0, %vm1457_vm15  ;;  %vm1688_vm15 = vcmp.eq.s32.totalorder %v5606_v31, %v6329_v8  ;;  %vm1450_vm5 = vcmp.eq.s32.totalorder %v5630_v32, %v6307_v5 }
  0x9c   : > { %4976 = vmatpush1.bf16.msk.msra.mxu1 %vm4975_vm1, %v5440_v30  ;;  %vm5037_vm10 = vmpackc.low %vm1692_vm4, %vm1690_vm3  ;;  %vm1687_vm3 = vcmp.eq.s32.totalorder %v5606_v31, %v6343_v9  ;;  %vm1449_vm1 = vcmp.eq.s32.totalorder %v5630_v32, %v6318_v7 }
  0x9d   : > { %5038 = vmatprep.subr.msk.bf16.mxu0 %vm5037_vm10, %v5440_v30  ;;  %vm5039_vm13 = vmpackc.low %vm1691_vm7, %vm1689_vm6  ;;  %vm1452_vm6 = vcmp.eq.s32.totalorder %v5633_v33, %v6307_v5  ;;  %vm1682_vm10 = vcmp.eq.s32.totalorder %v5630_v32, %v6329_v8 }
  0x9e   : > { %5040 = vmatpush1.bf16.msk.msra.mxu0 %vm5039_vm13, %v5440_v30  ;;  %vm4977_vm0 = vmpackc.low %vm1456_vm9, %vm1454_vm8  ;;  %vm1451_vm8 = vcmp.eq.s32.totalorder %v5633_v33, %v6318_v7  ;;  %vm1681_vm13 = vcmp.eq.s32.totalorder %v5630_v32, %v6343_v9 }
  0x9f   : > { %4978 = vmatprep.subr.msk.bf16.mxu1 %vm4977_vm0, %v5440_v30  ;;  %vm4979_vm4 = vmpackc.low %vm1455_vm12, %vm1453_vm11  ;;  %vm1684_vm11 = vcmp.eq.s32.totalorder %v5633_v33, %v6329_v8  ;;  %vm1446_vm0 = vcmp.eq.s32.totalorder %v5657_v34, %v6307_v5 }
  0xa0   : > { %4980 = vmatpush1.bf16.msk.msra.mxu1 %vm4979_vm4, %v5440_v30  ;;  %vm5041_vm7 = vmpackc.low %vm1688_vm15, %vm1686_vm14  ;;  %vm1683_vm14 = vcmp.eq.s32.totalorder %v5633_v33, %v6343_v9  ;;  %vm1445_vm4 = vcmp.eq.s32.totalorder %v5657_v34, %v6318_v7 }
  0xa1   : > { %5042 = vmatprep.subr.msk.bf16.mxu0 %vm5041_vm7, %v5440_v30  ;;  %vm5043_vm9 = vmpackc.low %vm1687_vm3, %vm1685_vm2  ;;  %vm1448_vm2 = vcmp.eq.s32.totalorder %v5660_v35, %v6307_v5  ;;  %vm1678_vm7 = vcmp.eq.s32.totalorder %v5657_v34, %v6329_v8 }
  0xa2   : > { %5044 = vmatpush1.bf16.msk.msra.mxu0 %vm5043_vm9, %v5440_v30  ;;  %vm4981_vm12 = vmpackc.low %vm1452_vm6, %vm1450_vm5  ;;  %vm1447_vm5 = vcmp.eq.s32.totalorder %v5660_v35, %v6318_v7  ;;  %vm1677_vm9 = vcmp.eq.s32.totalorder %v5657_v34, %v6343_v9 }
  0xa3   : > { %4982 = vmatprep.subr.msk.bf16.mxu1 %vm4981_vm12, %v5440_v30  ;;  %vm4983_vm15 = vmpackc.low %vm1451_vm8, %vm1449_vm1  ;;  %vm1680_vm1 = vcmp.eq.s32.totalorder %v5660_v35, %v6329_v8  ;;  %vm1442_vm12 = vcmp.eq.s32.totalorder %v5683_v36, %v6307_v5 }
  0xa4   : > { %4984 = vmatpush1.bf16.msk.msra.mxu1 %vm4983_vm15, %v5440_v30  ;;  %vm5045_vm3 = vmpackc.low %vm1684_vm11, %vm1682_vm10  ;;  %vm1679_vm10 = vcmp.eq.s32.totalorder %v5660_v35, %v6343_v9  ;;  %vm1441_vm15 = vcmp.eq.s32.totalorder %v5683_v36, %v6318_v7 }
  0xa5   : > { %5046 = vmatprep.subr.msk.bf16.mxu0 %vm5045_vm3, %v5440_v30  ;;  %vm5047_vm6 = vmpackc.low %vm1683_vm14, %vm1681_vm13  ;;  %vm1444_vm13 = vcmp.eq.s32.totalorder %v5686_v37, %v6307_v5  ;;  %vm1674_vm3 = vcmp.eq.s32.totalorder %v5683_v36, %v6329_v8 }
  0xa6   : > { %5048 = vmatpush1.bf16.msk.msra.mxu0 %vm5047_vm6, %v5440_v30  ;;  %vm4985_vm8 = vmpackc.low %vm1448_vm2, %vm1446_vm0  ;;  %vm1443_vm0 = vcmp.eq.s32.totalorder %v5686_v37, %v6318_v7  ;;  %vm1673_vm6 = vcmp.eq.s32.totalorder %v5683_v36, %v6343_v9 }
  0xa7   : > { %4986 = vmatprep.subr.msk.bf16.mxu1 %vm4985_vm8, %v5440_v30  ;;  %vm4987_vm11 = vmpackc.low %vm1447_vm5, %vm1445_vm4  ;;  %vm1676_vm4 = vcmp.eq.s32.totalorder %v5686_v37, %v6329_v8  ;;  %vm1438_vm8 = vcmp.eq.s32.totalorder %v5709_v38, %v6307_v5 }
  0xa8   : > { %4988 = vmatpush1.bf16.msk.msra.mxu1 %vm4987_vm11, %v5440_v30  ;;  %vm5049_vm14 = vmpackc.low %vm1680_vm1, %vm1678_vm7  ;;  %vm1675_vm7 = vcmp.eq.s32.totalorder %v5686_v37, %v6343_v9  ;;  %vm1437_vm11 = vcmp.eq.s32.totalorder %v5709_v38, %v6318_v7 }
  0xa9   : > { %5050 = vmatprep.subr.msk.bf16.mxu0 %vm5049_vm14, %v5440_v30  ;;  %vm5051_vm2 = vmpackc.low %vm1679_vm10, %vm1677_vm9  ;;  %vm1440_vm9 = vcmp.eq.s32.totalorder %v5712_v39, %v6307_v5  ;;  %vm1670_vm14 = vcmp.eq.s32.totalorder %v5709_v38, %v6329_v8 }
  0xaa   : > { %5052 = vmatpush1.bf16.msk.msra.mxu0 %vm5051_vm2, %v5440_v30  ;;  %vm4989_vm5 = vmpackc.low %vm1444_vm13, %vm1442_vm12  ;;  %vm1439_vm12 = vcmp.eq.s32.totalorder %v5712_v39, %v6318_v7  ;;  %vm1669_vm2 = vcmp.eq.s32.totalorder %v5709_v38, %v6343_v9 }
  0xab   : > { %4990 = vmatprep.subr.msk.bf16.mxu1 %vm4989_vm5, %v5440_v30  ;;  %vm4991_vm1 = vmpackc.low %vm1443_vm0, %vm1441_vm15  ;;  %vm1672_vm15 = vcmp.eq.s32.totalorder %v5712_v39, %v6329_v8  ;;  %vm1434_vm5 = vcmp.eq.s32.totalorder %v5506_v3, %v6307_v5 }
  0xac   : > { %4992 = vmatpush1.bf16.msk.msra.mxu1 %vm4991_vm1, %v5440_v30  ;;  %vm5053_vm10 = vmpackc.low %vm1676_vm4, %vm1674_vm3  ;;  %vm1671_vm3 = vcmp.eq.s32.totalorder %v5712_v39, %v6343_v9  ;;  %vm1433_vm1 = vcmp.eq.s32.totalorder %v5506_v3, %v6318_v7 }
  0xad   : > { %5054 = vmatprep.subr.msk.bf16.mxu0 %vm5053_vm10, %v5440_v30  ;;  %vm5055_vm13 = vmpackc.low %vm1675_vm7, %vm1673_vm6  ;;  %vm1436_vm6 = vcmp.eq.s32.totalorder %v5735_v40, %v6307_v5  ;;  %vm1666_vm10 = vcmp.eq.s32.totalorder %v5506_v3, %v6329_v8 }
  0xae   : > { %5056 = vmatpush1.bf16.msk.msra.mxu0 %vm5055_vm13, %v5440_v30  ;;  %vm4993_vm0 = vmpackc.low %vm1440_vm9, %vm1438_vm8  ;;  %vm1435_vm8 = vcmp.eq.s32.totalorder %v5735_v40, %v6318_v7  ;;  %vm1665_vm13 = vcmp.eq.s32.totalorder %v5506_v3, %v6343_v9 }
  0xaf   : > { %4994 = vmatprep.subr.msk.bf16.mxu1 %vm4993_vm0, %v5440_v30  ;;  %vm4995_vm4 = vmpackc.low %vm1439_vm12, %vm1437_vm11  ;;  %vm1668_vm11 = vcmp.eq.s32.totalorder %v5735_v40, %v6329_v8  ;;  %vm1494_vm0 = vcmp.eq.s32.totalorder %v5758_v41, %v6307_v5 }
  0xb0   : > { %4996 = vmatpush1.bf16.msk.msra.mxu1 %vm4995_vm4, %v5440_v30  ;;  %vm5057_vm7 = vmpackc.low %vm1672_vm15, %vm1670_vm14  ;;  %vm1667_vm14 = vcmp.eq.s32.totalorder %v5735_v40, %v6343_v9  ;;  %vm1493_vm4 = vcmp.eq.s32.totalorder %v5758_v41, %v6318_v7 }
  0xb1   : > { %5058 = vmatprep.subr.msk.bf16.mxu0 %vm5057_vm7, %v5440_v30  ;;  %vm5059_vm9 = vmpackc.low %vm1671_vm3, %vm1669_vm2  ;;  %vm1496_vm2 = vcmp.eq.s32.totalorder %v5761_v42, %v6307_v5  ;;  %vm1726_vm7 = vcmp.eq.s32.totalorder %v5758_v41, %v6329_v8 }
  0xb2   : > { %5060 = vmatpush1.bf16.msk.msra.mxu0 %vm5059_vm9, %v5440_v30  ;;  %vm4997_vm12 = vmpackc.low %vm1436_vm6, %vm1434_vm5  ;;  %vm1495_vm5 = vcmp.eq.s32.totalorder %v5761_v42, %v6318_v7  ;;  %vm1725_vm9 = vcmp.eq.s32.totalorder %v5758_v41, %v6343_v9 }
  0xb3   : > { %4998 = vmatprep.subr.msk.bf16.mxu1 %vm4997_vm12, %v5440_v30  ;;  %vm4999_vm15 = vmpackc.low %vm1435_vm8, %vm1433_vm1  ;;  %vm1728_vm1 = vcmp.eq.s32.totalorder %v5761_v42, %v6329_v8  ;;  %vm1490_vm12 = vcmp.eq.s32.totalorder %v5784_v43, %v6307_v5 }
  0xb4   : > { %5000 = vmatpush1.bf16.msk.msra.mxu1 %vm4999_vm15, %v5440_v30  ;;  %vm5061_vm3 = vmpackc.low %vm1668_vm11, %vm1666_vm10  ;;  %vm1727_vm10 = vcmp.eq.s32.totalorder %v5761_v42, %v6343_v9  ;;  %vm1489_vm15 = vcmp.eq.s32.totalorder %v5784_v43, %v6318_v7 }
  0xb5   : > { %5062 = vmatprep.subr.msk.bf16.mxu0 %vm5061_vm3, %v5440_v30  ;;  %vm5063_vm6 = vmpackc.low %vm1667_vm14, %vm1665_vm13  ;;  %vm1492_vm13 = vcmp.eq.s32.totalorder %v5787_v44, %v6307_v5  ;;  %vm1722_vm3 = vcmp.eq.s32.totalorder %v5784_v43, %v6329_v8 }
  0xb6   : > { %5064 = vmatpush1.bf16.msk.msra.mxu0 %vm5063_vm6, %v5440_v30  ;;  %vm5001_vm8 = vmpackc.low %vm1496_vm2, %vm1494_vm0  ;;  %vm1491_vm0 = vcmp.eq.s32.totalorder %v5787_v44, %v6318_v7  ;;  %vm1721_vm6 = vcmp.eq.s32.totalorder %v5784_v43, %v6343_v9 }
  0xb7   : > { %5002 = vmatprep.subr.msk.bf16.mxu1 %vm5001_vm8, %v5440_v30  ;;  %vm5003_vm11 = vmpackc.low %vm1495_vm5, %vm1493_vm4  ;;  %vm1724_vm4 = vcmp.eq.s32.totalorder %v5787_v44, %v6329_v8  ;;  %vm1486_vm8 = vcmp.eq.s32.totalorder %v5810_v45, %v6307_v5 }
  0xb8   : > { %5004 = vmatpush2.bf16.msk.msra.mxu1 %vm5003_vm11, %v5440_v30  ;;  %vm5065_vm14 = vmpackc.low %vm1728_vm1, %vm1726_vm7  ;;  %vm1723_vm7 = vcmp.eq.s32.totalorder %v5787_v44, %v6343_v9  ;;  %vm1485_vm11 = vcmp.eq.s32.totalorder %v5810_v45, %v6318_v7 }
  0xb9   : > { %5066 = vmatprep.subr.msk.bf16.mxu0 %vm5065_vm14, %v5440_v30  ;;  %vm5067_vm2 = vmpackc.low %vm1727_vm10, %vm1725_vm9  ;;  %vm1488_vm9 = vcmp.eq.s32.totalorder %v5813_v46, %v6307_v5  ;;  %vm1718_vm14 = vcmp.eq.s32.totalorder %v5810_v45, %v6329_v8 }
  0xba   : > { %5068 = vmatpush2.bf16.msk.msra.mxu0 %vm5067_vm2, %v5440_v30  ;;  %vm5005_vm5 = vmpackc.low %vm1492_vm13, %vm1490_vm12  ;;  %vm1487_vm12 = vcmp.eq.s32.totalorder %v5813_v46, %v6318_v7  ;;  %vm1717_vm2 = vcmp.eq.s32.totalorder %v5810_v45, %v6343_v9 }
  0xbb   : > { %5006 = vmatprep.subr.msk.bf16.mxu1 %vm5005_vm5, %v5440_v30  ;;  %vm5007_vm1 = vmpackc.low %vm1491_vm0, %vm1489_vm15  ;;  %vm1720_vm15 = vcmp.eq.s32.totalorder %v5813_v46, %v6329_v8  ;;  %vm1482_vm5 = vcmp.eq.s32.totalorder %v5836_v47, %v6307_v5 }
  0xbc   : > { %5008 = vmatpush2.bf16.msk.msra.mxu1 %vm5007_vm1, %v5440_v30  ;;  %vm5069_vm10 = vmpackc.low %vm1724_vm4, %vm1722_vm3  ;;  %vm1719_vm3 = vcmp.eq.s32.totalorder %v5813_v46, %v6343_v9  ;;  %vm1481_vm1 = vcmp.eq.s32.totalorder %v5836_v47, %v6318_v7 }
  0xbd   : > { %5070 = vmatprep.subr.msk.bf16.mxu0 %vm5069_vm10, %v5440_v30  ;;  %vm5071_vm13 = vmpackc.low %vm1723_vm7, %vm1721_vm6  ;;  %vm1484_vm6 = vcmp.eq.s32.totalorder %v5839_v48, %v6307_v5  ;;  %vm1714_vm10 = vcmp.eq.s32.totalorder %v5836_v47, %v6329_v8 }
  0xbe   : > { %5072 = vmatpush2.bf16.msk.msra.mxu0 %vm5071_vm13, %v5440_v30  ;;  %vm5009_vm0 = vmpackc.low %vm1488_vm9, %vm1486_vm8  ;;  %vm1483_vm8 = vcmp.eq.s32.totalorder %v5839_v48, %v6318_v7  ;;  %vm1713_vm13 = vcmp.eq.s32.totalorder %v5836_v47, %v6343_v9 }
  0xbf   : > { %5010 = vmatprep.subr.msk.bf16.mxu1 %vm5009_vm0, %v5440_v30  ;;  %vm5011_vm4 = vmpackc.low %vm1487_vm12, %vm1485_vm11  ;;  %vm1716_vm11 = vcmp.eq.s32.totalorder %v5839_v48, %v6329_v8  ;;  %vm1478_vm0 = vcmp.eq.s32.totalorder %v5862_v49, %v6307_v5 }
  0xc0   : > { %5012 = vmatpush2.bf16.msk.msra.mxu1 %vm5011_vm4, %v5440_v30  ;;  %vm5073_vm7 = vmpackc.low %vm1720_vm15, %vm1718_vm14  ;;  %vm1715_vm14 = vcmp.eq.s32.totalorder %v5839_v48, %v6343_v9  ;;  %vm1477_vm4 = vcmp.eq.s32.totalorder %v5862_v49, %v6318_v7 }
  0xc1   : > { %5074 = vmatprep.subr.msk.bf16.mxu0 %vm5073_vm7, %v5440_v30  ;;  %vm5075_vm9 = vmpackc.low %vm1719_vm3, %vm1717_vm2  ;;  %vm1480_vm2 = vcmp.eq.s32.totalorder %v5865_v50, %v6307_v5  ;;  %vm1710_vm7 = vcmp.eq.s32.totalorder %v5862_v49, %v6329_v8 }
  0xc2   : > { %5076 = vmatpush2.bf16.msk.msra.mxu0 %vm5075_vm9, %v5440_v30  ;;  %vm5013_vm12 = vmpackc.low %vm1484_vm6, %vm1482_vm5  ;;  %vm1479_vm5 = vcmp.eq.s32.totalorder %v5865_v50, %v6318_v7  ;;  %vm1709_vm9 = vcmp.eq.s32.totalorder %v5862_v49, %v6343_v9 }
  0xc3   : > { %5014 = vmatprep.subr.msk.bf16.mxu1 %vm5013_vm12, %v5440_v30  ;;  %vm5015_vm15 = vmpackc.low %vm1483_vm8, %vm1481_vm1  ;;  %vm1712_vm1 = vcmp.eq.s32.totalorder %v5865_v50, %v6329_v8  ;;  %vm1474_vm12 = vcmp.eq.s32.totalorder %v5888_v51, %v6307_v5 }
  0xc4   : > { %5016 = vmatpush2.bf16.msk.msra.mxu1 %vm5015_vm15, %v5440_v30  ;;  %vm5077_vm3 = vmpackc.low %vm1716_vm11, %vm1714_vm10  ;;  %vm1711_vm10 = vcmp.eq.s32.totalorder %v5865_v50, %v6343_v9  ;;  %vm1473_vm15 = vcmp.eq.s32.totalorder %v5888_v51, %v6318_v7 }
  0xc5   : > { %5078 = vmatprep.subr.msk.bf16.mxu0 %vm5077_vm3, %v5440_v30  ;;  %vm5079_vm6 = vmpackc.low %vm1715_vm14, %vm1713_vm13  ;;  %vm1476_vm13 = vcmp.eq.s32.totalorder %v5891_v52, %v6307_v5  ;;  %vm1706_vm3 = vcmp.eq.s32.totalorder %v5888_v51, %v6329_v8 }
  0xc6   : > { %5080 = vmatpush2.bf16.msk.msra.mxu0 %vm5079_vm6, %v5440_v30  ;;  %vm5017_vm8 = vmpackc.low %vm1480_vm2, %vm1478_vm0  ;;  %vm1475_vm0 = vcmp.eq.s32.totalorder %v5891_v52, %v6318_v7  ;;  %vm1705_vm6 = vcmp.eq.s32.totalorder %v5888_v51, %v6343_v9 }
  0xc7   : > { %5018 = vmatprep.subr.msk.bf16.mxu1 %vm5017_vm8, %v5440_v30  ;;  %vm5019_vm11 = vmpackc.low %vm1479_vm5, %vm1477_vm4  ;;  %vm1708_vm4 = vcmp.eq.s32.totalorder %v5891_v52, %v6329_v8  ;;  %vm1470_vm8 = vcmp.eq.s32.totalorder %v5914_v53, %v6307_v5 }
  0xc8   : > { %5020 = vmatpush2.bf16.msk.msra.mxu1 %vm5019_vm11, %v5440_v30  ;;  %vm5081_vm14 = vmpackc.low %vm1712_vm1, %vm1710_vm7  ;;  %vm1707_vm7 = vcmp.eq.s32.totalorder %v5891_v52, %v6343_v9  ;;  %vm1469_vm11 = vcmp.eq.s32.totalorder %v5914_v53, %v6318_v7 }
  0xc9   : > { %5082 = vmatprep.subr.msk.bf16.mxu0 %vm5081_vm14, %v5440_v30  ;;  %vm5083_vm2 = vmpackc.low %vm1711_vm10, %vm1709_vm9  ;;  %vm1472_vm9 = vcmp.eq.s32.totalorder %v5917_v54, %v6307_v5  ;;  %vm1702_vm14 = vcmp.eq.s32.totalorder %v5914_v53, %v6329_v8 }
  0xca   : > { %5084 = vmatpush2.bf16.msk.msra.mxu0 %vm5083_vm2, %v5440_v30  ;;  %vm5021_vm5 = vmpackc.low %vm1476_vm13, %vm1474_vm12  ;;  %vm1471_vm12 = vcmp.eq.s32.totalorder %v5917_v54, %v6318_v7  ;;  %vm1701_vm2 = vcmp.eq.s32.totalorder %v5914_v53, %v6343_v9 }
  0xcb   : > { %5022 = vmatprep.subr.msk.bf16.mxu1 %vm5021_vm5, %v5440_v30  ;;  %vm5023_vm1 = vmpackc.low %vm1475_vm0, %vm1473_vm15  ;;  %vm1704_vm15 = vcmp.eq.s32.totalorder %v5917_v54, %v6329_v8  ;;  %vm1466_vm5 = vcmp.eq.s32.totalorder %v5941_v56, %v6307_v5 }
  0xcc   : > { %5024 = vmatpush2.bf16.msk.msra.mxu1 %vm5023_vm1, %v5440_v30  ;;  %vm5085_vm10 = vmpackc.low %vm1708_vm4, %vm1706_vm3  ;;  %vm1703_vm3 = vcmp.eq.s32.totalorder %v5917_v54, %v6343_v9  ;;  %vm1465_vm1 = vcmp.eq.s32.totalorder %v5941_v56, %v6318_v7 }
  0xcd   : > { %5086 = vmatprep.subr.msk.bf16.mxu0 %vm5085_vm10, %v5440_v30  ;;  %vm5087_vm13 = vmpackc.low %vm1707_vm7, %vm1705_vm6  ;;  %vm1468_vm6 = vcmp.eq.s32.totalorder %v5944_v57, %v6307_v5  ;;  %vm1698_vm10 = vcmp.eq.s32.totalorder %v5941_v56, %v6329_v8 }
  0xce   : > { %5088 = vmatpush2.bf16.msk.msra.mxu0 %vm5087_vm13, %v5440_v30  ;;  %vm5025_vm0 = vmpackc.low %vm1472_vm9, %vm1470_vm8  ;;  %vm1467_vm8 = vcmp.eq.s32.totalorder %v5944_v57, %v6318_v7  ;;  %vm1697_vm13 = vcmp.eq.s32.totalorder %v5941_v56, %v6343_v9 }
  0xcf   : > { %5026 = vmatprep.subr.msk.bf16.mxu1 %vm5025_vm0, %v5440_v30  ;;  %vm5027_vm4 = vmpackc.low %vm1471_vm12, %vm1469_vm11  ;;  %vm1700_vm11 = vcmp.eq.s32.totalorder %v5944_v57, %v6329_v8  ;;  %vm1926_vm0 = vcmp.eq.s32.totalorder %v5543_v12, %v6669_v14 }
  0xd0   : > { %5028 = vmatpush2.bf16.msk.msra.mxu1 %vm5027_vm4, %v5440_v30  ;;  %vm5089_vm7 = vmpackc.low %vm1704_vm15, %vm1702_vm14  ;;  %vm1699_vm14 = vcmp.eq.s32.totalorder %v5944_v57, %v6343_v9  ;;  %vm1925_vm4 = vcmp.eq.s32.totalorder %v5543_v12, %v6677_v15 }
  0xd1   : > { %5090 = vmatprep.subr.msk.bf16.mxu0 %vm5089_vm7, %v5440_v30  ;;  %vm5091_vm9 = vmpackc.low %vm1703_vm3, %vm1701_vm2  ;;  %vm1928_vm2 = vcmp.eq.s32.totalorder %v5554_v18, %v6669_v14  ;;  %vm2158_vm7 = vcmp.eq.s32.totalorder %v5543_v12, %v6685_v16 }
  0xd2   : > { %5092 = vmatpush2.bf16.msk.msra.mxu0 %vm5091_vm9, %v5440_v30  ;;  %vm5029_vm12 = vmpackc.low %vm1468_vm6, %vm1466_vm5  ;;  %vm1927_vm5 = vcmp.eq.s32.totalorder %v5554_v18, %v6677_v15  ;;  %vm2157_vm9 = vcmp.eq.s32.totalorder %v5543_v12, %v6693_v17 }
  0xd3   : > { %5030 = vmatprep.subr.msk.bf16.mxu1 %vm5029_vm12, %v5440_v30  ;;  %vm5031_vm15 = vmpackc.low %vm1467_vm8, %vm1465_vm1  ;;  %vm2160_vm1 = vcmp.eq.s32.totalorder %v5554_v18, %v6685_v16  ;;  %vm1922_vm12 = vcmp.eq.s32.totalorder %v5564_v21, %v6669_v14 }
  0xd4   : > { %5032 = vmatpush2.bf16.msk.msra.mxu1 %vm5031_vm15, %v5440_v30  ;;  %vm5093_vm3 = vmpackc.low %vm1700_vm11, %vm1698_vm10  ;;  %vm2159_vm10 = vcmp.eq.s32.totalorder %v5554_v18, %v6693_v17  ;;  %vm1921_vm15 = vcmp.eq.s32.totalorder %v5564_v21, %v6677_v15 }
  0xd5   : > { %5094 = vmatprep.subr.msk.bf16.mxu0 %vm5093_vm3, %v5440_v30  ;;  %vm5095_vm6 = vmpackc.low %vm1699_vm14, %vm1697_vm13  ;;  %vm1924_vm13 = vcmp.eq.s32.totalorder %v5567_v22, %v6669_v14  ;;  %vm2154_vm3 = vcmp.eq.s32.totalorder %v5564_v21, %v6685_v16 }
  0xd6   : > { %5096 = vmatpush2.bf16.msk.msra.mxu0 %vm5095_vm6, %v5440_v30  ;;  %vm5097_vm8 = vmpackc.low %vm1928_vm2, %vm1926_vm0  ;;  %vm1923_vm0 = vcmp.eq.s32.totalorder %v5567_v22, %v6677_v15  ;;  %vm2153_vm6 = vcmp.eq.s32.totalorder %v5564_v21, %v6693_v17 }
  0xd7   : > { %3032 = vmatmul.mubr.bf16.vlgmr.msra.gmra.mxu1 %v6721_v19  ;;  %5098 = vmatprep.subr.msk.bf16.mxu1 %vm5097_vm8, %v5440_v30  ;;  %vm5099_vm11 = vmpackc.low %vm1927_vm5, %vm1925_vm4  ;;  %vm2156_vm4 = vcmp.eq.s32.totalorder %v5567_v22, %v6685_v16  ;;  %vm1918_vm8 = vcmp.eq.s32.totalorder %v5570_v23, %v6669_v14 }
  0xd8   : > { %5100 = vmatpush1.bf16.msk.msra.mxu1 %vm5099_vm11, %v5440_v30  ;;  %vm5161_vm14 = vmpackc.low %vm2160_vm1, %vm2158_vm7  ;;  %3117 = vmatprep.mubr.bf16.mxu1 %v6385_v10  ;;  %vm2155_vm7 = vcmp.eq.s32.totalorder %v5567_v22, %v6693_v17  ;;  %vm1917_vm11 = vcmp.eq.s32.totalorder %v5570_v23, %v6677_v15 }
  0xd9   : > { %3075 = vmatmul.mubr.bf16.vlgmr.msra.gmra.mxu0 %v6721_v19  ;;  %5162 = vmatprep.subr.msk.bf16.mxu0 %vm5161_vm14, %v5440_v30  ;;  %vm5163_vm2 = vmpackc.low %vm2159_vm10, %vm2157_vm9  ;;  %vm1920_vm9 = vcmp.eq.s32.totalorder %v5606_v31, %v6669_v14  ;;  %vm2150_vm14 = vcmp.eq.s32.totalorder %v5570_v23, %v6685_v16 }
  0xda   : > { %5164 = vmatpush1.bf16.msk.msra.mxu0 %vm5163_vm2, %v5440_v30  ;;  %vm5101_vm5 = vmpackc.low %vm1924_vm13, %vm1922_vm12  ;;  %3160 = vmatprep.mubr.bf16.mxu0 %v6385_v10  ;;  %vm1919_vm12 = vcmp.eq.s32.totalorder %v5606_v31, %v6677_v15  ;;  %vm2149_vm2 = vcmp.eq.s32.totalorder %v5570_v23, %v6693_v17  ;;  %v7502_v10 = vld [vmem:[%s7631_s5] sm:$0xff]  }
  0xdb   : > { %5102 = vmatprep.subr.msk.bf16.mxu1 %vm5101_vm5, %v5440_v30  ;;  %vm5103_vm1 = vmpackc.low %vm1923_vm0, %vm1921_vm15  ;;  %vm2152_vm15 = vcmp.eq.s32.totalorder %v5606_v31, %v6685_v16  ;;  %vm1914_vm5 = vcmp.eq.s32.totalorder %v5630_v32, %v6669_v14 }
  0xdc   : > { %5104 = vmatpush1.bf16.msk.msra.mxu1 %vm5103_vm1, %v5440_v30  ;;  %vm5165_vm10 = vmpackc.low %vm2156_vm4, %vm2154_vm3  ;;  %vm2151_vm3 = vcmp.eq.s32.totalorder %v5606_v31, %v6693_v17  ;;  %vm1913_vm1 = vcmp.eq.s32.totalorder %v5630_v32, %v6677_v15 }
  0xdd   : > { %5166 = vmatprep.subr.msk.bf16.mxu0 %vm5165_vm10, %v5440_v30  ;;  %vm5167_vm13 = vmpackc.low %vm2155_vm7, %vm2153_vm6  ;;  %vm1916_vm6 = vcmp.eq.s32.totalorder %v5633_v33, %v6669_v14  ;;  %vm2146_vm10 = vcmp.eq.s32.totalorder %v5630_v32, %v6685_v16 }
  0xde   : > { %5168 = vmatpush1.bf16.msk.msra.mxu0 %vm5167_vm13, %v5440_v30  ;;  %vm5105_vm0 = vmpackc.low %vm1920_vm9, %vm1918_vm8  ;;  %vm1915_vm8 = vcmp.eq.s32.totalorder %v5633_v33, %v6677_v15  ;;  %vm2145_vm13 = vcmp.eq.s32.totalorder %v5630_v32, %v6693_v17 }
  0xdf   : > { %5106 = vmatprep.subr.msk.bf16.mxu1 %vm5105_vm0, %v5440_v30  ;;  %vm5107_vm4 = vmpackc.low %vm1919_vm12, %vm1917_vm11  ;;  %vm2148_vm11 = vcmp.eq.s32.totalorder %v5633_v33, %v6685_v16  ;;  %vm1910_vm0 = vcmp.eq.s32.totalorder %v5657_v34, %v6669_v14 }
  0xe0   : > { %5108 = vmatpush1.bf16.msk.msra.mxu1 %vm5107_vm4, %v5440_v30  ;;  %vm5169_vm7 = vmpackc.low %vm2152_vm15, %vm2150_vm14  ;;  %vm2147_vm14 = vcmp.eq.s32.totalorder %v5633_v33, %v6693_v17  ;;  %vm1909_vm4 = vcmp.eq.s32.totalorder %v5657_v34, %v6677_v15 }
  0xe1   : > { %5170 = vmatprep.subr.msk.bf16.mxu0 %vm5169_vm7, %v5440_v30  ;;  %vm5171_vm9 = vmpackc.low %vm2151_vm3, %vm2149_vm2  ;;  %vm1912_vm2 = vcmp.eq.s32.totalorder %v5660_v35, %v6669_v14  ;;  %vm2142_vm7 = vcmp.eq.s32.totalorder %v5657_v34, %v6685_v16 }
  0xe2   : > { %5172 = vmatpush1.bf16.msk.msra.mxu0 %vm5171_vm9, %v5440_v30  ;;  %vm5109_vm12 = vmpackc.low %vm1916_vm6, %vm1914_vm5  ;;  %vm1911_vm5 = vcmp.eq.s32.totalorder %v5660_v35, %v6677_v15  ;;  %vm2141_vm9 = vcmp.eq.s32.totalorder %v5657_v34, %v6693_v17 }
  0xe3   : > { %5110 = vmatprep.subr.msk.bf16.mxu1 %vm5109_vm12, %v5440_v30  ;;  %vm5111_vm15 = vmpackc.low %vm1915_vm8, %vm1913_vm1  ;;  %vm2144_vm1 = vcmp.eq.s32.totalorder %v5660_v35, %v6685_v16  ;;  %vm1906_vm12 = vcmp.eq.s32.totalorder %v5683_v36, %v6669_v14 }
  0xe4   : > { %5112 = vmatpush1.bf16.msk.msra.mxu1 %vm5111_vm15, %v5440_v30  ;;  %vm5173_vm3 = vmpackc.low %vm2148_vm11, %vm2146_vm10  ;;  %vm2143_vm10 = vcmp.eq.s32.totalorder %v5660_v35, %v6693_v17  ;;  %vm1905_vm15 = vcmp.eq.s32.totalorder %v5683_v36, %v6677_v15 }
  0xe5   : > { %5174 = vmatprep.subr.msk.bf16.mxu0 %vm5173_vm3, %v5440_v30  ;;  %vm5175_vm6 = vmpackc.low %vm2147_vm14, %vm2145_vm13  ;;  %vm1908_vm13 = vcmp.eq.s32.totalorder %v5686_v37, %v6669_v14  ;;  %vm2138_vm3 = vcmp.eq.s32.totalorder %v5683_v36, %v6685_v16 }
  0xe6   : > { %5176 = vmatpush1.bf16.msk.msra.mxu0 %vm5175_vm6, %v5440_v30  ;;  %vm5113_vm8 = vmpackc.low %vm1912_vm2, %vm1910_vm0  ;;  %vm1907_vm0 = vcmp.eq.s32.totalorder %v5686_v37, %v6677_v15  ;;  %vm2137_vm6 = vcmp.eq.s32.totalorder %v5683_v36, %v6693_v17 }
  0xe7   : > { %5114 = vmatprep.subr.msk.bf16.mxu1 %vm5113_vm8, %v5440_v30  ;;  %vm5115_vm11 = vmpackc.low %vm1911_vm5, %vm1909_vm4  ;;  %vm2140_vm4 = vcmp.eq.s32.totalorder %v5686_v37, %v6685_v16  ;;  %vm1902_vm8 = vcmp.eq.s32.totalorder %v5709_v38, %v6669_v14 }
  0xe8   : > { %5116 = vmatpush1.bf16.msk.msra.mxu1 %vm5115_vm11, %v5440_v30  ;;  %vm5177_vm14 = vmpackc.low %vm2144_vm1, %vm2142_vm7  ;;  %vm2139_vm7 = vcmp.eq.s32.totalorder %v5686_v37, %v6693_v17  ;;  %vm1901_vm11 = vcmp.eq.s32.totalorder %v5709_v38, %v6677_v15 }
  0xe9   : > { %5178 = vmatprep.subr.msk.bf16.mxu0 %vm5177_vm14, %v5440_v30  ;;  %vm5179_vm2 = vmpackc.low %vm2143_vm10, %vm2141_vm9  ;;  %vm1904_vm9 = vcmp.eq.s32.totalorder %v5712_v39, %v6669_v14  ;;  %vm2134_vm14 = vcmp.eq.s32.totalorder %v5709_v38, %v6685_v16 }
  0xea   : > { %5180 = vmatpush1.bf16.msk.msra.mxu0 %vm5179_vm2, %v5440_v30  ;;  %vm5117_vm5 = vmpackc.low %vm1908_vm13, %vm1906_vm12  ;;  %vm1903_vm12 = vcmp.eq.s32.totalorder %v5712_v39, %v6677_v15  ;;  %vm2133_vm2 = vcmp.eq.s32.totalorder %v5709_v38, %v6693_v17 }
  0xeb   : > { %5118 = vmatprep.subr.msk.bf16.mxu1 %vm5117_vm5, %v5440_v30  ;;  %vm5119_vm1 = vmpackc.low %vm1907_vm0, %vm1905_vm15  ;;  %vm2136_vm15 = vcmp.eq.s32.totalorder %v5712_v39, %v6685_v16  ;;  %vm1898_vm5 = vcmp.eq.s32.totalorder %v5506_v3, %v6669_v14 }
  0xec   : > { %5120 = vmatpush1.bf16.msk.msra.mxu1 %vm5119_vm1, %v5440_v30  ;;  %vm5181_vm10 = vmpackc.low %vm2140_vm4, %vm2138_vm3  ;;  %vm2135_vm3 = vcmp.eq.s32.totalorder %v5712_v39, %v6693_v17  ;;  %vm1897_vm1 = vcmp.eq.s32.totalorder %v5506_v3, %v6677_v15 }
  0xed   : > { %5182 = vmatprep.subr.msk.bf16.mxu0 %vm5181_vm10, %v5440_v30  ;;  %vm5183_vm13 = vmpackc.low %vm2139_vm7, %vm2137_vm6  ;;  %vm1900_vm6 = vcmp.eq.s32.totalorder %v5735_v40, %v6669_v14  ;;  %vm2130_vm10 = vcmp.eq.s32.totalorder %v5506_v3, %v6685_v16 }
  0xee   : > { %5184 = vmatpush1.bf16.msk.msra.mxu0 %vm5183_vm13, %v5440_v30  ;;  %vm5121_vm0 = vmpackc.low %vm1904_vm9, %vm1902_vm8  ;;  %vm1899_vm8 = vcmp.eq.s32.totalorder %v5735_v40, %v6677_v15  ;;  %vm2129_vm13 = vcmp.eq.s32.totalorder %v5506_v3, %v6693_v17 }
  0xef   : > { %5122 = vmatprep.subr.msk.bf16.mxu1 %vm5121_vm0, %v5440_v30  ;;  %vm5123_vm4 = vmpackc.low %vm1903_vm12, %vm1901_vm11  ;;  %vm2132_vm11 = vcmp.eq.s32.totalorder %v5735_v40, %v6685_v16  ;;  %vm1958_vm0 = vcmp.eq.s32.totalorder %v5758_v41, %v6669_v14 }
  0xf0   : > { %5124 = vmatpush1.bf16.msk.msra.mxu1 %vm5123_vm4, %v5440_v30  ;;  %vm5185_vm7 = vmpackc.low %vm2136_vm15, %vm2134_vm14  ;;  %vm2131_vm14 = vcmp.eq.s32.totalorder %v5735_v40, %v6693_v17  ;;  %vm1957_vm4 = vcmp.eq.s32.totalorder %v5758_v41, %v6677_v15 }
  0xf1   : > { %5186 = vmatprep.subr.msk.bf16.mxu0 %vm5185_vm7, %v5440_v30  ;;  %vm5187_vm9 = vmpackc.low %vm2135_vm3, %vm2133_vm2  ;;  %vm1960_vm2 = vcmp.eq.s32.totalorder %v5761_v42, %v6669_v14  ;;  %vm2190_vm7 = vcmp.eq.s32.totalorder %v5758_v41, %v6685_v16 }
  0xf2   : > { %5188 = vmatpush1.bf16.msk.msra.mxu0 %vm5187_vm9, %v5440_v30  ;;  %vm5125_vm12 = vmpackc.low %vm1900_vm6, %vm1898_vm5  ;;  %vm1959_vm5 = vcmp.eq.s32.totalorder %v5761_v42, %v6677_v15  ;;  %vm2189_vm9 = vcmp.eq.s32.totalorder %v5758_v41, %v6693_v17 }
  0xf3   : > { %5126 = vmatprep.subr.msk.bf16.mxu1 %vm5125_vm12, %v5440_v30  ;;  %vm5127_vm15 = vmpackc.low %vm1899_vm8, %vm1897_vm1  ;;  %vm2192_vm1 = vcmp.eq.s32.totalorder %v5761_v42, %v6685_v16  ;;  %vm1954_vm12 = vcmp.eq.s32.totalorder %v5784_v43, %v6669_v14 }
  0xf4   : > { %5128 = vmatpush1.bf16.msk.msra.mxu1 %vm5127_vm15, %v5440_v30  ;;  %vm5189_vm3 = vmpackc.low %vm2132_vm11, %vm2130_vm10  ;;  %vm2191_vm10 = vcmp.eq.s32.totalorder %v5761_v42, %v6693_v17  ;;  %vm1953_vm15 = vcmp.eq.s32.totalorder %v5784_v43, %v6677_v15 }
  0xf5   : > { %5190 = vmatprep.subr.msk.bf16.mxu0 %vm5189_vm3, %v5440_v30  ;;  %vm5191_vm6 = vmpackc.low %vm2131_vm14, %vm2129_vm13  ;;  %vm1956_vm13 = vcmp.eq.s32.totalorder %v5787_v44, %v6669_v14  ;;  %vm2186_vm3 = vcmp.eq.s32.totalorder %v5784_v43, %v6685_v16 }
  0xf6   : > { %5192 = vmatpush1.bf16.msk.msra.mxu0 %vm5191_vm6, %v5440_v30  ;;  %vm5129_vm8 = vmpackc.low %vm1960_vm2, %vm1958_vm0  ;;  %vm1955_vm0 = vcmp.eq.s32.totalorder %v5787_v44, %v6677_v15  ;;  %vm2185_vm6 = vcmp.eq.s32.totalorder %v5784_v43, %v6693_v17 }
  0xf7   : > { %5130 = vmatprep.subr.msk.bf16.mxu1 %vm5129_vm8, %v5440_v30  ;;  %vm5131_vm11 = vmpackc.low %vm1959_vm5, %vm1957_vm4  ;;  %vm2188_vm4 = vcmp.eq.s32.totalorder %v5787_v44, %v6685_v16  ;;  %vm1950_vm8 = vcmp.eq.s32.totalorder %v5810_v45, %v6669_v14 }
  0xf8   : > { %5132 = vmatpush2.bf16.msk.msra.mxu1 %vm5131_vm11, %v5440_v30  ;;  %vm5193_vm14 = vmpackc.low %vm2192_vm1, %vm2190_vm7  ;;  %vm2187_vm7 = vcmp.eq.s32.totalorder %v5787_v44, %v6693_v17  ;;  %vm1949_vm11 = vcmp.eq.s32.totalorder %v5810_v45, %v6677_v15 }
  0xf9   : > { %5194 = vmatprep.subr.msk.bf16.mxu0 %vm5193_vm14, %v5440_v30  ;;  %vm5195_vm2 = vmpackc.low %vm2191_vm10, %vm2189_vm9  ;;  %vm1952_vm9 = vcmp.eq.s32.totalorder %v5813_v46, %v6669_v14  ;;  %vm2182_vm14 = vcmp.eq.s32.totalorder %v5810_v45, %v6685_v16 }
  0xfa   : > { %5196 = vmatpush2.bf16.msk.msra.mxu0 %vm5195_vm2, %v5440_v30  ;;  %vm5133_vm5 = vmpackc.low %vm1956_vm13, %vm1954_vm12  ;;  %vm1951_vm12 = vcmp.eq.s32.totalorder %v5813_v46, %v6677_v15  ;;  %vm2181_vm2 = vcmp.eq.s32.totalorder %v5810_v45, %v6693_v17 }
  0xfb   : > { %5134 = vmatprep.subr.msk.bf16.mxu1 %vm5133_vm5, %v5440_v30  ;;  %vm5135_vm1 = vmpackc.low %vm1955_vm0, %vm1953_vm15  ;;  %vm2184_vm15 = vcmp.eq.s32.totalorder %v5813_v46, %v6685_v16  ;;  %vm1946_vm5 = vcmp.eq.s32.totalorder %v5836_v47, %v6669_v14 }
  0xfc   : > { %5136 = vmatpush2.bf16.msk.msra.mxu1 %vm5135_vm1, %v5440_v30  ;;  %vm5197_vm10 = vmpackc.low %vm2188_vm4, %vm2186_vm3  ;;  %vm2183_vm3 = vcmp.eq.s32.totalorder %v5813_v46, %v6693_v17  ;;  %vm1945_vm1 = vcmp.eq.s32.totalorder %v5836_v47, %v6677_v15 }
  0xfd   : > { %5198 = vmatprep.subr.msk.bf16.mxu0 %vm5197_vm10, %v5440_v30  ;;  %vm5199_vm13 = vmpackc.low %vm2187_vm7, %vm2185_vm6  ;;  %vm1948_vm6 = vcmp.eq.s32.totalorder %v5839_v48, %v6669_v14  ;;  %vm2178_vm10 = vcmp.eq.s32.totalorder %v5836_v47, %v6685_v16 }
  0xfe   : > { %5200 = vmatpush2.bf16.msk.msra.mxu0 %vm5199_vm13, %v5440_v30  ;;  %vm5137_vm0 = vmpackc.low %vm1952_vm9, %vm1950_vm8  ;;  %vm1947_vm8 = vcmp.eq.s32.totalorder %v5839_v48, %v6677_v15  ;;  %vm2177_vm13 = vcmp.eq.s32.totalorder %v5836_v47, %v6693_v17 }
  0xff   : > { %5138 = vmatprep.subr.msk.bf16.mxu1 %vm5137_vm0, %v5440_v30  ;;  %vm5139_vm4 = vmpackc.low %vm1951_vm12, %vm1949_vm11  ;;  %vm2180_vm11 = vcmp.eq.s32.totalorder %v5839_v48, %v6685_v16  ;;  %vm1942_vm0 = vcmp.eq.s32.totalorder %v5862_v49, %v6669_v14 }
 0x100   : > { %5140 = vmatpush2.bf16.msk.msra.mxu1 %vm5139_vm4, %v5440_v30  ;;  %vm5201_vm7 = vmpackc.low %vm2184_vm15, %vm2182_vm14  ;;  %vm2179_vm14 = vcmp.eq.s32.totalorder %v5839_v48, %v6693_v17  ;;  %vm1941_vm4 = vcmp.eq.s32.totalorder %v5862_v49, %v6677_v15 }
 0x101   : > { %5202 = vmatprep.subr.msk.bf16.mxu0 %vm5201_vm7, %v5440_v30  ;;  %vm5203_vm9 = vmpackc.low %vm2183_vm3, %vm2181_vm2  ;;  %vm1944_vm2 = vcmp.eq.s32.totalorder %v5865_v50, %v6669_v14  ;;  %vm2174_vm7 = vcmp.eq.s32.totalorder %v5862_v49, %v6685_v16 }
 0x102   : > { %5204 = vmatpush2.bf16.msk.msra.mxu0 %vm5203_vm9, %v5440_v30  ;;  %vm5141_vm12 = vmpackc.low %vm1948_vm6, %vm1946_vm5  ;;  %vm1943_vm5 = vcmp.eq.s32.totalorder %v5865_v50, %v6677_v15  ;;  %vm2173_vm9 = vcmp.eq.s32.totalorder %v5862_v49, %v6693_v17 }
 0x103   : > { %5142 = vmatprep.subr.msk.bf16.mxu1 %vm5141_vm12, %v5440_v30  ;;  %vm5143_vm15 = vmpackc.low %vm1947_vm8, %vm1945_vm1  ;;  %vm2176_vm1 = vcmp.eq.s32.totalorder %v5865_v50, %v6685_v16  ;;  %vm1938_vm12 = vcmp.eq.s32.totalorder %v5888_v51, %v6669_v14 }
 0x104   : > { %5144 = vmatpush2.bf16.msk.msra.mxu1 %vm5143_vm15, %v5440_v30  ;;  %vm5205_vm3 = vmpackc.low %vm2180_vm11, %vm2178_vm10  ;;  %vm2175_vm10 = vcmp.eq.s32.totalorder %v5865_v50, %v6693_v17  ;;  %vm1937_vm15 = vcmp.eq.s32.totalorder %v5888_v51, %v6677_v15 }
 0x105   : > { %5206 = vmatprep.subr.msk.bf16.mxu0 %vm5205_vm3, %v5440_v30  ;;  %vm5207_vm6 = vmpackc.low %vm2179_vm14, %vm2177_vm13  ;;  %vm1940_vm13 = vcmp.eq.s32.totalorder %v5891_v52, %v6669_v14  ;;  %vm2170_vm3 = vcmp.eq.s32.totalorder %v5888_v51, %v6685_v16 }
 0x106   : > { %5208 = vmatpush2.bf16.msk.msra.mxu0 %vm5207_vm6, %v5440_v30  ;;  %vm5145_vm8 = vmpackc.low %vm1944_vm2, %vm1942_vm0  ;;  %vm1939_vm0 = vcmp.eq.s32.totalorder %v5891_v52, %v6677_v15  ;;  %vm2169_vm6 = vcmp.eq.s32.totalorder %v5888_v51, %v6693_v17 }
 0x107   : > { %5146 = vmatprep.subr.msk.bf16.mxu1 %vm5145_vm8, %v5440_v30  ;;  %vm5147_vm11 = vmpackc.low %vm1943_vm5, %vm1941_vm4  ;;  %vm2172_vm4 = vcmp.eq.s32.totalorder %v5891_v52, %v6685_v16  ;;  %vm1934_vm8 = vcmp.eq.s32.totalorder %v5914_v53, %v6669_v14 }
 0x108   : > { %5148 = vmatpush2.bf16.msk.msra.mxu1 %vm5147_vm11, %v5440_v30  ;;  %vm5209_vm14 = vmpackc.low %vm2176_vm1, %vm2174_vm7  ;;  %vm2171_vm7 = vcmp.eq.s32.totalorder %v5891_v52, %v6693_v17  ;;  %vm1933_vm11 = vcmp.eq.s32.totalorder %v5914_v53, %v6677_v15 }
 0x109   : > { %5210 = vmatprep.subr.msk.bf16.mxu0 %vm5209_vm14, %v5440_v30  ;;  %vm5211_vm2 = vmpackc.low %vm2175_vm10, %vm2173_vm9  ;;  %vm1936_vm9 = vcmp.eq.s32.totalorder %v5917_v54, %v6669_v14  ;;  %vm2166_vm14 = vcmp.eq.s32.totalorder %v5914_v53, %v6685_v16 }
 0x10a   : > { %5212 = vmatpush2.bf16.msk.msra.mxu0 %vm5211_vm2, %v5440_v30  ;;  %vm5149_vm5 = vmpackc.low %vm1940_vm13, %vm1938_vm12  ;;  %vm1935_vm12 = vcmp.eq.s32.totalorder %v5917_v54, %v6677_v15  ;;  %vm2165_vm2 = vcmp.eq.s32.totalorder %v5914_v53, %v6693_v17 }
 0x10b   : > { %5150 = vmatprep.subr.msk.bf16.mxu1 %vm5149_vm5, %v5440_v30  ;;  %vm5151_vm1 = vmpackc.low %vm1939_vm0, %vm1937_vm15  ;;  %vm2168_vm15 = vcmp.eq.s32.totalorder %v5917_v54, %v6685_v16  ;;  %vm1930_vm5 = vcmp.eq.s32.totalorder %v5941_v56, %v6669_v14 }
 0x10c   : > { %5152 = vmatpush2.bf16.msk.msra.mxu1 %vm5151_vm1, %v5440_v30  ;;  %vm5213_vm10 = vmpackc.low %vm2172_vm4, %vm2170_vm3  ;;  %vm2167_vm3 = vcmp.eq.s32.totalorder %v5917_v54, %v6693_v17  ;;  %vm1929_vm1 = vcmp.eq.s32.totalorder %v5941_v56, %v6677_v15 }
 0x10d   : > { %5214 = vmatprep.subr.msk.bf16.mxu0 %vm5213_vm10, %v5440_v30  ;;  %vm5215_vm13 = vmpackc.low %vm2171_vm7, %vm2169_vm6  ;;  %vm1932_vm6 = vcmp.eq.s32.totalorder %v5944_v57, %v6669_v14  ;;  %vm2162_vm10 = vcmp.eq.s32.totalorder %v5941_v56, %v6685_v16 }
 0x10e   : > { %5216 = vmatpush2.bf16.msk.msra.mxu0 %vm5215_vm13, %v5440_v30  ;;  %vm5153_vm0 = vmpackc.low %vm1936_vm9, %vm1934_vm8  ;;  %vm1931_vm8 = vcmp.eq.s32.totalorder %v5944_v57, %v6677_v15  ;;  %vm2161_vm13 = vcmp.eq.s32.totalorder %v5941_v56, %v6693_v17 }
 0x10f   : > { %5154 = vmatprep.subr.msk.bf16.mxu1 %vm5153_vm0, %v5440_v30  ;;  %vm5155_vm4 = vmpackc.low %vm1935_vm12, %vm1933_vm11  ;;  %vm2164_vm11 = vcmp.eq.s32.totalorder %v5944_v57, %v6685_v16  ;;  %vm2390_vm0 = vcmp.eq.s32.totalorder %v5543_v12, %v5574_v25 }
 0x110   : > { %5156 = vmatpush2.bf16.msk.msra.mxu1 %vm5155_vm4, %v5440_v30  ;;  %vm5217_vm7 = vmpackc.low %vm2168_vm15, %vm2166_vm14  ;;  %vm2163_vm14 = vcmp.eq.s32.totalorder %v5944_v57, %v6693_v17  ;;  %vm2389_vm4 = vcmp.eq.s32.totalorder %v5543_v12, %v5572_v24 }
 0x111   : > { %5218 = vmatprep.subr.msk.bf16.mxu0 %vm5217_vm7, %v5440_v30  ;;  %vm5219_vm9 = vmpackc.low %vm2167_vm3, %vm2165_vm2  ;;  %vm2392_vm2 = vcmp.eq.s32.totalorder %v5554_v18, %v5574_v25  ;;  %vm2622_vm7 = vcmp.eq.s32.totalorder %v5543_v12, %v5578_v27 }
 0x112   : > { %5220 = vmatpush2.bf16.msk.msra.mxu0 %vm5219_vm9, %v5440_v30  ;;  %vm5157_vm12 = vmpackc.low %vm1932_vm6, %vm1930_vm5  ;;  %vm2391_vm5 = vcmp.eq.s32.totalorder %v5554_v18, %v5572_v24  ;;  %vm2621_vm9 = vcmp.eq.s32.totalorder %v5543_v12, %v5576_v26  ;;  %v7164_v12 = vpop.f32.mrf.mxu0 }
 0x113   : > { %5158 = vmatprep.subr.msk.bf16.mxu1 %vm5157_vm12, %v5440_v30  ;;  %vm5159_vm15 = vmpackc.low %vm1931_vm8, %vm1929_vm1  ;;  %vm2624_vm1 = vcmp.eq.s32.totalorder %v5554_v18, %v5578_v27  ;;  %vm2386_vm12 = vcmp.eq.s32.totalorder %v5564_v21, %v5574_v25 }
 0x114   : > { %5160 = vmatpush2.bf16.msk.msra.mxu1 %vm5159_vm15, %v5440_v30  ;;  %vm5221_vm3 = vmpackc.low %vm2164_vm11, %vm2162_vm10  ;;  %vm2623_vm10 = vcmp.eq.s32.totalorder %v5554_v18, %v5576_v26  ;;  %vm2385_vm15 = vcmp.eq.s32.totalorder %v5564_v21, %v5572_v24  ;;  %v5413_v18 = vld [vmem:[%s5519_s13 + $0x4] ss:$8 sps:$4 sm:$0xff]   ;;  %v7186_v20 = vpop.f32.mrf.mxu0 }
 0x115   : > { %5222 = vmatprep.subr.msk.bf16.mxu0 %vm5221_vm3, %v5440_v30  ;;  %vm5223_vm6 = vmpackc.low %vm2163_vm14, %vm2161_vm13  ;;  %vm2388_vm13 = vcmp.eq.s32.totalorder %v5567_v22, %v5574_v25  ;;  %vm2618_vm3 = vcmp.eq.s32.totalorder %v5564_v21, %v5578_v27 }
 0x116   : > { %5224 = vmatpush2.bf16.msk.msra.mxu0 %vm5223_vm6, %v5440_v30  ;;  %vm5225_vm8 = vmpackc.low %vm2392_vm2, %vm2390_vm0  ;;  %vm2387_vm0 = vcmp.eq.s32.totalorder %v5567_v22, %v5572_v24  ;;  %vm2617_vm6 = vcmp.eq.s32.totalorder %v5564_v21, %v5576_v26  ;;  %v7208_v21 = vpop.f32.mrf.mxu0 }
 0x117   : > { %3118 = vmatmul.mubr.bf16.vlgmr.msra.gmra.mxu1 %v6721_v19  ;;  %5226 = vmatprep.subr.msk.bf16.mxu1 %vm5225_vm8, %v5440_v30  ;;  %vm5227_vm11 = vmpackc.low %vm2391_vm5, %vm2389_vm4  ;;  %vm2620_vm4 = vcmp.eq.s32.totalorder %v5567_v22, %v5578_v27  ;;  %vm2382_vm8 = vcmp.eq.s32.totalorder %v5570_v23, %v5574_v25 }
 0x118   : > { %5228 = vmatpush1.bf16.msk.msra.mxu1 %vm5227_vm11, %v5440_v30  ;;  %vm5289_vm14 = vmpackc.low %vm2624_vm1, %vm2622_vm7  ;;  %3203 = vmatprep.mubr.bf16.mxu1 %v5413_v18  ;;  %vm2619_vm7 = vcmp.eq.s32.totalorder %v5567_v22, %v5576_v26  ;;  %vm2381_vm11 = vcmp.eq.s32.totalorder %v5570_v23, %v5572_v24  ;;  %v7230_v22 = vpop.f32.mrf.mxu1 }
 0x119   : > { %3161 = vmatmul.mubr.bf16.vlgmr.msra.gmra.mxu0 %v6721_v19  ;;  %5290 = vmatprep.subr.msk.bf16.mxu0 %vm5289_vm14, %v5440_v30  ;;  %vm5291_vm2 = vmpackc.low %vm2623_vm10, %vm2621_vm9  ;;  %vm2384_vm9 = vcmp.eq.s32.totalorder %v5606_v31, %v5574_v25  ;;  %vm2614_vm14 = vcmp.eq.s32.totalorder %v5570_v23, %v5578_v27 }
 0x11a   : > { %5292 = vmatpush1.bf16.msk.msra.mxu0 %vm5291_vm2, %v5440_v30  ;;  %vm5229_vm5 = vmpackc.low %vm2388_vm13, %vm2386_vm12  ;;  %3246 = vmatprep.mubr.bf16.mxu0 %v5413_v18  ;;  %vm2383_vm12 = vcmp.eq.s32.totalorder %v5606_v31, %v5572_v24  ;;  %vm2613_vm2 = vcmp.eq.s32.totalorder %v5570_v23, %v5576_v26  ;;  %v7254_v28 = vpop.f32.mrf.mxu1 }
 0x11b   : > { %5230 = vmatprep.subr.msk.bf16.mxu1 %vm5229_vm5, %v5440_v30  ;;  %vm5231_vm1 = vmpackc.low %vm2387_vm0, %vm2385_vm15  ;;  %vm2616_vm15 = vcmp.eq.s32.totalorder %v5606_v31, %v5578_v27  ;;  %vm2378_vm5 = vcmp.eq.s32.totalorder %v5630_v32, %v5574_v25 }
 0x11c   : > { %5232 = vmatpush1.bf16.msk.msra.mxu1 %vm5231_vm1, %v5440_v30  ;;  %vm5293_vm10 = vmpackc.low %vm2620_vm4, %vm2618_vm3  ;;  %vm2615_vm3 = vcmp.eq.s32.totalorder %v5606_v31, %v5576_v26  ;;  %vm2377_vm1 = vcmp.eq.s32.totalorder %v5630_v32, %v5572_v24 }
 0x11d   : > { %5294 = vmatprep.subr.msk.bf16.mxu0 %vm5293_vm10, %v5440_v30  ;;  %vm5295_vm13 = vmpackc.low %vm2619_vm7, %vm2617_vm6  ;;  %vm2380_vm6 = vcmp.eq.s32.totalorder %v5633_v33, %v5574_v25  ;;  %vm2610_vm10 = vcmp.eq.s32.totalorder %v5630_v32, %v5578_v27 }
 0x11e   : > { %5296 = vmatpush1.bf16.msk.msra.mxu0 %vm5295_vm13, %v5440_v30  ;;  %vm5233_vm0 = vmpackc.low %vm2384_vm9, %vm2382_vm8  ;;  %vm2379_vm8 = vcmp.eq.s32.totalorder %v5633_v33, %v5572_v24  ;;  %vm2609_vm13 = vcmp.eq.s32.totalorder %v5630_v32, %v5576_v26  ;;  %v2865_v32 = vpop.f32.mrf.mxu1 }
 0x11f   : > { %5234 = vmatprep.subr.msk.bf16.mxu1 %vm5233_vm0, %v5440_v30  ;;  %vm5235_vm4 = vmpackc.low %vm2383_vm12, %vm2381_vm11  ;;  %vm2612_vm11 = vcmp.eq.s32.totalorder %v5633_v33, %v5578_v27  ;;  %vm2374_vm0 = vcmp.eq.s32.totalorder %v5657_v34, %v5574_v25 }
 0x120   : > { %5236 = vmatpush1.bf16.msk.msra.mxu1 %vm5235_vm4, %v5440_v30  ;;  %vm5297_vm7 = vmpackc.low %vm2616_vm15, %vm2614_vm14  ;;  %vm2611_vm14 = vcmp.eq.s32.totalorder %v5633_v33, %v5576_v26  ;;  %vm2373_vm4 = vcmp.eq.s32.totalorder %v5657_v34, %v5572_v24 }
 0x121   : > { %5298 = vmatprep.subr.msk.bf16.mxu0 %vm5297_vm7, %v5440_v30  ;;  %vm5299_vm9 = vmpackc.low %vm2615_vm3, %vm2613_vm2  ;;  %vm2376_vm2 = vcmp.eq.s32.totalorder %v5660_v35, %v5574_v25  ;;  %vm2606_vm7 = vcmp.eq.s32.totalorder %v5657_v34, %v5578_v27 }
 0x122   : > { %5300 = vmatpush1.bf16.msk.msra.mxu0 %vm5299_vm9, %v5440_v30  ;;  %vm5237_vm12 = vmpackc.low %vm2380_vm6, %vm2378_vm5  ;;  %vm2375_vm5 = vcmp.eq.s32.totalorder %v5660_v35, %v5572_v24  ;;  %vm2605_vm9 = vcmp.eq.s32.totalorder %v5657_v34, %v5576_v26  ;;  %v390_v34 = vpop.permute.xlu0 %389 }
 0x123   : > { %5238 = vmatprep.subr.msk.bf16.mxu1 %vm5237_vm12, %v5440_v30  ;;  %vm5239_vm15 = vmpackc.low %vm2379_vm8, %vm2377_vm1  ;;  %vm2608_vm1 = vcmp.eq.s32.totalorder %v5660_v35, %v5578_v27  ;;  %vm2370_vm12 = vcmp.eq.s32.totalorder %v5683_v36, %v5574_v25 }
 0x124   : > { %5240 = vmatpush1.bf16.msk.msra.mxu1 %vm5239_vm15, %v5440_v30  ;;  %vm5301_vm3 = vmpackc.low %vm2612_vm11, %vm2610_vm10  ;;  %vm2607_vm10 = vcmp.eq.s32.totalorder %v5660_v35, %v5576_v26  ;;  %vm2369_vm15 = vcmp.eq.s32.totalorder %v5683_v36, %v5572_v24  ;;  %v2867_v35 = vpop.f32.mrf.mxu1 }
 0x125   : > { %5302 = vmatprep.subr.msk.bf16.mxu0 %vm5301_vm3, %v5440_v30  ;;  %vm5303_vm6 = vmpackc.low %vm2611_vm14, %vm2609_vm13  ;;  %vm2372_vm13 = vcmp.eq.s32.totalorder %v5686_v37, %v5574_v25  ;;  %vm2602_vm3 = vcmp.eq.s32.totalorder %v5683_v36, %v5578_v27 }
 0x126   : > { %5304 = vmatpush1.bf16.msk.msra.mxu0 %vm5303_vm6, %v5440_v30  ;;  %vm5241_vm8 = vmpackc.low %vm2376_vm2, %vm2374_vm0  ;;  %vm2371_vm0 = vcmp.eq.s32.totalorder %v5686_v37, %v5572_v24  ;;  %vm2601_vm6 = vcmp.eq.s32.totalorder %v5683_v36, %v5576_v26 }
 0x127   : > { %5242 = vmatprep.subr.msk.bf16.mxu1 %vm5241_vm8, %v5440_v30  ;;  %vm5243_vm11 = vmpackc.low %vm2375_vm5, %vm2373_vm4  ;;  %vm2604_vm4 = vcmp.eq.s32.totalorder %v5686_v37, %v5578_v27  ;;  %vm2366_vm8 = vcmp.eq.s32.totalorder %v5709_v38, %v5574_v25 }
 0x128   : > { %5244 = vmatpush1.bf16.msk.msra.mxu1 %vm5243_vm11, %v5440_v30  ;;  %vm5305_vm14 = vmpackc.low %vm2608_vm1, %vm2606_vm7  ;;  %vm2603_vm7 = vcmp.eq.s32.totalorder %v5686_v37, %v5576_v26  ;;  %vm2365_vm11 = vcmp.eq.s32.totalorder %v5709_v38, %v5572_v24 }
 0x129   : > { %5306 = vmatprep.subr.msk.bf16.mxu0 %vm5305_vm14, %v5440_v30  ;;  %vm5307_vm2 = vmpackc.low %vm2607_vm10, %vm2605_vm9  ;;  %vm2368_vm9 = vcmp.eq.s32.totalorder %v5712_v39, %v5574_v25  ;;  %vm2598_vm14 = vcmp.eq.s32.totalorder %v5709_v38, %v5578_v27 }
 0x12a   : > { %5308 = vmatpush1.bf16.msk.msra.mxu0 %vm5307_vm2, %v5440_v30  ;;  %vm5245_vm5 = vmpackc.low %vm2372_vm13, %vm2370_vm12  ;;  %vm2367_vm12 = vcmp.eq.s32.totalorder %v5712_v39, %v5572_v24  ;;  %vm2597_vm2 = vcmp.eq.s32.totalorder %v5709_v38, %v5576_v26  ;;  %v7319_v38 = vadd.f32 %v7186_v20, %v385_v29 }
 0x12b   : > { %5246 = vmatprep.subr.msk.bf16.mxu1 %vm5245_vm5, %v5440_v30  ;;  %vm5247_vm1 = vmpackc.low %vm2371_vm0, %vm2369_vm15  ;;  %vm2600_vm15 = vcmp.eq.s32.totalorder %v5712_v39, %v5578_v27  ;;  %vm2362_vm5 = vcmp.eq.s32.totalorder %v5506_v3, %v5574_v25 }
 0x12c   : > { %5248 = vmatpush1.bf16.msk.msra.mxu1 %vm5247_vm1, %v5440_v30  ;;  %vm5309_vm10 = vmpackc.low %vm2604_vm4, %vm2602_vm3  ;;  %vm2599_vm3 = vcmp.eq.s32.totalorder %v5712_v39, %v5576_v26  ;;  %vm2361_vm1 = vcmp.eq.s32.totalorder %v5506_v3, %v5572_v24 }
 0x12d   : > { %5310 = vmatprep.subr.msk.bf16.mxu0 %vm5309_vm10, %v5440_v30  ;;  %vm5311_vm13 = vmpackc.low %vm2603_vm7, %vm2601_vm6  ;;  %vm2364_vm6 = vcmp.eq.s32.totalorder %v5735_v40, %v5574_v25  ;;  %vm2594_vm10 = vcmp.eq.s32.totalorder %v5506_v3, %v5578_v27 }
 0x12e   : > { %5312 = vmatpush1.bf16.msk.msra.mxu0 %vm5311_vm13, %v5440_v30  ;;  %vm5249_vm0 = vmpackc.low %vm2368_vm9, %vm2366_vm8  ;;  %vm2363_vm8 = vcmp.eq.s32.totalorder %v5735_v40, %v5572_v24  ;;  %vm2593_vm13 = vcmp.eq.s32.totalorder %v5506_v3, %v5576_v26  ;;  %v453_v3 = vpop.f32.mrf.mxu0 }
 0x12f   : > { %5250 = vmatprep.subr.msk.bf16.mxu1 %vm5249_vm0, %v5440_v30  ;;  %vm5251_vm4 = vmpackc.low %vm2367_vm12, %vm2365_vm11  ;;  %vm2596_vm11 = vcmp.eq.s32.totalorder %v5735_v40, %v5578_v27  ;;  %vm2422_vm0 = vcmp.eq.s32.totalorder %v5758_v41, %v5574_v25  ;;  %v7303_v36 = vadd.f32 %v453_v3, %v390_v34 }
 0x130   : > { %5252 = vmatpush1.bf16.msk.msra.mxu1 %vm5251_vm4, %v5440_v30  ;;  %vm5313_vm7 = vmpackc.low %vm2600_vm15, %vm2598_vm14  ;;  %vm2595_vm14 = vcmp.eq.s32.totalorder %v5735_v40, %v5576_v26  ;;  %vm2421_vm4 = vcmp.eq.s32.totalorder %v5758_v41, %v5572_v24  ;;  %v7242_v23 = vpop.f32.mrf.mxu0  ;;  %v7333_v40 = vadd.f32 %v7208_v21, %v390_v34 }
 0x131   : > { %5314 = vmatprep.subr.msk.bf16.mxu0 %vm5313_vm7, %v5440_v30  ;;  %vm5315_vm9 = vmpackc.low %vm2599_vm3, %vm2597_vm2  ;;  %vm2424_vm2 = vcmp.eq.s32.totalorder %v5761_v42, %v5574_v25  ;;  %vm2654_vm7 = vcmp.eq.s32.totalorder %v5758_v41, %v5578_v27  ;;  %v7322_v39 = vadd.f32 %v2867_v35, %v7303_v36 }
 0x132   : > { %5316 = vmatpush1.bf16.msk.msra.mxu0 %vm5315_vm9, %v5440_v30  ;;  %vm5253_vm12 = vmpackc.low %vm2364_vm6, %vm2362_vm5  ;;  %vm2423_vm5 = vcmp.eq.s32.totalorder %v5761_v42, %v5572_v24  ;;  %vm2653_vm9 = vcmp.eq.s32.totalorder %v5758_v41, %v5576_v26  ;;  %v7266_v31 = vpop.f32.mrf.mxu0  ;;  %v7345_v41 = vadd.f32 %v7254_v28, %v7319_v38 }
 0x133   : > { %5254 = vmatprep.subr.msk.bf16.mxu1 %vm5253_vm12, %v5440_v30  ;;  %vm5255_vm15 = vmpackc.low %vm2363_vm8, %vm2361_vm1  ;;  %vm2656_vm1 = vcmp.eq.s32.totalorder %v5761_v42, %v5578_v27  ;;  %vm2418_vm12 = vcmp.eq.s32.totalorder %v5784_v43, %v5574_v25 }
 0x134   : > { %5256 = vmatpush1.bf16.msk.msra.mxu1 %vm5255_vm15, %v5440_v30  ;;  %vm5317_vm3 = vmpackc.low %vm2596_vm11, %vm2594_vm10  ;;  %vm2655_vm10 = vcmp.eq.s32.totalorder %v5761_v42, %v5576_v26  ;;  %vm2417_vm15 = vcmp.eq.s32.totalorder %v5784_v43, %v5572_v24  ;;  %v2908_v33 = vpop.f32.mrf.mxu0 }
 0x135   : > { %5318 = vmatprep.subr.msk.bf16.mxu0 %vm5317_vm3, %v5440_v30  ;;  %vm5319_vm6 = vmpackc.low %vm2595_vm14, %vm2593_vm13  ;;  %vm2420_vm13 = vcmp.eq.s32.totalorder %v5787_v44, %v5574_v25  ;;  %vm2650_vm3 = vcmp.eq.s32.totalorder %v5784_v43, %v5578_v27 }
 0x136   : > { %5320 = vmatpush1.bf16.msk.msra.mxu0 %vm5319_vm6, %v5440_v30  ;;  %vm5257_vm8 = vmpackc.low %vm2424_vm2, %vm2422_vm0  ;;  %vm2419_vm0 = vcmp.eq.s32.totalorder %v5787_v44, %v5572_v24  ;;  %vm2649_vm6 = vcmp.eq.s32.totalorder %v5784_v43, %v5576_v26  ;;  %v2910_v37 = vpop.f32.mrf.mxu0  ;;  %v7362_v43 = vadd.f32 %v7164_v12, %v385_v29 }
 0x137   : > { %5258 = vmatprep.subr.msk.bf16.mxu1 %vm5257_vm8, %v5440_v30  ;;  %vm5259_vm11 = vmpackc.low %vm2423_vm5, %vm2421_vm4  ;;  %vm2652_vm4 = vcmp.eq.s32.totalorder %v5787_v44, %v5578_v27  ;;  %vm2414_vm8 = vcmp.eq.s32.totalorder %v5810_v45, %v5574_v25  ;;  %v7348_v42 = vadd.f32 %v2910_v37, %v7303_v36 }
 0x138   : > { %5260 = vmatpush2.bf16.msk.msra.mxu1 %vm5259_vm11, %v5440_v30  ;;  %vm5321_vm14 = vmpackc.low %vm2656_vm1, %vm2654_vm7  ;;  %vm2651_vm7 = vcmp.eq.s32.totalorder %v5787_v44, %v5576_v26  ;;  %vm2413_vm11 = vcmp.eq.s32.totalorder %v5810_v45, %v5572_v24  ;;  %v7365_v44 = vadd.f32 %v2865_v32, %v7333_v40  ;;  %v2905_v55 = vadd.f32 %v7242_v23, %v7362_v43 }
 0x139   : > { %5322 = vmatprep.subr.msk.bf16.mxu0 %vm5321_vm14, %v5440_v30  ;;  %vm5323_vm2 = vmpackc.low %vm2655_vm10, %vm2653_vm9  ;;  %vm2416_vm9 = vcmp.eq.s32.totalorder %v5813_v46, %v5574_v25  ;;  %vm2646_vm14 = vcmp.eq.s32.totalorder %v5810_v45, %v5578_v27 }
 0x13a   : > { %5324 = vmatpush2.bf16.msk.msra.mxu0 %vm5323_vm2, %v5440_v30  ;;  %vm5261_vm5 = vmpackc.low %vm2420_vm13, %vm2418_vm12  ;;  %vm2415_vm12 = vcmp.eq.s32.totalorder %v5813_v46, %v5572_v24  ;;  %vm2645_vm2 = vcmp.eq.s32.totalorder %v5810_v45, %v5576_v26  ;;  %v2907_v45 = vadd.f32 %v7266_v31, %v7319_v38  ;;  %v3277_v58 = vmul.f32 0.2, %v7365_v44 }
 0x13b   : > { %5262 = vmatprep.subr.msk.bf16.mxu1 %vm5261_vm5, %v5440_v30  ;;  %vm5263_vm1 = vmpackc.low %vm2419_vm0, %vm2417_vm15  ;;  %vm2648_vm15 = vcmp.eq.s32.totalorder %v5813_v46, %v5578_v27  ;;  %vm2410_vm5 = vcmp.eq.s32.totalorder %v5836_v47, %v5574_v25  ;;  %v3259_v63 = vmul.f32 0.2, %v2905_v55 }
 0x13c   : > { %5264 = vmatpush2.bf16.msk.msra.mxu1 %vm5263_vm1, %v5440_v30  ;;  %vm5325_vm10 = vmpackc.low %vm2652_vm4, %vm2650_vm3  ;;  %vm2647_vm3 = vcmp.eq.s32.totalorder %v5813_v46, %v5576_v26  ;;  %vm2409_vm1 = vcmp.eq.s32.totalorder %v5836_v47, %v5572_v24  ;;  %v3278_v46 = vmul.f32 0.2, %v7322_v39  ;;  %v3317_v0 = vmax.f32 %v7365_v44, %v3277_v58 }
 0x13d   : > { %5326 = vmatprep.subr.msk.bf16.mxu0 %vm5325_vm10, %v5440_v30  ;;  %vm5327_vm13 = vmpackc.low %vm2651_vm7, %vm2649_vm6  ;;  %vm2412_vm6 = vcmp.eq.s32.totalorder %v5839_v48, %v5574_v25  ;;  %vm2642_vm10 = vcmp.eq.s32.totalorder %v5836_v47, %v5578_v27  ;;  %v3299_v4 = vmax.f32 %v2905_v55, %v3259_v63 }
 0x13e   : > { %5328 = vmatpush2.bf16.msk.msra.mxu0 %vm5327_vm13, %v5440_v30  ;;  %vm5265_vm0 = vmpackc.low %vm2416_vm9, %vm2414_vm8  ;;  %vm2411_vm8 = vcmp.eq.s32.totalorder %v5839_v48, %v5572_v24  ;;  %vm2641_vm13 = vcmp.eq.s32.totalorder %v5836_v47, %v5576_v26  ;;  %v2862_v47 = vadd.f32 %v7230_v22, %v7362_v43 }
 0x13f   : > { %5266 = vmatprep.subr.msk.bf16.mxu1 %vm5265_vm0, %v5440_v30  ;;  %vm5267_vm4 = vmpackc.low %vm2415_vm12, %vm2413_vm11  ;;  %vm2644_vm11 = vcmp.eq.s32.totalorder %v5839_v48, %v5578_v27  ;;  %vm2406_vm0 = vcmp.eq.s32.totalorder %v5862_v49, %v5574_v25 }
 0x140   : > { %5268 = vmatpush2.bf16.msk.msra.mxu1 %vm5267_vm4, %v5440_v30  ;;  %vm5329_vm7 = vmpackc.low %vm2648_vm15, %vm2646_vm14  ;;  %vm2643_vm14 = vcmp.eq.s32.totalorder %v5839_v48, %v5576_v26  ;;  %vm2405_vm4 = vcmp.eq.s32.totalorder %v5862_v49, %v5572_v24  ;;  %v2909_v48 = vadd.f32 %v2908_v33, %v7333_v40  ;;  %v3257_v59 = vmul.f32 0.2, %v2862_v47 }
 0x141   : > { %5330 = vmatprep.subr.msk.bf16.mxu0 %vm5329_vm7, %v5440_v30  ;;  %vm5331_vm9 = vmpackc.low %vm2647_vm3, %vm2645_vm2  ;;  %vm2408_vm2 = vcmp.eq.s32.totalorder %v5865_v50, %v5574_v25  ;;  %vm2638_vm7 = vcmp.eq.s32.totalorder %v5862_v49, %v5578_v27 }
 0x142   : > { %5332 = vmatpush2.bf16.msk.msra.mxu0 %vm5331_vm9, %v5440_v30  ;;  %vm5269_vm12 = vmpackc.low %vm2412_vm6, %vm2410_vm5  ;;  %vm2407_vm5 = vcmp.eq.s32.totalorder %v5865_v50, %v5572_v24  ;;  %vm2637_vm9 = vcmp.eq.s32.totalorder %v5862_v49, %v5576_v26  ;;  %v3258_v49 = vmul.f32 0.2, %v7345_v41  ;;  %v3279_v60 = vmul.f32 0.2, %v2909_v48 }
 0x143   : > { %5270 = vmatprep.subr.msk.bf16.mxu1 %vm5269_vm12, %v5440_v30  ;;  %vm5271_vm15 = vmpackc.low %vm2411_vm8, %vm2409_vm1  ;;  %vm2640_vm1 = vcmp.eq.s32.totalorder %v5865_v50, %v5578_v27  ;;  %vm2402_vm12 = vcmp.eq.s32.totalorder %v5888_v51, %v5574_v25 }
 0x144   : > { %5272 = vmatpush2.bf16.msk.msra.mxu1 %vm5271_vm15, %v5440_v30  ;;  %vm5333_vm3 = vmpackc.low %vm2644_vm11, %vm2642_vm10  ;;  %vm2639_vm10 = vcmp.eq.s32.totalorder %v5865_v50, %v5576_v26  ;;  %vm2401_vm15 = vcmp.eq.s32.totalorder %v5888_v51, %v5572_v24  ;;  %v3280_v50 = vmul.f32 0.2, %v7348_v42  ;;  %v3298_v61 = vmax.f32 %v7345_v41, %v3258_v49 }
 0x145   : > { %5334 = vmatprep.subr.msk.bf16.mxu0 %vm5333_vm3, %v5440_v30  ;;  %vm5335_vm6 = vmpackc.low %vm2643_vm14, %vm2641_vm13  ;;  %vm2404_vm13 = vcmp.eq.s32.totalorder %v5891_v52, %v5574_v25  ;;  %vm2634_vm3 = vcmp.eq.s32.totalorder %v5888_v51, %v5578_v27  ;;  %v3319_v2 = vmax.f32 %v2909_v48, %v3279_v60 }
 0x146   : > { %5336 = vmatpush2.bf16.msk.msra.mxu0 %vm5335_vm6, %v5440_v30  ;;  %vm5273_vm8 = vmpackc.low %vm2408_vm2, %vm2406_vm0  ;;  %vm2403_vm0 = vcmp.eq.s32.totalorder %v5891_v52, %v5572_v24  ;;  %vm2633_vm6 = vcmp.eq.s32.totalorder %v5888_v51, %v5576_v26  ;;  %v3260_v51 = vmul.f32 0.2, %v2907_v45  ;;  %v3320_v62 = vmax.f32 %v7348_v42, %v3280_v50 }
 0x147   : > { %5274 = vmatprep.subr.msk.bf16.mxu1 %vm5273_vm8, %v5440_v30  ;;  %vm5275_vm11 = vmpackc.low %vm2407_vm5, %vm2405_vm4  ;;  %vm2636_vm4 = vcmp.eq.s32.totalorder %v5891_v52, %v5578_v27  ;;  %vm2398_vm8 = vcmp.eq.s32.totalorder %v5914_v53, %v5574_v25  ;;  %v3339_v6 = vpack.c.bf16 %v3319_v2, %v3299_v4 }
 0x148   : > { %5276 = vmatpush2.bf16.msk.msra.mxu1 %vm5275_vm11, %v5440_v30  ;;  %vm5337_vm14 = vmpackc.low %vm2640_vm1, %vm2638_vm7  ;;  %vm2635_vm7 = vcmp.eq.s32.totalorder %v5891_v52, %v5576_v26  ;;  %vm2397_vm11 = vcmp.eq.s32.totalorder %v5914_v53, %v5572_v24  ;;  %v3318_v52 = vmax.f32 %v7322_v39, %v3278_v46 }
 0x149   : > { %5338 = vmatprep.subr.msk.bf16.mxu0 %vm5337_vm14, %v5440_v30  ;;  %vm5339_vm2 = vmpackc.low %vm2639_vm10, %vm2637_vm9  ;;  %vm2400_vm9 = vcmp.eq.s32.totalorder %v5917_v54, %v5574_v25  ;;  %vm2630_vm14 = vcmp.eq.s32.totalorder %v5914_v53, %v5578_v27 }
 0x14a   : > { %5340 = vmatpush2.bf16.msk.msra.mxu0 %vm5339_vm2, %v5440_v30  ;;  %vm5277_vm5 = vmpackc.low %vm2404_vm13, %vm2402_vm12  ;;  %vm2399_vm12 = vcmp.eq.s32.totalorder %v5917_v54, %v5572_v24  ;;  %vm2629_vm2 = vcmp.eq.s32.totalorder %v5914_v53, %v5576_v26  ;;  %v3300_v53 = vmax.f32 %v2907_v45, %v3260_v51 }
 0x14b   : > { %5278 = vmatprep.subr.msk.bf16.mxu1 %vm5277_vm5, %v5440_v30  ;;  %vm5279_vm1 = vmpackc.low %vm2403_vm0, %vm2401_vm15  ;;  %vm2632_vm15 = vcmp.eq.s32.totalorder %v5917_v54, %v5578_v27  ;;  %vm2394_vm5 = vcmp.eq.s32.totalorder %v5941_v56, %v5574_v25 }
 0x14c   : > { %5280 = vmatpush2.bf16.msk.msra.mxu1 %vm5279_vm1, %v5440_v30  ;;  %vm5341_vm10 = vmpackc.low %vm2636_vm4, %vm2634_vm3  ;;  %vm2631_vm3 = vcmp.eq.s32.totalorder %v5917_v54, %v5576_v26  ;;  %vm2393_vm1 = vcmp.eq.s32.totalorder %v5941_v56, %v5572_v24  ;;  %v3338_v54 = vpack.c.bf16 %v3318_v52, %v3298_v61 }
 0x14d   : > { %5342 = vmatprep.subr.msk.bf16.mxu0 %vm5341_vm10, %v5440_v30  ;;  %vm5343_vm13 = vmpackc.low %vm2635_vm7, %vm2633_vm6  ;;  %vm2396_vm6 = vcmp.eq.s32.totalorder %v5944_v57, %v5574_v25  ;;  %vm2626_vm10 = vcmp.eq.s32.totalorder %v5941_v56, %v5578_v27  ;;  %v3297_v25 = vmax.f32 %v2862_v47, %v3257_v59 }
 0x14e   : > { %5344 = vmatpush2.bf16.msk.msra.mxu0 %vm5343_vm13, %v5440_v30  ;;  %vm5281_vm0 = vmpackc.low %vm2400_vm9, %vm2398_vm8  ;;  %vm2395_vm8 = vcmp.eq.s32.totalorder %v5944_v57, %v5572_v24  ;;  %vm2625_vm13 = vcmp.eq.s32.totalorder %v5941_v56, %v5576_v26 }
 0x14f   : > { %5282 = vmatprep.subr.msk.bf16.mxu1 %vm5281_vm0, %v5440_v30  ;;  %vm5283_vm4 = vmpackc.low %vm2399_vm12, %vm2397_vm11  ;;  %vm2628_vm11 = vcmp.eq.s32.totalorder %v5944_v57, %v5578_v27  ;;  %v3337_v5 = vpack.c.bf16 %v3317_v0, %v3297_v25 }
 0x150   : > { %5284 = vmatpush2.bf16.msk.msra.mxu1 %vm5283_vm4, %v5440_v30  ;;  %vm5345_vm7 = vmpackc.low %vm2632_vm15, %vm2630_vm14  ;;  %vm2627_vm14 = vcmp.eq.s32.totalorder %v5944_v57, %v5576_v26  ;;  %v3340_v26 = vpack.c.bf16 %v3320_v62, %v3300_v53  ;;  %v5414_v57 = vld [vmem:[%s5519_s13] ss:$8 sps:$4 sm:$0xff]   ;;  %s372_s13 = scalar_lea.vmem %s7633_s7, %s5368_s9 }
 0x151   : > { %5346 = vmatprep.subr.msk.bf16.mxu0 %vm5345_vm7, %v5440_v30  ;;  %vm5347_vm9 = vmpackc.low %vm2631_vm3, %vm2629_vm2  ;;  %vm3372_vm3 = vcmask 130048  }
 0x152   : > { %5348 = vmatpush2.bf16.msk.msra.mxu0 %vm5347_vm9, %v5440_v30  ;;  %vm5285_vm12 = vmpackc.low %vm2396_vm6, %vm2394_vm5 }
 0x153   : > { %5286 = vmatprep.subr.msk.bf16.mxu1 %vm5285_vm12, %v5440_v30  ;;  %vm5287_vm15 = vmpackc.low %vm2395_vm8, %vm2393_vm1 }
 0x154   : > { %5288 = vmatpush2.bf16.msk.msra.mxu1 %vm5287_vm15, %v5440_v30  ;;  %vm5349_vm0 = vmpackc.low %vm2628_vm11, %vm2626_vm10 }
 0x155   : > { %5350 = vmatprep.subr.msk.bf16.mxu0 %vm5349_vm0, %v5440_v30  ;;  %3390 = vmatprep.subr.bf16.mxu1 %v3338_v54  ;;  %vm5351_vm2 = vmpackc.low %vm2627_vm14, %vm2625_vm13 }
 0x156   : > { %5352 = vmatpush2.bf16.msk.msra.mxu0 %vm5351_vm2, %v5440_v30 }
 0x157   : > { %v2947_v24 = vpop.f32.mrf.mxu1  ;;  %3204 = vmatmul.mubr.bf16.vlgmr.msra.gmra.mxu1 %v5414_v57  ;;  %3433 = vmatprep.subr.bf16.mxu0 %v3340_v26 }
 0x158   : > { %3391 = vmatpush1.bf16.msra.mxu1 %v3337_v5  ;;  %3408 = vmatprep.mubr.bf16.mxu1 %v5439_v1  ;;  %v2948_v8 = vadd.f32 %v2947_v24, %v7362_v43 }
 0x159   : > { %v2949_v7 = vpop.f32.mrf.mxu1  ;;  %v2990_v27 = vpop.f32.mrf.mxu0  ;;  %3247 = vmatmul.mubr.bf16.vlgmr.msra.gmra.mxu0 %v5414_v57 }
 0x15a   : > { %v2950_v56 = vadd.f32 %v2949_v7, %v7319_v38  ;;  %3434 = vmatpush1.bf16.msra.mxu0 %v3339_v6  ;;  %3451 = vmatprep.mubr.bf16.mxu0 %v5439_v1  ;;  %v2991_v13 = vadd.f32 %v2990_v27, %v7362_v43  ;;  %v3261_v12 = vmul.f32 0.2, %v2948_v8 }
 0x15b   : > { %v2951_v9 = vpop.f32.mrf.mxu1  ;;  %v2992_v30 = vpop.f32.mrf.mxu0 }
 0x15c   : > { %v2952_v11 = vadd.f32 %v2951_v9, %v7333_v40  ;;  %v2993_v14 = vadd.f32 %v2992_v30, %v7319_v38  ;;  %v3262_v17 = vmul.f32 0.2, %v2950_v56  ;;  %v3263_v28 = vmul.f32 0.2, %v2991_v13 }
 0x15d   : > { %v2953_v15 = vpop.f32.mrf.mxu1  ;;  %v2994_v16 = vpop.f32.mrf.mxu0  ;;  %v3301_v35 = vmax.f32 %v2948_v8, %v3261_v12  ;;  %v463_v12 = vld [vmem:[%s7632_s6 + $0x8] sm:$0xff] }
 0x15e   : > { %v3281_v19 = vmul.f32 0.2, %v2952_v11  ;;  %v2954_v18 = vadd.f32 %v2953_v15, %v7303_v36  ;;  %v2995_v20 = vadd.f32 %v2994_v16, %v7333_v40  ;;  %v3264_v3 = vmul.f32 0.2, %v2993_v14 }
 0x15f   : > { %v2996_v21 = vpop.f32.mrf.mxu0  ;;  %5354 = vmatmul.mubr.msk.bf16.vlgmr.msra.gmra.mxu1 %vm3372_vm3, %v7502_v10  ;;  %v3302_v32 = vmax.f32 %v2950_v56, %v3262_v17  ;;  %v3303_v44 = vmax.f32 %v2991_v13, %v3263_v28 }
 0x160   : > { %v3282_v22 = vmul.f32 0.2, %v2954_v18  ;;  %v2997_v23 = vadd.f32 %v2996_v21, %v7303_v36  ;;  %3494 = vmatprep.mubr.bf16.mxu1 %v5439_v1  ;;  %v3321_v29 = vmax.f32 %v2952_v11, %v3281_v19  ;;  %v3283_v31 = vmul.f32 0.2, %v2995_v20 }
 0x161   : > { %5355 = vmatmul.mubr.msk.bf16.vlgmr.msra.gmra.mxu0 %vm3372_vm3, %v7502_v10  ;;  %v3304_v39 = vmax.f32 %v2993_v14, %v3264_v3 }
 0x162   : > { %v3322_v33 = vmax.f32 %v2954_v18, %v3282_v22  ;;  %v3284_v34 = vmul.f32 0.2, %v2997_v23  ;;  %3537 = vmatprep.mubr.bf16.mxu0 %v5439_v1  ;;  %v3323_v37 = vmax.f32 %v2995_v20, %v3283_v31  ;;  %v3341_v45 = vpack.c.bf16 %v3321_v29, %v3301_v35  ;;  %v462_v18 = vld [vmem:[%s7632_s6] sm:$0xff] }
 0x163   : > { %3359 = vperm.xlu1 %5401, %v462_v18  }
 0x164   : > { %v3324_v41 = vmax.f32 %v2997_v23, %v3284_v34  ;;  %v3342_v42 = vpack.c.bf16 %v3322_v33, %v3302_v32  ;;  %v3343_v47 = vpack.c.bf16 %v3323_v37, %v3303_v44 }
 0x166   : > { %3476 = vmatprep.subr.bf16.mxu1 %v3342_v42  ;;  %v3344_v46 = vpack.c.bf16 %v3324_v41, %v3304_v39 }
 0x167   : > { %3477 = vmatpush1.bf16.msra.mxu1 %v3341_v45  ;;  %3364 = vperm.xlu1 %5401, %v463_v12  }
 0x168   : > { %3519 = vmatprep.subr.bf16.mxu0 %v3344_v46 }
 0x169   : > { %3520 = vmatpush1.bf16.msra.mxu0 %v3343_v47 }
 0x16a   : > { %5356 = vmatmul.mubr.msk.bf16.vlgmr.msra.gmra.mxu1 %vm3372_vm3, %v7502_v10 }
 0x16b   : > { %3580 = vmatprep.mubr.bf16.mxu1 %v5439_v1 }
 0x16c   : > { %5357 = vmatmul.mubr.msk.bf16.vlgmr.msra.gmra.mxu0 %vm3372_vm3, %v7502_v10 }
 0x16d   : > { %3623 = vmatprep.mubr.bf16.mxu0 %v5439_v1 }
 0x197   : > { %v3033_v48 = vpop.f32.mrf.mxu1 }
 0x198   : > { %v3034_v58 = vadd.f32 %v3033_v48, %v7362_v43 }
 0x199   : > { %v3035_v49 = vpop.f32.mrf.mxu1  ;;  %v3076_v50 = vpop.f32.mrf.mxu0 }
 0x19a   : > { %v3036_v55 = vadd.f32 %v3035_v49, %v7319_v38  ;;  %v3077_v60 = vadd.f32 %v3076_v50, %v7362_v43  ;;  %v3265_v25 = vmul.f32 0.2, %v3034_v58 }
 0x19b   : > { %v3037_v51 = vpop.f32.mrf.mxu1  ;;  %v3078_v52 = vpop.f32.mrf.mxu0 }
 0x19c   : > { %v3038_v59 = vadd.f32 %v3037_v51, %v7333_v40  ;;  %v3079_v61 = vadd.f32 %v3078_v52, %v7319_v38  ;;  %v3266_v0 = vmul.f32 0.2, %v3036_v55  ;;  %v3267_v57 = vmul.f32 0.2, %v3077_v60 }
 0x19d   : > { %v3039_v62 = vpop.f32.mrf.mxu1  ;;  %v3080_v63 = vpop.f32.mrf.mxu0  ;;  %v3305_v9 = vmax.f32 %v3034_v58, %v3265_v25 }
 0x19e   : > { %v3285_v53 = vmul.f32 0.2, %v3038_v59  ;;  %v3040_v54 = vadd.f32 %v3039_v62, %v7303_v36  ;;  %v3081_v2 = vadd.f32 %v3080_v63, %v7333_v40  ;;  %v3268_v4 = vmul.f32 0.2, %v3079_v61 }
 0x19f   : > { %v3082_v26 = vpop.f32.mrf.mxu0  ;;  %v3306_v27 = vmax.f32 %v3036_v55, %v3266_v0  ;;  %v3307_v15 = vmax.f32 %v3077_v60, %v3267_v57 }
 0x1a0   : > { %v3286_v5 = vmul.f32 0.2, %v3040_v54  ;;  %v3083_v24 = vadd.f32 %v3082_v26, %v7303_v36  ;;  %v3325_v6 = vmax.f32 %v3038_v59, %v3285_v53  ;;  %v3287_v7 = vmul.f32 0.2, %v3081_v2 }
 0x1a1   : > { %v3308_v11 = vmax.f32 %v3079_v61, %v3268_v4 }
 0x1a2   : > { %v3326_v56 = vmax.f32 %v3040_v54, %v3286_v5  ;;  %v3288_v8 = vmul.f32 0.2, %v3083_v24  ;;  %v3327_v30 = vmax.f32 %v3081_v2, %v3287_v7  ;;  %v3345_v16 = vpack.c.bf16 %v3325_v6, %v3305_v9 }
 0x1a4   : > { %v3328_v13 = vmax.f32 %v3083_v24, %v3288_v8  ;;  %v3346_v14 = vpack.c.bf16 %v3326_v56, %v3306_v27  ;;  %v3347_v19 = vpack.c.bf16 %v3327_v30, %v3307_v15 }
 0x1a6   : > { %3562 = vmatprep.subr.bf16.mxu1 %v3346_v14  ;;  %v3348_v17 = vpack.c.bf16 %v3328_v13, %v3308_v11 }
 0x1a7   : > { %3563 = vmatpush1.bf16.msra.mxu1 %v3345_v16 }
 0x1a8   : > { %3605 = vmatprep.subr.bf16.mxu0 %v3348_v17 }
 0x1a9   : > { %3606 = vmatpush1.bf16.msra.mxu0 %v3347_v19 }
 0x1aa   : > { %5358 = vmatmul.mubr.msk.bf16.vlgmr.msra.gmra.mxu1 %vm3372_vm3, %v7502_v10 }
 0x1ab   : > { %3666 = vmatprep.mubr.bf16.mxu1 %v5439_v1 }
 0x1ac   : > { %5359 = vmatmul.mubr.msk.bf16.vlgmr.msra.gmra.mxu0 %vm3372_vm3, %v7502_v10 }
 0x1ad   : > { %3709 = vmatprep.mubr.bf16.mxu0 %v5439_v1 }
 0x1d7   : > { %v3119_v20 = vpop.f32.mrf.mxu1 }
 0x1d8   : > { %v3120_v23 = vadd.f32 %v3119_v20, %v7362_v43 }
 0x1d9   : > { %v3121_v21 = vpop.f32.mrf.mxu1  ;;  %v3162_v3 = vpop.f32.mrf.mxu0 }
 0x1da   : > { %v3122_v22 = vadd.f32 %v3121_v21, %v7319_v38  ;;  %v3163_v32 = vadd.f32 %v3162_v3, %v7362_v43  ;;  %v3269_v42 = vmul.f32 0.2, %v3120_v23 }
 0x1db   : > { %v3123_v28 = vpop.f32.mrf.mxu1  ;;  %v3164_v29 = vpop.f32.mrf.mxu0 }
 0x1dc   : > { %v3124_v31 = vadd.f32 %v3123_v28, %v7333_v40  ;;  %v3165_v33 = vadd.f32 %v3164_v29, %v7319_v38  ;;  %v3270_v37 = vmul.f32 0.2, %v3122_v22  ;;  %v3271_v49 = vmul.f32 0.2, %v3163_v32 }
 0x1dd   : > { %v3125_v34 = vpop.f32.mrf.mxu1  ;;  %v3166_v35 = vpop.f32.mrf.mxu0  ;;  %v3309_v59 = vmax.f32 %v3120_v23, %v3269_v42 }
 0x1de   : > { %v3289_v39 = vmul.f32 0.2, %v3124_v31  ;;  %v3126_v41 = vadd.f32 %v3125_v34, %v7303_v36  ;;  %v3167_v44 = vadd.f32 %v3166_v35, %v7333_v40  ;;  %v3272_v46 = vmul.f32 0.2, %v3165_v33 }
 0x1df   : > { %v3168_v45 = vpop.f32.mrf.mxu0  ;;  %v3310_v58 = vmax.f32 %v3122_v22, %v3270_v37  ;;  %v3311_v0 = vmax.f32 %v3163_v32, %v3271_v49 }
 0x1e0   : > { %v3290_v47 = vmul.f32 0.2, %v3126_v41  ;;  %v3169_v48 = vadd.f32 %v3168_v45, %v7303_v36  ;;  %v3329_v50 = vmax.f32 %v3124_v31, %v3289_v39  ;;  %v3291_v55 = vmul.f32 0.2, %v3167_v44 }
 0x1e1   : > { %v3312_v61 = vmax.f32 %v3165_v33, %v3272_v46 }
 0x1e2   : > { %v3330_v51 = vmax.f32 %v3126_v41, %v3290_v47  ;;  %v3292_v52 = vmul.f32 0.2, %v3169_v48  ;;  %v3331_v60 = vmax.f32 %v3167_v44, %v3291_v55  ;;  %v3349_v53 = vpack.c.bf16 %v3329_v50, %v3309_v59  ;;  %v7568_v50 = vpop.permute.xlu1 %3359 }
 0x1e4   : > { %v3332_v62 = vmax.f32 %v3169_v48, %v3292_v52  ;;  %v3350_v63 = vpack.c.bf16 %v3330_v51, %v3310_v58  ;;  %v3351_v25 = vpack.c.bf16 %v3331_v60, %v3311_v0 }
 0x1e6   : > { %3648 = vmatprep.subr.bf16.mxu1 %v3350_v63  ;;  %v3352_v54 = vpack.c.bf16 %v3332_v62, %v3312_v61  ;;  %v7574_v62 = vpop.permute.xlu1 %3364 }
 0x1e7   : > { %3649 = vmatpush1.bf16.msra.mxu1 %v3349_v53 }
 0x1e8   : > { %3691 = vmatprep.subr.bf16.mxu0 %v3352_v54 }
 0x1e9   : > { %3692 = vmatpush1.bf16.msra.mxu0 %v3351_v25 }
 0x1ea   : > { %5360 = vmatmul.mubr.msk.bf16.vlgmr.msra.gmra.mxu1 %vm3372_vm3, %v7502_v10 }
 0x1eb   : > { %3752 = vmatprep.mubr.bf16.mxu1 %v5439_v1 }
 0x1ec   : > { %5361 = vmatmul.mubr.msk.bf16.vlgmr.msra.gmra.mxu0 %vm3372_vm3, %v7502_v10 }
 0x1ed   : > { %3795 = vmatprep.mubr.bf16.mxu0 %v5439_v1 }
 0x217   : > { %v3205_v2 = vpop.f32.mrf.mxu1 }
 0x218   : > { %v3206_v24 = vadd.f32 %v3205_v2, %v7362_v43 }
 0x219   : > { %v3207_v26 = vpop.f32.mrf.mxu1  ;;  %v3248_v4 = vpop.f32.mrf.mxu0 }
 0x21a   : > { %v3208_v5 = vadd.f32 %v3207_v26, %v7319_v38  ;;  %v3249_v27 = vadd.f32 %v3248_v4, %v7362_v43  ;;  %v3273_v13 = vmul.f32 0.2, %v3206_v24 }
 0x21b   : > { %v3209_v57 = vpop.f32.mrf.mxu1  ;;  %v3250_v6 = vpop.f32.mrf.mxu0 }
 0x21c   : > { %v3210_v7 = vadd.f32 %v3209_v57, %v7333_v40  ;;  %v3251_v56 = vadd.f32 %v3250_v6, %v7319_v38  ;;  %v3274_v30 = vmul.f32 0.2, %v3208_v5  ;;  %v3275_v18 = vmul.f32 0.2, %v3249_v27 }
 0x21d   : > { %v3211_v8 = vpop.f32.mrf.mxu1  ;;  %v3252_v9 = vpop.f32.mrf.mxu0  ;;  %v3313_v3 = vmax.f32 %v3206_v24, %v3273_v13 }
 0x21e   : > { %v3293_v11 = vmul.f32 0.2, %v3210_v7  ;;  %v3212_v1 = vadd.f32 %v3211_v8, %v7303_v36  ;;  %v3253_v14 = vadd.f32 %v3252_v9, %v7333_v40  ;;  %v3276_v16 = vmul.f32 0.2, %v3251_v56 }
 0x21f   : > { %v3254_v15 = vpop.f32.mrf.mxu0  ;;  %v3314_v43 = vmax.f32 %v3208_v5, %v3274_v30  ;;  %v3315_v31 = vmax.f32 %v3249_v27, %v3275_v18 }
 0x220   : > { %v3294_v17 = vmul.f32 0.2, %v3212_v1  ;;  %v3255_v19 = vadd.f32 %v3254_v15, %v7303_v36  ;;  %v3333_v12 = vmax.f32 %v3210_v7, %v3293_v11  ;;  %v3295_v20 = vmul.f32 0.2, %v3253_v14  ;;  %v3410_v36 = vpop.f32.mrf.mxu1 }
 0x221   : > { %v3316_v23 = vmax.f32 %v3251_v56, %v3276_v16  ;;  %v3453_v35 = vpop.f32.mrf.mxu0  ;;  %v3411_v51 = vadd.f32 %v3410_v36, %v7568_v50 }
 0x222   : > { %v3334_v21 = vmax.f32 %v3212_v1, %v3294_v17  ;;  %v3296_v38 = vmul.f32 0.2, %v3255_v19  ;;  %v3335_v22 = vmax.f32 %v3253_v14, %v3295_v20  ;;  %v3353_v32 = vpack.c.bf16 %v3333_v12, %v3313_v3  ;;  %v3412_v34 = vpop.f32.mrf.mxu1 }
 0x223   : > { %v3455_v39 = vpop.f32.mrf.mxu0  ;;  %v3454_v52 = vadd.f32 %v3453_v35, %v7568_v50  ;;  %v3413_v60 = vadd.f32 %v3412_v34, %v7568_v50  ;;  %v3806_v0 = vmul.f32 0.2, %v3411_v51 }
 0x224   : > { %v3336_v28 = vmax.f32 %v3255_v19, %v3296_v38  ;;  %v3354_v29 = vpack.c.bf16 %v3334_v21, %v3314_v43  ;;  %v3355_v33 = vpack.c.bf16 %v3335_v22, %v3315_v31  ;;  %v3414_v37 = vpop.f32.mrf.mxu1  ;;  %v3456_v61 = vadd.f32 %v3455_v39, %v7568_v50 }
 0x225   : > { %v3457_v42 = vpop.f32.mrf.mxu0  ;;  %v3808_v53 = vmul.f32 0.2, %v3454_v52  ;;  %v3807_v25 = vmul.f32 0.2, %v3413_v60  ;;  %v3415_v5 = vadd.f32 %v3414_v37, %v7574_v62  ;;  %v3846_v7 = vmax.f32 %v3411_v51, %v3806_v0 }
 0x226   : > { %3734 = vmatprep.subr.bf16.mxu1 %v3354_v29  ;;  %v3356_v40 = vpack.c.bf16 %v3336_v28, %v3316_v23  ;;  %v3416_v41 = vpop.f32.mrf.mxu1  ;;  %v3809_v2 = vmul.f32 0.2, %v3456_v61  ;;  %v3458_v24 = vadd.f32 %v3457_v42, %v7574_v62 }
 0x227   : > { %3735 = vmatpush1.bf16.msra.mxu1 %v3353_v32  ;;  %v3459_v44 = vpop.f32.mrf.mxu0  ;;  %v3848_v27 = vmax.f32 %v3454_v52, %v3808_v53  ;;  %v3847_v8 = vmax.f32 %v3413_v60, %v3807_v25  ;;  %v3826_v14 = vmul.f32 0.2, %v3415_v5  ;;  %v3417_v16 = vadd.f32 %v3416_v41, %v7574_v62 }
 0x228   : > { %3777 = vmatprep.subr.bf16.mxu0 %v3356_v40  ;;  %v3849_v9 = vmax.f32 %v3456_v61, %v3809_v2  ;;  %v3828_v15 = vmul.f32 0.2, %v3458_v24  ;;  %v3460_v17 = vadd.f32 %v3459_v44, %v7574_v62 }
 0x229   : > { %3778 = vmatpush1.bf16.msra.mxu0 %v3355_v33  ;;  %v3886_v12 = vmax.f32 %v3846_v7, %v3848_v27  ;;  %v3866_v28 = vmax.f32 %v3415_v5, %v3826_v14  ;;  %v3827_v32 = vmul.f32 0.2, %v3417_v16 }
 0x22a   : > { %5362 = vmatmul.mubr.msk.bf16.vlgmr.msra.gmra.mxu1 %vm3372_vm3, %v7502_v10  ;;  %v3496_v45 = vpop.f32.mrf.mxu1  ;;  %v3887_v43 = vmax.f32 %v3847_v8, %v3849_v9  ;;  %v3868_v29 = vmax.f32 %v3458_v24, %v3828_v15  ;;  %v3829_v40 = vmul.f32 0.2, %v3460_v17 }
 0x22b   : > { %v3497_v63 = vadd.f32 %v3496_v45, %v7568_v50 }
 0x22c   : > { %5363 = vmatmul.mubr.msk.bf16.vlgmr.msra.gmra.mxu0 %vm3372_vm3, %v7502_v10  ;;  %v3498_v46 = vpop.f32.mrf.mxu1  ;;  %v3539_v47 = vpop.f32.mrf.mxu0 }
 0x22d   : > { %v3499_v4 = vadd.f32 %v3498_v46, %v7568_v50  ;;  %v3540_v57 = vadd.f32 %v3539_v47, %v7568_v50  ;;  %v3810_v6 = vmul.f32 0.2, %v3497_v63  ;;  %v3888_v47 = vmax.f32 %v3866_v28, %v3868_v29 }
 0x22e   : > { %v3500_v48 = vpop.f32.mrf.mxu1  ;;  %v3541_v49 = vpop.f32.mrf.mxu0 }
 0x22f   : > { %v3542_v56 = vadd.f32 %v3541_v49, %v7568_v50  ;;  %v3811_v1 = vmul.f32 0.2, %v3499_v4  ;;  %v3501_v13 = vadd.f32 %v3500_v48, %v7574_v62  ;;  %v3812_v19 = vmul.f32 0.2, %v3540_v57 }
 0x230   : > { %v3502_v55 = vpop.f32.mrf.mxu1  ;;  %v3543_v58 = vpop.f32.mrf.mxu0  ;;  %v3850_v18 = vmax.f32 %v3497_v63, %v3810_v6  ;;  %v3867_v49 = vmax.f32 %v3417_v16, %v3827_v32 }
 0x231   : > { %v3813_v20 = vmul.f32 0.2, %v3542_v56  ;;  %v3851_v3 = vmax.f32 %v3499_v4, %v3811_v1  ;;  %v3544_v22 = vadd.f32 %v3543_v58, %v7574_v62  ;;  %v3830_v23 = vmul.f32 0.2, %v3501_v13 }
 0x232   : > { %v3545_v10 = vpop.f32.mrf.mxu0  ;;  %v3503_v31 = vadd.f32 %v3502_v55, %v7574_v62  ;;  %v3852_v34 = vmax.f32 %v3540_v57, %v3812_v19  ;;  %v3890_v35 = vmax.f32 %v3886_v12, %v3850_v18  ;;  %v3869_v55 = vmax.f32 %v3460_v17, %v3829_v40 }
 0x233   : > { %v3853_v37 = vmax.f32 %v3542_v56, %v3813_v20  ;;  %v3891_v42 = vmax.f32 %v3887_v43, %v3851_v3  ;;  %v3832_v44 = vmul.f32 0.2, %v3544_v22  ;;  %v3870_v45 = vmax.f32 %v3501_v13, %v3830_v23 }
 0x234   : > { %v3546_v46 = vadd.f32 %v3545_v10, %v7574_v62  ;;  %v3831_v48 = vmul.f32 0.2, %v3503_v31  ;;  %v3894_v0 = vmax.f32 %v3890_v35, %v3852_v34  ;;  %v3889_v4 = vmax.f32 %v3867_v49, %v3869_v55 }
 0x235   : > { %v3895_v53 = vmax.f32 %v3891_v42, %v3853_v37  ;;  %v3892_v25 = vmax.f32 %v3888_v47, %v3870_v45 }
 0x236   : > { %v3833_v2 = vmul.f32 0.2, %v3546_v46  ;;  %v3871_v10 = vmax.f32 %v3503_v31, %v3831_v48 }
 0x238   : > { %v3873_v1 = vmax.f32 %v3546_v46, %v3833_v2  ;;  %v3893_v13 = vmax.f32 %v3889_v4, %v3871_v10 }
 0x23a   : > { %v3897_v40 = vmax.f32 %v3893_v13, %v3873_v1 }
 0x26a   : > { %v3582_v59 = vpop.f32.mrf.mxu1 }
 0x26b   : > { %v3583_v33 = vadd.f32 %v3582_v59, %v7568_v50 }
 0x26c   : > { %v3584_v54 = vpop.f32.mrf.mxu1  ;;  %v3625_v26 = vpop.f32.mrf.mxu0 }
 0x26d   : > { %v3585_v36 = vadd.f32 %v3584_v54, %v7568_v50  ;;  %v3814_v58 = vmul.f32 0.2, %v3583_v33  ;;  %v3626_v52 = vadd.f32 %v3625_v26, %v7568_v50  ;;  %v3872_v54 = vmax.f32 %v3544_v22, %v3832_v44 }
 0x26e   : > { %v3586_v30 = vpop.f32.mrf.mxu1  ;;  %v3627_v11 = vpop.f32.mrf.mxu0 }
 0x26f   : > { %v3815_v51 = vmul.f32 0.2, %v3585_v36  ;;  %v3587_v59 = vadd.f32 %v3586_v30, %v7574_v62  ;;  %v3628_v60 = vadd.f32 %v3627_v11, %v7568_v50  ;;  %v3854_v5 = vmax.f32 %v3583_v33, %v3814_v58 }
 0x270   : > { %v3588_v21 = vpop.f32.mrf.mxu1  ;;  %v3629_v38 = vpop.f32.mrf.mxu0  ;;  %v3816_v57 = vmul.f32 0.2, %v3626_v52  ;;  %v3896_v11 = vmax.f32 %v3892_v25, %v3872_v54 }
 0x271   : > { %v3855_v24 = vmax.f32 %v3585_v36, %v3815_v51  ;;  %v3589_v6 = vadd.f32 %v3588_v21, %v7574_v62  ;;  %v3834_v7 = vmul.f32 0.2, %v3587_v59  ;;  %v3817_v26 = vmul.f32 0.2, %v3628_v60 }
 0x272   : > { %v3631_v39 = vpop.f32.mrf.mxu0  ;;  %v3630_v27 = vadd.f32 %v3629_v38, %v7574_v62  ;;  %v3898_v15 = vmax.f32 %v3894_v0, %v3854_v5  ;;  %v3856_v17 = vmax.f32 %v3626_v52, %v3816_v57 }
 0x273   : > { %v3632_v14 = vadd.f32 %v3631_v39, %v7574_v62  ;;  %v3899_v16 = vmax.f32 %v3895_v53, %v3855_v24  ;;  %v3835_v19 = vmul.f32 0.2, %v3589_v6  ;;  %v3874_v18 = vmax.f32 %v3587_v59, %v3834_v7 }
 0x274   : > { %v3857_v12 = vmax.f32 %v3628_v60, %v3817_v26  ;;  %v3836_v20 = vmul.f32 0.2, %v3630_v27  ;;  %v3902_v31 = vmax.f32 %v3898_v15, %v3856_v17 }
 0x275   : > { %v3837_v29 = vmul.f32 0.2, %v3632_v14  ;;  %v3875_v32 = vmax.f32 %v3589_v6, %v3835_v19  ;;  %v3900_v36 = vmax.f32 %v3896_v11, %v3874_v18 }
 0x276   : > { %v3903_v34 = vmax.f32 %v3899_v16, %v3857_v12  ;;  %v3876_v35 = vmax.f32 %v3630_v27, %v3836_v20 }
 0x277   : > { %v3877_v46 = vmax.f32 %v3632_v14, %v3837_v29  ;;  %v3901_v47 = vmax.f32 %v3897_v40, %v3875_v32 }
 0x278   : > { %v3904_v58 = vmax.f32 %v3900_v36, %v3876_v35 }
 0x279   : > { %v3905_v53 = vmax.f32 %v3901_v47, %v3877_v46 }
 0x2aa   : > { %v3668_v41 = vpop.f32.mrf.mxu1 }
 0x2ab   : > { %v3669_v56 = vadd.f32 %v3668_v41, %v7568_v50 }
 0x2ac   : > { %v3670_v61 = vpop.f32.mrf.mxu1  ;;  %v3711_v63 = vpop.f32.mrf.mxu0 }
 0x2ad   : > { %v3671_v30 = vadd.f32 %v3670_v61, %v7568_v50  ;;  %v3818_v43 = vmul.f32 0.2, %v3669_v56  ;;  %v3712_v22 = vadd.f32 %v3711_v63, %v7568_v50 }
 0x2ae   : > { %v3672_v8 = vpop.f32.mrf.mxu1  ;;  %v3713_v9 = vpop.f32.mrf.mxu0 }
 0x2af   : > { %v3819_v3 = vmul.f32 0.2, %v3671_v30  ;;  %v3673_v23 = vadd.f32 %v3672_v8, %v7574_v62  ;;  %v3714_v28 = vadd.f32 %v3713_v9, %v7568_v50  ;;  %v3858_v37 = vmax.f32 %v3669_v56, %v3818_v43 }
 0x2b0   : > { %v3674_v21 = vpop.f32.mrf.mxu1  ;;  %v3715_v38 = vpop.f32.mrf.mxu0  ;;  %v3820_v42 = vmul.f32 0.2, %v3712_v22 }
 0x2b1   : > { %v3675_v33 = vadd.f32 %v3674_v21, %v7574_v62  ;;  %v3859_v41 = vmax.f32 %v3671_v30, %v3819_v3  ;;  %v3838_v44 = vmul.f32 0.2, %v3673_v23  ;;  %v3821_v45 = vmul.f32 0.2, %v3714_v28 }
 0x2b2   : > { %v3717_v39 = vpop.f32.mrf.mxu0  ;;  %v3716_v49 = vadd.f32 %v3715_v38, %v7574_v62  ;;  %v3906_v51 = vmax.f32 %v3902_v31, %v3858_v37  ;;  %v3860_v59 = vmax.f32 %v3712_v22, %v3820_v42 }
 0x2b3   : > { %v3839_v48 = vmul.f32 0.2, %v3675_v33  ;;  %v3718_v55 = vadd.f32 %v3717_v39, %v7574_v62  ;;  %v3907_v52 = vmax.f32 %v3903_v34, %v3859_v41  ;;  %v3878_v60 = vmax.f32 %v3673_v23, %v3838_v44 }
 0x2b4   : > { %v3861_v61 = vmax.f32 %v3714_v28, %v3821_v45  ;;  %v3840_v25 = vmul.f32 0.2, %v3716_v49  ;;  %v3910_v6 = vmax.f32 %v3906_v51, %v3860_v59 }
 0x2b5   : > { %v3879_v54 = vmax.f32 %v3675_v33, %v3839_v48  ;;  %v3841_v2 = vmul.f32 0.2, %v3718_v55  ;;  %v3908_v7 = vmax.f32 %v3904_v58, %v3878_v60 }
 0x2b6   : > { %v3911_v26 = vmax.f32 %v3907_v52, %v3861_v61  ;;  %v3880_v13 = vmax.f32 %v3716_v49, %v3840_v25 }
 0x2b7   : > { %v3909_v1 = vmax.f32 %v3905_v53, %v3879_v54  ;;  %v3881_v14 = vmax.f32 %v3718_v55, %v3841_v2 }
 0x2b8   : > { %v3912_v29 = vmax.f32 %v3908_v7, %v3880_v13 }
 0x2b9   : > { %v3913_v40 = vmax.f32 %v3909_v1, %v3881_v14 }
 0x2ea   : > { %v3754_v63 = vpop.f32.mrf.mxu1 }
 0x2eb   : > { %v3755_v0 = vadd.f32 %v3754_v63, %v7568_v50 }
 0x2ec   : > { %v3756_v10 = vpop.f32.mrf.mxu1  ;;  %v3797_v4 = vpop.f32.mrf.mxu0 }
 0x2ed   : > { %v3822_v5 = vmul.f32 0.2, %v3755_v0  ;;  %v3757_v24 = vadd.f32 %v3756_v10, %v7568_v50  ;;  %v3798_v57 = vadd.f32 %v3797_v4, %v7568_v50 }
 0x2ee   : > { %v3758_v27 = vpop.f32.mrf.mxu1  ;;  %v3799_v56 = vpop.f32.mrf.mxu0 }
 0x2ef   : > { %v3862_v8 = vmax.f32 %v3755_v0, %v3822_v5  ;;  %v3823_v9 = vmul.f32 0.2, %v3757_v24  ;;  %v3824_v30 = vmul.f32 0.2, %v3798_v57  ;;  %v3759_v11 = vadd.f32 %v3758_v27, %v7574_v62 }
 0x2f0   : > { %v3800_v15 = vadd.f32 %v3799_v56, %v7568_v50  ;;  %v3760_v16 = vpop.f32.mrf.mxu1  ;;  %v3801_v17 = vpop.f32.mrf.mxu0 }
 0x2f1   : > { %v3914_v19 = vmax.f32 %v3910_v6, %v3862_v8  ;;  %v3863_v18 = vmax.f32 %v3757_v24, %v3823_v9  ;;  %v3864_v12 = vmax.f32 %v3798_v57, %v3824_v30  ;;  %v3842_v20 = vmul.f32 0.2, %v3759_v11 }
 0x2f2   : > { %v3825_v43 = vmul.f32 0.2, %v3800_v15  ;;  %v3761_v21 = vadd.f32 %v3760_v16, %v7574_v62  ;;  %v3802_v38 = vadd.f32 %v3801_v17, %v7574_v62  ;;  %v3803_v3 = vpop.f32.mrf.mxu0 }
 0x2f3   : > { %v3915_v22 = vmax.f32 %v3911_v26, %v3863_v18  ;;  %v3882_v23 = vmax.f32 %v3759_v11, %v3842_v20  ;;  %v3804_v28 = vadd.f32 %v3803_v3, %v7574_v62  ;;  %v3918_v33 = vmax.f32 %v3914_v19, %v3864_v12 }
 0x2f4   : > { %v3865_v31 = vmax.f32 %v3800_v15, %v3825_v43  ;;  %v3843_v50 = vmul.f32 0.2, %v3761_v21  ;;  %v3844_v32 = vmul.f32 0.2, %v3802_v38 }
 0x2f5   : > { %v3845_v36 = vmul.f32 0.2, %v3804_v28  ;;  %v3916_v34 = vmax.f32 %v3912_v29, %v3882_v23 }
 0x2f6   : > { %v3919_v35 = vmax.f32 %v3915_v22, %v3865_v31  ;;  %v3883_v37 = vmax.f32 %v3761_v21, %v3843_v50  ;;  %v3884_v39 = vmax.f32 %v3802_v38, %v3844_v32 }
 0x2f7   : > { %v3885_v41 = vmax.f32 %v3804_v28, %v3845_v36 }
 0x2f8   : > { %v5372_v42 = vpack.c.bf16 %v3919_v35, %v3918_v33  ;;  %v3917_v44 = vmax.f32 %v3913_v40, %v3883_v37  ;;  %v3920_v62 = vmax.f32 %v3916_v34, %v3884_v39 }
 0x2fa   : > { %3934 = vst [vmem:[%s372_s13] sm:$0xff] %v5372_v42  ;;  %v3921_v45 = vmax.f32 %v3917_v44, %v3885_v41 }
 0x2fc   : > { %v5373_v46 = vpack.c.bf16 %v3921_v45, %v3920_v62 }
 0x2fe   : > { %3935 = vst [vmem:[%s372_s13 + $0x8] sm:$0xff] %v5373_v46 }
 0x2ff PF: > { %s17_s26 = sadd.s32 1, %s5437_s26   ;;  %s7634_s24 = smov %s5433_s25 }
 0x300   : > { %p14_p5 = scmp.ge.s32.totalorder %s17_s26, 4   ;;  %s7635_s25 = smov %s7637_s27 }
 0x302   :  { %16 = sbr.rel (!%p14_p5) target bundleno = 2 (0x2), region = 84 }

// kernel: forward.3
= control target key start
LH: loop header
LB: loop body
LE: loop exit
PB: predicated region body
PF: predicated region fallthrough
CT: control target
= control target key end

     0   :  { %17 = vsyncpa [#allocation3], 0  ;;  %s9523_s0 = inlined_call_operand.vmem [shape: bf16[2,32,256], index: 0, kind: input, shape index: {}]   ;;  %s9524_s1 = inlined_call_operand.vmem [shape: bf16[2,16,256], index: 1, kind: input, shape index: {}]   ;;  %s9525_s2 = inlined_call_operand.vmem [shape: s32[2,10,256], index: 2, kind: input, shape index: {}]   ;;  %s9526_s3 = inlined_call_operand.vmem [shape: bf16[32,16], index: 3, kind: input, shape index: {}]   ;;  %s9527_s4 = inlined_call_operand.vmem [shape: f32[32,1], index: 4, kind: input, shape index: {}]   ;;  %s9528_s5 = inlined_call_operand.vmem [shape: bf16[32,32], index: 5, kind: input, shape index: {}]   ;;  %s9529_s6 = inlined_call_operand.vmem [shape: f32[32,1], index: 6, kind: input, shape index: {}]   ;;  %s9530_s7 = inlined_call_operand.vmem [shape: bf16[48,16], index: 7, kind: input, shape index: {}]   ;;  %s9531_s8 = inlined_call_operand.vmem [shape: bf16[48,32], index: 8, kind: input, shape index: {}]   ;;  %s9532_s9 = inlined_call_operand.vmem [shape: f32[48,1], index: 9, kind: input, shape index: {}]   ;;  %s9533_s10 = inlined_call_operand.vmem [shape: bf16[32,48], index: 10, kind: input, shape index: {}]   ;;  %s9534_s11 = inlined_call_operand.vmem [shape: f32[32,1], index: 11, kind: input, shape index: {}]   ;;  %s9535_s12 = inlined_call_operand.hbm [shape: f32[2,32,256], index: 12, kind: output, shape index: {}]  }
   0x1   :  { %19 = vsyncpa [#allocation3 + $0x1], 0  ;;  %s6638_s21 = smov 0   ;;  %s6640_s22 = smov 0  }
   0x2   :  { %s6642_s23 = smov 0   ;;  %s6644_s24 = smov 0  }
   0x3   :  { %s6646_s25 = smov 0   ;;  %s6648_s26 = smov 0  }
   0x4 LB: > { %9543 = sst [smem:[#allocation5_spill]] %s6546_s21  ;;  %s5043_s27 = sadd.s32 4294967295, %s6566_s26   ;;  %s6566_s26 = sphi %s6648_s26, %s25_s26   ;;  %s6562_s25 = sphi %s6646_s25, %s9570_s25   ;;  %s6558_s24 = sphi %s6644_s24, %s9569_s24   ;;  %s6554_s23 = sphi %s6642_s23, %s9568_s23   ;;  %s6550_s22 = sphi %s6640_s22, %s9572_s22   ;;  %s6546_s21 = sphi %s6638_s21, %s9571_s21  }
   0x5   : > { %9544 = sst [smem:[#allocation6_spill]] %s6554_s23  ;;  %s5044_s28 = sadd.s32 4294967294, %s6566_s26  }
   0x6   : > { %9545 = sst [smem:[#allocation7_spill]] %s6562_s25  ;;  %s37_s29 = sadd.s32 1, %s6562_s25 }
   0x7   : > { %s317_s30 = sadd.s32 1, %s6554_s23  ;;  %p39_p0 = scmp.ge.s32.totalorder %s37_s29, 2 }
   0x8   : > { %p327_p1 = scmp.ne.s32.totalorder %s6554_s23, %s6550_s22  ;;  %p328_p2 = scmp.eq.s32.totalorder %s5043_s27, 1 }
   0x9   : > { %p333_p3 = scmp.ne.s32.totalorder %s6550_s22, %s6546_s21  ;;  %s9574_s29 = smov (%p39_p0, %s37_s29), 0 }
   0xa   : > { %9546 = sst [smem:[#allocation8_spill]] %s9574_s29  ;;  %p6678_p4 = por %p328_p2, %p327_p1 }
   0xb   : > { %p334_p5 = scmp.eq.s32.totalorder %s5044_s28, 1  ;;  %s312_s14 = ssub.s32 %s6562_s25, %s9574_s29 }
   0xc   : > { %p5047_p6 = scmp.ge.s32.totalorder %s6566_s26, 1  ;;  %p315_p7 = scmp.eq.s32.totalorder %s312_s14, 0 }
   0xd   : > { %p6685_p8 = por %p334_p5, %p333_p3  ;;  %p413_p9 = scmp.lt.s32.totalorder %s6566_s26, 3 }
   0xe   : > { %s6691_s16 = scalar_select %p315_p7, %s6554_s23, %s317_s30  }
   0xf   : > { %s9548_s15 = scalar_select %p6685_p8, 1, 0 }
  0x10   : > { %9550 = sst [smem:[#allocation10_spill]] %s6691_s16  ;;  %p414_p10 = pnand %p5047_p6, %p413_p9 }
  0x11   : > { %9549 = sst [smem:[#allocation9_spill]] %s9548_s15 }
  0x12   : > { %417 = sbr.rel (%p414_p10) target bundleno = 1269 (0x4f5), region = 68 }
  0x17   : > { %p473_p11 = scmp.lt.s32.totalorder %s6558_s24, 1  ;;  %v626_v0 = vlaneseq  ;;  %v9541_v1 = vmov 0   ;;  %v510_v3 = vld [vmem:[%s9527_s4] sm:$0xff]  ;;  %v511_v4 = vld [vmem:[%s9527_s4 + $0x8] sm:$0xff]  ;;  %vm554_vm0 = vcmask 130048   ;;  %v512_v23 = vld [vmem:[%s9527_s4 + $0x10] sm:$0xff] }
  0x18   : > { %593 = vmatprep.mubr.bf16.mxu0 %v9541_v1  ;;  %6456 = vset.pattern.permute.xlu1 %v9541_v1  ;;  %v6466_v18 = vld [vmem:[%s9526_s3] sm:$0xff]   ;;  %v6569_v28 = vmov 1.0|1.0   ;;  %v513_v33 = vld [vmem:[%s9527_s4 + $0x18] sm:$0xff]  ;;  %v6467_v36 = vld [vmem:[%s9526_s3 + $0x8] sm:$0xff]   ;;  %s6391_s30 = sshll.u32 %s6558_s24, 10 }
  0x19   : > { %s474_s17 = scalar_select %p473_p11, %s6558_s24, 1  ;;  %v6697_v2 = vshrl.u32 %v626_v0, 7  ;;  %6455 = vset.pattern.permute.xlu0 %v9541_v1  ;;  %516 = vperm.xlu1 %6456, %v510_v3  }
  0x1a   : > { %526 = vperm.xlu0 %6455, %v512_v23   ;;  %v4722_v23 = vld [vmem:[%s9532_s9 + $0x20] sm:$0xff]  ;;  %s9470_s19 = scalar_lea.hbm %s9535_s12, %s6391_s30  ;;  %s6570_s23 = smov [#allocation2]  }
  0x1b   : > { %s6388_s20 = sshll.u32 %s474_s17, 5  ;;  %s6389_s27 = sshll.u32 %s474_s17, 4  ;;  %v661_v5 = vsub.s32 0, %v6697_v2  ;;  %v893_v6 = vsub.s32 1, %v6697_v2  ;;  %v6731_v10 = vadd.s32 112, %v6697_v2  ;;  %v6734_v11 = vadd.s32 120, %v6697_v2 }
  0x1c   : > { %s6709_s25 = scalar_lea.vmem %s9523_s0, %s6388_s20  ;;  %s6714_s15 = scalar_lea.vmem %s9524_s1, %s6389_s27  ;;  %v6737_v12 = vadd.s32 96, %v6697_v2  ;;  %v6761_v22 = vadd.s32 104, %v6697_v2  ;;  %v6798_v29 = vadd.s32 80, %v6697_v2  ;;  %v6801_v30 = vadd.s32 88, %v6697_v2 }
  0x1d   : > { %s6719_s21 = scalar_lea.vmem %s9525_s2, %s6388_s20  ;;  %521 = vperm.xlu1 %6456, %v511_v4   ;;  %v6457_v7 = vld [vmem:[%s6714_s15 + $0x4] ss:$8 sps:$4 sm:$0xff]   ;;  %v6465_v21 = vld [vmem:[%s6714_s15] ss:$8 sps:$4 sm:$0xff]   ;;  %v6827_v31 = vadd.s32 64, %v6697_v2  ;;  %v6830_v32 = vadd.s32 72, %v6697_v2 }
  0x1e   : > { %v6725_v8 = vld [vmem:[%s6719_s21] sm:$0xff]  ;;  %v6728_v9 = vld [vmem:[%s6719_s21 + $0x8] sm:$0xff]  ;;  %575 = vmatprep.subr.bf16.mxu0 %v6457_v7  ;;  %v616_v13 = vld [vmem:[%s6719_s21 + $0x10] sm:$0x3]  ;;  %531 = vperm.xlu0 %6455, %v513_v33   ;;  %v6860_v34 = vadd.s32 48, %v6697_v2  ;;  %v6863_v35 = vadd.s32 56, %v6697_v2 }
  0x1f   : > { %v617_v14 = vld [vmem:[%s6719_s21 + $0x18] sm:$0x3]  ;;  %v6742_v15 = vrot.slane %v6725_v8, %v661_v5  ;;  %v6745_v16 = vrot.slane %v6728_v9, %v661_v5  ;;  %v6748_v17 = vld [vmem:[%s6709_s25 + $0x4] ss:$8 sps:$4 sm:$0xff]   ;;  %v6754_v19 = vrot.slane %v6725_v8, %v893_v6  ;;  %v6757_v20 = vrot.slane %v6728_v9, %v893_v6  ;;  %576 = vmatpush1.bf16.msra.mxu0 %v6465_v21  ;;  %v7212_v0 = vld [vmem:[%s6709_s25] ss:$8 sps:$4 sm:$0xff]  }
  0x20   : > { %3031 = vmatprep.mubr.bf16.mxu1 %v6748_v17  ;;  %v6767_v24 = vrot.slane %v616_v13, %v661_v5  ;;  %v6769_v25 = vrot.slane %v617_v14, %v661_v5  ;;  %v6771_v26 = vrot.slane %v616_v13, %v893_v6  ;;  %v6773_v27 = vrot.slane %v617_v14, %v893_v6  ;;  %v7220_v3 = vld [vmem:[%s6709_s25 + $0x14] ss:$8 sps:$4 sm:$0xff]   ;;  %v7262_v4 = vld [vmem:[%s6709_s25 + $0x10] ss:$8 sps:$4 sm:$0xff]   ;;  %v7534_v7 = vld [vmem:[%s6719_s21 + $0x8] sm:$0xff]  ;;  %s470_s20 = sand.u32 1, %s6550_s22  }
  0x21   : > { %vm696_vm1 = vcmp.eq.s32.totalorder %v6731_v10, %v6745_v16  ;;  %vm698_vm2 = vcmp.eq.s32.totalorder %v6734_v11, %v6745_v16  ;;  %vm695_vm3 = vcmp.eq.s32.totalorder %v6731_v10, %v6742_v15  ;;  %vm697_vm4 = vcmp.eq.s32.totalorder %v6734_v11, %v6742_v15  ;;  %v623_v33 = vld [vmem:[%s9529_s6 + $0x8] sm:$0xff]  ;;  %s5048_s27 = sshll.u32 %s470_s20, 6  ;;  %s6494_s29 = sshll.u32 %s6570_s23, 4  ;;  %s6495_s29 = int_to_ptr.vmem [resolvable:$false] %s6494_s29 }
  0x22   : > { %vm5705_vm5 = vmpackc.low %vm698_vm2, %vm696_vm1  ;;  %vm928_vm6 = vcmp.eq.s32.totalorder %v6731_v10, %v6757_v20  ;;  %vm930_vm7 = vcmp.eq.s32.totalorder %v6734_v11, %v6757_v20  ;;  %vm927_vm8 = vcmp.eq.s32.totalorder %v6731_v10, %v6754_v19  ;;  %vm929_vm9 = vcmp.eq.s32.totalorder %v6734_v11, %v6754_v19  ;;  %5059 = vmatmul.mubr.msk.bf16.vlgmr.msra.gmra.mxu0 %vm554_vm0, %v6466_v18  ;;  %v622_v18 = vld [vmem:[%s9529_s6] sm:$0xff]  ;;  %s9457_s28 = scalar_lea.vmem [#allocation2], %s5048_s27  ;;  %s6496_s16 = scalar_lea.vmem %s6495_s29, 2048 }
  0x23   : > { %5706 = vmatprep.subr.msk.bf16.mxu1 %vm5705_vm5, %v6569_v28  ;;  %vm5707_vm10 = vmpackc.low %vm697_vm4, %vm695_vm3  ;;  %vm692_vm11 = vcmp.eq.s32.totalorder %v6737_v12, %v6745_v16  ;;  %vm694_vm12 = vcmp.eq.s32.totalorder %v6761_v22, %v6745_v16  ;;  %vm691_vm14 = vcmp.eq.s32.totalorder %v6737_v12, %v6742_v15  ;;  %vm693_vm15 = vcmp.eq.s32.totalorder %v6761_v22, %v6742_v15 }
  0x24   : > { %5708 = vmatpush1.bf16.msk.msra.mxu1 %vm5707_vm10, %v6569_v28  ;;  %vm5769_vm13 = vmpackc.low %vm930_vm7, %vm928_vm6  ;;  %vm924_vm2 = vcmp.eq.s32.totalorder %v6737_v12, %v6757_v20  ;;  %vm926_vm3 = vcmp.eq.s32.totalorder %v6761_v22, %v6757_v20  ;;  %vm923_vm5 = vcmp.eq.s32.totalorder %v6737_v12, %v6754_v19  ;;  %vm925_vm6 = vcmp.eq.s32.totalorder %v6761_v22, %v6754_v19 }
  0x25   : > { %5770 = vmatprep.subr.msk.bf16.mxu0 %vm5769_vm13, %v6569_v28  ;;  %vm5771_vm1 = vmpackc.low %vm929_vm9, %vm927_vm8  ;;  %vm688_vm8 = vcmp.eq.s32.totalorder %v6798_v29, %v6745_v16  ;;  %vm690_vm9 = vcmp.eq.s32.totalorder %v6801_v30, %v6745_v16  ;;  %603 = vmatprep.mubr.bf16.mxu0 %v9541_v1  ;;  %v6898_v37 = vadd.s32 32, %v6697_v2  ;;  %v6901_v38 = vadd.s32 40, %v6697_v2 }
  0x26   : > { %5772 = vmatpush1.bf16.msk.msra.mxu0 %vm5771_vm1, %v6569_v28  ;;  %vm5709_vm4 = vmpackc.low %vm694_vm12, %vm692_vm11  ;;  %vm687_vm11 = vcmp.eq.s32.totalorder %v6798_v29, %v6742_v15  ;;  %vm689_vm12 = vcmp.eq.s32.totalorder %v6801_v30, %v6742_v15  ;;  %v6925_v39 = vadd.s32 16, %v6697_v2  ;;  %v6928_v40 = vadd.s32 24, %v6697_v2 }
  0x27   : > { %5710 = vmatprep.subr.msk.bf16.mxu1 %vm5709_vm4, %v6569_v28  ;;  %vm5711_vm7 = vmpackc.low %vm693_vm15, %vm691_vm14  ;;  %vm920_vm14 = vcmp.eq.s32.totalorder %v6798_v29, %v6757_v20  ;;  %vm922_vm15 = vcmp.eq.s32.totalorder %v6801_v30, %v6757_v20  ;;  %v6952_v41 = vadd.s32 8, %v6697_v2  ;;  %v6975_v42 = vadd.s32 240, %v6697_v2 }
  0x28   : > { %5712 = vmatpush1.bf16.msk.msra.mxu1 %vm5711_vm7, %v6569_v28  ;;  %vm5773_vm10 = vmpackc.low %vm926_vm3, %vm924_vm2  ;;  %vm919_vm2 = vcmp.eq.s32.totalorder %v6798_v29, %v6754_v19  ;;  %vm921_vm3 = vcmp.eq.s32.totalorder %v6801_v30, %v6754_v19  ;;  %v6978_v43 = vadd.s32 248, %v6697_v2  ;;  %v7001_v44 = vadd.s32 224, %v6697_v2 }
  0x29   : > { %5774 = vmatprep.subr.msk.bf16.mxu0 %vm5773_vm10, %v6569_v28  ;;  %vm5775_vm13 = vmpackc.low %vm925_vm6, %vm923_vm5  ;;  %vm684_vm5 = vcmp.eq.s32.totalorder %v6827_v31, %v6745_v16  ;;  %vm686_vm6 = vcmp.eq.s32.totalorder %v6830_v32, %v6745_v16  ;;  %v7004_v45 = vadd.s32 232, %v6697_v2  ;;  %v7027_v46 = vadd.s32 208, %v6697_v2 }
  0x2a   : > { %5776 = vmatpush1.bf16.msk.msra.mxu0 %vm5775_vm13, %v6569_v28  ;;  %vm5713_vm1 = vmpackc.low %vm690_vm9, %vm688_vm8  ;;  %vm683_vm8 = vcmp.eq.s32.totalorder %v6827_v31, %v6742_v15  ;;  %vm685_vm9 = vcmp.eq.s32.totalorder %v6830_v32, %v6742_v15  ;;  %v7030_v47 = vadd.s32 216, %v6697_v2  ;;  %v7053_v48 = vadd.s32 192, %v6697_v2 }
  0x2b   : > { %5714 = vmatprep.subr.msk.bf16.mxu1 %vm5713_vm1, %v6569_v28  ;;  %vm5715_vm4 = vmpackc.low %vm689_vm12, %vm687_vm11  ;;  %vm916_vm11 = vcmp.eq.s32.totalorder %v6827_v31, %v6757_v20  ;;  %vm918_vm12 = vcmp.eq.s32.totalorder %v6830_v32, %v6757_v20  ;;  %5060 = vmatmul.mubr.msk.bf16.gmra.mxu0 %vm554_vm0, %v6467_v36  ;;  %v7056_v49 = vadd.s32 200, %v6697_v2  ;;  %v7079_v50 = vadd.s32 176, %v6697_v2 }
  0x2c   : > { %5716 = vmatpush1.bf16.msk.msra.mxu1 %vm5715_vm4, %v6569_v28  ;;  %vm5777_vm7 = vmpackc.low %vm922_vm15, %vm920_vm14  ;;  %vm915_vm14 = vcmp.eq.s32.totalorder %v6827_v31, %v6754_v19  ;;  %vm917_vm15 = vcmp.eq.s32.totalorder %v6830_v32, %v6754_v19  ;;  %3084 = vmatprep.mubr.bf16.mxu0 %v6748_v17  ;;  %v7082_v51 = vadd.s32 184, %v6697_v2  ;;  %v7105_v52 = vadd.s32 160, %v6697_v2 }
  0x2d   : > { %5778 = vmatprep.subr.msk.bf16.mxu0 %vm5777_vm7, %v6569_v28  ;;  %vm5779_vm10 = vmpackc.low %vm921_vm3, %vm919_vm2  ;;  %vm680_vm2 = vcmp.eq.s32.totalorder %v6860_v34, %v6745_v16  ;;  %vm682_vm3 = vcmp.eq.s32.totalorder %v6863_v35, %v6745_v16  ;;  %v7108_v53 = vadd.s32 168, %v6697_v2  ;;  %v7131_v54 = vadd.s32 144, %v6697_v2 }
  0x2e   : > { %5780 = vmatpush1.bf16.msk.msra.mxu0 %vm5779_vm10, %v6569_v28  ;;  %vm5717_vm13 = vmpackc.low %vm686_vm6, %vm684_vm5  ;;  %vm679_vm5 = vcmp.eq.s32.totalorder %v6860_v34, %v6742_v15  ;;  %vm681_vm6 = vcmp.eq.s32.totalorder %v6863_v35, %v6742_v15  ;;  %v7134_v55 = vadd.s32 152, %v6697_v2  ;;  %v1125_v56 = vsub.s32 2, %v6697_v2 }
  0x2f   : > { %5718 = vmatprep.subr.msk.bf16.mxu1 %vm5717_vm13, %v6569_v28  ;;  %vm5719_vm1 = vmpackc.low %vm685_vm9, %vm683_vm8  ;;  %vm912_vm8 = vcmp.eq.s32.totalorder %v6860_v34, %v6757_v20  ;;  %vm914_vm9 = vcmp.eq.s32.totalorder %v6863_v35, %v6757_v20  ;;  %v7158_v57 = vadd.s32 128, %v6697_v2  ;;  %v7161_v58 = vadd.s32 136, %v6697_v2 }
  0x30   : > { %5720 = vmatpush1.bf16.msk.msra.mxu1 %vm5719_vm1, %v6569_v28  ;;  %vm5781_vm4 = vmpackc.low %vm918_vm12, %vm916_vm11  ;;  %vm911_vm11 = vcmp.eq.s32.totalorder %v6860_v34, %v6754_v19  ;;  %vm913_vm12 = vcmp.eq.s32.totalorder %v6863_v35, %v6754_v19  ;;  %v1357_v59 = vsub.s32 3, %v6697_v2  ;;  %v7180_v60 = vrot.slane %v6728_v9, %v1125_v56 }
  0x31   : > { %5782 = vmatprep.subr.msk.bf16.mxu0 %vm5781_vm4, %v6569_v28  ;;  %vm5783_vm7 = vmpackc.low %vm917_vm15, %vm915_vm14  ;;  %vm676_vm14 = vcmp.eq.s32.totalorder %v6898_v37, %v6745_v16  ;;  %vm678_vm15 = vcmp.eq.s32.totalorder %v6901_v38, %v6745_v16  ;;  %v7188_v61 = vrot.slane %v6725_v8, %v1125_v56  ;;  %v1589_v5 = vsub.s32 4, %v6697_v2 }
  0x32   : > { %5784 = vmatpush1.bf16.msk.msra.mxu0 %vm5783_vm7, %v6569_v28  ;;  %vm5721_vm10 = vmpackc.low %vm682_vm3, %vm680_vm2  ;;  %vm675_vm2 = vcmp.eq.s32.totalorder %v6898_v37, %v6742_v15  ;;  %vm677_vm3 = vcmp.eq.s32.totalorder %v6901_v38, %v6742_v15  ;;  %v7196_v62 = vrot.slane %v6728_v9, %v1357_v59  ;;  %v7204_v63 = vrot.slane %v6725_v8, %v1357_v59  ;;  %v7545_v9 = vld [vmem:[%s6719_s21] sm:$0xff]  ;;  %s4934_s21 = sshll.u32 %s9457_s28, 4  ;;  %s9472_s21 = int_to_ptr.vmem [resolvable:$true] %s4934_s21 }
  0x33   : > { %5722 = vmatprep.subr.msk.bf16.mxu1 %vm5721_vm10, %v6569_v28  ;;  %vm5723_vm13 = vmpackc.low %vm681_vm6, %vm679_vm5  ;;  %vm908_vm5 = vcmp.eq.s32.totalorder %v6898_v37, %v6757_v20  ;;  %vm910_vm6 = vcmp.eq.s32.totalorder %v6901_v38, %v6757_v20  ;;  %v1821_v6 = vsub.s32 5, %v6697_v2  ;;  %v7537_v8 = vrot.slane %v7534_v7, %v1589_v5  ;;  %s6490_s24 = scalar_lea.vmem %s9472_s21, 1024  ;;  %p6497_p1 = scmp.lt.s32.totalorder %s9472_s21, %s6495_s29 }
  0x34   : > { %5724 = vmatpush1.bf16.msk.msra.mxu1 %vm5723_vm13, %v6569_v28  ;;  %vm5785_vm1 = vmpackc.low %vm914_vm9, %vm912_vm8  ;;  %vm907_vm8 = vcmp.eq.s32.totalorder %v6898_v37, %v6754_v19  ;;  %vm909_vm9 = vcmp.eq.s32.totalorder %v6901_v38, %v6754_v19  ;;  %v7548_v13 = vrot.slane %v7545_v9, %v1589_v5  ;;  %v2285_v21 = vsub.s32 7, %v6697_v2  ;;  %v4800_v5 = vld [vmem:[%s9534_s11] sm:$0xff]  ;;  %p6491_p12 = scmp.ne.s32.totalorder %s9472_s21, %s6490_s24  ;;  %p6498_p2 = scmp.lt.s32.totalorder %s6496_s16, %s6490_s24 }
  0x35   : > { %5786 = vmatprep.subr.msk.bf16.mxu0 %vm5785_vm1, %v6569_v28  ;;  %vm5787_vm4 = vmpackc.low %vm913_vm12, %vm911_vm11  ;;  %vm672_vm11 = vcmp.eq.s32.totalorder %v6925_v39, %v6745_v16  ;;  %vm674_vm12 = vcmp.eq.s32.totalorder %v6928_v40, %v6745_v16  ;;  %v7559_v14 = vrot.slane %v7534_v7, %v1821_v6 }
  0x36   : > { %5788 = vmatpush1.bf16.msk.msra.mxu0 %vm5787_vm4, %v6569_v28  ;;  %vm5725_vm7 = vmpackc.low %vm678_vm15, %vm676_vm14  ;;  %vm671_vm14 = vcmp.eq.s32.totalorder %v6925_v39, %v6742_v15  ;;  %vm673_vm15 = vcmp.eq.s32.totalorder %v6928_v40, %v6742_v15  ;;  %v7961_v59 = vrot.slane %v7534_v7, %v2285_v21  ;;  %p6492_p13 = pnand %p6491_p12, %p6678_p4  ;;  %p6499_p3 = por %p6498_p2, %p6497_p1 }
  0x37   : > { %5726 = vmatprep.subr.msk.bf16.mxu1 %vm5725_vm7, %v6569_v28  ;;  %vm5727_vm10 = vmpackc.low %vm677_vm3, %vm675_vm2  ;;  %vm904_vm2 = vcmp.eq.s32.totalorder %v6925_v39, %v6757_v20  ;;  %vm906_vm3 = vcmp.eq.s32.totalorder %v6928_v40, %v6757_v20 }
  0x38   : > { %5728 = vmatpush1.bf16.msk.msra.mxu1 %vm5727_vm10, %v6569_v28  ;;  %vm5789_vm13 = vmpackc.low %vm910_vm6, %vm908_vm5  ;;  %vm903_vm5 = vcmp.eq.s32.totalorder %v6925_v39, %v6754_v19  ;;  %vm905_vm6 = vcmp.eq.s32.totalorder %v6928_v40, %v6754_v19  ;;  %p6493_p0 = pneg %p6492_p13 }
  0x39   : > { %5790 = vmatprep.subr.msk.bf16.mxu0 %vm5789_vm13, %v6569_v28  ;;  %vm5791_vm1 = vmpackc.low %vm909_vm9, %vm907_vm8  ;;  %vm668_vm8 = vcmp.eq.s32.totalorder %v6697_v2, %v6745_v16  ;;  %vm670_vm9 = vcmp.eq.s32.totalorder %v6952_v41, %v6745_v16 }
  0x3a   : > { %5792 = vmatpush1.bf16.msk.msra.mxu0 %vm5791_vm1, %v6569_v28  ;;  %vm5729_vm4 = vmpackc.low %vm674_vm12, %vm672_vm11  ;;  %vm667_vm11 = vcmp.eq.s32.totalorder %v6697_v2, %v6742_v15  ;;  %vm669_vm12 = vcmp.eq.s32.totalorder %v6952_v41, %v6742_v15  ;;  %p6500_p5 = pnand %p6499_p3, %p6493_p0 }
  0x3b   : > { %5730 = vmatprep.subr.msk.bf16.mxu1 %vm5729_vm4, %v6569_v28  ;;  %vm5731_vm7 = vmpackc.low %vm673_vm15, %vm671_vm14  ;;  %vm900_vm14 = vcmp.eq.s32.totalorder %v6697_v2, %v6757_v20  ;;  %vm902_vm15 = vcmp.eq.s32.totalorder %v6952_v41, %v6757_v20 }
  0x3c   : > { %5732 = vmatpush1.bf16.msk.msra.mxu1 %vm5731_vm7, %v6569_v28  ;;  %vm5793_vm10 = vmpackc.low %vm906_vm3, %vm904_vm2  ;;  %vm899_vm2 = vcmp.eq.s32.totalorder %v6697_v2, %v6754_v19  ;;  %vm901_vm3 = vcmp.eq.s32.totalorder %v6952_v41, %v6754_v19 }
  0x3d   : > { %5794 = vmatprep.subr.msk.bf16.mxu0 %vm5793_vm10, %v6569_v28  ;;  %vm5795_vm13 = vmpackc.low %vm905_vm6, %vm903_vm5  ;;  %vm728_vm5 = vcmp.eq.s32.totalorder %v6975_v42, %v6745_v16  ;;  %vm730_vm6 = vcmp.eq.s32.totalorder %v6978_v43, %v6745_v16 }
  0x3e   : > { %5796 = vmatpush1.bf16.msk.msra.mxu0 %vm5795_vm13, %v6569_v28  ;;  %vm5733_vm1 = vmpackc.low %vm670_vm9, %vm668_vm8  ;;  %vm727_vm8 = vcmp.eq.s32.totalorder %v6975_v42, %v6742_v15  ;;  %vm729_vm9 = vcmp.eq.s32.totalorder %v6978_v43, %v6742_v15 }
  0x3f   : > { %5734 = vmatprep.subr.msk.bf16.mxu1 %vm5733_vm1, %v6569_v28  ;;  %vm5735_vm4 = vmpackc.low %vm669_vm12, %vm667_vm11  ;;  %vm960_vm11 = vcmp.eq.s32.totalorder %v6975_v42, %v6757_v20  ;;  %vm962_vm12 = vcmp.eq.s32.totalorder %v6978_v43, %v6757_v20 }
  0x40   : > { %5736 = vmatpush1.bf16.msk.msra.mxu1 %vm5735_vm4, %v6569_v28  ;;  %vm5797_vm7 = vmpackc.low %vm902_vm15, %vm900_vm14  ;;  %vm959_vm14 = vcmp.eq.s32.totalorder %v6975_v42, %v6754_v19  ;;  %vm961_vm15 = vcmp.eq.s32.totalorder %v6978_v43, %v6754_v19 }
  0x41   : > { %5798 = vmatprep.subr.msk.bf16.mxu0 %vm5797_vm7, %v6569_v28  ;;  %vm5799_vm10 = vmpackc.low %vm901_vm3, %vm899_vm2  ;;  %vm724_vm2 = vcmp.eq.s32.totalorder %v7001_v44, %v6745_v16  ;;  %vm726_vm3 = vcmp.eq.s32.totalorder %v7004_v45, %v6745_v16 }
  0x42   : > { %5800 = vmatpush1.bf16.msk.msra.mxu0 %vm5799_vm10, %v6569_v28  ;;  %vm5737_vm13 = vmpackc.low %vm730_vm6, %vm728_vm5  ;;  %vm723_vm5 = vcmp.eq.s32.totalorder %v7001_v44, %v6742_v15  ;;  %vm725_vm6 = vcmp.eq.s32.totalorder %v7004_v45, %v6742_v15 }
  0x43   : > { %5738 = vmatprep.subr.msk.bf16.mxu1 %vm5737_vm13, %v6569_v28  ;;  %vm5739_vm1 = vmpackc.low %vm729_vm9, %vm727_vm8  ;;  %vm956_vm8 = vcmp.eq.s32.totalorder %v7001_v44, %v6757_v20  ;;  %vm958_vm9 = vcmp.eq.s32.totalorder %v7004_v45, %v6757_v20 }
  0x44   : > { %5740 = vmatpush2.bf16.msk.msra.mxu1 %vm5739_vm1, %v6569_v28  ;;  %vm5801_vm4 = vmpackc.low %vm962_vm12, %vm960_vm11  ;;  %vm955_vm11 = vcmp.eq.s32.totalorder %v7001_v44, %v6754_v19  ;;  %vm957_vm12 = vcmp.eq.s32.totalorder %v7004_v45, %v6754_v19 }
  0x45   : > { %5802 = vmatprep.subr.msk.bf16.mxu0 %vm5801_vm4, %v6569_v28  ;;  %vm5803_vm7 = vmpackc.low %vm961_vm15, %vm959_vm14  ;;  %vm720_vm14 = vcmp.eq.s32.totalorder %v7027_v46, %v6745_v16  ;;  %vm722_vm15 = vcmp.eq.s32.totalorder %v7030_v47, %v6745_v16 }
  0x46   : > { %5804 = vmatpush2.bf16.msk.msra.mxu0 %vm5803_vm7, %v6569_v28  ;;  %vm5741_vm10 = vmpackc.low %vm726_vm3, %vm724_vm2  ;;  %vm719_vm2 = vcmp.eq.s32.totalorder %v7027_v46, %v6742_v15  ;;  %vm721_vm3 = vcmp.eq.s32.totalorder %v7030_v47, %v6742_v15 }
  0x47   : > { %5742 = vmatprep.subr.msk.bf16.mxu1 %vm5741_vm10, %v6569_v28  ;;  %vm5743_vm13 = vmpackc.low %vm725_vm6, %vm723_vm5  ;;  %vm952_vm5 = vcmp.eq.s32.totalorder %v7027_v46, %v6757_v20  ;;  %vm954_vm6 = vcmp.eq.s32.totalorder %v7030_v47, %v6757_v20 }
  0x48   : > { %5744 = vmatpush2.bf16.msk.msra.mxu1 %vm5743_vm13, %v6569_v28  ;;  %vm5805_vm1 = vmpackc.low %vm958_vm9, %vm956_vm8  ;;  %vm951_vm8 = vcmp.eq.s32.totalorder %v7027_v46, %v6754_v19  ;;  %vm953_vm9 = vcmp.eq.s32.totalorder %v7030_v47, %v6754_v19 }
  0x49   : > { %5806 = vmatprep.subr.msk.bf16.mxu0 %vm5805_vm1, %v6569_v28  ;;  %vm5807_vm4 = vmpackc.low %vm957_vm12, %vm955_vm11  ;;  %vm716_vm11 = vcmp.eq.s32.totalorder %v7053_v48, %v6745_v16  ;;  %vm718_vm12 = vcmp.eq.s32.totalorder %v7056_v49, %v6745_v16 }
  0x4a   : > { %5808 = vmatpush2.bf16.msk.msra.mxu0 %vm5807_vm4, %v6569_v28  ;;  %vm5745_vm7 = vmpackc.low %vm722_vm15, %vm720_vm14  ;;  %vm715_vm14 = vcmp.eq.s32.totalorder %v7053_v48, %v6742_v15  ;;  %vm717_vm15 = vcmp.eq.s32.totalorder %v7056_v49, %v6742_v15 }
  0x4b   : > { %5746 = vmatprep.subr.msk.bf16.mxu1 %vm5745_vm7, %v6569_v28  ;;  %vm5747_vm10 = vmpackc.low %vm721_vm3, %vm719_vm2  ;;  %vm948_vm2 = vcmp.eq.s32.totalorder %v7053_v48, %v6757_v20  ;;  %vm950_vm3 = vcmp.eq.s32.totalorder %v7056_v49, %v6757_v20 }
  0x4c   : > { %5748 = vmatpush2.bf16.msk.msra.mxu1 %vm5747_vm10, %v6569_v28  ;;  %vm5809_vm13 = vmpackc.low %vm954_vm6, %vm952_vm5  ;;  %vm947_vm5 = vcmp.eq.s32.totalorder %v7053_v48, %v6754_v19  ;;  %vm949_vm6 = vcmp.eq.s32.totalorder %v7056_v49, %v6754_v19 }
  0x4d   : > { %5810 = vmatprep.subr.msk.bf16.mxu0 %vm5809_vm13, %v6569_v28  ;;  %vm5811_vm1 = vmpackc.low %vm953_vm9, %vm951_vm8  ;;  %vm712_vm8 = vcmp.eq.s32.totalorder %v7079_v50, %v6745_v16  ;;  %vm714_vm9 = vcmp.eq.s32.totalorder %v7082_v51, %v6745_v16 }
  0x4e   : > { %5812 = vmatpush2.bf16.msk.msra.mxu0 %vm5811_vm1, %v6569_v28  ;;  %vm5749_vm4 = vmpackc.low %vm718_vm12, %vm716_vm11  ;;  %vm711_vm11 = vcmp.eq.s32.totalorder %v7079_v50, %v6742_v15  ;;  %vm713_vm12 = vcmp.eq.s32.totalorder %v7082_v51, %v6742_v15 }
  0x4f   : > { %5750 = vmatprep.subr.msk.bf16.mxu1 %vm5749_vm4, %v6569_v28  ;;  %vm5751_vm7 = vmpackc.low %vm717_vm15, %vm715_vm14  ;;  %vm944_vm14 = vcmp.eq.s32.totalorder %v7079_v50, %v6757_v20  ;;  %vm946_vm15 = vcmp.eq.s32.totalorder %v7082_v51, %v6757_v20 }
  0x50   : > { %5752 = vmatpush2.bf16.msk.msra.mxu1 %vm5751_vm7, %v6569_v28  ;;  %vm5813_vm10 = vmpackc.low %vm950_vm3, %vm948_vm2  ;;  %vm943_vm2 = vcmp.eq.s32.totalorder %v7079_v50, %v6754_v19  ;;  %vm945_vm3 = vcmp.eq.s32.totalorder %v7082_v51, %v6754_v19 }
  0x51   : > { %5814 = vmatprep.subr.msk.bf16.mxu0 %vm5813_vm10, %v6569_v28  ;;  %vm5815_vm13 = vmpackc.low %vm949_vm6, %vm947_vm5  ;;  %vm708_vm5 = vcmp.eq.s32.totalorder %v7105_v52, %v6745_v16  ;;  %vm710_vm6 = vcmp.eq.s32.totalorder %v7108_v53, %v6745_v16 }
  0x52   : > { %5816 = vmatpush2.bf16.msk.msra.mxu0 %vm5815_vm13, %v6569_v28  ;;  %vm5753_vm1 = vmpackc.low %vm714_vm9, %vm712_vm8  ;;  %vm707_vm8 = vcmp.eq.s32.totalorder %v7105_v52, %v6742_v15  ;;  %vm709_vm9 = vcmp.eq.s32.totalorder %v7108_v53, %v6742_v15 }
  0x53   : > { %5754 = vmatprep.subr.msk.bf16.mxu1 %vm5753_vm1, %v6569_v28  ;;  %vm5755_vm4 = vmpackc.low %vm713_vm12, %vm711_vm11  ;;  %vm940_vm11 = vcmp.eq.s32.totalorder %v7105_v52, %v6757_v20  ;;  %vm942_vm12 = vcmp.eq.s32.totalorder %v7108_v53, %v6757_v20 }
  0x54   : > { %5756 = vmatpush2.bf16.msk.msra.mxu1 %vm5755_vm4, %v6569_v28  ;;  %vm5817_vm7 = vmpackc.low %vm946_vm15, %vm944_vm14  ;;  %vm939_vm14 = vcmp.eq.s32.totalorder %v7105_v52, %v6754_v19  ;;  %vm941_vm15 = vcmp.eq.s32.totalorder %v7108_v53, %v6754_v19 }
  0x55   : > { %5818 = vmatprep.subr.msk.bf16.mxu0 %vm5817_vm7, %v6569_v28  ;;  %vm5819_vm10 = vmpackc.low %vm945_vm3, %vm943_vm2  ;;  %vm704_vm2 = vcmp.eq.s32.totalorder %v7131_v54, %v6745_v16  ;;  %vm706_vm3 = vcmp.eq.s32.totalorder %v7134_v55, %v6745_v16 }
  0x56   : > { %5820 = vmatpush2.bf16.msk.msra.mxu0 %vm5819_vm10, %v6569_v28  ;;  %vm5757_vm13 = vmpackc.low %vm710_vm6, %vm708_vm5  ;;  %vm703_vm5 = vcmp.eq.s32.totalorder %v7131_v54, %v6742_v15  ;;  %vm705_vm6 = vcmp.eq.s32.totalorder %v7134_v55, %v6742_v15 }
  0x57   : > { %5758 = vmatprep.subr.msk.bf16.mxu1 %vm5757_vm13, %v6569_v28  ;;  %vm5759_vm1 = vmpackc.low %vm709_vm9, %vm707_vm8  ;;  %vm936_vm8 = vcmp.eq.s32.totalorder %v7131_v54, %v6757_v20  ;;  %vm938_vm9 = vcmp.eq.s32.totalorder %v7134_v55, %v6757_v20 }
  0x58   : > { %5760 = vmatpush2.bf16.msk.msra.mxu1 %vm5759_vm1, %v6569_v28  ;;  %vm5821_vm4 = vmpackc.low %vm942_vm12, %vm940_vm11  ;;  %vm935_vm11 = vcmp.eq.s32.totalorder %v7131_v54, %v6754_v19  ;;  %vm937_vm12 = vcmp.eq.s32.totalorder %v7134_v55, %v6754_v19 }
  0x59   : > { %5822 = vmatprep.subr.msk.bf16.mxu0 %vm5821_vm4, %v6569_v28  ;;  %vm5823_vm7 = vmpackc.low %vm941_vm15, %vm939_vm14  ;;  %vm700_vm14 = vcmp.eq.s32.totalorder %v7158_v57, %v6745_v16  ;;  %vm702_vm15 = vcmp.eq.s32.totalorder %v7161_v58, %v6745_v16  ;;  %v7659_v16 = vld [vmem:[%s6709_s25 + $0x4] ss:$8 sps:$4 sm:$0xff]  }
  0x5a   : > { %5824 = vmatpush2.bf16.msk.msra.mxu0 %vm5823_vm7, %v6569_v28  ;;  %vm5761_vm10 = vmpackc.low %vm706_vm3, %vm704_vm2  ;;  %vm699_vm2 = vcmp.eq.s32.totalorder %v7158_v57, %v6742_v15  ;;  %vm701_vm3 = vcmp.eq.s32.totalorder %v7161_v58, %v6742_v15  ;;  %v7573_v15 = vrot.slane %v7545_v9, %v1821_v6  ;;  %v8110_v6 = vld [vmem:[%s6709_s25 + $0x10] ss:$8 sps:$4 sm:$0xff]  }
  0x5b   : > { %5762 = vmatprep.subr.msk.bf16.mxu1 %vm5761_vm10, %v6569_v28  ;;  %vm5763_vm13 = vmpackc.low %vm705_vm6, %vm703_vm5  ;;  %vm932_vm5 = vcmp.eq.s32.totalorder %v7158_v57, %v6757_v20  ;;  %vm934_vm6 = vcmp.eq.s32.totalorder %v7161_v58, %v6757_v20  ;;  %v2053_v20 = vsub.s32 6, %v6697_v2 }
  0x5c   : > { %5764 = vmatpush2.bf16.msk.msra.mxu1 %vm5763_vm13, %v6569_v28  ;;  %vm5825_vm1 = vmpackc.low %vm938_vm9, %vm936_vm8  ;;  %vm931_vm8 = vcmp.eq.s32.totalorder %v7158_v57, %v6754_v19  ;;  %vm933_vm9 = vcmp.eq.s32.totalorder %v7161_v58, %v6754_v19  ;;  %v625_v19 = vld [vmem:[%s9529_s6 + $0x18] sm:$0xff] }
  0x5d   : > { %5826 = vmatprep.subr.msk.bf16.mxu0 %vm5825_vm1, %v6569_v28  ;;  %vm5827_vm4 = vmpackc.low %vm937_vm12, %vm935_vm11  ;;  %vm1160_vm11 = vcmp.eq.s32.totalorder %v6731_v10, %v7180_v60  ;;  %vm1162_vm12 = vcmp.eq.s32.totalorder %v6734_v11, %v7180_v60  ;;  %3746 = vperm.xlu1 %6456, %v625_v19   ;;  %v7933_v36 = vrot.slane %v7534_v7, %v2053_v20  ;;  %v4719_v7 = vld [vmem:[%s9532_s9 + $0x8] sm:$0xff] }
  0x5e   : > { %5828 = vmatpush2.bf16.msk.msra.mxu0 %vm5827_vm4, %v6569_v28  ;;  %vm5765_vm7 = vmpackc.low %vm702_vm15, %vm700_vm14  ;;  %vm1159_vm14 = vcmp.eq.s32.totalorder %v6731_v10, %v7188_v61  ;;  %vm1161_vm15 = vcmp.eq.s32.totalorder %v6734_v11, %v7188_v61  ;;  %v7947_v56 = vrot.slane %v7545_v9, %v2053_v20 }
  0x5f   : > { %5766 = vmatprep.subr.msk.bf16.mxu1 %vm5765_vm7, %v6569_v28  ;;  %vm5767_vm10 = vmpackc.low %vm701_vm3, %vm699_vm2  ;;  %vm1392_vm2 = vcmp.eq.s32.totalorder %v6731_v10, %v7196_v62  ;;  %vm1394_vm3 = vcmp.eq.s32.totalorder %v6734_v11, %v7196_v62 }
  0x60   : > { %5768 = vmatpush2.bf16.msk.msra.mxu1 %vm5767_vm10, %v6569_v28  ;;  %vm5829_vm13 = vmpackc.low %vm934_vm6, %vm932_vm5  ;;  %vm1391_vm5 = vcmp.eq.s32.totalorder %v6731_v10, %v7204_v63  ;;  %vm1393_vm6 = vcmp.eq.s32.totalorder %v6734_v11, %v7204_v63 }
  0x61   : > { %5830 = vmatprep.subr.msk.bf16.mxu0 %vm5829_vm13, %v6569_v28  ;;  %vm5831_vm1 = vmpackc.low %vm933_vm9, %vm931_vm8  ;;  %vm1156_vm8 = vcmp.eq.s32.totalorder %v6737_v12, %v7180_v60  ;;  %vm1158_vm9 = vcmp.eq.s32.totalorder %v6761_v22, %v7180_v60  ;;  %3736 = vperm.xlu1 %6456, %v623_v33  }
  0x62   : > { %5832 = vmatpush2.bf16.msk.msra.mxu0 %vm5831_vm1, %v6569_v28  ;;  %vm5833_vm4 = vmpackc.low %vm1162_vm12, %vm1160_vm11  ;;  %vm1155_vm11 = vcmp.eq.s32.totalorder %v6737_v12, %v7188_v61  ;;  %vm1157_vm12 = vcmp.eq.s32.totalorder %v6761_v22, %v7188_v61 }
  0x63   : > { %3032 = vmatmul.mubr.bf16.vlgmr.msra.gmra.mxu1 %v7212_v0  ;;  %5834 = vmatprep.subr.msk.bf16.mxu1 %vm5833_vm4, %v6569_v28  ;;  %vm5835_vm7 = vmpackc.low %vm1161_vm15, %vm1159_vm14  ;;  %vm1388_vm14 = vcmp.eq.s32.totalorder %v6737_v12, %v7196_v62  ;;  %vm1390_vm15 = vcmp.eq.s32.totalorder %v6761_v22, %v7196_v62 }
  0x64   : > { %5836 = vmatpush1.bf16.msk.msra.mxu1 %vm5835_vm7, %v6569_v28  ;;  %vm5897_vm10 = vmpackc.low %vm1394_vm3, %vm1392_vm2  ;;  %3041 = vmatprep.mubr.bf16.mxu1 %v7220_v3  ;;  %vm1387_vm2 = vcmp.eq.s32.totalorder %v6737_v12, %v7204_v63  ;;  %vm1389_vm3 = vcmp.eq.s32.totalorder %v6761_v22, %v7204_v63 }
  0x65   : > { %3085 = vmatmul.mubr.bf16.vlgmr.msra.gmra.mxu0 %v7212_v0  ;;  %5898 = vmatprep.subr.msk.bf16.mxu0 %vm5897_vm10, %v6569_v28  ;;  %vm5899_vm13 = vmpackc.low %vm1393_vm6, %vm1391_vm5  ;;  %vm1152_vm5 = vcmp.eq.s32.totalorder %v6798_v29, %v7180_v60  ;;  %vm1154_vm6 = vcmp.eq.s32.totalorder %v6801_v30, %v7180_v60 }
  0x66   : > { %5900 = vmatpush1.bf16.msk.msra.mxu0 %vm5899_vm13, %v6569_v28  ;;  %vm5837_vm1 = vmpackc.low %vm1158_vm9, %vm1156_vm8  ;;  %3094 = vmatprep.mubr.bf16.mxu0 %v7220_v3  ;;  %vm1151_vm8 = vcmp.eq.s32.totalorder %v6798_v29, %v7188_v61  ;;  %vm1153_vm9 = vcmp.eq.s32.totalorder %v6801_v30, %v7188_v61 }
  0x67   : > { %5838 = vmatprep.subr.msk.bf16.mxu1 %vm5837_vm1, %v6569_v28  ;;  %vm5839_vm4 = vmpackc.low %vm1157_vm12, %vm1155_vm11  ;;  %vm1384_vm11 = vcmp.eq.s32.totalorder %v6798_v29, %v7196_v62  ;;  %vm1386_vm12 = vcmp.eq.s32.totalorder %v6801_v30, %v7196_v62 }
  0x68   : > { %5840 = vmatpush1.bf16.msk.msra.mxu1 %vm5839_vm4, %v6569_v28  ;;  %vm5901_vm7 = vmpackc.low %vm1390_vm15, %vm1388_vm14  ;;  %vm1383_vm14 = vcmp.eq.s32.totalorder %v6798_v29, %v7204_v63  ;;  %vm1385_vm15 = vcmp.eq.s32.totalorder %v6801_v30, %v7204_v63 }
  0x69   : > { %5902 = vmatprep.subr.msk.bf16.mxu0 %vm5901_vm7, %v6569_v28  ;;  %vm5903_vm10 = vmpackc.low %vm1389_vm3, %vm1387_vm2  ;;  %vm1148_vm2 = vcmp.eq.s32.totalorder %v6827_v31, %v7180_v60  ;;  %vm1150_vm3 = vcmp.eq.s32.totalorder %v6830_v32, %v7180_v60 }
  0x6a   : > { %5904 = vmatpush1.bf16.msk.msra.mxu0 %vm5903_vm10, %v6569_v28  ;;  %vm5841_vm13 = vmpackc.low %vm1154_vm6, %vm1152_vm5  ;;  %vm1147_vm5 = vcmp.eq.s32.totalorder %v6827_v31, %v7188_v61  ;;  %vm1149_vm6 = vcmp.eq.s32.totalorder %v6830_v32, %v7188_v61 }
  0x6b   : > { %3042 = vmatmul.mubr.bf16.gmra.mxu1 %v7262_v4  ;;  %5842 = vmatprep.subr.msk.bf16.mxu1 %vm5841_vm13, %v6569_v28  ;;  %vm5843_vm1 = vmpackc.low %vm1153_vm9, %vm1151_vm8  ;;  %vm1380_vm8 = vcmp.eq.s32.totalorder %v6827_v31, %v7196_v62  ;;  %vm1382_vm9 = vcmp.eq.s32.totalorder %v6830_v32, %v7196_v62 }
  0x6c   : > { %5844 = vmatpush1.bf16.msk.msra.mxu1 %vm5843_vm1, %v6569_v28  ;;  %vm5905_vm4 = vmpackc.low %vm1386_vm12, %vm1384_vm11  ;;  %3137 = vmatprep.mubr.bf16.mxu1 %v6748_v17  ;;  %vm1379_vm11 = vcmp.eq.s32.totalorder %v6827_v31, %v7204_v63  ;;  %vm1381_vm12 = vcmp.eq.s32.totalorder %v6830_v32, %v7204_v63 }
  0x6d   : > { %3095 = vmatmul.mubr.bf16.gmra.mxu0 %v7262_v4  ;;  %5906 = vmatprep.subr.msk.bf16.mxu0 %vm5905_vm4, %v6569_v28  ;;  %vm5907_vm7 = vmpackc.low %vm1385_vm15, %vm1383_vm14  ;;  %vm1144_vm14 = vcmp.eq.s32.totalorder %v6860_v34, %v7180_v60  ;;  %vm1146_vm15 = vcmp.eq.s32.totalorder %v6863_v35, %v7180_v60 }
  0x6e   : > { %5908 = vmatpush1.bf16.msk.msra.mxu0 %vm5907_vm7, %v6569_v28  ;;  %vm5845_vm10 = vmpackc.low %vm1150_vm3, %vm1148_vm2  ;;  %3190 = vmatprep.mubr.bf16.mxu0 %v6748_v17  ;;  %vm1143_vm2 = vcmp.eq.s32.totalorder %v6860_v34, %v7188_v61  ;;  %vm1145_vm3 = vcmp.eq.s32.totalorder %v6863_v35, %v7188_v61  ;;  %v624_v17 = vld [vmem:[%s9529_s6 + $0x10] sm:$0xff] }
  0x6f   : > { %5846 = vmatprep.subr.msk.bf16.mxu1 %vm5845_vm10, %v6569_v28  ;;  %vm5847_vm13 = vmpackc.low %vm1149_vm6, %vm1147_vm5  ;;  %vm1376_vm5 = vcmp.eq.s32.totalorder %v6860_v34, %v7196_v62  ;;  %vm1378_vm6 = vcmp.eq.s32.totalorder %v6863_v35, %v7196_v62  ;;  %3741 = vperm.xlu0 %6455, %v624_v17  }
  0x70   : > { %5848 = vmatpush1.bf16.msk.msra.mxu1 %vm5847_vm13, %v6569_v28  ;;  %vm5909_vm1 = vmpackc.low %vm1382_vm9, %vm1380_vm8  ;;  %vm1375_vm8 = vcmp.eq.s32.totalorder %v6860_v34, %v7204_v63  ;;  %vm1377_vm9 = vcmp.eq.s32.totalorder %v6863_v35, %v7204_v63 }
  0x71   : > { %5910 = vmatprep.subr.msk.bf16.mxu0 %vm5909_vm1, %v6569_v28  ;;  %vm5911_vm4 = vmpackc.low %vm1381_vm12, %vm1379_vm11  ;;  %vm1140_vm11 = vcmp.eq.s32.totalorder %v6898_v37, %v7180_v60  ;;  %vm1142_vm12 = vcmp.eq.s32.totalorder %v6901_v38, %v7180_v60 }
  0x72   : > { %5912 = vmatpush1.bf16.msk.msra.mxu0 %vm5911_vm4, %v6569_v28  ;;  %vm5849_vm7 = vmpackc.low %vm1146_vm15, %vm1144_vm14  ;;  %vm1139_vm14 = vcmp.eq.s32.totalorder %v6898_v37, %v7188_v61  ;;  %vm1141_vm15 = vcmp.eq.s32.totalorder %v6901_v38, %v7188_v61 }
  0x73   : > { %5850 = vmatprep.subr.msk.bf16.mxu1 %vm5849_vm7, %v6569_v28  ;;  %vm5851_vm10 = vmpackc.low %vm1145_vm3, %vm1143_vm2  ;;  %vm1372_vm2 = vcmp.eq.s32.totalorder %v6898_v37, %v7196_v62  ;;  %vm1374_vm3 = vcmp.eq.s32.totalorder %v6901_v38, %v7196_v62  ;;  %3731 = vperm.xlu0 %6455, %v622_v18  }
  0x74   : > { %5852 = vmatpush1.bf16.msk.msra.mxu1 %vm5851_vm10, %v6569_v28  ;;  %vm5913_vm13 = vmpackc.low %vm1378_vm6, %vm1376_vm5  ;;  %vm1371_vm5 = vcmp.eq.s32.totalorder %v6898_v37, %v7204_v63  ;;  %vm1373_vm6 = vcmp.eq.s32.totalorder %v6901_v38, %v7204_v63 }
  0x75   : > { %5914 = vmatprep.subr.msk.bf16.mxu0 %vm5913_vm13, %v6569_v28  ;;  %vm5915_vm1 = vmpackc.low %vm1377_vm9, %vm1375_vm8  ;;  %vm1136_vm8 = vcmp.eq.s32.totalorder %v6925_v39, %v7180_v60  ;;  %vm1138_vm9 = vcmp.eq.s32.totalorder %v6928_v40, %v7180_v60 }
  0x76   : > { %5916 = vmatpush1.bf16.msk.msra.mxu0 %vm5915_vm1, %v6569_v28  ;;  %vm5853_vm4 = vmpackc.low %vm1142_vm12, %vm1140_vm11  ;;  %vm1135_vm11 = vcmp.eq.s32.totalorder %v6925_v39, %v7188_v61  ;;  %vm1137_vm12 = vcmp.eq.s32.totalorder %v6928_v40, %v7188_v61 }
  0x77   : > { %5854 = vmatprep.subr.msk.bf16.mxu1 %vm5853_vm4, %v6569_v28  ;;  %vm5855_vm7 = vmpackc.low %vm1141_vm15, %vm1139_vm14  ;;  %vm1368_vm14 = vcmp.eq.s32.totalorder %v6925_v39, %v7196_v62  ;;  %vm1370_vm15 = vcmp.eq.s32.totalorder %v6928_v40, %v7196_v62  ;;  %4746 = vperm.xlu0 %6455, %v4722_v23  }
  0x78   : > { %5856 = vmatpush1.bf16.msk.msra.mxu1 %vm5855_vm7, %v6569_v28  ;;  %vm5917_vm10 = vmpackc.low %vm1374_vm3, %vm1372_vm2  ;;  %vm1367_vm2 = vcmp.eq.s32.totalorder %v6925_v39, %v7204_v63  ;;  %vm1369_vm3 = vcmp.eq.s32.totalorder %v6928_v40, %v7204_v63 }
  0x79   : > { %5918 = vmatprep.subr.msk.bf16.mxu0 %vm5917_vm10, %v6569_v28  ;;  %vm5919_vm13 = vmpackc.low %vm1373_vm6, %vm1371_vm5  ;;  %vm1132_vm5 = vcmp.eq.s32.totalorder %v6697_v2, %v7180_v60  ;;  %vm1134_vm6 = vcmp.eq.s32.totalorder %v6952_v41, %v7180_v60 }
  0x7a   : > { %5920 = vmatpush1.bf16.msk.msra.mxu0 %vm5919_vm13, %v6569_v28  ;;  %vm5857_vm1 = vmpackc.low %vm1138_vm9, %vm1136_vm8  ;;  %vm1131_vm8 = vcmp.eq.s32.totalorder %v6697_v2, %v7188_v61  ;;  %vm1133_vm9 = vcmp.eq.s32.totalorder %v6952_v41, %v7188_v61 }
  0x7b   : > { %5858 = vmatprep.subr.msk.bf16.mxu1 %vm5857_vm1, %v6569_v28  ;;  %vm5859_vm4 = vmpackc.low %vm1137_vm12, %vm1135_vm11  ;;  %vm1364_vm11 = vcmp.eq.s32.totalorder %v6697_v2, %v7196_v62  ;;  %vm1366_vm12 = vcmp.eq.s32.totalorder %v6952_v41, %v7196_v62 }
  0x7c   : > { %5860 = vmatpush1.bf16.msk.msra.mxu1 %vm5859_vm4, %v6569_v28  ;;  %vm5921_vm7 = vmpackc.low %vm1370_vm15, %vm1368_vm14  ;;  %vm1363_vm14 = vcmp.eq.s32.totalorder %v6697_v2, %v7204_v63  ;;  %vm1365_vm15 = vcmp.eq.s32.totalorder %v6952_v41, %v7204_v63 }
  0x7d   : > { %5922 = vmatprep.subr.msk.bf16.mxu0 %vm5921_vm7, %v6569_v28  ;;  %vm5923_vm10 = vmpackc.low %vm1369_vm3, %vm1367_vm2  ;;  %vm1192_vm2 = vcmp.eq.s32.totalorder %v6975_v42, %v7180_v60  ;;  %vm1194_vm3 = vcmp.eq.s32.totalorder %v6978_v43, %v7180_v60 }
  0x7e   : > { %5924 = vmatpush1.bf16.msk.msra.mxu0 %vm5923_vm10, %v6569_v28  ;;  %vm5861_vm13 = vmpackc.low %vm1134_vm6, %vm1132_vm5  ;;  %vm1191_vm5 = vcmp.eq.s32.totalorder %v6975_v42, %v7188_v61  ;;  %vm1193_vm6 = vcmp.eq.s32.totalorder %v6978_v43, %v7188_v61 }
  0x7f   : > { %5862 = vmatprep.subr.msk.bf16.mxu1 %vm5861_vm13, %v6569_v28  ;;  %vm5863_vm1 = vmpackc.low %vm1133_vm9, %vm1131_vm8  ;;  %vm1424_vm8 = vcmp.eq.s32.totalorder %v6975_v42, %v7196_v62  ;;  %vm1426_vm9 = vcmp.eq.s32.totalorder %v6978_v43, %v7196_v62 }
  0x80   : > { %5864 = vmatpush1.bf16.msk.msra.mxu1 %vm5863_vm1, %v6569_v28  ;;  %vm5925_vm4 = vmpackc.low %vm1366_vm12, %vm1364_vm11  ;;  %vm1423_vm11 = vcmp.eq.s32.totalorder %v6975_v42, %v7204_v63  ;;  %vm1425_vm12 = vcmp.eq.s32.totalorder %v6978_v43, %v7204_v63 }
  0x81   : > { %5926 = vmatprep.subr.msk.bf16.mxu0 %vm5925_vm4, %v6569_v28  ;;  %vm5927_vm7 = vmpackc.low %vm1365_vm15, %vm1363_vm14  ;;  %vm1188_vm14 = vcmp.eq.s32.totalorder %v7001_v44, %v7180_v60  ;;  %vm1190_vm15 = vcmp.eq.s32.totalorder %v7004_v45, %v7180_v60 }
  0x82   : > { %5928 = vmatpush1.bf16.msk.msra.mxu0 %vm5927_vm7, %v6569_v28  ;;  %vm5865_vm10 = vmpackc.low %vm1194_vm3, %vm1192_vm2  ;;  %vm1187_vm2 = vcmp.eq.s32.totalorder %v7001_v44, %v7188_v61  ;;  %vm1189_vm3 = vcmp.eq.s32.totalorder %v7004_v45, %v7188_v61 }
  0x83   : > { %5866 = vmatprep.subr.msk.bf16.mxu1 %vm5865_vm10, %v6569_v28  ;;  %vm5867_vm13 = vmpackc.low %vm1193_vm6, %vm1191_vm5  ;;  %vm1420_vm5 = vcmp.eq.s32.totalorder %v7001_v44, %v7196_v62  ;;  %vm1422_vm6 = vcmp.eq.s32.totalorder %v7004_v45, %v7196_v62 }
  0x84   : > { %5868 = vmatpush2.bf16.msk.msra.mxu1 %vm5867_vm13, %v6569_v28  ;;  %vm5929_vm1 = vmpackc.low %vm1426_vm9, %vm1424_vm8  ;;  %vm1419_vm8 = vcmp.eq.s32.totalorder %v7001_v44, %v7204_v63  ;;  %vm1421_vm9 = vcmp.eq.s32.totalorder %v7004_v45, %v7204_v63 }
  0x85   : > { %5930 = vmatprep.subr.msk.bf16.mxu0 %vm5929_vm1, %v6569_v28  ;;  %vm5931_vm4 = vmpackc.low %vm1425_vm12, %vm1423_vm11  ;;  %vm1184_vm11 = vcmp.eq.s32.totalorder %v7027_v46, %v7180_v60  ;;  %vm1186_vm12 = vcmp.eq.s32.totalorder %v7030_v47, %v7180_v60 }
  0x86   : > { %5932 = vmatpush2.bf16.msk.msra.mxu0 %vm5931_vm4, %v6569_v28  ;;  %vm5869_vm7 = vmpackc.low %vm1190_vm15, %vm1188_vm14  ;;  %vm1183_vm14 = vcmp.eq.s32.totalorder %v7027_v46, %v7188_v61  ;;  %vm1185_vm15 = vcmp.eq.s32.totalorder %v7030_v47, %v7188_v61 }
  0x87   : > { %5870 = vmatprep.subr.msk.bf16.mxu1 %vm5869_vm7, %v6569_v28  ;;  %vm5871_vm10 = vmpackc.low %vm1189_vm3, %vm1187_vm2  ;;  %vm1416_vm2 = vcmp.eq.s32.totalorder %v7027_v46, %v7196_v62  ;;  %vm1418_vm3 = vcmp.eq.s32.totalorder %v7030_v47, %v7196_v62 }
  0x88   : > { %5872 = vmatpush2.bf16.msk.msra.mxu1 %vm5871_vm10, %v6569_v28  ;;  %vm5933_vm13 = vmpackc.low %vm1422_vm6, %vm1420_vm5  ;;  %vm1415_vm5 = vcmp.eq.s32.totalorder %v7027_v46, %v7204_v63  ;;  %vm1417_vm6 = vcmp.eq.s32.totalorder %v7030_v47, %v7204_v63 }
  0x89   : > { %5934 = vmatprep.subr.msk.bf16.mxu0 %vm5933_vm13, %v6569_v28  ;;  %vm5935_vm1 = vmpackc.low %vm1421_vm9, %vm1419_vm8  ;;  %vm1180_vm8 = vcmp.eq.s32.totalorder %v7053_v48, %v7180_v60  ;;  %vm1182_vm9 = vcmp.eq.s32.totalorder %v7056_v49, %v7180_v60 }
  0x8a   : > { %5936 = vmatpush2.bf16.msk.msra.mxu0 %vm5935_vm1, %v6569_v28  ;;  %vm5873_vm4 = vmpackc.low %vm1186_vm12, %vm1184_vm11  ;;  %vm1179_vm11 = vcmp.eq.s32.totalorder %v7053_v48, %v7188_v61  ;;  %vm1181_vm12 = vcmp.eq.s32.totalorder %v7056_v49, %v7188_v61 }
  0x8b   : > { %5874 = vmatprep.subr.msk.bf16.mxu1 %vm5873_vm4, %v6569_v28  ;;  %vm5875_vm7 = vmpackc.low %vm1185_vm15, %vm1183_vm14  ;;  %vm1412_vm14 = vcmp.eq.s32.totalorder %v7053_v48, %v7196_v62  ;;  %vm1414_vm15 = vcmp.eq.s32.totalorder %v7056_v49, %v7196_v62 }
  0x8c   : > { %5876 = vmatpush2.bf16.msk.msra.mxu1 %vm5875_vm7, %v6569_v28  ;;  %vm5937_vm10 = vmpackc.low %vm1418_vm3, %vm1416_vm2  ;;  %vm1411_vm2 = vcmp.eq.s32.totalorder %v7053_v48, %v7204_v63  ;;  %vm1413_vm3 = vcmp.eq.s32.totalorder %v7056_v49, %v7204_v63 }
  0x8d   : > { %5938 = vmatprep.subr.msk.bf16.mxu0 %vm5937_vm10, %v6569_v28  ;;  %vm5939_vm13 = vmpackc.low %vm1417_vm6, %vm1415_vm5  ;;  %vm1176_vm5 = vcmp.eq.s32.totalorder %v7079_v50, %v7180_v60  ;;  %vm1178_vm6 = vcmp.eq.s32.totalorder %v7082_v51, %v7180_v60 }
  0x8e   : > { %5940 = vmatpush2.bf16.msk.msra.mxu0 %vm5939_vm13, %v6569_v28  ;;  %vm5877_vm1 = vmpackc.low %vm1182_vm9, %vm1180_vm8  ;;  %vm1175_vm8 = vcmp.eq.s32.totalorder %v7079_v50, %v7188_v61  ;;  %vm1177_vm9 = vcmp.eq.s32.totalorder %v7082_v51, %v7188_v61 }
  0x8f   : > { %5878 = vmatprep.subr.msk.bf16.mxu1 %vm5877_vm1, %v6569_v28  ;;  %vm5879_vm4 = vmpackc.low %vm1181_vm12, %vm1179_vm11  ;;  %vm1408_vm11 = vcmp.eq.s32.totalorder %v7079_v50, %v7196_v62  ;;  %vm1410_vm12 = vcmp.eq.s32.totalorder %v7082_v51, %v7196_v62 }
  0x90   : > { %5880 = vmatpush2.bf16.msk.msra.mxu1 %vm5879_vm4, %v6569_v28  ;;  %vm5941_vm7 = vmpackc.low %vm1414_vm15, %vm1412_vm14  ;;  %vm1407_vm14 = vcmp.eq.s32.totalorder %v7079_v50, %v7204_v63  ;;  %vm1409_vm15 = vcmp.eq.s32.totalorder %v7082_v51, %v7204_v63 }
  0x91   : > { %5942 = vmatprep.subr.msk.bf16.mxu0 %vm5941_vm7, %v6569_v28  ;;  %vm5943_vm10 = vmpackc.low %vm1413_vm3, %vm1411_vm2  ;;  %vm1172_vm2 = vcmp.eq.s32.totalorder %v7105_v52, %v7180_v60  ;;  %vm1174_vm3 = vcmp.eq.s32.totalorder %v7108_v53, %v7180_v60 }
  0x92   : > { %5944 = vmatpush2.bf16.msk.msra.mxu0 %vm5943_vm10, %v6569_v28  ;;  %vm5881_vm13 = vmpackc.low %vm1178_vm6, %vm1176_vm5  ;;  %vm1171_vm5 = vcmp.eq.s32.totalorder %v7105_v52, %v7188_v61  ;;  %vm1173_vm6 = vcmp.eq.s32.totalorder %v7108_v53, %v7188_v61 }
  0x93   : > { %5882 = vmatprep.subr.msk.bf16.mxu1 %vm5881_vm13, %v6569_v28  ;;  %vm5883_vm1 = vmpackc.low %vm1177_vm9, %vm1175_vm8  ;;  %vm1404_vm8 = vcmp.eq.s32.totalorder %v7105_v52, %v7196_v62  ;;  %vm1406_vm9 = vcmp.eq.s32.totalorder %v7108_v53, %v7196_v62 }
  0x94   : > { %5884 = vmatpush2.bf16.msk.msra.mxu1 %vm5883_vm1, %v6569_v28  ;;  %vm5945_vm4 = vmpackc.low %vm1410_vm12, %vm1408_vm11  ;;  %vm1403_vm11 = vcmp.eq.s32.totalorder %v7105_v52, %v7204_v63  ;;  %vm1405_vm12 = vcmp.eq.s32.totalorder %v7108_v53, %v7204_v63 }
  0x95   : > { %5946 = vmatprep.subr.msk.bf16.mxu0 %vm5945_vm4, %v6569_v28  ;;  %vm5947_vm7 = vmpackc.low %vm1409_vm15, %vm1407_vm14  ;;  %vm1168_vm14 = vcmp.eq.s32.totalorder %v7131_v54, %v7180_v60  ;;  %vm1170_vm15 = vcmp.eq.s32.totalorder %v7134_v55, %v7180_v60 }
  0x96   : > { %5948 = vmatpush2.bf16.msk.msra.mxu0 %vm5947_vm7, %v6569_v28  ;;  %vm5885_vm10 = vmpackc.low %vm1174_vm3, %vm1172_vm2  ;;  %vm1167_vm2 = vcmp.eq.s32.totalorder %v7131_v54, %v7188_v61  ;;  %vm1169_vm3 = vcmp.eq.s32.totalorder %v7134_v55, %v7188_v61 }
  0x97   : > { %5886 = vmatprep.subr.msk.bf16.mxu1 %vm5885_vm10, %v6569_v28  ;;  %vm5887_vm13 = vmpackc.low %vm1173_vm6, %vm1171_vm5  ;;  %vm1400_vm5 = vcmp.eq.s32.totalorder %v7131_v54, %v7196_v62  ;;  %vm1402_vm6 = vcmp.eq.s32.totalorder %v7134_v55, %v7196_v62 }
  0x98   : > { %5888 = vmatpush2.bf16.msk.msra.mxu1 %vm5887_vm13, %v6569_v28  ;;  %vm5949_vm1 = vmpackc.low %vm1406_vm9, %vm1404_vm8  ;;  %vm1399_vm8 = vcmp.eq.s32.totalorder %v7131_v54, %v7204_v63  ;;  %vm1401_vm9 = vcmp.eq.s32.totalorder %v7134_v55, %v7204_v63 }
  0x99   : > { %5950 = vmatprep.subr.msk.bf16.mxu0 %vm5949_vm1, %v6569_v28  ;;  %vm5951_vm4 = vmpackc.low %vm1405_vm12, %vm1403_vm11  ;;  %vm1164_vm11 = vcmp.eq.s32.totalorder %v7158_v57, %v7180_v60  ;;  %vm1166_vm12 = vcmp.eq.s32.totalorder %v7161_v58, %v7180_v60  ;;  %v4720_v60 = vld [vmem:[%s9532_s9 + $0x10] sm:$0xff] }
  0x9a   : > { %5952 = vmatpush2.bf16.msk.msra.mxu0 %vm5951_vm4, %v6569_v28  ;;  %vm5889_vm7 = vmpackc.low %vm1170_vm15, %vm1168_vm14  ;;  %vm1163_vm14 = vcmp.eq.s32.totalorder %v7158_v57, %v7188_v61  ;;  %vm1165_vm15 = vcmp.eq.s32.totalorder %v7161_v58, %v7188_v61  ;;  %v4723_v61 = vld [vmem:[%s9532_s9 + $0x28] sm:$0xff]  ;;  %4736 = vperm.xlu0 %6455, %v4720_v60  }
  0x9b   : > { %5890 = vmatprep.subr.msk.bf16.mxu1 %vm5889_vm7, %v6569_v28  ;;  %vm5891_vm10 = vmpackc.low %vm1169_vm3, %vm1167_vm2  ;;  %vm1396_vm2 = vcmp.eq.s32.totalorder %v7158_v57, %v7196_v62  ;;  %vm1398_vm3 = vcmp.eq.s32.totalorder %v7161_v58, %v7196_v62  ;;  %v7981_v62 = vrot.slane %v7545_v9, %v2285_v21  ;;  %4751 = vperm.xlu1 %6456, %v4723_v61   ;;  %v4801_v9 = vld [vmem:[%s9534_s11 + $0x8] sm:$0xff] }
  0x9c   : > { %5892 = vmatpush2.bf16.msk.msra.mxu1 %vm5891_vm10, %v6569_v28  ;;  %vm5953_vm13 = vmpackc.low %vm1402_vm6, %vm1400_vm5  ;;  %vm1395_vm5 = vcmp.eq.s32.totalorder %v7158_v57, %v7204_v63  ;;  %vm1397_vm6 = vcmp.eq.s32.totalorder %v7161_v58, %v7204_v63  ;;  %v4718_v63 = vld [vmem:[%s9532_s9] sm:$0xff] }
  0x9d   : > { %5954 = vmatprep.subr.msk.bf16.mxu0 %vm5953_vm13, %v6569_v28  ;;  %vm5955_vm1 = vmpackc.low %vm1401_vm9, %vm1399_vm8  ;;  %vm1624_vm8 = vcmp.eq.s32.totalorder %v6731_v10, %v7537_v8  ;;  %vm1626_vm9 = vcmp.eq.s32.totalorder %v6734_v11, %v7537_v8 }
  0x9e   : > { %5956 = vmatpush2.bf16.msk.msra.mxu0 %vm5955_vm1, %v6569_v28  ;;  %vm5893_vm4 = vmpackc.low %vm1166_vm12, %vm1164_vm11  ;;  %vm1623_vm11 = vcmp.eq.s32.totalorder %v6731_v10, %v7548_v13  ;;  %vm1625_vm12 = vcmp.eq.s32.totalorder %v6734_v11, %v7548_v13  ;;  %4726 = vperm.xlu0 %6455, %v4718_v63  }
  0x9f   : > { %5894 = vmatprep.subr.msk.bf16.mxu1 %vm5893_vm4, %v6569_v28  ;;  %vm5895_vm7 = vmpackc.low %vm1165_vm15, %vm1163_vm14  ;;  %vm1856_vm14 = vcmp.eq.s32.totalorder %v6731_v10, %v7559_v14  ;;  %vm1858_vm15 = vcmp.eq.s32.totalorder %v6734_v11, %v7559_v14 }
  0xa0   : > { %5896 = vmatpush2.bf16.msk.msra.mxu1 %vm5895_vm7, %v6569_v28  ;;  %vm5957_vm10 = vmpackc.low %vm1398_vm3, %vm1396_vm2  ;;  %vm1855_vm2 = vcmp.eq.s32.totalorder %v6731_v10, %v7573_v15  ;;  %vm1857_vm3 = vcmp.eq.s32.totalorder %v6734_v11, %v7573_v15 }
  0xa1   : > { %5958 = vmatprep.subr.msk.bf16.mxu0 %vm5957_vm10, %v6569_v28  ;;  %vm5959_vm13 = vmpackc.low %vm1397_vm6, %vm1395_vm5  ;;  %vm1620_vm5 = vcmp.eq.s32.totalorder %v6737_v12, %v7537_v8  ;;  %vm1622_vm6 = vcmp.eq.s32.totalorder %v6761_v22, %v7537_v8 }
  0xa2   : > { %5960 = vmatpush2.bf16.msk.msra.mxu0 %vm5959_vm13, %v6569_v28  ;;  %vm5961_vm1 = vmpackc.low %vm1626_vm9, %vm1624_vm8  ;;  %vm1619_vm8 = vcmp.eq.s32.totalorder %v6737_v12, %v7548_v13  ;;  %vm1621_vm9 = vcmp.eq.s32.totalorder %v6761_v22, %v7548_v13  ;;  %4806 = vperm.xlu0 %6455, %v4800_v5  }
  0xa3   : > { %3138 = vmatmul.mubr.bf16.vlgmr.msra.gmra.mxu1 %v7212_v0  ;;  %5962 = vmatprep.subr.msk.bf16.mxu1 %vm5961_vm1, %v6569_v28  ;;  %vm5963_vm4 = vmpackc.low %vm1625_vm12, %vm1623_vm11  ;;  %vm1852_vm11 = vcmp.eq.s32.totalorder %v6737_v12, %v7559_v14  ;;  %vm1854_vm12 = vcmp.eq.s32.totalorder %v6761_v22, %v7559_v14 }
  0xa4   : > { %5964 = vmatpush1.bf16.msk.msra.mxu1 %vm5963_vm4, %v6569_v28  ;;  %vm6025_vm7 = vmpackc.low %vm1858_vm15, %vm1856_vm14  ;;  %3147 = vmatprep.mubr.bf16.mxu1 %v7220_v3  ;;  %vm1851_vm14 = vcmp.eq.s32.totalorder %v6737_v12, %v7573_v15  ;;  %vm1853_vm15 = vcmp.eq.s32.totalorder %v6761_v22, %v7573_v15 }
  0xa5   : > { %3191 = vmatmul.mubr.bf16.vlgmr.msra.gmra.mxu0 %v7212_v0  ;;  %6026 = vmatprep.subr.msk.bf16.mxu0 %vm6025_vm7, %v6569_v28  ;;  %vm6027_vm10 = vmpackc.low %vm1857_vm3, %vm1855_vm2  ;;  %vm1616_vm2 = vcmp.eq.s32.totalorder %v6798_v29, %v7537_v8  ;;  %vm1618_vm3 = vcmp.eq.s32.totalorder %v6801_v30, %v7537_v8  ;;  %v8030_v0 = vld [vmem:[%s6709_s25] ss:$8 sps:$4 sm:$0xff]  }
  0xa6   : > { %6028 = vmatpush1.bf16.msk.msra.mxu0 %vm6027_vm10, %v6569_v28  ;;  %vm5965_vm13 = vmpackc.low %vm1622_vm6, %vm1620_vm5  ;;  %3200 = vmatprep.mubr.bf16.mxu0 %v7220_v3  ;;  %vm1615_vm5 = vcmp.eq.s32.totalorder %v6798_v29, %v7548_v13  ;;  %vm1617_vm6 = vcmp.eq.s32.totalorder %v6801_v30, %v7548_v13  ;;  %v8050_v3 = vld [vmem:[%s6709_s25 + $0x14] ss:$8 sps:$4 sm:$0xff]  }
  0xa7   : > { %5966 = vmatprep.subr.msk.bf16.mxu1 %vm5965_vm13, %v6569_v28  ;;  %vm5967_vm1 = vmpackc.low %vm1621_vm9, %vm1619_vm8  ;;  %vm1848_vm8 = vcmp.eq.s32.totalorder %v6798_v29, %v7559_v14  ;;  %vm1850_vm9 = vcmp.eq.s32.totalorder %v6801_v30, %v7559_v14 }
  0xa8   : > { %5968 = vmatpush1.bf16.msk.msra.mxu1 %vm5967_vm1, %v6569_v28  ;;  %vm6029_vm4 = vmpackc.low %vm1854_vm12, %vm1852_vm11  ;;  %vm1847_vm11 = vcmp.eq.s32.totalorder %v6798_v29, %v7573_v15  ;;  %vm1849_vm12 = vcmp.eq.s32.totalorder %v6801_v30, %v7573_v15 }
  0xa9   : > { %6030 = vmatprep.subr.msk.bf16.mxu0 %vm6029_vm4, %v6569_v28  ;;  %vm6031_vm7 = vmpackc.low %vm1853_vm15, %vm1851_vm14  ;;  %vm1612_vm14 = vcmp.eq.s32.totalorder %v6827_v31, %v7537_v8  ;;  %vm1614_vm15 = vcmp.eq.s32.totalorder %v6830_v32, %v7537_v8 }
  0xaa   : > { %6032 = vmatpush1.bf16.msk.msra.mxu0 %vm6031_vm7, %v6569_v28  ;;  %vm5969_vm10 = vmpackc.low %vm1618_vm3, %vm1616_vm2  ;;  %vm1611_vm2 = vcmp.eq.s32.totalorder %v6827_v31, %v7548_v13  ;;  %vm1613_vm3 = vcmp.eq.s32.totalorder %v6830_v32, %v7548_v13 }
  0xab   : > { %3148 = vmatmul.mubr.bf16.gmra.mxu1 %v7262_v4  ;;  %5970 = vmatprep.subr.msk.bf16.mxu1 %vm5969_vm10, %v6569_v28  ;;  %vm5971_vm13 = vmpackc.low %vm1617_vm6, %vm1615_vm5  ;;  %vm1844_vm5 = vcmp.eq.s32.totalorder %v6827_v31, %v7559_v14  ;;  %vm1846_vm6 = vcmp.eq.s32.totalorder %v6830_v32, %v7559_v14 }
  0xac   : > { %5972 = vmatpush1.bf16.msk.msra.mxu1 %vm5971_vm13, %v6569_v28  ;;  %vm6033_vm1 = vmpackc.low %vm1850_vm9, %vm1848_vm8  ;;  %3243 = vmatprep.mubr.bf16.mxu1 %v7659_v16  ;;  %vm1843_vm8 = vcmp.eq.s32.totalorder %v6827_v31, %v7573_v15  ;;  %vm1845_vm9 = vcmp.eq.s32.totalorder %v6830_v32, %v7573_v15 }
  0xad   : > { %3201 = vmatmul.mubr.bf16.gmra.mxu0 %v7262_v4  ;;  %6034 = vmatprep.subr.msk.bf16.mxu0 %vm6033_vm1, %v6569_v28  ;;  %vm6035_vm4 = vmpackc.low %vm1849_vm12, %vm1847_vm11  ;;  %vm1608_vm11 = vcmp.eq.s32.totalorder %v6860_v34, %v7537_v8  ;;  %vm1610_vm12 = vcmp.eq.s32.totalorder %v6863_v35, %v7537_v8  ;;  %v4721_v4 = vld [vmem:[%s9532_s9 + $0x18] sm:$0xff] }
  0xae   : > { %6036 = vmatpush1.bf16.msk.msra.mxu0 %vm6035_vm4, %v6569_v28  ;;  %vm5973_vm7 = vmpackc.low %vm1614_vm15, %vm1612_vm14  ;;  %3296 = vmatprep.mubr.bf16.mxu0 %v7659_v16  ;;  %vm1607_vm14 = vcmp.eq.s32.totalorder %v6860_v34, %v7548_v13  ;;  %vm1609_vm15 = vcmp.eq.s32.totalorder %v6863_v35, %v7548_v13 }
  0xaf   : > { %5974 = vmatprep.subr.msk.bf16.mxu1 %vm5973_vm7, %v6569_v28  ;;  %vm5975_vm10 = vmpackc.low %vm1613_vm3, %vm1611_vm2  ;;  %vm1840_vm2 = vcmp.eq.s32.totalorder %v6860_v34, %v7559_v14  ;;  %vm1842_vm3 = vcmp.eq.s32.totalorder %v6863_v35, %v7559_v14  ;;  %4741 = vperm.xlu1 %6456, %v4721_v4  }
  0xb0   : > { %5976 = vmatpush1.bf16.msk.msra.mxu1 %vm5975_vm10, %v6569_v28  ;;  %vm6037_vm13 = vmpackc.low %vm1846_vm6, %vm1844_vm5  ;;  %vm1839_vm5 = vcmp.eq.s32.totalorder %v6860_v34, %v7573_v15  ;;  %vm1841_vm6 = vcmp.eq.s32.totalorder %v6863_v35, %v7573_v15 }
  0xb1   : > { %6038 = vmatprep.subr.msk.bf16.mxu0 %vm6037_vm13, %v6569_v28  ;;  %vm6039_vm1 = vmpackc.low %vm1845_vm9, %vm1843_vm8  ;;  %vm1604_vm8 = vcmp.eq.s32.totalorder %v6898_v37, %v7537_v8  ;;  %vm1606_vm9 = vcmp.eq.s32.totalorder %v6901_v38, %v7537_v8 }
  0xb2   : > { %6040 = vmatpush1.bf16.msk.msra.mxu0 %vm6039_vm1, %v6569_v28  ;;  %vm5977_vm4 = vmpackc.low %vm1610_vm12, %vm1608_vm11  ;;  %vm1603_vm11 = vcmp.eq.s32.totalorder %v6898_v37, %v7548_v13  ;;  %vm1605_vm12 = vcmp.eq.s32.totalorder %v6901_v38, %v7548_v13 }
  0xb3   : > { %5978 = vmatprep.subr.msk.bf16.mxu1 %vm5977_vm4, %v6569_v28  ;;  %vm5979_vm7 = vmpackc.low %vm1609_vm15, %vm1607_vm14  ;;  %vm1836_vm14 = vcmp.eq.s32.totalorder %v6898_v37, %v7559_v14  ;;  %vm1838_vm15 = vcmp.eq.s32.totalorder %v6901_v38, %v7559_v14  ;;  %4731 = vperm.xlu1 %6456, %v4719_v7  }
  0xb4   : > { %5980 = vmatpush1.bf16.msk.msra.mxu1 %vm5979_vm7, %v6569_v28  ;;  %vm6041_vm10 = vmpackc.low %vm1842_vm3, %vm1840_vm2  ;;  %vm1835_vm2 = vcmp.eq.s32.totalorder %v6898_v37, %v7573_v15  ;;  %vm1837_vm3 = vcmp.eq.s32.totalorder %v6901_v38, %v7573_v15 }
  0xb5   : > { %6042 = vmatprep.subr.msk.bf16.mxu0 %vm6041_vm10, %v6569_v28  ;;  %vm6043_vm13 = vmpackc.low %vm1841_vm6, %vm1839_vm5  ;;  %vm1600_vm5 = vcmp.eq.s32.totalorder %v6925_v39, %v7537_v8  ;;  %vm1602_vm6 = vcmp.eq.s32.totalorder %v6928_v40, %v7537_v8 }
  0xb6   : > { %6044 = vmatpush1.bf16.msk.msra.mxu0 %vm6043_vm13, %v6569_v28  ;;  %vm5981_vm1 = vmpackc.low %vm1606_vm9, %vm1604_vm8  ;;  %vm1599_vm8 = vcmp.eq.s32.totalorder %v6925_v39, %v7548_v13  ;;  %vm1601_vm9 = vcmp.eq.s32.totalorder %v6928_v40, %v7548_v13 }
  0xb7   : > { %5982 = vmatprep.subr.msk.bf16.mxu1 %vm5981_vm1, %v6569_v28  ;;  %vm5983_vm4 = vmpackc.low %vm1605_vm12, %vm1603_vm11  ;;  %vm1832_vm11 = vcmp.eq.s32.totalorder %v6925_v39, %v7559_v14  ;;  %vm1834_vm12 = vcmp.eq.s32.totalorder %v6928_v40, %v7559_v14  ;;  %4811 = vperm.xlu1 %6456, %v4801_v9  }
  0xb8   : > { %5984 = vmatpush1.bf16.msk.msra.mxu1 %vm5983_vm4, %v6569_v28  ;;  %vm6045_vm7 = vmpackc.low %vm1838_vm15, %vm1836_vm14  ;;  %vm1831_vm14 = vcmp.eq.s32.totalorder %v6925_v39, %v7573_v15  ;;  %vm1833_vm15 = vcmp.eq.s32.totalorder %v6928_v40, %v7573_v15 }
  0xb9   : > { %6046 = vmatprep.subr.msk.bf16.mxu0 %vm6045_vm7, %v6569_v28  ;;  %vm6047_vm10 = vmpackc.low %vm1837_vm3, %vm1835_vm2  ;;  %vm1596_vm2 = vcmp.eq.s32.totalorder %v6697_v2, %v7537_v8  ;;  %vm1598_vm3 = vcmp.eq.s32.totalorder %v6952_v41, %v7537_v8 }
  0xba   : > { %6048 = vmatpush1.bf16.msk.msra.mxu0 %vm6047_vm10, %v6569_v28  ;;  %vm5985_vm13 = vmpackc.low %vm1602_vm6, %vm1600_vm5  ;;  %vm1595_vm5 = vcmp.eq.s32.totalorder %v6697_v2, %v7548_v13  ;;  %vm1597_vm6 = vcmp.eq.s32.totalorder %v6952_v41, %v7548_v13 }
  0xbb   : > { %5986 = vmatprep.subr.msk.bf16.mxu1 %vm5985_vm13, %v6569_v28  ;;  %vm5987_vm1 = vmpackc.low %vm1601_vm9, %vm1599_vm8  ;;  %vm1828_vm8 = vcmp.eq.s32.totalorder %v6697_v2, %v7559_v14  ;;  %vm1830_vm9 = vcmp.eq.s32.totalorder %v6952_v41, %v7559_v14 }
  0xbc   : > { %5988 = vmatpush1.bf16.msk.msra.mxu1 %vm5987_vm1, %v6569_v28  ;;  %vm6049_vm4 = vmpackc.low %vm1834_vm12, %vm1832_vm11  ;;  %vm1827_vm11 = vcmp.eq.s32.totalorder %v6697_v2, %v7573_v15  ;;  %vm1829_vm12 = vcmp.eq.s32.totalorder %v6952_v41, %v7573_v15 }
  0xbd   : > { %6050 = vmatprep.subr.msk.bf16.mxu0 %vm6049_vm4, %v6569_v28  ;;  %vm6051_vm7 = vmpackc.low %vm1833_vm15, %vm1831_vm14  ;;  %vm1656_vm14 = vcmp.eq.s32.totalorder %v6975_v42, %v7537_v8  ;;  %vm1658_vm15 = vcmp.eq.s32.totalorder %v6978_v43, %v7537_v8 }
  0xbe   : > { %6052 = vmatpush1.bf16.msk.msra.mxu0 %vm6051_vm7, %v6569_v28  ;;  %vm5989_vm10 = vmpackc.low %vm1598_vm3, %vm1596_vm2  ;;  %vm1655_vm2 = vcmp.eq.s32.totalorder %v6975_v42, %v7548_v13  ;;  %vm1657_vm3 = vcmp.eq.s32.totalorder %v6978_v43, %v7548_v13 }
  0xbf   : > { %5990 = vmatprep.subr.msk.bf16.mxu1 %vm5989_vm10, %v6569_v28  ;;  %vm5991_vm13 = vmpackc.low %vm1597_vm6, %vm1595_vm5  ;;  %vm1888_vm5 = vcmp.eq.s32.totalorder %v6975_v42, %v7559_v14  ;;  %vm1890_vm6 = vcmp.eq.s32.totalorder %v6978_v43, %v7559_v14 }
  0xc0   : > { %5992 = vmatpush1.bf16.msk.msra.mxu1 %vm5991_vm13, %v6569_v28  ;;  %vm6053_vm1 = vmpackc.low %vm1830_vm9, %vm1828_vm8  ;;  %vm1887_vm8 = vcmp.eq.s32.totalorder %v6975_v42, %v7573_v15  ;;  %vm1889_vm9 = vcmp.eq.s32.totalorder %v6978_v43, %v7573_v15 }
  0xc1   : > { %6054 = vmatprep.subr.msk.bf16.mxu0 %vm6053_vm1, %v6569_v28  ;;  %vm6055_vm4 = vmpackc.low %vm1829_vm12, %vm1827_vm11  ;;  %vm1652_vm11 = vcmp.eq.s32.totalorder %v7001_v44, %v7537_v8  ;;  %vm1654_vm12 = vcmp.eq.s32.totalorder %v7004_v45, %v7537_v8 }
  0xc2   : > { %6056 = vmatpush1.bf16.msk.msra.mxu0 %vm6055_vm4, %v6569_v28  ;;  %vm5993_vm7 = vmpackc.low %vm1658_vm15, %vm1656_vm14  ;;  %vm1651_vm14 = vcmp.eq.s32.totalorder %v7001_v44, %v7548_v13  ;;  %vm1653_vm15 = vcmp.eq.s32.totalorder %v7004_v45, %v7548_v13 }
  0xc3   : > { %5994 = vmatprep.subr.msk.bf16.mxu1 %vm5993_vm7, %v6569_v28  ;;  %vm5995_vm10 = vmpackc.low %vm1657_vm3, %vm1655_vm2  ;;  %vm1884_vm2 = vcmp.eq.s32.totalorder %v7001_v44, %v7559_v14  ;;  %vm1886_vm3 = vcmp.eq.s32.totalorder %v7004_v45, %v7559_v14 }
  0xc4   : > { %5996 = vmatpush2.bf16.msk.msra.mxu1 %vm5995_vm10, %v6569_v28  ;;  %vm6057_vm13 = vmpackc.low %vm1890_vm6, %vm1888_vm5  ;;  %vm1883_vm5 = vcmp.eq.s32.totalorder %v7001_v44, %v7573_v15  ;;  %vm1885_vm6 = vcmp.eq.s32.totalorder %v7004_v45, %v7573_v15 }
  0xc5   : > { %6058 = vmatprep.subr.msk.bf16.mxu0 %vm6057_vm13, %v6569_v28  ;;  %vm6059_vm1 = vmpackc.low %vm1889_vm9, %vm1887_vm8  ;;  %vm1648_vm8 = vcmp.eq.s32.totalorder %v7027_v46, %v7537_v8  ;;  %vm1650_vm9 = vcmp.eq.s32.totalorder %v7030_v47, %v7537_v8 }
  0xc6   : > { %6060 = vmatpush2.bf16.msk.msra.mxu0 %vm6059_vm1, %v6569_v28  ;;  %vm5997_vm4 = vmpackc.low %vm1654_vm12, %vm1652_vm11  ;;  %vm1647_vm11 = vcmp.eq.s32.totalorder %v7027_v46, %v7548_v13  ;;  %vm1649_vm12 = vcmp.eq.s32.totalorder %v7030_v47, %v7548_v13 }
  0xc7   : > { %5998 = vmatprep.subr.msk.bf16.mxu1 %vm5997_vm4, %v6569_v28  ;;  %vm5999_vm7 = vmpackc.low %vm1653_vm15, %vm1651_vm14  ;;  %vm1880_vm14 = vcmp.eq.s32.totalorder %v7027_v46, %v7559_v14  ;;  %vm1882_vm15 = vcmp.eq.s32.totalorder %v7030_v47, %v7559_v14 }
  0xc8   : > { %6000 = vmatpush2.bf16.msk.msra.mxu1 %vm5999_vm7, %v6569_v28  ;;  %vm6061_vm10 = vmpackc.low %vm1886_vm3, %vm1884_vm2  ;;  %vm1879_vm2 = vcmp.eq.s32.totalorder %v7027_v46, %v7573_v15  ;;  %vm1881_vm3 = vcmp.eq.s32.totalorder %v7030_v47, %v7573_v15 }
  0xc9   : > { %6062 = vmatprep.subr.msk.bf16.mxu0 %vm6061_vm10, %v6569_v28  ;;  %vm6063_vm13 = vmpackc.low %vm1885_vm6, %vm1883_vm5  ;;  %vm1644_vm5 = vcmp.eq.s32.totalorder %v7053_v48, %v7537_v8  ;;  %vm1646_vm6 = vcmp.eq.s32.totalorder %v7056_v49, %v7537_v8 }
  0xca   : > { %6064 = vmatpush2.bf16.msk.msra.mxu0 %vm6063_vm13, %v6569_v28  ;;  %vm6001_vm1 = vmpackc.low %vm1650_vm9, %vm1648_vm8  ;;  %vm1643_vm8 = vcmp.eq.s32.totalorder %v7053_v48, %v7548_v13  ;;  %vm1645_vm9 = vcmp.eq.s32.totalorder %v7056_v49, %v7548_v13 }
  0xcb   : > { %6002 = vmatprep.subr.msk.bf16.mxu1 %vm6001_vm1, %v6569_v28  ;;  %vm6003_vm4 = vmpackc.low %vm1649_vm12, %vm1647_vm11  ;;  %vm1876_vm11 = vcmp.eq.s32.totalorder %v7053_v48, %v7559_v14  ;;  %vm1878_vm12 = vcmp.eq.s32.totalorder %v7056_v49, %v7559_v14 }
  0xcc   : > { %6004 = vmatpush2.bf16.msk.msra.mxu1 %vm6003_vm4, %v6569_v28  ;;  %vm6065_vm7 = vmpackc.low %vm1882_vm15, %vm1880_vm14  ;;  %vm1875_vm14 = vcmp.eq.s32.totalorder %v7053_v48, %v7573_v15  ;;  %vm1877_vm15 = vcmp.eq.s32.totalorder %v7056_v49, %v7573_v15 }
  0xcd   : > { %6066 = vmatprep.subr.msk.bf16.mxu0 %vm6065_vm7, %v6569_v28  ;;  %vm6067_vm10 = vmpackc.low %vm1881_vm3, %vm1879_vm2  ;;  %vm1640_vm2 = vcmp.eq.s32.totalorder %v7079_v50, %v7537_v8  ;;  %vm1642_vm3 = vcmp.eq.s32.totalorder %v7082_v51, %v7537_v8 }
  0xce   : > { %6068 = vmatpush2.bf16.msk.msra.mxu0 %vm6067_vm10, %v6569_v28  ;;  %vm6005_vm13 = vmpackc.low %vm1646_vm6, %vm1644_vm5  ;;  %vm1639_vm5 = vcmp.eq.s32.totalorder %v7079_v50, %v7548_v13  ;;  %vm1641_vm6 = vcmp.eq.s32.totalorder %v7082_v51, %v7548_v13 }
  0xcf   : > { %6006 = vmatprep.subr.msk.bf16.mxu1 %vm6005_vm13, %v6569_v28  ;;  %vm6007_vm1 = vmpackc.low %vm1645_vm9, %vm1643_vm8  ;;  %vm1872_vm8 = vcmp.eq.s32.totalorder %v7079_v50, %v7559_v14  ;;  %vm1874_vm9 = vcmp.eq.s32.totalorder %v7082_v51, %v7559_v14 }
  0xd0   : > { %6008 = vmatpush2.bf16.msk.msra.mxu1 %vm6007_vm1, %v6569_v28  ;;  %vm6069_vm4 = vmpackc.low %vm1878_vm12, %vm1876_vm11  ;;  %vm1871_vm11 = vcmp.eq.s32.totalorder %v7079_v50, %v7573_v15  ;;  %vm1873_vm12 = vcmp.eq.s32.totalorder %v7082_v51, %v7573_v15 }
  0xd1   : > { %6070 = vmatprep.subr.msk.bf16.mxu0 %vm6069_vm4, %v6569_v28  ;;  %vm6071_vm7 = vmpackc.low %vm1877_vm15, %vm1875_vm14  ;;  %vm1636_vm14 = vcmp.eq.s32.totalorder %v7105_v52, %v7537_v8  ;;  %vm1638_vm15 = vcmp.eq.s32.totalorder %v7108_v53, %v7537_v8 }
  0xd2   : > { %6072 = vmatpush2.bf16.msk.msra.mxu0 %vm6071_vm7, %v6569_v28  ;;  %vm6009_vm10 = vmpackc.low %vm1642_vm3, %vm1640_vm2  ;;  %vm1635_vm2 = vcmp.eq.s32.totalorder %v7105_v52, %v7548_v13  ;;  %vm1637_vm3 = vcmp.eq.s32.totalorder %v7108_v53, %v7548_v13 }
  0xd3   : > { %6010 = vmatprep.subr.msk.bf16.mxu1 %vm6009_vm10, %v6569_v28  ;;  %vm6011_vm13 = vmpackc.low %vm1641_vm6, %vm1639_vm5  ;;  %vm1868_vm5 = vcmp.eq.s32.totalorder %v7105_v52, %v7559_v14  ;;  %vm1870_vm6 = vcmp.eq.s32.totalorder %v7108_v53, %v7559_v14 }
  0xd4   : > { %6012 = vmatpush2.bf16.msk.msra.mxu1 %vm6011_vm13, %v6569_v28  ;;  %vm6073_vm1 = vmpackc.low %vm1874_vm9, %vm1872_vm8  ;;  %vm1867_vm8 = vcmp.eq.s32.totalorder %v7105_v52, %v7573_v15  ;;  %vm1869_vm9 = vcmp.eq.s32.totalorder %v7108_v53, %v7573_v15 }
  0xd5   : > { %6074 = vmatprep.subr.msk.bf16.mxu0 %vm6073_vm1, %v6569_v28  ;;  %vm6075_vm4 = vmpackc.low %vm1873_vm12, %vm1871_vm11  ;;  %vm1632_vm11 = vcmp.eq.s32.totalorder %v7131_v54, %v7537_v8  ;;  %vm1634_vm12 = vcmp.eq.s32.totalorder %v7134_v55, %v7537_v8 }
  0xd6   : > { %6076 = vmatpush2.bf16.msk.msra.mxu0 %vm6075_vm4, %v6569_v28  ;;  %vm6013_vm7 = vmpackc.low %vm1638_vm15, %vm1636_vm14  ;;  %vm1631_vm14 = vcmp.eq.s32.totalorder %v7131_v54, %v7548_v13  ;;  %vm1633_vm15 = vcmp.eq.s32.totalorder %v7134_v55, %v7548_v13 }
  0xd7   : > { %6014 = vmatprep.subr.msk.bf16.mxu1 %vm6013_vm7, %v6569_v28  ;;  %vm6015_vm10 = vmpackc.low %vm1637_vm3, %vm1635_vm2  ;;  %vm1864_vm2 = vcmp.eq.s32.totalorder %v7131_v54, %v7559_v14  ;;  %vm1866_vm3 = vcmp.eq.s32.totalorder %v7134_v55, %v7559_v14 }
  0xd8   : > { %6016 = vmatpush2.bf16.msk.msra.mxu1 %vm6015_vm10, %v6569_v28  ;;  %vm6077_vm13 = vmpackc.low %vm1870_vm6, %vm1868_vm5  ;;  %vm1863_vm5 = vcmp.eq.s32.totalorder %v7131_v54, %v7573_v15  ;;  %vm1865_vm6 = vcmp.eq.s32.totalorder %v7134_v55, %v7573_v15 }
  0xd9   : > { %6078 = vmatprep.subr.msk.bf16.mxu0 %vm6077_vm13, %v6569_v28  ;;  %vm6079_vm1 = vmpackc.low %vm1869_vm9, %vm1867_vm8  ;;  %vm1628_vm8 = vcmp.eq.s32.totalorder %v7158_v57, %v7537_v8  ;;  %vm1630_vm9 = vcmp.eq.s32.totalorder %v7161_v58, %v7537_v8  ;;  %v4802_v8 = vld [vmem:[%s9534_s11 + $0x10] sm:$0xff] }
  0xda   : > { %6080 = vmatpush2.bf16.msk.msra.mxu0 %vm6079_vm1, %v6569_v28  ;;  %vm6017_vm4 = vmpackc.low %vm1634_vm12, %vm1632_vm11  ;;  %vm1627_vm11 = vcmp.eq.s32.totalorder %v7158_v57, %v7548_v13  ;;  %vm1629_vm12 = vcmp.eq.s32.totalorder %v7161_v58, %v7548_v13  ;;  %4816 = vperm.xlu0 %6455, %v4802_v8   ;;  %v4803_v13 = vld [vmem:[%s9534_s11 + $0x18] sm:$0xff] }
  0xdb   : > { %6018 = vmatprep.subr.msk.bf16.mxu1 %vm6017_vm4, %v6569_v28  ;;  %vm6019_vm7 = vmpackc.low %vm1633_vm15, %vm1631_vm14  ;;  %vm1860_vm14 = vcmp.eq.s32.totalorder %v7158_v57, %v7559_v14  ;;  %vm1862_vm15 = vcmp.eq.s32.totalorder %v7161_v58, %v7559_v14  ;;  %4821 = vperm.xlu1 %6456, %v4803_v13  }
  0xdc   : > { %6020 = vmatpush2.bf16.msk.msra.mxu1 %vm6019_vm7, %v6569_v28  ;;  %vm6081_vm10 = vmpackc.low %vm1866_vm3, %vm1864_vm2  ;;  %vm1859_vm2 = vcmp.eq.s32.totalorder %v7158_v57, %v7573_v15  ;;  %vm1861_vm3 = vcmp.eq.s32.totalorder %v7161_v58, %v7573_v15 }
  0xdd   : > { %6082 = vmatprep.subr.msk.bf16.mxu0 %vm6081_vm10, %v6569_v28  ;;  %vm6083_vm13 = vmpackc.low %vm1865_vm6, %vm1863_vm5  ;;  %vm2088_vm5 = vcmp.eq.s32.totalorder %v6731_v10, %v7933_v36  ;;  %vm2090_vm6 = vcmp.eq.s32.totalorder %v6734_v11, %v7933_v36 }
  0xde   : > { %6084 = vmatpush2.bf16.msk.msra.mxu0 %vm6083_vm13, %v6569_v28  ;;  %vm6021_vm1 = vmpackc.low %vm1630_vm9, %vm1628_vm8  ;;  %vm2087_vm8 = vcmp.eq.s32.totalorder %v6731_v10, %v7947_v56  ;;  %vm2089_vm9 = vcmp.eq.s32.totalorder %v6734_v11, %v7947_v56 }
  0xdf   : > { %6022 = vmatprep.subr.msk.bf16.mxu1 %vm6021_vm1, %v6569_v28  ;;  %vm6023_vm4 = vmpackc.low %vm1629_vm12, %vm1627_vm11  ;;  %vm2320_vm11 = vcmp.eq.s32.totalorder %v6731_v10, %v7961_v59  ;;  %vm2322_vm12 = vcmp.eq.s32.totalorder %v6734_v11, %v7961_v59 }
  0xe0   : > { %6024 = vmatpush2.bf16.msk.msra.mxu1 %vm6023_vm4, %v6569_v28  ;;  %vm6085_vm7 = vmpackc.low %vm1862_vm15, %vm1860_vm14  ;;  %vm2319_vm14 = vcmp.eq.s32.totalorder %v6731_v10, %v7981_v62  ;;  %vm2321_vm15 = vcmp.eq.s32.totalorder %v6734_v11, %v7981_v62 }
  0xe1   : > { %6086 = vmatprep.subr.msk.bf16.mxu0 %vm6085_vm7, %v6569_v28  ;;  %vm6087_vm10 = vmpackc.low %vm1861_vm3, %vm1859_vm2  ;;  %vm2084_vm2 = vcmp.eq.s32.totalorder %v6737_v12, %v7933_v36  ;;  %vm2086_vm3 = vcmp.eq.s32.totalorder %v6761_v22, %v7933_v36 }
  0xe2   : > { %6088 = vmatpush2.bf16.msk.msra.mxu0 %vm6087_vm10, %v6569_v28  ;;  %vm6089_vm13 = vmpackc.low %vm2090_vm6, %vm2088_vm5  ;;  %vm2083_vm5 = vcmp.eq.s32.totalorder %v6737_v12, %v7947_v56  ;;  %vm2085_vm6 = vcmp.eq.s32.totalorder %v6761_v22, %v7947_v56  ;;  %v8421_v14 = vpop.f32.mrf.mxu0 }
  0xe3   : > { %3244 = vmatmul.mubr.bf16.vlgmr.msra.gmra.mxu1 %v8030_v0  ;;  %6090 = vmatprep.subr.msk.bf16.mxu1 %vm6089_vm13, %v6569_v28  ;;  %vm6091_vm1 = vmpackc.low %vm2089_vm9, %vm2087_vm8  ;;  %vm2316_vm8 = vcmp.eq.s32.totalorder %v6737_v12, %v7961_v59  ;;  %vm2318_vm9 = vcmp.eq.s32.totalorder %v6761_v22, %v7961_v59 }
  0xe4   : > { %6092 = vmatpush1.bf16.msk.msra.mxu1 %vm6091_vm1, %v6569_v28  ;;  %vm6153_vm4 = vmpackc.low %vm2322_vm12, %vm2320_vm11  ;;  %3253 = vmatprep.mubr.bf16.mxu1 %v8050_v3  ;;  %vm2315_vm11 = vcmp.eq.s32.totalorder %v6737_v12, %v7981_v62  ;;  %vm2317_vm12 = vcmp.eq.s32.totalorder %v6761_v22, %v7981_v62 }
  0xe5   : > { %3297 = vmatmul.mubr.bf16.vlgmr.msra.gmra.mxu0 %v8030_v0  ;;  %6154 = vmatprep.subr.msk.bf16.mxu0 %vm6153_vm4, %v6569_v28  ;;  %vm6155_vm7 = vmpackc.low %vm2321_vm15, %vm2319_vm14  ;;  %vm2080_vm14 = vcmp.eq.s32.totalorder %v6798_v29, %v7933_v36  ;;  %vm2082_vm15 = vcmp.eq.s32.totalorder %v6801_v30, %v7933_v36 }
  0xe6   : > { %6156 = vmatpush1.bf16.msk.msra.mxu0 %vm6155_vm7, %v6569_v28  ;;  %vm6093_vm10 = vmpackc.low %vm2086_vm3, %vm2084_vm2  ;;  %3306 = vmatprep.mubr.bf16.mxu0 %v8050_v3  ;;  %vm2079_vm2 = vcmp.eq.s32.totalorder %v6798_v29, %v7947_v56  ;;  %vm2081_vm3 = vcmp.eq.s32.totalorder %v6801_v30, %v7947_v56 }
  0xe7   : > { %6094 = vmatprep.subr.msk.bf16.mxu1 %vm6093_vm10, %v6569_v28  ;;  %vm6095_vm13 = vmpackc.low %vm2085_vm6, %vm2083_vm5  ;;  %vm2312_vm5 = vcmp.eq.s32.totalorder %v6798_v29, %v7961_v59  ;;  %vm2314_vm6 = vcmp.eq.s32.totalorder %v6801_v30, %v7961_v59 }
  0xe8   : > { %6096 = vmatpush1.bf16.msk.msra.mxu1 %vm6095_vm13, %v6569_v28  ;;  %vm6157_vm1 = vmpackc.low %vm2318_vm9, %vm2316_vm8  ;;  %vm2311_vm8 = vcmp.eq.s32.totalorder %v6798_v29, %v7981_v62  ;;  %vm2313_vm9 = vcmp.eq.s32.totalorder %v6801_v30, %v7981_v62 }
  0xe9   : > { %6158 = vmatprep.subr.msk.bf16.mxu0 %vm6157_vm1, %v6569_v28  ;;  %vm6159_vm4 = vmpackc.low %vm2317_vm12, %vm2315_vm11  ;;  %vm2076_vm11 = vcmp.eq.s32.totalorder %v6827_v31, %v7933_v36  ;;  %vm2078_vm12 = vcmp.eq.s32.totalorder %v6830_v32, %v7933_v36 }
  0xea   : > { %6160 = vmatpush1.bf16.msk.msra.mxu0 %vm6159_vm4, %v6569_v28  ;;  %vm6097_vm7 = vmpackc.low %vm2082_vm15, %vm2080_vm14  ;;  %vm2075_vm14 = vcmp.eq.s32.totalorder %v6827_v31, %v7947_v56  ;;  %vm2077_vm15 = vcmp.eq.s32.totalorder %v6830_v32, %v7947_v56 }
  0xeb   : > { %3254 = vmatmul.mubr.bf16.gmra.mxu1 %v8110_v6  ;;  %6098 = vmatprep.subr.msk.bf16.mxu1 %vm6097_vm7, %v6569_v28  ;;  %vm6099_vm10 = vmpackc.low %vm2081_vm3, %vm2079_vm2  ;;  %vm2308_vm2 = vcmp.eq.s32.totalorder %v6827_v31, %v7961_v59  ;;  %vm2310_vm3 = vcmp.eq.s32.totalorder %v6830_v32, %v7961_v59 }
  0xec   : > { %6100 = vmatpush1.bf16.msk.msra.mxu1 %vm6099_vm10, %v6569_v28  ;;  %vm6161_vm13 = vmpackc.low %vm2314_vm6, %vm2312_vm5  ;;  %3349 = vmatprep.mubr.bf16.mxu1 %v7659_v16  ;;  %vm2307_vm5 = vcmp.eq.s32.totalorder %v6827_v31, %v7981_v62  ;;  %vm2309_vm6 = vcmp.eq.s32.totalorder %v6830_v32, %v7981_v62 }
  0xed   : > { %3307 = vmatmul.mubr.bf16.gmra.mxu0 %v8110_v6  ;;  %6162 = vmatprep.subr.msk.bf16.mxu0 %vm6161_vm13, %v6569_v28  ;;  %vm6163_vm1 = vmpackc.low %vm2313_vm9, %vm2311_vm8  ;;  %vm2072_vm8 = vcmp.eq.s32.totalorder %v6860_v34, %v7933_v36  ;;  %vm2074_vm9 = vcmp.eq.s32.totalorder %v6863_v35, %v7933_v36 }
  0xee   : > { %6164 = vmatpush1.bf16.msk.msra.mxu0 %vm6163_vm1, %v6569_v28  ;;  %vm6101_vm4 = vmpackc.low %vm2078_vm12, %vm2076_vm11  ;;  %3402 = vmatprep.mubr.bf16.mxu0 %v7659_v16  ;;  %vm2071_vm11 = vcmp.eq.s32.totalorder %v6860_v34, %v7947_v56  ;;  %vm2073_vm12 = vcmp.eq.s32.totalorder %v6863_v35, %v7947_v56 }
  0xef   : > { %6102 = vmatprep.subr.msk.bf16.mxu1 %vm6101_vm4, %v6569_v28  ;;  %vm6103_vm7 = vmpackc.low %vm2077_vm15, %vm2075_vm14  ;;  %vm2304_vm14 = vcmp.eq.s32.totalorder %v6860_v34, %v7961_v59  ;;  %vm2306_vm15 = vcmp.eq.s32.totalorder %v6863_v35, %v7961_v59 }
  0xf0   : > { %6104 = vmatpush1.bf16.msk.msra.mxu1 %vm6103_vm7, %v6569_v28  ;;  %vm6165_vm10 = vmpackc.low %vm2310_vm3, %vm2308_vm2  ;;  %vm2303_vm2 = vcmp.eq.s32.totalorder %v6860_v34, %v7981_v62  ;;  %vm2305_vm3 = vcmp.eq.s32.totalorder %v6863_v35, %v7981_v62 }
  0xf1   : > { %6166 = vmatprep.subr.msk.bf16.mxu0 %vm6165_vm10, %v6569_v28  ;;  %vm6167_vm13 = vmpackc.low %vm2309_vm6, %vm2307_vm5  ;;  %vm2068_vm5 = vcmp.eq.s32.totalorder %v6898_v37, %v7933_v36  ;;  %vm2070_vm6 = vcmp.eq.s32.totalorder %v6901_v38, %v7933_v36 }
  0xf2   : > { %6168 = vmatpush1.bf16.msk.msra.mxu0 %vm6167_vm13, %v6569_v28  ;;  %vm6105_vm1 = vmpackc.low %vm2074_vm9, %vm2072_vm8  ;;  %vm2067_vm8 = vcmp.eq.s32.totalorder %v6898_v37, %v7947_v56  ;;  %vm2069_vm9 = vcmp.eq.s32.totalorder %v6901_v38, %v7947_v56 }
  0xf3   : > { %6106 = vmatprep.subr.msk.bf16.mxu1 %vm6105_vm1, %v6569_v28  ;;  %vm6107_vm4 = vmpackc.low %vm2073_vm12, %vm2071_vm11  ;;  %vm2300_vm11 = vcmp.eq.s32.totalorder %v6898_v37, %v7961_v59  ;;  %vm2302_vm12 = vcmp.eq.s32.totalorder %v6901_v38, %v7961_v59 }
  0xf4   : > { %6108 = vmatpush1.bf16.msk.msra.mxu1 %vm6107_vm4, %v6569_v28  ;;  %vm6169_vm7 = vmpackc.low %vm2306_vm15, %vm2304_vm14  ;;  %vm2299_vm14 = vcmp.eq.s32.totalorder %v6898_v37, %v7981_v62  ;;  %vm2301_vm15 = vcmp.eq.s32.totalorder %v6901_v38, %v7981_v62 }
  0xf5   : > { %6170 = vmatprep.subr.msk.bf16.mxu0 %vm6169_vm7, %v6569_v28  ;;  %vm6171_vm10 = vmpackc.low %vm2305_vm3, %vm2303_vm2  ;;  %vm2064_vm2 = vcmp.eq.s32.totalorder %v6925_v39, %v7933_v36  ;;  %vm2066_vm3 = vcmp.eq.s32.totalorder %v6928_v40, %v7933_v36 }
  0xf6   : > { %6172 = vmatpush1.bf16.msk.msra.mxu0 %vm6171_vm10, %v6569_v28  ;;  %vm6109_vm13 = vmpackc.low %vm2070_vm6, %vm2068_vm5  ;;  %vm2063_vm5 = vcmp.eq.s32.totalorder %v6925_v39, %v7947_v56  ;;  %vm2065_vm6 = vcmp.eq.s32.totalorder %v6928_v40, %v7947_v56 }
  0xf7   : > { %6110 = vmatprep.subr.msk.bf16.mxu1 %vm6109_vm13, %v6569_v28  ;;  %vm6111_vm1 = vmpackc.low %vm2069_vm9, %vm2067_vm8  ;;  %vm2296_vm8 = vcmp.eq.s32.totalorder %v6925_v39, %v7961_v59  ;;  %vm2298_vm9 = vcmp.eq.s32.totalorder %v6928_v40, %v7961_v59 }
  0xf8   : > { %6112 = vmatpush1.bf16.msk.msra.mxu1 %vm6111_vm1, %v6569_v28  ;;  %vm6173_vm4 = vmpackc.low %vm2302_vm12, %vm2300_vm11  ;;  %vm2295_vm11 = vcmp.eq.s32.totalorder %v6925_v39, %v7981_v62  ;;  %vm2297_vm12 = vcmp.eq.s32.totalorder %v6928_v40, %v7981_v62 }
  0xf9   : > { %6174 = vmatprep.subr.msk.bf16.mxu0 %vm6173_vm4, %v6569_v28  ;;  %vm6175_vm7 = vmpackc.low %vm2301_vm15, %vm2299_vm14  ;;  %vm2060_vm14 = vcmp.eq.s32.totalorder %v6697_v2, %v7933_v36  ;;  %vm2062_vm15 = vcmp.eq.s32.totalorder %v6952_v41, %v7933_v36 }
  0xfa   : > { %6176 = vmatpush1.bf16.msk.msra.mxu0 %vm6175_vm7, %v6569_v28  ;;  %vm6113_vm10 = vmpackc.low %vm2066_vm3, %vm2064_vm2  ;;  %vm2059_vm2 = vcmp.eq.s32.totalorder %v6697_v2, %v7947_v56  ;;  %vm2061_vm3 = vcmp.eq.s32.totalorder %v6952_v41, %v7947_v56 }
  0xfb   : > { %6114 = vmatprep.subr.msk.bf16.mxu1 %vm6113_vm10, %v6569_v28  ;;  %vm6115_vm13 = vmpackc.low %vm2065_vm6, %vm2063_vm5  ;;  %vm2292_vm5 = vcmp.eq.s32.totalorder %v6697_v2, %v7961_v59  ;;  %vm2294_vm6 = vcmp.eq.s32.totalorder %v6952_v41, %v7961_v59 }
  0xfc   : > { %6116 = vmatpush1.bf16.msk.msra.mxu1 %vm6115_vm13, %v6569_v28  ;;  %vm6177_vm1 = vmpackc.low %vm2298_vm9, %vm2296_vm8  ;;  %vm2291_vm8 = vcmp.eq.s32.totalorder %v6697_v2, %v7981_v62  ;;  %vm2293_vm9 = vcmp.eq.s32.totalorder %v6952_v41, %v7981_v62 }
  0xfd   : > { %6178 = vmatprep.subr.msk.bf16.mxu0 %vm6177_vm1, %v6569_v28  ;;  %vm6179_vm4 = vmpackc.low %vm2297_vm12, %vm2295_vm11  ;;  %vm2120_vm11 = vcmp.eq.s32.totalorder %v6975_v42, %v7933_v36  ;;  %vm2122_vm12 = vcmp.eq.s32.totalorder %v6978_v43, %v7933_v36 }
  0xfe   : > { %6180 = vmatpush1.bf16.msk.msra.mxu0 %vm6179_vm4, %v6569_v28  ;;  %vm6117_vm7 = vmpackc.low %vm2062_vm15, %vm2060_vm14  ;;  %vm2119_vm14 = vcmp.eq.s32.totalorder %v6975_v42, %v7947_v56  ;;  %vm2121_vm15 = vcmp.eq.s32.totalorder %v6978_v43, %v7947_v56 }
  0xff   : > { %6118 = vmatprep.subr.msk.bf16.mxu1 %vm6117_vm7, %v6569_v28  ;;  %vm6119_vm10 = vmpackc.low %vm2061_vm3, %vm2059_vm2  ;;  %vm2352_vm2 = vcmp.eq.s32.totalorder %v6975_v42, %v7961_v59  ;;  %vm2354_vm3 = vcmp.eq.s32.totalorder %v6978_v43, %v7961_v59 }
 0x100   : > { %6120 = vmatpush1.bf16.msk.msra.mxu1 %vm6119_vm10, %v6569_v28  ;;  %vm6181_vm13 = vmpackc.low %vm2294_vm6, %vm2292_vm5  ;;  %vm2351_vm5 = vcmp.eq.s32.totalorder %v6975_v42, %v7981_v62  ;;  %vm2353_vm6 = vcmp.eq.s32.totalorder %v6978_v43, %v7981_v62 }
 0x101   : > { %6182 = vmatprep.subr.msk.bf16.mxu0 %vm6181_vm13, %v6569_v28  ;;  %vm6183_vm1 = vmpackc.low %vm2293_vm9, %vm2291_vm8  ;;  %vm2116_vm8 = vcmp.eq.s32.totalorder %v7001_v44, %v7933_v36  ;;  %vm2118_vm9 = vcmp.eq.s32.totalorder %v7004_v45, %v7933_v36 }
 0x102   : > { %6184 = vmatpush1.bf16.msk.msra.mxu0 %vm6183_vm1, %v6569_v28  ;;  %vm6121_vm4 = vmpackc.low %vm2122_vm12, %vm2120_vm11  ;;  %vm2115_vm11 = vcmp.eq.s32.totalorder %v7001_v44, %v7947_v56  ;;  %vm2117_vm12 = vcmp.eq.s32.totalorder %v7004_v45, %v7947_v56 }
 0x103   : > { %6122 = vmatprep.subr.msk.bf16.mxu1 %vm6121_vm4, %v6569_v28  ;;  %vm6123_vm7 = vmpackc.low %vm2121_vm15, %vm2119_vm14  ;;  %vm2348_vm14 = vcmp.eq.s32.totalorder %v7001_v44, %v7961_v59  ;;  %vm2350_vm15 = vcmp.eq.s32.totalorder %v7004_v45, %v7961_v59 }
 0x104   : > { %6124 = vmatpush2.bf16.msk.msra.mxu1 %vm6123_vm7, %v6569_v28  ;;  %vm6185_vm10 = vmpackc.low %vm2354_vm3, %vm2352_vm2  ;;  %vm2347_vm2 = vcmp.eq.s32.totalorder %v7001_v44, %v7981_v62  ;;  %vm2349_vm3 = vcmp.eq.s32.totalorder %v7004_v45, %v7981_v62 }
 0x105   : > { %6186 = vmatprep.subr.msk.bf16.mxu0 %vm6185_vm10, %v6569_v28  ;;  %vm6187_vm13 = vmpackc.low %vm2353_vm6, %vm2351_vm5  ;;  %vm2112_vm5 = vcmp.eq.s32.totalorder %v7027_v46, %v7933_v36  ;;  %vm2114_vm6 = vcmp.eq.s32.totalorder %v7030_v47, %v7933_v36 }
 0x106   : > { %6188 = vmatpush2.bf16.msk.msra.mxu0 %vm6187_vm13, %v6569_v28  ;;  %vm6125_vm1 = vmpackc.low %vm2118_vm9, %vm2116_vm8  ;;  %vm2111_vm8 = vcmp.eq.s32.totalorder %v7027_v46, %v7947_v56  ;;  %vm2113_vm9 = vcmp.eq.s32.totalorder %v7030_v47, %v7947_v56 }
 0x107   : > { %6126 = vmatprep.subr.msk.bf16.mxu1 %vm6125_vm1, %v6569_v28  ;;  %vm6127_vm4 = vmpackc.low %vm2117_vm12, %vm2115_vm11  ;;  %vm2344_vm11 = vcmp.eq.s32.totalorder %v7027_v46, %v7961_v59  ;;  %vm2346_vm12 = vcmp.eq.s32.totalorder %v7030_v47, %v7961_v59 }
 0x108   : > { %6128 = vmatpush2.bf16.msk.msra.mxu1 %vm6127_vm4, %v6569_v28  ;;  %vm6189_vm7 = vmpackc.low %vm2350_vm15, %vm2348_vm14  ;;  %vm2343_vm14 = vcmp.eq.s32.totalorder %v7027_v46, %v7981_v62  ;;  %vm2345_vm15 = vcmp.eq.s32.totalorder %v7030_v47, %v7981_v62 }
 0x109   : > { %6190 = vmatprep.subr.msk.bf16.mxu0 %vm6189_vm7, %v6569_v28  ;;  %vm6191_vm10 = vmpackc.low %vm2349_vm3, %vm2347_vm2  ;;  %vm2108_vm2 = vcmp.eq.s32.totalorder %v7053_v48, %v7933_v36  ;;  %vm2110_vm3 = vcmp.eq.s32.totalorder %v7056_v49, %v7933_v36 }
 0x10a   : > { %6192 = vmatpush2.bf16.msk.msra.mxu0 %vm6191_vm10, %v6569_v28  ;;  %vm6129_vm13 = vmpackc.low %vm2114_vm6, %vm2112_vm5  ;;  %vm2107_vm5 = vcmp.eq.s32.totalorder %v7053_v48, %v7947_v56  ;;  %vm2109_vm6 = vcmp.eq.s32.totalorder %v7056_v49, %v7947_v56 }
 0x10b   : > { %6130 = vmatprep.subr.msk.bf16.mxu1 %vm6129_vm13, %v6569_v28  ;;  %vm6131_vm1 = vmpackc.low %vm2113_vm9, %vm2111_vm8  ;;  %vm2340_vm8 = vcmp.eq.s32.totalorder %v7053_v48, %v7961_v59  ;;  %vm2342_vm9 = vcmp.eq.s32.totalorder %v7056_v49, %v7961_v59 }
 0x10c   : > { %6132 = vmatpush2.bf16.msk.msra.mxu1 %vm6131_vm1, %v6569_v28  ;;  %vm6193_vm4 = vmpackc.low %vm2346_vm12, %vm2344_vm11  ;;  %vm2339_vm11 = vcmp.eq.s32.totalorder %v7053_v48, %v7981_v62  ;;  %vm2341_vm12 = vcmp.eq.s32.totalorder %v7056_v49, %v7981_v62 }
 0x10d   : > { %6194 = vmatprep.subr.msk.bf16.mxu0 %vm6193_vm4, %v6569_v28  ;;  %vm6195_vm7 = vmpackc.low %vm2345_vm15, %vm2343_vm14  ;;  %vm2104_vm14 = vcmp.eq.s32.totalorder %v7079_v50, %v7933_v36  ;;  %vm2106_vm15 = vcmp.eq.s32.totalorder %v7082_v51, %v7933_v36 }
 0x10e   : > { %6196 = vmatpush2.bf16.msk.msra.mxu0 %vm6195_vm7, %v6569_v28  ;;  %vm6133_vm10 = vmpackc.low %vm2110_vm3, %vm2108_vm2  ;;  %vm2103_vm2 = vcmp.eq.s32.totalorder %v7079_v50, %v7947_v56  ;;  %vm2105_vm3 = vcmp.eq.s32.totalorder %v7082_v51, %v7947_v56 }
 0x10f   : > { %6134 = vmatprep.subr.msk.bf16.mxu1 %vm6133_vm10, %v6569_v28  ;;  %vm6135_vm13 = vmpackc.low %vm2109_vm6, %vm2107_vm5  ;;  %vm2336_vm5 = vcmp.eq.s32.totalorder %v7079_v50, %v7961_v59  ;;  %vm2338_vm6 = vcmp.eq.s32.totalorder %v7082_v51, %v7961_v59 }
 0x110   : > { %6136 = vmatpush2.bf16.msk.msra.mxu1 %vm6135_vm13, %v6569_v28  ;;  %vm6197_vm1 = vmpackc.low %vm2342_vm9, %vm2340_vm8  ;;  %vm2335_vm8 = vcmp.eq.s32.totalorder %v7079_v50, %v7981_v62  ;;  %vm2337_vm9 = vcmp.eq.s32.totalorder %v7082_v51, %v7981_v62 }
 0x111   : > { %6198 = vmatprep.subr.msk.bf16.mxu0 %vm6197_vm1, %v6569_v28  ;;  %vm6199_vm4 = vmpackc.low %vm2341_vm12, %vm2339_vm11  ;;  %vm2100_vm11 = vcmp.eq.s32.totalorder %v7105_v52, %v7933_v36  ;;  %vm2102_vm12 = vcmp.eq.s32.totalorder %v7108_v53, %v7933_v36 }
 0x112   : > { %6200 = vmatpush2.bf16.msk.msra.mxu0 %vm6199_vm4, %v6569_v28  ;;  %vm6137_vm7 = vmpackc.low %vm2106_vm15, %vm2104_vm14  ;;  %vm2099_vm14 = vcmp.eq.s32.totalorder %v7105_v52, %v7947_v56  ;;  %vm2101_vm15 = vcmp.eq.s32.totalorder %v7108_v53, %v7947_v56 }
 0x113   : > { %6138 = vmatprep.subr.msk.bf16.mxu1 %vm6137_vm7, %v6569_v28  ;;  %vm6139_vm10 = vmpackc.low %vm2105_vm3, %vm2103_vm2  ;;  %vm2332_vm2 = vcmp.eq.s32.totalorder %v7105_v52, %v7961_v59  ;;  %vm2334_vm3 = vcmp.eq.s32.totalorder %v7108_v53, %v7961_v59 }
 0x114   : > { %6140 = vmatpush2.bf16.msk.msra.mxu1 %vm6139_vm10, %v6569_v28  ;;  %vm6201_vm13 = vmpackc.low %vm2338_vm6, %vm2336_vm5  ;;  %vm2331_vm5 = vcmp.eq.s32.totalorder %v7105_v52, %v7981_v62  ;;  %vm2333_vm6 = vcmp.eq.s32.totalorder %v7108_v53, %v7981_v62 }
 0x115   : > { %6202 = vmatprep.subr.msk.bf16.mxu0 %vm6201_vm13, %v6569_v28  ;;  %vm6203_vm1 = vmpackc.low %vm2337_vm9, %vm2335_vm8  ;;  %vm2096_vm8 = vcmp.eq.s32.totalorder %v7131_v54, %v7933_v36  ;;  %vm2098_vm9 = vcmp.eq.s32.totalorder %v7134_v55, %v7933_v36 }
 0x116   : > { %6204 = vmatpush2.bf16.msk.msra.mxu0 %vm6203_vm1, %v6569_v28  ;;  %vm6141_vm4 = vmpackc.low %vm2102_vm12, %vm2100_vm11  ;;  %vm2095_vm11 = vcmp.eq.s32.totalorder %v7131_v54, %v7947_v56  ;;  %vm2097_vm12 = vcmp.eq.s32.totalorder %v7134_v55, %v7947_v56 }
 0x117   : > { %6142 = vmatprep.subr.msk.bf16.mxu1 %vm6141_vm4, %v6569_v28  ;;  %vm6143_vm7 = vmpackc.low %vm2101_vm15, %vm2099_vm14  ;;  %vm2328_vm14 = vcmp.eq.s32.totalorder %v7131_v54, %v7961_v59  ;;  %vm2330_vm15 = vcmp.eq.s32.totalorder %v7134_v55, %v7961_v59 }
 0x118   : > { %6144 = vmatpush2.bf16.msk.msra.mxu1 %vm6143_vm7, %v6569_v28  ;;  %vm6205_vm10 = vmpackc.low %vm2334_vm3, %vm2332_vm2  ;;  %vm2327_vm2 = vcmp.eq.s32.totalorder %v7131_v54, %v7981_v62  ;;  %vm2329_vm3 = vcmp.eq.s32.totalorder %v7134_v55, %v7981_v62 }
 0x119   : > { %6206 = vmatprep.subr.msk.bf16.mxu0 %vm6205_vm10, %v6569_v28  ;;  %vm6207_vm13 = vmpackc.low %vm2333_vm6, %vm2331_vm5  ;;  %vm2092_vm5 = vcmp.eq.s32.totalorder %v7158_v57, %v7933_v36  ;;  %vm2094_vm6 = vcmp.eq.s32.totalorder %v7161_v58, %v7933_v36 }
 0x11a   : > { %6208 = vmatpush2.bf16.msk.msra.mxu0 %vm6207_vm13, %v6569_v28  ;;  %vm6145_vm1 = vmpackc.low %vm2098_vm9, %vm2096_vm8  ;;  %vm2091_vm8 = vcmp.eq.s32.totalorder %v7158_v57, %v7947_v56  ;;  %vm2093_vm9 = vcmp.eq.s32.totalorder %v7161_v58, %v7947_v56 }
 0x11b   : > { %6146 = vmatprep.subr.msk.bf16.mxu1 %vm6145_vm1, %v6569_v28  ;;  %vm6147_vm4 = vmpackc.low %vm2097_vm12, %vm2095_vm11  ;;  %vm2324_vm11 = vcmp.eq.s32.totalorder %v7158_v57, %v7961_v59  ;;  %vm2326_vm12 = vcmp.eq.s32.totalorder %v7161_v58, %v7961_v59 }
 0x11c   : > { %6148 = vmatpush2.bf16.msk.msra.mxu1 %vm6147_vm4, %v6569_v28  ;;  %vm6209_vm7 = vmpackc.low %vm2330_vm15, %vm2328_vm14  ;;  %vm2323_vm14 = vcmp.eq.s32.totalorder %v7158_v57, %v7981_v62  ;;  %vm2325_vm15 = vcmp.eq.s32.totalorder %v7161_v58, %v7981_v62 }
 0x11d   : > { %6210 = vmatprep.subr.msk.bf16.mxu0 %vm6209_vm7, %v6569_v28  ;;  %vm6211_vm10 = vmpackc.low %vm2329_vm3, %vm2327_vm2  ;;  %vm2552_vm2 = vcmp.eq.s32.totalorder %v6731_v10, %v6769_v25  ;;  %vm2554_vm3 = vcmp.eq.s32.totalorder %v6734_v11, %v6769_v25 }
 0x11e   : > { %6212 = vmatpush2.bf16.msk.msra.mxu0 %vm6211_vm10, %v6569_v28  ;;  %vm6149_vm13 = vmpackc.low %vm2094_vm6, %vm2092_vm5  ;;  %vm2551_vm5 = vcmp.eq.s32.totalorder %v6731_v10, %v6767_v24  ;;  %vm2553_vm6 = vcmp.eq.s32.totalorder %v6734_v11, %v6767_v24 }
 0x11f   : > { %6150 = vmatprep.subr.msk.bf16.mxu1 %vm6149_vm13, %v6569_v28  ;;  %vm6151_vm1 = vmpackc.low %vm2093_vm9, %vm2091_vm8  ;;  %vm2784_vm8 = vcmp.eq.s32.totalorder %v6731_v10, %v6773_v27  ;;  %vm2786_vm9 = vcmp.eq.s32.totalorder %v6734_v11, %v6773_v27 }
 0x120   : > { %6152 = vmatpush2.bf16.msk.msra.mxu1 %vm6151_vm1, %v6569_v28  ;;  %vm6213_vm4 = vmpackc.low %vm2326_vm12, %vm2324_vm11  ;;  %vm2783_vm11 = vcmp.eq.s32.totalorder %v6731_v10, %v6771_v26  ;;  %vm2785_vm12 = vcmp.eq.s32.totalorder %v6734_v11, %v6771_v26  ;;  %v8446_v10 = vpop.f32.mrf.mxu0 }
 0x121   : > { %6214 = vmatprep.subr.msk.bf16.mxu0 %vm6213_vm4, %v6569_v28  ;;  %vm6215_vm7 = vmpackc.low %vm2325_vm15, %vm2323_vm14  ;;  %vm2548_vm14 = vcmp.eq.s32.totalorder %v6737_v12, %v6769_v25  ;;  %vm2550_vm15 = vcmp.eq.s32.totalorder %v6761_v22, %v6769_v25 }
 0x122   : > { %6216 = vmatpush2.bf16.msk.msra.mxu0 %vm6215_vm7, %v6569_v28  ;;  %vm6217_vm10 = vmpackc.low %vm2554_vm3, %vm2552_vm2  ;;  %vm2547_vm2 = vcmp.eq.s32.totalorder %v6737_v12, %v6767_v24  ;;  %vm2549_vm3 = vcmp.eq.s32.totalorder %v6761_v22, %v6767_v24  ;;  %v8472_v11 = vpop.f32.mrf.mxu0 }
 0x123   : > { %3350 = vmatmul.mubr.bf16.vlgmr.msra.gmra.mxu1 %v8030_v0  ;;  %6218 = vmatprep.subr.msk.bf16.mxu1 %vm6217_vm10, %v6569_v28  ;;  %vm6219_vm13 = vmpackc.low %vm2553_vm6, %vm2551_vm5  ;;  %vm2780_vm5 = vcmp.eq.s32.totalorder %v6737_v12, %v6773_v27  ;;  %vm2782_vm6 = vcmp.eq.s32.totalorder %v6761_v22, %v6773_v27 }
 0x124   : > { %6220 = vmatpush1.bf16.msk.msra.mxu1 %vm6219_vm13, %v6569_v28  ;;  %vm6281_vm1 = vmpackc.low %vm2786_vm9, %vm2784_vm8  ;;  %3359 = vmatprep.mubr.bf16.mxu1 %v8050_v3  ;;  %vm2779_vm8 = vcmp.eq.s32.totalorder %v6737_v12, %v6771_v26  ;;  %vm2781_vm9 = vcmp.eq.s32.totalorder %v6761_v22, %v6771_v26  ;;  %v6484_v12 = vld [vmem:[%s6709_s25 + $0x4] ss:$8 sps:$4 sm:$0xff]   ;;  %v8500_v22 = vpop.f32.mrf.mxu0 }
 0x125   : > { %3403 = vmatmul.mubr.bf16.vlgmr.msra.gmra.mxu0 %v8030_v0  ;;  %6282 = vmatprep.subr.msk.bf16.mxu0 %vm6281_vm1, %v6569_v28  ;;  %vm6283_vm4 = vmpackc.low %vm2785_vm12, %vm2783_vm11  ;;  %vm2544_vm11 = vcmp.eq.s32.totalorder %v6798_v29, %v6769_v25  ;;  %vm2546_vm12 = vcmp.eq.s32.totalorder %v6801_v30, %v6769_v25 }
 0x126   : > { %6284 = vmatpush1.bf16.msk.msra.mxu0 %vm6283_vm4, %v6569_v28  ;;  %vm6221_vm7 = vmpackc.low %vm2550_vm15, %vm2548_vm14  ;;  %3412 = vmatprep.mubr.bf16.mxu0 %v8050_v3  ;;  %vm2543_vm14 = vcmp.eq.s32.totalorder %v6798_v29, %v6767_v24  ;;  %vm2545_vm15 = vcmp.eq.s32.totalorder %v6801_v30, %v6767_v24 }
 0x127   : > { %6222 = vmatprep.subr.msk.bf16.mxu1 %vm6221_vm7, %v6569_v28  ;;  %vm6223_vm10 = vmpackc.low %vm2549_vm3, %vm2547_vm2  ;;  %vm2776_vm2 = vcmp.eq.s32.totalorder %v6798_v29, %v6773_v27  ;;  %vm2778_vm3 = vcmp.eq.s32.totalorder %v6801_v30, %v6773_v27 }
 0x128   : > { %6224 = vmatpush1.bf16.msk.msra.mxu1 %vm6223_vm10, %v6569_v28  ;;  %vm6285_vm13 = vmpackc.low %vm2782_vm6, %vm2780_vm5  ;;  %vm2775_vm5 = vcmp.eq.s32.totalorder %v6798_v29, %v6771_v26  ;;  %vm2777_vm6 = vcmp.eq.s32.totalorder %v6801_v30, %v6771_v26  ;;  %v8521_v29 = vpop.f32.mrf.mxu0 }
 0x129   : > { %6286 = vmatprep.subr.msk.bf16.mxu0 %vm6285_vm13, %v6569_v28  ;;  %vm6287_vm1 = vmpackc.low %vm2781_vm9, %vm2779_vm8  ;;  %vm2540_vm8 = vcmp.eq.s32.totalorder %v6827_v31, %v6769_v25  ;;  %vm2542_vm9 = vcmp.eq.s32.totalorder %v6830_v32, %v6769_v25 }
 0x12a   : > { %6288 = vmatpush1.bf16.msk.msra.mxu0 %vm6287_vm1, %v6569_v28  ;;  %vm6225_vm4 = vmpackc.low %vm2546_vm12, %vm2544_vm11  ;;  %vm2539_vm11 = vcmp.eq.s32.totalorder %v6827_v31, %v6767_v24  ;;  %vm2541_vm12 = vcmp.eq.s32.totalorder %v6830_v32, %v6767_v24  ;;  %v8543_v30 = vpop.f32.mrf.mxu0 }
 0x12b   : > { %3360 = vmatmul.mubr.bf16.gmra.mxu1 %v8110_v6  ;;  %6226 = vmatprep.subr.msk.bf16.mxu1 %vm6225_vm4, %v6569_v28  ;;  %vm6227_vm7 = vmpackc.low %vm2545_vm15, %vm2543_vm14  ;;  %vm2772_vm14 = vcmp.eq.s32.totalorder %v6827_v31, %v6773_v27  ;;  %vm2774_vm15 = vcmp.eq.s32.totalorder %v6830_v32, %v6773_v27 }
 0x12c   : > { %6228 = vmatpush1.bf16.msk.msra.mxu1 %vm6227_vm7, %v6569_v28  ;;  %vm6289_vm10 = vmpackc.low %vm2778_vm3, %vm2776_vm2  ;;  %3455 = vmatprep.mubr.bf16.mxu1 %v6484_v12  ;;  %vm2771_vm2 = vcmp.eq.s32.totalorder %v6827_v31, %v6771_v26  ;;  %vm2773_vm3 = vcmp.eq.s32.totalorder %v6830_v32, %v6771_v26  ;;  %v8545_v31 = vpop.f32.mrf.mxu1  ;;  %v8567_v32 = vpop.f32.mrf.mxu0 }
 0x12d   : > { %3413 = vmatmul.mubr.bf16.gmra.mxu0 %v8110_v6  ;;  %6290 = vmatprep.subr.msk.bf16.mxu0 %vm6289_vm10, %v6569_v28  ;;  %vm6291_vm13 = vmpackc.low %vm2777_vm6, %vm2775_vm5  ;;  %vm2536_vm5 = vcmp.eq.s32.totalorder %v6860_v34, %v6769_v25  ;;  %vm2538_vm6 = vcmp.eq.s32.totalorder %v6863_v35, %v6769_v25 }
 0x12e   : > { %6292 = vmatpush1.bf16.msk.msra.mxu0 %vm6291_vm13, %v6569_v28  ;;  %vm6229_vm1 = vmpackc.low %vm2542_vm9, %vm2540_vm8  ;;  %3508 = vmatprep.mubr.bf16.mxu0 %v6484_v12  ;;  %vm2535_vm8 = vcmp.eq.s32.totalorder %v6860_v34, %v6767_v24  ;;  %vm2537_vm9 = vcmp.eq.s32.totalorder %v6863_v35, %v6767_v24 }
 0x12f   : > { %6230 = vmatprep.subr.msk.bf16.mxu1 %vm6229_vm1, %v6569_v28  ;;  %vm6231_vm4 = vmpackc.low %vm2541_vm12, %vm2539_vm11  ;;  %vm2768_vm11 = vcmp.eq.s32.totalorder %v6860_v34, %v6773_v27  ;;  %vm2770_vm12 = vcmp.eq.s32.totalorder %v6863_v35, %v6773_v27 }
 0x130   : > { %6232 = vmatpush1.bf16.msk.msra.mxu1 %vm6231_vm4, %v6569_v28  ;;  %vm6293_vm7 = vmpackc.low %vm2774_vm15, %vm2772_vm14  ;;  %vm2767_vm14 = vcmp.eq.s32.totalorder %v6860_v34, %v6771_v26  ;;  %vm2769_vm15 = vcmp.eq.s32.totalorder %v6863_v35, %v6771_v26  ;;  %v8569_v34 = vpop.f32.mrf.mxu1  ;;  %v8591_v35 = vpop.f32.mrf.mxu0 }
 0x131   : > { %6294 = vmatprep.subr.msk.bf16.mxu0 %vm6293_vm7, %v6569_v28  ;;  %vm6295_vm10 = vmpackc.low %vm2773_vm3, %vm2771_vm2  ;;  %vm2532_vm2 = vcmp.eq.s32.totalorder %v6898_v37, %v6769_v25  ;;  %vm2534_vm3 = vcmp.eq.s32.totalorder %v6901_v38, %v6769_v25 }
 0x132   : > { %6296 = vmatpush1.bf16.msk.msra.mxu0 %vm6295_vm10, %v6569_v28  ;;  %vm6233_vm13 = vmpackc.low %vm2538_vm6, %vm2536_vm5  ;;  %vm2531_vm5 = vcmp.eq.s32.totalorder %v6898_v37, %v6767_v24  ;;  %vm2533_vm6 = vcmp.eq.s32.totalorder %v6901_v38, %v6767_v24 }
 0x133   : > { %6234 = vmatprep.subr.msk.bf16.mxu1 %vm6233_vm13, %v6569_v28  ;;  %vm6235_vm1 = vmpackc.low %vm2537_vm9, %vm2535_vm8  ;;  %vm2764_vm8 = vcmp.eq.s32.totalorder %v6898_v37, %v6773_v27  ;;  %vm2766_vm9 = vcmp.eq.s32.totalorder %v6901_v38, %v6773_v27 }
 0x134   : > { %6236 = vmatpush1.bf16.msk.msra.mxu1 %vm6235_vm1, %v6569_v28  ;;  %vm6297_vm4 = vmpackc.low %vm2770_vm12, %vm2768_vm11  ;;  %vm2763_vm11 = vcmp.eq.s32.totalorder %v6898_v37, %v6771_v26  ;;  %vm2765_vm12 = vcmp.eq.s32.totalorder %v6901_v38, %v6771_v26  ;;  %v8593_v37 = vpop.f32.mrf.mxu1  ;;  %v8605_v38 = vpop.f32.mrf.mxu0 }
 0x135   : > { %6298 = vmatprep.subr.msk.bf16.mxu0 %vm6297_vm4, %v6569_v28  ;;  %vm6299_vm7 = vmpackc.low %vm2769_vm15, %vm2767_vm14  ;;  %vm2528_vm14 = vcmp.eq.s32.totalorder %v6925_v39, %v6769_v25  ;;  %vm2530_vm15 = vcmp.eq.s32.totalorder %v6928_v40, %v6769_v25 }
 0x136   : > { %6300 = vmatpush1.bf16.msk.msra.mxu0 %vm6299_vm7, %v6569_v28  ;;  %vm6237_vm10 = vmpackc.low %vm2534_vm3, %vm2532_vm2  ;;  %vm2527_vm2 = vcmp.eq.s32.totalorder %v6925_v39, %v6767_v24  ;;  %vm2529_vm3 = vcmp.eq.s32.totalorder %v6928_v40, %v6767_v24 }
 0x137   : > { %6238 = vmatprep.subr.msk.bf16.mxu1 %vm6237_vm10, %v6569_v28  ;;  %vm6239_vm13 = vmpackc.low %vm2533_vm6, %vm2531_vm5  ;;  %vm2760_vm5 = vcmp.eq.s32.totalorder %v6925_v39, %v6773_v27  ;;  %vm2762_vm6 = vcmp.eq.s32.totalorder %v6928_v40, %v6773_v27 }
 0x138   : > { %6240 = vmatpush1.bf16.msk.msra.mxu1 %vm6239_vm13, %v6569_v28  ;;  %vm6301_vm1 = vmpackc.low %vm2766_vm9, %vm2764_vm8  ;;  %vm2759_vm8 = vcmp.eq.s32.totalorder %v6925_v39, %v6771_v26  ;;  %vm2761_vm9 = vcmp.eq.s32.totalorder %v6928_v40, %v6771_v26  ;;  %v8617_v39 = vpop.f32.mrf.mxu1 }
 0x139   : > { %6302 = vmatprep.subr.msk.bf16.mxu0 %vm6301_vm1, %v6569_v28  ;;  %vm6303_vm4 = vmpackc.low %vm2765_vm12, %vm2763_vm11  ;;  %vm2524_vm11 = vcmp.eq.s32.totalorder %v6697_v2, %v6769_v25  ;;  %vm2526_vm12 = vcmp.eq.s32.totalorder %v6952_v41, %v6769_v25 }
 0x13a   : > { %6304 = vmatpush1.bf16.msk.msra.mxu0 %vm6303_vm4, %v6569_v28  ;;  %vm6241_vm7 = vmpackc.low %vm2530_vm15, %vm2528_vm14  ;;  %vm2523_vm14 = vcmp.eq.s32.totalorder %v6697_v2, %v6767_v24  ;;  %vm2525_vm15 = vcmp.eq.s32.totalorder %v6952_v41, %v6767_v24  ;;  %v8641_v40 = vpop.f32.mrf.mxu1 }
 0x13b   : > { %6242 = vmatprep.subr.msk.bf16.mxu1 %vm6241_vm7, %v6569_v28  ;;  %vm6243_vm10 = vmpackc.low %vm2529_vm3, %vm2527_vm2  ;;  %vm2756_vm2 = vcmp.eq.s32.totalorder %v6697_v2, %v6773_v27  ;;  %vm2758_vm3 = vcmp.eq.s32.totalorder %v6952_v41, %v6773_v27 }
 0x13c   : > { %6244 = vmatpush1.bf16.msk.msra.mxu1 %vm6243_vm10, %v6569_v28  ;;  %vm6305_vm13 = vmpackc.low %vm2762_vm6, %vm2760_vm5  ;;  %vm2755_vm5 = vcmp.eq.s32.totalorder %v6697_v2, %v6771_v26  ;;  %vm2757_vm6 = vcmp.eq.s32.totalorder %v6952_v41, %v6771_v26  ;;  %v8629_v2 = vpop.f32.mrf.mxu0 }
 0x13d   : > { %6306 = vmatprep.subr.msk.bf16.mxu0 %vm6305_vm13, %v6569_v28  ;;  %vm6307_vm1 = vmpackc.low %vm2761_vm9, %vm2759_vm8  ;;  %vm2584_vm8 = vcmp.eq.s32.totalorder %v6975_v42, %v6769_v25  ;;  %vm2586_vm9 = vcmp.eq.s32.totalorder %v6978_v43, %v6769_v25 }
 0x13e   : > { %6308 = vmatpush1.bf16.msk.msra.mxu0 %vm6307_vm1, %v6569_v28  ;;  %vm6245_vm4 = vmpackc.low %vm2526_vm12, %vm2524_vm11  ;;  %vm2583_vm11 = vcmp.eq.s32.totalorder %v6975_v42, %v6767_v24  ;;  %vm2585_vm12 = vcmp.eq.s32.totalorder %v6978_v43, %v6767_v24  ;;  %v8653_v41 = vpop.f32.mrf.mxu0 }
 0x13f   : > { %6246 = vmatprep.subr.msk.bf16.mxu1 %vm6245_vm4, %v6569_v28  ;;  %vm6247_vm7 = vmpackc.low %vm2525_vm15, %vm2523_vm14  ;;  %vm2816_vm14 = vcmp.eq.s32.totalorder %v6975_v42, %v6773_v27  ;;  %vm2818_vm15 = vcmp.eq.s32.totalorder %v6978_v43, %v6773_v27 }
 0x140   : > { %6248 = vmatpush1.bf16.msk.msra.mxu1 %vm6247_vm7, %v6569_v28  ;;  %vm6309_vm10 = vmpackc.low %vm2758_vm3, %vm2756_vm2  ;;  %vm2815_vm2 = vcmp.eq.s32.totalorder %v6975_v42, %v6771_v26  ;;  %vm2817_vm3 = vcmp.eq.s32.totalorder %v6978_v43, %v6771_v26  ;;  %v8665_v42 = vpop.permute.xlu0 %526  ;;  %v8667_v43 = vpop.f32.mrf.mxu1 }
 0x141   : > { %6310 = vmatprep.subr.msk.bf16.mxu0 %vm6309_vm10, %v6569_v28  ;;  %vm6311_vm13 = vmpackc.low %vm2757_vm6, %vm2755_vm5  ;;  %vm2580_vm5 = vcmp.eq.s32.totalorder %v7001_v44, %v6769_v25  ;;  %vm2582_vm6 = vcmp.eq.s32.totalorder %v7004_v45, %v6769_v25  ;;  %v8744_v17 = vadd.f32 %v8543_v30, %v8665_v42  ;;  %v8796_v33 = vadd.f32 %v8521_v29, %v8665_v42 }
 0x142   : > { %6312 = vmatpush1.bf16.msk.msra.mxu0 %vm6311_vm13, %v6569_v28  ;;  %vm6249_vm1 = vmpackc.low %vm2586_vm9, %vm2584_vm8  ;;  %vm2579_vm8 = vcmp.eq.s32.totalorder %v7001_v44, %v6767_v24  ;;  %vm2581_vm9 = vcmp.eq.s32.totalorder %v7004_v45, %v6767_v24 }
 0x143   : > { %6250 = vmatprep.subr.msk.bf16.mxu1 %vm6249_vm1, %v6569_v28  ;;  %vm6251_vm4 = vmpackc.low %vm2585_vm12, %vm2583_vm11  ;;  %vm2812_vm11 = vcmp.eq.s32.totalorder %v7001_v44, %v6773_v27  ;;  %vm2814_vm12 = vcmp.eq.s32.totalorder %v7004_v45, %v6773_v27  ;;  %v8781_v23 = vadd.f32 %v8667_v43, %v8744_v17  ;;  %v3044_v61 = vadd.f32 %v8641_v40, %v8796_v33 }
 0x144   : > { %6252 = vmatpush2.bf16.msk.msra.mxu1 %vm6251_vm4, %v6569_v28  ;;  %vm6313_vm7 = vmpackc.low %vm2818_vm15, %vm2816_vm14  ;;  %vm2811_vm14 = vcmp.eq.s32.totalorder %v7001_v44, %v6771_v26  ;;  %vm2813_vm15 = vcmp.eq.s32.totalorder %v7004_v45, %v6771_v26  ;;  %v8679_v44 = vpop.f32.mrf.mxu0  ;;  %v3047_v45 = vpop.f32.mrf.mxu1 }
 0x145   : > { %6314 = vmatprep.subr.msk.bf16.mxu0 %vm6313_vm7, %v6569_v28  ;;  %vm6315_vm10 = vmpackc.low %vm2817_vm3, %vm2815_vm2  ;;  %vm2576_vm2 = vcmp.eq.s32.totalorder %v7027_v46, %v6769_v25  ;;  %vm2578_vm3 = vcmp.eq.s32.totalorder %v7030_v47, %v6769_v25  ;;  %v3570_v63 = vmul.f32 0.2, %v8781_v23  ;;  %v3569_v7 = vmul.f32 0.2, %v3044_v61 }
 0x146   : > { %6316 = vmatpush2.bf16.msk.msra.mxu0 %vm6315_vm10, %v6569_v28  ;;  %vm6253_vm13 = vmpackc.low %vm2582_vm6, %vm2580_vm5  ;;  %vm2575_vm5 = vcmp.eq.s32.totalorder %v7027_v46, %v6767_v24  ;;  %vm2577_vm6 = vcmp.eq.s32.totalorder %v7030_v47, %v6767_v24  ;;  %v8703_v15 = vpop.f32.mrf.mxu0  ;;  %v3049_v16 = vpop.f32.mrf.mxu1 }
 0x147   : > { %6254 = vmatprep.subr.msk.bf16.mxu1 %vm6253_vm13, %v6569_v28  ;;  %vm6255_vm1 = vmpackc.low %vm2581_vm9, %vm2579_vm8  ;;  %vm2808_vm8 = vcmp.eq.s32.totalorder %v7027_v46, %v6773_v27  ;;  %vm2810_vm9 = vcmp.eq.s32.totalorder %v7030_v47, %v6773_v27  ;;  %v3650_v9 = vmax.f32 %v8781_v23, %v3570_v63  ;;  %v3649_v12 = vmax.f32 %v3044_v61, %v3569_v7 }
 0x148   : > { %6256 = vmatpush2.bf16.msk.msra.mxu1 %vm6255_vm1, %v6569_v28  ;;  %vm6317_vm4 = vmpackc.low %vm2814_vm12, %vm2812_vm11  ;;  %vm2807_vm11 = vcmp.eq.s32.totalorder %v7027_v46, %v6771_v26  ;;  %vm2809_vm12 = vcmp.eq.s32.totalorder %v7030_v47, %v6771_v26  ;;  %v8696_v46 = vpop.permute.xlu1 %516  ;;  %v532_v47 = vpop.permute.xlu0 %531 }
 0x149   : > { %6318 = vmatprep.subr.msk.bf16.mxu0 %vm6317_vm4, %v6569_v28  ;;  %vm6319_vm7 = vmpackc.low %vm2813_vm15, %vm2811_vm14  ;;  %vm2572_vm14 = vcmp.eq.s32.totalorder %v7053_v48, %v6769_v25  ;;  %vm2574_vm15 = vcmp.eq.s32.totalorder %v7056_v49, %v6769_v25  ;;  %v8761_v20 = vadd.f32 %v8567_v32, %v532_v47  ;;  %v8864_v0 = vadd.f32 %v8421_v14, %v8696_v46 }
 0x14a   : > { %6320 = vmatpush2.bf16.msk.msra.mxu0 %vm6319_vm7, %v6569_v28  ;;  %vm6257_vm10 = vmpackc.low %vm2578_vm3, %vm2576_vm2  ;;  %vm2571_vm2 = vcmp.eq.s32.totalorder %v7053_v48, %v6767_v24  ;;  %vm2573_vm3 = vcmp.eq.s32.totalorder %v7056_v49, %v6767_v24 }
 0x14b   : > { %6258 = vmatprep.subr.msk.bf16.mxu1 %vm6257_vm10, %v6569_v28  ;;  %vm6259_vm13 = vmpackc.low %vm2577_vm6, %vm2575_vm5  ;;  %vm2804_vm5 = vcmp.eq.s32.totalorder %v7053_v48, %v6773_v27  ;;  %vm2806_vm6 = vcmp.eq.s32.totalorder %v7056_v49, %v6773_v27  ;;  %v8799_v36 = vadd.f32 %v3047_v45, %v8761_v20  ;;  %v3034_v6 = vadd.f32 %v8545_v31, %v8864_v0 }
 0x14c   : > { %6260 = vmatpush2.bf16.msk.msra.mxu1 %vm6259_vm13, %v6569_v28  ;;  %vm6321_vm1 = vmpackc.low %vm2810_vm9, %vm2808_vm8  ;;  %vm2803_vm8 = vcmp.eq.s32.totalorder %v7053_v48, %v6771_v26  ;;  %vm2805_vm9 = vcmp.eq.s32.totalorder %v7056_v49, %v6771_v26  ;;  %v8724_v48 = vadd.f32 %v8591_v35, %v532_v47  ;;  %v8731_v49 = vpop.f32.mrf.mxu0  ;;  %v522_v19 = vpop.permute.xlu1 %521  ;;  %v3087_v35 = vadd.f32 %v8605_v38, %v8864_v0 }
 0x14d   : > { %6322 = vmatprep.subr.msk.bf16.mxu0 %vm6321_vm1, %v6569_v28  ;;  %vm6323_vm4 = vmpackc.low %vm2809_vm12, %vm2807_vm11  ;;  %vm2568_vm11 = vcmp.eq.s32.totalorder %v7079_v50, %v6769_v25  ;;  %vm2570_vm12 = vcmp.eq.s32.totalorder %v7082_v51, %v6769_v25  ;;  %v8777_v21 = vadd.f32 %v8500_v22, %v522_v19  ;;  %v8833_v60 = vadd.f32 %v8472_v11, %v522_v19 }
 0x14e   : > { %6324 = vmatpush2.bf16.msk.msra.mxu0 %vm6323_vm4, %v6569_v28  ;;  %vm6261_vm7 = vmpackc.low %vm2574_vm15, %vm2572_vm14  ;;  %vm2567_vm14 = vcmp.eq.s32.totalorder %v7079_v50, %v6767_v24  ;;  %vm2569_vm15 = vcmp.eq.s32.totalorder %v7082_v51, %v6767_v24  ;;  %v8747_v18 = vadd.f32 %v3049_v16, %v8724_v48  ;;  %v8801_v56 = vpop.f32.mrf.mxu0  ;;  %v3529_v11 = vmul.f32 0.2, %v3034_v6 }
 0x14f   : > { %6262 = vmatprep.subr.msk.bf16.mxu1 %vm6261_vm7, %v6569_v28  ;;  %vm6263_vm10 = vmpackc.low %vm2573_vm3, %vm2571_vm2  ;;  %vm2800_vm2 = vcmp.eq.s32.totalorder %v7079_v50, %v6773_v27  ;;  %vm2802_vm3 = vcmp.eq.s32.totalorder %v7082_v51, %v6773_v27  ;;  %vm2564_vm7 = vcmp.eq.s32.totalorder %v7105_v52, %v6769_v25  ;;  %v8868_v3 = vadd.f32 %v8593_v37, %v8833_v60 }
 0x150   : > { %6264 = vmatpush2.bf16.msk.msra.mxu1 %vm6263_vm10, %v6569_v28  ;;  %vm6325_vm13 = vmpackc.low %vm2806_vm6, %vm2804_vm5  ;;  %vm2799_vm5 = vcmp.eq.s32.totalorder %v7079_v50, %v6771_v26  ;;  %vm2801_vm6 = vcmp.eq.s32.totalorder %v7082_v51, %v6771_v26  ;;  %vm2563_vm10 = vcmp.eq.s32.totalorder %v7105_v52, %v6767_v24  ;;  %v8816_v50 = vadd.f32 %v8446_v10, %v8696_v46  ;;  %v3102_v4 = vpop.f32.mrf.mxu0 }
 0x151   : > { %6326 = vmatprep.subr.msk.bf16.mxu0 %vm6325_vm13, %v6569_v28  ;;  %vm6327_vm1 = vmpackc.low %vm2805_vm9, %vm2803_vm8  ;;  %vm2566_vm8 = vcmp.eq.s32.totalorder %v7108_v53, %v6769_v25  ;;  %vm2796_vm13 = vcmp.eq.s32.totalorder %v7105_v52, %v6773_v27  ;;  %v8820_v51 = vadd.f32 %v8617_v39, %v8777_v21  ;;  %v3590_v59 = vmul.f32 0.2, %v8747_v18  ;;  %v6486_v39 = vld [vmem:[%s6709_s25 + $0x14] ss:$8 sps:$4 sm:$0xff]  }
 0x152   : > { %6328 = vmatpush2.bf16.msk.msra.mxu0 %vm6327_vm1, %v6569_v28  ;;  %vm6265_vm4 = vmpackc.low %vm2570_vm12, %vm2568_vm11  ;;  %vm2565_vm11 = vcmp.eq.s32.totalorder %v7108_v53, %v6767_v24  ;;  %v3036_v62 = vadd.f32 %v8569_v34, %v8816_v50  ;;  %v8908_v13 = vadd.f32 %v3102_v4, %v8724_v48  ;;  %v3549_v14 = vmul.f32 0.2, %v8868_v3  ;;  %v6485_v34 = vld [vmem:[%s6709_s25] ss:$8 sps:$4 sm:$0xff]  }
 0x153   : > { %6266 = vmatprep.subr.msk.bf16.mxu1 %vm6265_vm4, %v6569_v28  ;;  %vm6267_vm9 = vmpackc.low %vm2569_vm15, %vm2567_vm14  ;;  %vm2798_vm14 = vcmp.eq.s32.totalorder %v7108_v53, %v6773_v27  ;;  %vm2795_vm15 = vcmp.eq.s32.totalorder %v7105_v52, %v6771_v26  ;;  %v3589_v52 = vmul.f32 0.2, %v8799_v36  ;;  %v3670_v5 = vmax.f32 %v8747_v18, %v3590_v59 }
 0x154   : > { %6268 = vmatpush2.bf16.msk.msra.mxu1 %vm6267_vm9, %v6569_v28  ;;  %vm6329_vm12 = vmpackc.low %vm2802_vm3, %vm2800_vm2  ;;  %vm2797_vm2 = vcmp.eq.s32.totalorder %v7108_v53, %v6771_v26  ;;  %vm2560_vm3 = vcmp.eq.s32.totalorder %v7131_v54, %v6769_v25  ;;  %v3550_v53 = vmul.f32 0.2, %v8820_v51  ;;  %v3530_v8 = vmul.f32 0.2, %v3036_v62 }
 0x155   : > { %6330 = vmatprep.subr.msk.bf16.mxu0 %vm6329_vm12, %v6569_v28  ;;  %vm6331_vm1 = vmpackc.low %vm2801_vm6, %vm2799_vm5  ;;  %vm2562_vm5 = vcmp.eq.s32.totalorder %v7134_v55, %v6769_v25  ;;  %vm2559_vm6 = vcmp.eq.s32.totalorder %v7131_v54, %v6767_v24  ;;  %v3669_v10 = vmax.f32 %v8799_v36, %v3589_v52  ;;  %v3592_v29 = vmul.f32 0.2, %v8908_v13 }
 0x156   : > { %6332 = vmatpush2.bf16.msk.msra.mxu0 %vm6331_vm1, %v6569_v28  ;;  %vm6269_vm4 = vmpackc.low %vm2566_vm8, %vm2564_vm7  ;;  %vm2561_vm8 = vcmp.eq.s32.totalorder %v7134_v55, %v6767_v24  ;;  %vm2556_vm1 = vcmp.eq.s32.totalorder %v7158_v57, %v6769_v25  ;;  %v3610_v22 = vmax.f32 %v3036_v62, %v3530_v8  ;;  %v3091_v30 = vadd.f32 %v8653_v41, %v8833_v60  ;;  %v6487_v62 = vld [vmem:[%s6709_s25 + $0x10] ss:$8 sps:$4 sm:$0xff]   ;;  %s9478_s25 = scalar_lea.sflag [#allocation3], %s470_s20 }
 0x157   : > { %6270 = vmatprep.subr.msk.bf16.mxu1 %vm6269_vm4, %v6569_v28  ;;  %vm6271_vm7 = vmpackc.low %vm2565_vm11, %vm2563_vm10  ;;  %vm2792_vm10 = vcmp.eq.s32.totalorder %v7131_v54, %v6773_v27  ;;  %vm2794_vm11 = vcmp.eq.s32.totalorder %v7134_v55, %v6773_v27  ;;  %vm2558_vm4 = vcmp.eq.s32.totalorder %v7161_v58, %v6769_v25  ;;  %v3710_v25 = vpack.c.bf16 %v3670_v5, %v3650_v9 }
 0x158   : > { %6272 = vmatpush2.bf16.msk.msra.mxu1 %vm6271_vm7, %v6569_v28  ;;  %vm6333_vm9 = vmpackc.low %vm2798_vm14, %vm2796_vm13  ;;  %vm2791_vm13 = vcmp.eq.s32.totalorder %v7131_v54, %v6771_v26  ;;  %vm2793_vm14 = vcmp.eq.s32.totalorder %v7134_v55, %v6771_v26  ;;  %vm2788_vm7 = vcmp.eq.s32.totalorder %v7158_v57, %v6773_v27  ;;  %v3630_v54 = vmax.f32 %v8820_v51, %v3550_v53 }
 0x159   : > { %6334 = vmatprep.subr.msk.bf16.mxu0 %vm6333_vm9, %v6569_v28  ;;  %vm6335_vm12 = vmpackc.low %vm2797_vm2, %vm2795_vm15  ;;  %vm2790_vm9 = vcmp.eq.s32.totalorder %v7161_v58, %v6773_v27  ;;  %v3099_v55 = vadd.f32 %v8731_v49, %v8744_v17  ;;  %v3709_v31 = vpack.c.bf16 %v3669_v10, %v3649_v12  ;;  %v8960_v27 = vadd.f32 %v8679_v44, %v8777_v21 }
 0x15a   : > { %6336 = vmatpush2.bf16.msk.msra.mxu0 %vm6335_vm12, %v6569_v28  ;;  %vm6273_vm15 = vmpackc.low %vm2562_vm5, %vm2560_vm3  ;;  %vm2555_vm3 = vcmp.eq.s32.totalorder %v7158_v57, %v6767_v24  ;;  %vm2789_vm12 = vcmp.eq.s32.totalorder %v7161_v58, %v6771_v26  ;;  %v3101_v37 = vadd.f32 %v8801_v56, %v8761_v20  ;;  %v3672_v40 = vmax.f32 %v8908_v13, %v3592_v29 }
 0x15b   : > { %6274 = vmatprep.subr.msk.bf16.mxu1 %vm6273_vm15, %v6569_v28  ;;  %vm6275_vm2 = vmpackc.low %vm2561_vm8, %vm2559_vm6  ;;  %vm2557_vm6 = vcmp.eq.s32.totalorder %v7161_v58, %v6767_v24  ;;  %v3629_v24 = vmax.f32 %v8868_v3, %v3549_v14  ;;  %v3572_v58 = vmul.f32 0.2, %v3099_v55  ;;  %v3551_v44 = vmul.f32 0.2, %v3091_v30 }
 0x15c   : > { %6276 = vmatpush2.bf16.msk.msra.mxu1 %vm6275_vm2, %v6569_v28  ;;  %vm6337_vm5 = vmpackc.low %vm2794_vm11, %vm2792_vm10  ;;  %vm2787_vm11 = vcmp.eq.s32.totalorder %v7158_v57, %v6771_v26  ;;  %v3690_v26 = vpack.c.bf16 %v3630_v54, %v3610_v22  ;;  %v3609_v57 = vmax.f32 %v3034_v6, %v3529_v11  ;;  %v3097_v38 = vadd.f32 %v8703_v15, %v8796_v33 }
 0x15d   : > { %6338 = vmatprep.subr.msk.bf16.mxu0 %vm6337_vm5, %v6569_v28  ;;  %vm6339_vm8 = vmpackc.low %vm2793_vm14, %vm2791_vm13  ;;  %v3552_v45 = vmul.f32 0.2, %v8960_v27  ;;  %v3652_v46 = vmax.f32 %v3099_v55, %v3572_v58  ;;  %v3531_v16 = vmul.f32 0.2, %v3087_v35  ;;  %v3591_v49 = vmul.f32 0.2, %v3101_v37 }
 0x15e   : > { %6340 = vmatpush2.bf16.msk.msra.mxu0 %vm6339_vm8, %v6569_v28  ;;  %vm6277_vm10 = vmpackc.low %vm2558_vm4, %vm2556_vm1  ;;  %v3689_v43 = vpack.c.bf16 %v3629_v24, %v3609_v57  ;;  %v3631_v56 = vmax.f32 %v3091_v30, %v3551_v44  ;;  %v3571_v51 = vmul.f32 0.2, %v3097_v38  ;;  %vm3759_vm1 = vcmask 261120   ;;  %v8994_v55 = vld [vmem:[%s9528_s5 + $0x8] sm:$0xff]  }
 0x15f   : > { %6278 = vmatprep.subr.msk.bf16.mxu1 %vm6277_vm10, %v6569_v28  ;;  %vm6279_vm13 = vmpackc.low %vm2557_vm6, %vm2555_vm3  ;;  %v3712_v36 = vpack.c.bf16 %v3672_v40, %v3652_v46  ;;  %v3632_v15 = vmax.f32 %v8960_v27, %v3552_v45  ;;  %v3611_v63 = vmax.f32 %v3087_v35, %v3531_v16  ;;  %v3671_v3 = vmax.f32 %v3101_v37, %v3591_v49 }
 0x160   : > { %6280 = vmatpush2.bf16.msk.msra.mxu1 %vm6279_vm13, %v6569_v28  ;;  %vm6341_vm14 = vmpackc.low %vm2790_vm9, %vm2788_vm7  ;;  %v3651_v8 = vmax.f32 %v3097_v38, %v3571_v51 }
 0x161   : > { %6342 = vmatprep.subr.msk.bf16.mxu0 %vm6341_vm14, %v6569_v28  ;;  %6392 = vmatprep.subr.bf16.mxu1 %v3710_v25  ;;  %vm6343_vm15 = vmpackc.low %vm2789_vm12, %vm2787_vm11  ;;  %v8985_v7 = vpack.c.bf16 %v3631_v56, %v3611_v63 }
 0x162   : > { %6344 = vmatpush2.bf16.msk.msra.mxu0 %vm6343_vm15, %v6569_v28  ;;  %v3089_v28 = vadd.f32 %v8629_v2, %v8816_v50  ;;  %v3711_v11 = vpack.c.bf16 %v3671_v3, %v3651_v8 }
 0x163   : > { %v3139_v32 = vpop.f32.mrf.mxu1  ;;  %3456 = vmatmul.mubr.bf16.vlgmr.msra.gmra.mxu1 %v6485_v34  ;;  %3778 = vmatprep.subr.bf16.mxu0 %v3710_v25 }
 0x164   : > { %6394 = vmatpush1.bf16.msra.mxu1 %v3709_v31  ;;  %3465 = vmatprep.mubr.bf16.mxu1 %v6486_v39  ;;  %v3532_v18 = vmul.f32 0.2, %v3089_v28  ;;  %v8979_v52 = vadd.f32 %v3139_v32, %v8864_v0 }
 0x165   : > { %v3141_v41 = vpop.f32.mrf.mxu1  ;;  %v8971_v42 = vpop.f32.mrf.mxu0  ;;  %3509 = vmatmul.mubr.bf16.vlgmr.msra.gmra.mxu0 %v6485_v34  ;;  %6393 = vmatprep.subr.bf16.mxu1 %v3690_v26  ;;  %v9006_v34 = vld [vmem:[%s9528_s5] sm:$0xff]  }
 0x166   : > { %3779 = vmatpush1.bf16.msra.mxu0 %v3709_v31  ;;  %3518 = vmatprep.mubr.bf16.mxu0 %v6486_v39  ;;  %v3612_v4 = vmax.f32 %v3089_v28, %v3532_v18  ;;  %v3142_v9 = vadd.f32 %v3141_v41, %v8816_v50  ;;  %v3533_v12 = vmul.f32 0.2, %v8979_v52  ;;  %v3193_v28 = vadd.f32 %v8971_v42, %v8864_v0 }
 0x167   : > { %v3143_v47 = vpop.f32.mrf.mxu1  ;;  %v3194_v2 = vpop.f32.mrf.mxu0  ;;  %3780 = vmatprep.subr.bf16.mxu0 %v3690_v26 }
 0x168   : > { %6395 = vmatpush1.bf16.msra.mxu1 %v3689_v43  ;;  %v3692_v25 = vpack.c.bf16 %v3632_v15, %v3612_v4  ;;  %v3144_v22 = vadd.f32 %v3143_v47, %v8833_v60  ;;  %v3534_v39 = vmul.f32 0.2, %v3142_v9  ;;  %v3195_v40 = vadd.f32 %v3194_v2, %v8816_v50 }
 0x169   : > { %v3145_v19 = vpop.f32.mrf.mxu1  ;;  %v3196_v23 = vpop.f32.mrf.mxu0 }
 0x16a   : > { %3781 = vmatpush1.bf16.msra.mxu0 %v3689_v43  ;;  %v8983_v53 = vadd.f32 %v3145_v19, %v8777_v21  ;;  %v3553_v44 = vmul.f32 0.2, %v3144_v22  ;;  %v3197_v38 = vadd.f32 %v3196_v23, %v8833_v60  ;;  %v3614_v23 = vmax.f32 %v3142_v9, %v3534_v39 }
 0x16b   : > { %v3149_v59 = vpop.f32.mrf.mxu1  ;;  %v3198_v61 = vpop.f32.mrf.mxu0  ;;  %3466 = vmatmul.mubr.bf16.gmra.mxu1 %v6487_v62  ;;  %3831 = vmatprep.subr.bf16.mxu0 %v3712_v36  ;;  %v3536_v56 = vmul.f32 0.2, %v3195_v40  ;;  %v3613_v9 = vmax.f32 %v8979_v52, %v3533_v12 }
 0x16c   : > { %3808 = vmatprep.mubr.bf16.mxu1 %v9541_v1  ;;  %v3150_v13 = vadd.f32 %v3149_v59, %v8796_v33  ;;  %v3554_v24 = vmul.f32 0.2, %v8983_v53  ;;  %v3199_v30 = vadd.f32 %v3198_v61, %v8777_v21  ;;  %v3633_v59 = vmax.f32 %v3144_v22, %v3553_v44 }
 0x16d   : > { %v3151_v5 = vpop.f32.mrf.mxu1  ;;  %v3202_v6 = vpop.f32.mrf.mxu0  ;;  %3519 = vmatmul.mubr.bf16.gmra.mxu0 %v6487_v62  ;;  %v3555_v61 = vmul.f32 0.2, %v3197_v38 }
 0x16e   : > { %3798 = vmatprep.mubr.bf16.mxu0 %v9541_v1  ;;  %v3152_v14 = vadd.f32 %v3151_v5, %v8744_v17  ;;  %v3203_v31 = vadd.f32 %v3202_v6, %v8796_v33  ;;  %v3573_v41 = vmul.f32 0.2, %v3150_v13  ;;  %v3556_v47 = vmul.f32 0.2, %v3199_v30 }
 0x16f   : > { %v3153_v10 = vpop.f32.mrf.mxu1  ;;  %v3204_v54 = vpop.f32.mrf.mxu0  ;;  %v3634_v42 = vmax.f32 %v8983_v53, %v3554_v24  ;;  %v3535_v53 = vmul.f32 0.2, %v3193_v28 }
 0x170   : > { %v3154_v29 = vadd.f32 %v3153_v10, %v8761_v20  ;;  %v3205_v27 = vadd.f32 %v3204_v54, %v8744_v17  ;;  %v3574_v26 = vmul.f32 0.2, %v3152_v14  ;;  %v3575_v19 = vmul.f32 0.2, %v3203_v31 }
 0x171   : > { %v3155_v58 = vpop.f32.mrf.mxu1  ;;  %v3206_v32 = vpop.f32.mrf.mxu0  ;;  %v3653_v51 = vmax.f32 %v3150_v13, %v3573_v41  ;;  %v3636_v3 = vmax.f32 %v3199_v30, %v3556_v47  ;;  %v3616_v10 = vmax.f32 %v3195_v40, %v3536_v56  ;;  %v3635_v54 = vmax.f32 %v3197_v38, %v3555_v61 }
 0x172   : > { %v3593_v57 = vmul.f32 0.2, %v3154_v29  ;;  %v3156_v35 = vadd.f32 %v3155_v58, %v8724_v48  ;;  %v3207_v37 = vadd.f32 %v3206_v32, %v8761_v20  ;;  %v3576_v49 = vmul.f32 0.2, %v3205_v27 }
 0x173   : > { %v3208_v43 = vpop.f32.mrf.mxu0  ;;  %6348 = vmatmul.mubr.msk.bf16.vlgmr.msra.gmra.mxu1 %vm3759_vm1, %v8994_v55  ;;  %v3654_v2 = vmax.f32 %v3152_v14, %v3574_v26  ;;  %v3655_v8 = vmax.f32 %v3203_v31, %v3575_v19  ;;  %v3694_v14 = vpack.c.bf16 %v3634_v42, %v3614_v23  ;;  %v3696_v22 = vpack.c.bf16 %v3636_v3, %v3616_v10 }
 0x174   : > { %v3594_v45 = vmul.f32 0.2, %v3156_v35  ;;  %v3595_v46 = vmul.f32 0.2, %v3207_v37  ;;  %3904 = vmatprep.mubr.bf16.mxu1 %v9541_v1  ;;  %v3673_v16 = vmax.f32 %v3154_v29, %v3593_v57  ;;  %v3209_v18 = vadd.f32 %v3208_v43, %v8724_v48 }
 0x175   : > { %6347 = vmatmul.mubr.msk.bf16.vlgmr.msra.gmra.mxu0 %vm3759_vm1, %v9006_v34  ;;  %v3656_v5 = vmax.f32 %v3205_v27, %v3576_v49  ;;  %v3615_v29 = vmax.f32 %v3193_v28, %v3535_v53 }
 0x176   : > { %v3674_v36 = vmax.f32 %v3156_v35, %v3594_v45  ;;  %3832 = vmatpush1.bf16.msra.mxu0 %v3711_v11  ;;  %3851 = vmatprep.mubr.bf16.mxu0 %v9541_v1  ;;  %v3596_v15 = vmul.f32 0.2, %v3209_v18  ;;  %v3675_v62 = vmax.f32 %v3207_v37, %v3595_v46  ;;  %v3713_v4 = vpack.c.bf16 %v3673_v16, %v3653_v51 }
 0x177   : > { %3833 = vmatprep.subr.bf16.mxu0 %v3692_v25  ;;  %v3693_v11 = vpack.c.bf16 %v3633_v59, %v3613_v9 }
 0x178   : > { %v3714_v63 = vpack.c.bf16 %v3674_v36, %v3654_v2  ;;  %v3676_v6 = vmax.f32 %v3209_v18, %v3596_v15  ;;  %v3715_v25 = vpack.c.bf16 %v3675_v62, %v3655_v8 }
 0x17a   : > { %3834 = vmatpush1.bf16.msra.mxu0 %v8985_v7  ;;  %3884 = vmatprep.subr.bf16.mxu1 %v3714_v63  ;;  %v3716_v13 = vpack.c.bf16 %v3676_v6, %v3656_v5  ;;  %v3695_v7 = vpack.c.bf16 %v3635_v54, %v3615_v29 }
 0x17b   : > { %3885 = vmatpush1.bf16.msra.mxu1 %v3713_v4 }
 0x17c   : > { %3886 = vmatprep.subr.bf16.mxu1 %v3694_v14  ;;  %3937 = vmatprep.subr.bf16.mxu0 %v3716_v13 }
 0x17d   : > { %6349 = vmatmul.mubr.msk.bf16.vlgmr.msra.gmra.mxu0 %vm3759_vm1, %v9006_v34 }
 0x17e   : > { %3938 = vmatpush1.bf16.msra.mxu0 %v3715_v25  ;;  %3861 = vmatprep.mubr.bf16.mxu0 %v9541_v1 }
 0x17f   : > { %3939 = vmatprep.subr.bf16.mxu0 %v3696_v22  ;;  %3887 = vmatpush1.bf16.msra.mxu1 %v3693_v11 }
 0x182   : > { %3940 = vmatpush1.bf16.msra.mxu0 %v3695_v7  ;;  %6351 = vmatmul.mubr.msk.bf16.vlgmr.msra.gmra.mxu1 %vm3759_vm1, %v9006_v34 }
 0x183   : > { %3914 = vmatprep.mubr.bf16.mxu1 %v9541_v1 }
 0x185   : > { %6350 = vmatmul.mubr.msk.bf16.gmra.mxu0 %vm3759_vm1, %v8994_v55 }
 0x186   : > { %3957 = vmatprep.mubr.bf16.mxu0 %v9541_v1 }
 0x18a   : > { %6352 = vmatmul.mubr.msk.bf16.gmra.mxu1 %vm3759_vm1, %v8994_v55 }
 0x18b   : > { %4010 = vmatprep.mubr.bf16.mxu1 %v9541_v1 }
 0x18d   : > { %6353 = vmatmul.mubr.msk.bf16.vlgmr.msra.gmra.mxu0 %vm3759_vm1, %v9006_v34 }
 0x18e   : > { %3967 = vmatprep.mubr.bf16.mxu0 %v9541_v1 }
 0x195   : > { %6354 = vmatmul.mubr.msk.bf16.gmra.mxu0 %vm3759_vm1, %v8994_v55 }
 0x196   : > { %4063 = vmatprep.mubr.bf16.mxu0 %v9541_v1 }
 0x1a3   : > { %v3245_v52 = vpop.f32.mrf.mxu1 }
 0x1a4   : > { %v9043_v57 = vadd.f32 %v3245_v52, %v8864_v0 }
 0x1a5   : > { %v3247_v12 = vpop.f32.mrf.mxu1  ;;  %v3298_v24 = vpop.f32.mrf.mxu0 }
 0x1a6   : > { %v3248_v28 = vadd.f32 %v3247_v12, %v8816_v50  ;;  %v3537_v38 = vmul.f32 0.2, %v9043_v57  ;;  %v3299_v15 = vadd.f32 %v3298_v24, %v8864_v0 }
 0x1a7   : > { %v3249_v30 = vpop.f32.mrf.mxu1  ;;  %v3300_v31 = vpop.f32.mrf.mxu0 }
 0x1a8   : > { %v3250_v45 = vadd.f32 %v3249_v30, %v8833_v60  ;;  %v3538_v51 = vmul.f32 0.2, %v3248_v28  ;;  %v3301_v59 = vadd.f32 %v3300_v31, %v8816_v50 }
 0x1a9   : > { %v3251_v27 = vpop.f32.mrf.mxu1  ;;  %v3302_v58 = vpop.f32.mrf.mxu0 }
 0x1aa   : > { %v3252_v35 = vadd.f32 %v3251_v27, %v8777_v21  ;;  %v3557_v63 = vmul.f32 0.2, %v3250_v45  ;;  %v3303_v3 = vadd.f32 %v3302_v58, %v8833_v60  ;;  %v3618_v25 = vmax.f32 %v3248_v28, %v3538_v51 }
 0x1ab   : > { %v3255_v32 = vpop.f32.mrf.mxu1  ;;  %v3304_v26 = vpop.f32.mrf.mxu0  ;;  %v3540_v11 = vmul.f32 0.2, %v3301_v59 }
 0x1ac   : > { %v3256_v40 = vadd.f32 %v3255_v32, %v8796_v33  ;;  %v3558_v47 = vmul.f32 0.2, %v3252_v35  ;;  %v3305_v16 = vadd.f32 %v3304_v26, %v8777_v21  ;;  %v3637_v7 = vmax.f32 %v3250_v45, %v3557_v63 }
 0x1ad   : > { %v3257_v37 = vpop.f32.mrf.mxu1  ;;  %v3308_v39 = vpop.f32.mrf.mxu0  ;;  %v3559_v52 = vmul.f32 0.2, %v3303_v3  ;;  %v3539_v32 = vmul.f32 0.2, %v3299_v15 }
 0x1ae   : > { %v3258_v41 = vadd.f32 %v3257_v37, %v8744_v17  ;;  %v3309_v49 = vadd.f32 %v3308_v39, %v8796_v33  ;;  %v3577_v61 = vmul.f32 0.2, %v3256_v40  ;;  %v3560_v6 = vmul.f32 0.2, %v3305_v16 }
 0x1af   : > { %v3259_v43 = vpop.f32.mrf.mxu1  ;;  %v3310_v44 = vpop.f32.mrf.mxu0  ;;  %v3638_v9 = vmax.f32 %v3252_v35, %v3558_v47  ;;  %v3617_v35 = vmax.f32 %v9043_v57, %v3537_v38  ;;  %v3620_v39 = vmax.f32 %v3301_v59, %v3540_v11  ;;  %v3619_v45 = vmax.f32 %v3299_v15, %v3539_v32 }
 0x1b0   : > { %v3260_v46 = vadd.f32 %v3259_v43, %v8761_v20  ;;  %v3311_v18 = vadd.f32 %v3310_v44, %v8744_v17  ;;  %v3578_v19 = vmul.f32 0.2, %v3258_v41  ;;  %v3579_v13 = vmul.f32 0.2, %v3309_v49 }
 0x1b1   : > { %v3261_v42 = vpop.f32.mrf.mxu1  ;;  %v3312_v2 = vpop.f32.mrf.mxu0  ;;  %v3657_v22 = vmax.f32 %v3256_v40, %v3577_v61  ;;  %v3640_v30 = vmax.f32 %v3305_v16, %v3560_v6  ;;  %v3698_v37 = vpack.c.bf16 %v3638_v9, %v3618_v25  ;;  %v3697_v43 = vpack.c.bf16 %v3637_v7, %v3617_v35 }
 0x1b2   : > { %v3597_v36 = vmul.f32 0.2, %v3260_v46  ;;  %v3262_v23 = vadd.f32 %v3261_v42, %v8724_v48  ;;  %v3313_v56 = vadd.f32 %v3312_v2, %v8761_v20  ;;  %v3580_v8 = vmul.f32 0.2, %v3311_v18 }
 0x1b3   : > { %v3314_v62 = vpop.f32.mrf.mxu0  ;;  %v3658_v10 = vmax.f32 %v3258_v41, %v3578_v19  ;;  %v3659_v26 = vmax.f32 %v3309_v49, %v3579_v13  ;;  %v3639_v41 = vmax.f32 %v3303_v3, %v3559_v52  ;;  %v3700_v44 = vpack.c.bf16 %v3640_v30, %v3620_v39 }
 0x1b4   : > { %v3598_v4 = vmul.f32 0.2, %v3262_v23  ;;  %v3599_v5 = vmul.f32 0.2, %v3313_v56  ;;  %v3677_v53 = vmax.f32 %v3260_v46, %v3597_v36  ;;  %v3315_v14 = vadd.f32 %v3314_v62, %v8724_v48 }
 0x1b5   : > { %v3660_v27 = vmax.f32 %v3311_v18, %v3580_v8  ;;  %v3699_v46 = vpack.c.bf16 %v3639_v41, %v3619_v45 }
 0x1b6   : > { %v3678_v54 = vmax.f32 %v3262_v23, %v3598_v4  ;;  %v3600_v29 = vmul.f32 0.2, %v3315_v14  ;;  %v3679_v12 = vmax.f32 %v3313_v56, %v3599_v5  ;;  %v3717_v31 = vpack.c.bf16 %v3677_v53, %v3657_v22 }
 0x1b8   : > { %v3718_v24 = vpack.c.bf16 %v3678_v54, %v3658_v10  ;;  %v3680_v58 = vmax.f32 %v3315_v14, %v3600_v29  ;;  %v3719_v40 = vpack.c.bf16 %v3679_v12, %v3659_v26 }
 0x1ba   : > { %3990 = vmatprep.subr.bf16.mxu1 %v3718_v24  ;;  %v3720_v28 = vpack.c.bf16 %v3680_v58, %v3660_v27 }
 0x1bb   : > { %3991 = vmatpush1.bf16.msra.mxu1 %v3717_v31 }
 0x1bc   : > { %3992 = vmatprep.subr.bf16.mxu1 %v3698_v37  ;;  %4043 = vmatprep.subr.bf16.mxu0 %v3720_v28 }
 0x1bd   : > { %4044 = vmatpush1.bf16.msra.mxu0 %v3719_v40 }
 0x1be   : > { %4045 = vmatprep.subr.bf16.mxu0 %v3700_v44 }
 0x1bf   : > { %3993 = vmatpush1.bf16.msra.mxu1 %v3697_v43 }
 0x1c1   : > { %4046 = vmatpush1.bf16.msra.mxu0 %v3699_v46 }
 0x1c2   : > { %6355 = vmatmul.mubr.msk.bf16.vlgmr.msra.gmra.mxu1 %vm3759_vm1, %v9006_v34 }
 0x1c3   : > { %4020 = vmatprep.mubr.bf16.mxu1 %v9541_v1 }
 0x1c4   : > { %6357 = vmatmul.mubr.msk.bf16.vlgmr.msra.gmra.mxu0 %vm3759_vm1, %v9006_v34 }
 0x1c5   : > { %4073 = vmatprep.mubr.bf16.mxu0 %v9541_v1 }
 0x1ca   : > { %6356 = vmatmul.mubr.msk.bf16.gmra.mxu1 %vm3759_vm1, %v8994_v55 }
 0x1cb   : > { %4116 = vmatprep.mubr.bf16.mxu1 %v9541_v1 }
 0x1cc   : > { %6358 = vmatmul.mubr.msk.bf16.gmra.mxu0 %vm3759_vm1, %v8994_v55 }
 0x1cd   : > { %4169 = vmatprep.mubr.bf16.mxu0 %v9541_v1 }
 0x1e3   : > { %v3351_v57 = vpop.f32.mrf.mxu1 }
 0x1e4   : > { %v9075_v36 = vadd.f32 %v3351_v57, %v8864_v0 }
 0x1e5   : > { %v3353_v38 = vpop.f32.mrf.mxu1  ;;  %v3404_v47 = vpop.f32.mrf.mxu0 }
 0x1e6   : > { %v3354_v15 = vadd.f32 %v3353_v38, %v8816_v50  ;;  %v3541_v3 = vmul.f32 0.2, %v9075_v36  ;;  %v3405_v29 = vadd.f32 %v3404_v47, %v8864_v0 }
 0x1e7   : > { %v3355_v16 = vpop.f32.mrf.mxu1  ;;  %v3406_v49 = vpop.f32.mrf.mxu0 }
 0x1e8   : > { %v3356_v4 = vadd.f32 %v3355_v16, %v8833_v60  ;;  %v3542_v22 = vmul.f32 0.2, %v3354_v15  ;;  %v3407_v7 = vadd.f32 %v3406_v49, %v8816_v50 }
 0x1e9   : > { %v3357_v18 = vpop.f32.mrf.mxu1  ;;  %v3408_v42 = vpop.f32.mrf.mxu0 }
 0x1ea   : > { %v3358_v23 = vadd.f32 %v3357_v18, %v8777_v21  ;;  %v3561_v24 = vmul.f32 0.2, %v3356_v4  ;;  %v3409_v30 = vadd.f32 %v3408_v42, %v8833_v60  ;;  %v3622_v40 = vmax.f32 %v3354_v15, %v3542_v22 }
 0x1eb   : > { %v3361_v2 = vpop.f32.mrf.mxu1  ;;  %v3410_v19 = vpop.f32.mrf.mxu0  ;;  %v3544_v43 = vmul.f32 0.2, %v3407_v7 }
 0x1ec   : > { %v3362_v59 = vadd.f32 %v3361_v2, %v8796_v33  ;;  %v3562_v6 = vmul.f32 0.2, %v3358_v23  ;;  %v3411_v53 = vadd.f32 %v3410_v19, %v8777_v21  ;;  %v3641_v46 = vmax.f32 %v3356_v4, %v3561_v24 }
 0x1ed   : > { %v3363_v56 = vpop.f32.mrf.mxu1  ;;  %v3414_v51 = vpop.f32.mrf.mxu0  ;;  %v3563_v57 = vmul.f32 0.2, %v3409_v30  ;;  %v3543_v2 = vmul.f32 0.2, %v3405_v29 }
 0x1ee   : > { %v3364_v61 = vadd.f32 %v3363_v56, %v8744_v17  ;;  %v3415_v8 = vadd.f32 %v3414_v51, %v8796_v33  ;;  %v3581_v52 = vmul.f32 0.2, %v3362_v59  ;;  %v3564_v58 = vmul.f32 0.2, %v3411_v53 }
 0x1ef   : > { %v3365_v62 = vpop.f32.mrf.mxu1  ;;  %v3416_v63 = vpop.f32.mrf.mxu0  ;;  %v3642_v35 = vmax.f32 %v3358_v23, %v3562_v6  ;;  %v3621_v23 = vmax.f32 %v9075_v36, %v3541_v3  ;;  %v3624_v51 = vmax.f32 %v3407_v7, %v3544_v43  ;;  %v3623_v4 = vmax.f32 %v3405_v29, %v3543_v2 }
 0x1f0   : > { %v3366_v5 = vadd.f32 %v3365_v62, %v8761_v20  ;;  %v3417_v14 = vadd.f32 %v3416_v63, %v8744_v17  ;;  %v3582_v13 = vmul.f32 0.2, %v3364_v61  ;;  %v3583_v28 = vmul.f32 0.2, %v3415_v8  ;;  %v9126_v43 = vpop.permute.xlu0 %3741 }
 0x1f1   : > { %v3367_v9 = vpop.f32.mrf.mxu1  ;;  %v3418_v10 = vpop.f32.mrf.mxu0  ;;  %v3661_v44 = vmax.f32 %v3362_v59, %v3581_v52  ;;  %v3644_v16 = vmax.f32 %v3411_v53, %v3564_v58  ;;  %v3702_v56 = vpack.c.bf16 %v3642_v35, %v3622_v40  ;;  %v3701_v62 = vpack.c.bf16 %v3641_v46, %v3621_v23 }
 0x1f2   : > { %v3601_v54 = vmul.f32 0.2, %v3366_v5  ;;  %v3368_v25 = vadd.f32 %v3367_v9, %v8724_v48  ;;  %v3419_v11 = vadd.f32 %v3418_v10, %v8761_v20  ;;  %v3584_v26 = vmul.f32 0.2, %v3417_v14 }
 0x1f3   : > { %v3420_v12 = vpop.f32.mrf.mxu0  ;;  %v3662_v39 = vmax.f32 %v3364_v61, %v3582_v13  ;;  %v3663_v19 = vmax.f32 %v3415_v8, %v3583_v28  ;;  %v3643_v61 = vmax.f32 %v3409_v30, %v3563_v57  ;;  %v3704_v63 = vpack.c.bf16 %v3644_v16, %v3624_v51 }
 0x1f4   : > { %v3602_v31 = vmul.f32 0.2, %v3368_v25  ;;  %v3603_v27 = vmul.f32 0.2, %v3419_v11  ;;  %v3681_v32 = vmax.f32 %v3366_v5, %v3601_v54  ;;  %v3421_v37 = vadd.f32 %v3420_v12, %v8724_v48 }
 0x1f5   : > { %v3664_v18 = vmax.f32 %v3417_v14, %v3584_v26  ;;  %v3703_v5 = vpack.c.bf16 %v3643_v61, %v3623_v4  ;;  %v9134_v4 = vpop.permute.xlu0 %3731 }
 0x1f6   : > { %v3682_v41 = vmax.f32 %v3368_v25, %v3602_v31  ;;  %v3604_v45 = vmul.f32 0.2, %v3421_v37  ;;  %v3683_v38 = vmax.f32 %v3419_v11, %v3603_v27  ;;  %v3721_v49 = vpack.c.bf16 %v3681_v32, %v3661_v44 }
 0x1f8   : > { %v3722_v47 = vpack.c.bf16 %v3682_v41, %v3662_v39  ;;  %v3684_v42 = vmax.f32 %v3421_v37, %v3604_v45  ;;  %v3723_v59 = vpack.c.bf16 %v3683_v38, %v3663_v19 }
 0x1fa   : > { %4096 = vmatprep.subr.bf16.mxu1 %v3722_v47  ;;  %v3724_v15 = vpack.c.bf16 %v3684_v42, %v3664_v18 }
 0x1fb   : > { %4097 = vmatpush1.bf16.msra.mxu1 %v3721_v49 }
 0x1fc   : > { %4098 = vmatprep.subr.bf16.mxu1 %v3702_v56  ;;  %4149 = vmatprep.subr.bf16.mxu0 %v3724_v15 }
 0x1fd   : > { %4150 = vmatpush1.bf16.msra.mxu0 %v3723_v59 }
 0x1fe   : > { %4151 = vmatprep.subr.bf16.mxu0 %v3704_v63 }
 0x1ff   : > { %4099 = vmatpush1.bf16.msra.mxu1 %v3701_v62 }
 0x201   : > { %4152 = vmatpush1.bf16.msra.mxu0 %v3703_v5 }
 0x202   : > { %6359 = vmatmul.mubr.msk.bf16.vlgmr.msra.gmra.mxu1 %vm3759_vm1, %v9006_v34 }
 0x203   : > { %4126 = vmatprep.mubr.bf16.mxu1 %v9541_v1 }
 0x204   : > { %6361 = vmatmul.mubr.msk.bf16.vlgmr.msra.gmra.mxu0 %vm3759_vm1, %v9006_v34 }
 0x205   : > { %4179 = vmatprep.mubr.bf16.mxu0 %v9541_v1 }
 0x20a   : > { %6360 = vmatmul.mubr.msk.bf16.gmra.mxu1 %vm3759_vm1, %v8994_v55 }
 0x20b   : > { %4222 = vmatprep.mubr.bf16.mxu1 %v9541_v1 }
 0x20c   : > { %6362 = vmatmul.mubr.msk.bf16.gmra.mxu0 %vm3759_vm1, %v8994_v55 }
 0x20d   : > { %4275 = vmatprep.mubr.bf16.mxu0 %v9541_v1 }
 0x223   : > { %v3457_v36 = vpop.f32.mrf.mxu1 }
 0x224   : > { %v9107_v54 = vadd.f32 %v3457_v36, %v8864_v0 }
 0x225   : > { %v3459_v3 = vpop.f32.mrf.mxu1  ;;  %v3510_v6 = vpop.f32.mrf.mxu0 }
 0x226   : > { %v3460_v22 = vadd.f32 %v3459_v3, %v8816_v50  ;;  %v9113_v24 = vmul.f32 0.2, %v9107_v54  ;;  %v9118_v27 = vadd.f32 %v3510_v6, %v8864_v0 }
 0x227   : > { %v3461_v53 = vpop.f32.mrf.mxu1  ;;  %v3512_v8 = vpop.f32.mrf.mxu0 }
 0x228   : > { %v3462_v58 = vadd.f32 %v3461_v53, %v8833_v60  ;;  %v3546_v44 = vmul.f32 0.2, %v3460_v22  ;;  %v3513_v0 = vadd.f32 %v3512_v8, %v8816_v50 }
 0x229   : > { %v3463_v14 = vpop.f32.mrf.mxu1  ;;  %v3514_v9 = vpop.f32.mrf.mxu0 }
 0x22a   : > { %v3464_v29 = vadd.f32 %v3463_v14, %v8777_v21  ;;  %v3565_v42 = vmul.f32 0.2, %v3462_v58  ;;  %v3548_v50 = vmul.f32 0.2, %v3513_v0 }
 0x22b   : > { %v3467_v10 = vpop.f32.mrf.mxu1  ;;  %v3516_v13 = vpop.f32.mrf.mxu0 }
 0x22c   : > { %v3468_v30 = vadd.f32 %v3467_v10, %v8796_v33  ;;  %v3517_v32 = vadd.f32 %v3516_v13, %v8777_v21  ;;  %v3566_v45 = vmul.f32 0.2, %v3464_v29  ;;  %v3515_v21 = vadd.f32 %v3514_v9, %v8833_v60 }
 0x22d   : > { %v3469_v25 = vpop.f32.mrf.mxu1  ;;  %v3520_v11 = vpop.f32.mrf.mxu0  ;;  %v3626_v60 = vmax.f32 %v3460_v22, %v3546_v44  ;;  %v3645_v53 = vmax.f32 %v3462_v58, %v3565_v42  ;;  %v3628_v10 = vmax.f32 %v3513_v0, %v3548_v50  ;;  %v3625_v22 = vmax.f32 %v9107_v54, %v9113_v24 }
 0x22e   : > { %v3470_v7 = vadd.f32 %v3469_v25, %v8744_v17  ;;  %v3521_v39 = vadd.f32 %v3520_v11, %v8796_v33  ;;  %v3547_v33 = vmul.f32 0.2, %v9118_v27  ;;  %v3568_v16 = vmul.f32 0.2, %v3517_v32 }
 0x22f   : > { %v3471_v52 = vpop.f32.mrf.mxu1  ;;  %v3522_v12 = vpop.f32.mrf.mxu0  ;;  %v3646_v23 = vmax.f32 %v3464_v29, %v3566_v45  ;;  %v3567_v59 = vmul.f32 0.2, %v3515_v21 }
 0x230   : > { %v3472_v31 = vadd.f32 %v3471_v52, %v8761_v20  ;;  %v3523_v26 = vadd.f32 %v3522_v12, %v8744_v17  ;;  %v3586_v46 = vmul.f32 0.2, %v3470_v7  ;;  %v3585_v17 = vmul.f32 0.2, %v3468_v30 }
 0x231   : > { %v3473_v37 = vpop.f32.mrf.mxu1  ;;  %v3524_v35 = vpop.f32.mrf.mxu0  ;;  %v3587_v2 = vmul.f32 0.2, %v3521_v39  ;;  %v3648_v5 = vmax.f32 %v3517_v32, %v3568_v16  ;;  %v3706_v25 = vpack.c.bf16 %v3646_v23, %v3626_v60  ;;  %v3647_v29 = vmax.f32 %v3515_v21, %v3567_v59 }
 0x232   : > { %v3605_v28 = vmul.f32 0.2, %v3472_v31  ;;  %v3474_v41 = vadd.f32 %v3473_v37, %v8724_v48  ;;  %v3525_v40 = vadd.f32 %v3524_v35, %v8761_v20  ;;  %v3588_v49 = vmul.f32 0.2, %v3523_v26  ;;  %v6488_v35 = vld [vmem:[%s6714_s15 + $0x4] ss:$8 sps:$4 sm:$0xff]  }
 0x233   : > { %v3526_v57 = vpop.f32.mrf.mxu0  ;;  %v3666_v51 = vmax.f32 %v3470_v7, %v3586_v46  ;;  %v3665_v62 = vmax.f32 %v3468_v30, %v3585_v17  ;;  %v3667_v8 = vmax.f32 %v3521_v39, %v3587_v2  ;;  %v3708_v12 = vpack.c.bf16 %v3648_v5, %v3628_v10 }
 0x234   : > { %v3606_v38 = vmul.f32 0.2, %v3474_v41  ;;  %v3607_v47 = vmul.f32 0.2, %v3525_v40  ;;  %v3527_v18 = vadd.f32 %v3526_v57, %v8724_v48  ;;  %v3685_v19 = vmax.f32 %v3472_v31, %v3605_v28  ;;  %v6470_v57 = vld [vmem:[%s9530_s7] sm:$0xff]  }
 0x235   : > { %v3800_v20 = vpop.f32.mrf.mxu0  ;;  %v3668_v36 = vmax.f32 %v3523_v26, %v3588_v49  ;;  %v3627_v30 = vmax.f32 %v9118_v27, %v3547_v33  ;;  %v3705_v31 = vpack.c.bf16 %v3645_v53, %v3625_v22  ;;  %v6489_v27 = vld [vmem:[%s6714_s15] ss:$8 sps:$4 sm:$0xff]  }
 0x236   : > { %v3686_v56 = vmax.f32 %v3474_v41, %v3606_v38  ;;  %v3608_v15 = vmul.f32 0.2, %v3527_v18  ;;  %v3687_v63 = vmax.f32 %v3525_v40, %v3607_v47  ;;  %v3725_v14 = vpack.c.bf16 %v3685_v19, %v3665_v62  ;;  %v3810_v40 = vpop.f32.mrf.mxu1  ;;  %v6472_v47 = vld [vmem:[%s9530_s7 + $0x8] sm:$0xff]  }
 0x237   : > { %v9132_v61 = vpop.f32.mrf.mxu0  ;;  %v3801_v9 = vadd.f32 %v3800_v20, %v9134_v4  ;;  %v3707_v26 = vpack.c.bf16 %v3647_v29, %v3627_v30  ;;  %v6474_v20 = vld [vmem:[%s9530_s7 + $0x10] sm:$0xff]  }
 0x238   : > { %v3688_v48 = vmax.f32 %v3527_v18, %v3608_v15  ;;  %v3726_v6 = vpack.c.bf16 %v3686_v56, %v3666_v51  ;;  %v3727_v7 = vpack.c.bf16 %v3687_v63, %v3667_v8  ;;  %v3812_v0 = vpop.f32.mrf.mxu1  ;;  %v9205_v63 = vpop.permute.xlu1 %3746 }
 0x239   : > { %v9136_v3 = vpop.f32.mrf.mxu0  ;;  %v4296_v58 = vmul.f32 0.2, %v3801_v9  ;;  %v9217_v53 = vadd.f32 %v3812_v0, %v9126_v43 }
 0x23a   : > { %4202 = vmatprep.subr.bf16.mxu1 %v3726_v6  ;;  %v3728_v11 = vpack.c.bf16 %v3688_v48, %v3668_v36  ;;  %v3814_v45 = vpop.f32.mrf.mxu1  ;;  %v9214_v6 = vadd.f32 %v3810_v40, %v9126_v43 }
 0x23b   : > { %v9139_v13 = vpop.f32.mrf.mxu0  ;;  %4203 = vmatpush1.bf16.msra.mxu1 %v3725_v14  ;;  %v4376_v54 = vmax.f32 %v3801_v9, %v4296_v58  ;;  %v3803_v9 = vadd.f32 %v9132_v61, %v9134_v4  ;;  %v9226_v10 = vadd.f32 %v3814_v45, %v9205_v63  ;;  %v9241_v61 = vmul.f32 0.2, %v9217_v53 }
 0x23c   : > { %4204 = vmatprep.subr.bf16.mxu1 %v3706_v25  ;;  %4255 = vmatprep.subr.bf16.mxu0 %v3728_v11  ;;  %v3816_v21 = vpop.f32.mrf.mxu1  ;;  %v9221_v14 = vpop.permute.xlu1 %3736 }
 0x23d   : > { %v3853_v52 = vpop.f32.mrf.mxu0  ;;  %4256 = vmatpush1.bf16.msra.mxu0 %v3727_v7  ;;  %v3805_v25 = vadd.f32 %v9136_v3, %v9221_v14  ;;  %v9233_v22 = vadd.f32 %v3816_v21, %v9205_v63  ;;  %v4297_v30 = vmul.f32 0.2, %v3803_v9  ;;  %v9247_v3 = vadd.f32 %v9139_v13, %v9221_v14 }
 0x23e   : > { %v3854_v32 = vadd.f32 %v3853_v52, %v9134_v4  ;;  %4257 = vmatprep.subr.bf16.mxu0 %v3708_v12  ;;  %v9238_v52 = vmul.f32 0.2, %v9214_v6  ;;  %v9251_v58 = vmul.f32 0.2, %v9226_v10 }
 0x23f   : > { %4205 = vmatpush1.bf16.msra.mxu1 %v3705_v31  ;;  %v3855_v28 = vpop.f32.mrf.mxu0  ;;  %v4377_v40 = vmax.f32 %v3803_v9, %v4297_v30  ;;  %v4317_v0 = vmul.f32 0.2, %v9247_v3 }
 0x240   : > { %v4298_v37 = vmul.f32 0.2, %v3854_v32  ;;  %v3856_v29 = vadd.f32 %v3855_v28, %v9134_v4 }
 0x241   : > { %4258 = vmatpush1.bf16.msra.mxu0 %v3707_v26  ;;  %v3857_v41 = vpop.f32.mrf.mxu0 }
 0x242   : > { %v4378_v24 = vmax.f32 %v3854_v32, %v4298_v37  ;;  %6363 = vmatmul.mubr.msk.bf16.vlgmr.msra.gmra.mxu1 %vm3759_vm1, %v9006_v34  ;;  %4669 = vmatprep.subr.bf16.mxu0 %v6488_v35  ;;  %v3858_v7 = vadd.f32 %v3857_v41, %v9221_v14  ;;  %v4316_v32 = vmul.f32 0.2, %v3805_v25  ;;  %v9256_v37 = vmul.f32 0.2, %v9233_v22 }
 0x243   : > { %4232 = vmatprep.mubr.bf16.mxu1 %v9541_v1  ;;  %v3859_v44 = vpop.f32.mrf.mxu0  ;;  %v4416_v35 = vmax.f32 %v9214_v6, %v9238_v52 }
 0x244   : > { %v9148_v39 = vmax.f32 %v4376_v54, %v4378_v24  ;;  %6365 = vmatmul.mubr.msk.bf16.vlgmr.msra.gmra.mxu0 %vm3759_vm1, %v9006_v34  ;;  %v4299_v54 = vmul.f32 0.2, %v3856_v29  ;;  %v4318_v24 = vmul.f32 0.2, %v3858_v7 }
 0x245   : > { %4285 = vmatprep.mubr.bf16.mxu0 %v9541_v1  ;;  %4670 = vmatpush1.bf16.msra.mxu0 %v6489_v27  ;;  %v9161_v34 = vpop.f32.mrf.mxu0  ;;  %v3860_v27 = vadd.f32 %v3859_v44, %v9221_v14 }
 0x246   : > { %v4379_v6 = vmax.f32 %v3856_v29, %v4299_v54  ;;  %v4398_v9 = vmax.f32 %v3858_v7, %v4318_v24 }
 0x247   : > { %v9163_v46 = vpop.f32.mrf.mxu0  ;;  %v4319_v30 = vmul.f32 0.2, %v3860_v27 }
 0x248   : > { %v3866_v44 = vadd.f32 %v9163_v46, %v9126_v43  ;;  %v4397_v46 = vmax.f32 %v9247_v3, %v4317_v0 }
 0x249   : > { %v9168_v17 = vpop.f32.mrf.mxu0 }
 0x24a   : > { %6364 = vmatmul.mubr.msk.bf16.gmra.mxu1 %vm3759_vm1, %v8994_v55  ;;  %v4339_v7 = vmul.f32 0.2, %v3866_v44 }
 0x24b   : > { %4600 = vmatprep.mubr.bf16.mxu1 %v9541_v1  ;;  %v9172_v38 = vpop.f32.mrf.mxu0 }
 0x24c   : > { %6366 = vmatmul.mubr.msk.bf16.gmra.mxu0 %vm3759_vm1, %v8994_v55  ;;  %v3906_v55 = vpop.f32.mrf.mxu1 }
 0x24d   : > { %4687 = vmatprep.mubr.bf16.mxu0 %v9541_v1  ;;  %v9177_v16 = vpop.f32.mrf.mxu0  ;;  %v3907_v31 = vadd.f32 %v3906_v55, %v9134_v4  ;;  %v4396_v55 = vmax.f32 %v3805_v25, %v4316_v32 }
 0x24e   : > { %v3908_v33 = vpop.f32.mrf.mxu1  ;;  %v3960_v54 = vadd.f32 %v9177_v16, %v9134_v4 }
 0x24f   : > { %v9181_v18 = vpop.f32.mrf.mxu0  ;;  %v3909_v28 = vadd.f32 %v3908_v33, %v9134_v4  ;;  %v4300_v45 = vmul.f32 0.2, %v3907_v31  ;;  %v3870_v33 = vadd.f32 %v9172_v38, %v9205_v63  ;;  %v4458_v24 = vmax.f32 %v4396_v55, %v4398_v9 }
 0x250   : > { %v3910_v49 = vpop.f32.mrf.mxu1  ;;  %v3962_v16 = vadd.f32 %v9181_v18, %v9134_v4 }
 0x251   : > { %v9186_v2 = vpop.f32.mrf.mxu0  ;;  %v4380_v32 = vmax.f32 %v3907_v31, %v4300_v45  ;;  %v4399_v31 = vmax.f32 %v3860_v27, %v4319_v30 }
 0x252   : > { %v3912_v42 = vpop.f32.mrf.mxu1  ;;  %v3964_v30 = vadd.f32 %v9186_v2, %v9221_v14 }
 0x253   : > { %v9189_v56 = vpop.f32.mrf.mxu0  ;;  %v3913_v52 = vadd.f32 %v3912_v42, %v9221_v14 }
 0x254   : > { %6376 = vmatmul.mubr.msk.bf16.vlgmr.msra.gmra.mxu0 %vm554_vm0, %v6470_v57  ;;  %v3916_v19 = vpop.f32.mrf.mxu1  ;;  %v3864_v57 = vadd.f32 %v9161_v34, %v9126_v43  ;;  %v4301_v34 = vmul.f32 0.2, %v3909_v28 }
 0x255   : > { %4697 = vmatprep.mubr.bf16.mxu0 %v9541_v1  ;;  %v9193_v23 = vpop.f32.mrf.mxu0  ;;  %v3917_v25 = vadd.f32 %v3916_v19, %v9126_v43  ;;  %v4457_v19 = vmax.f32 %v4377_v40, %v4379_v6  ;;  %v4321_v13 = vmul.f32 0.2, %v3913_v52  ;;  %v4419_v40 = vmax.f32 %v3866_v44, %v4339_v7 }
 0x256   : > { %v9191_v50 = vpop.f32.mrf.mxu1  ;;  %v4338_v21 = vmul.f32 0.2, %v3864_v57  ;;  %v4381_v0 = vmax.f32 %v3909_v28, %v4301_v34  ;;  %v4302_v6 = vmul.f32 0.2, %v3960_v54  ;;  %v4303_v44 = vmul.f32 0.2, %v3962_v16 }
 0x257   : > { %v9197_v15 = vpop.f32.mrf.mxu0  ;;  %v3919_v42 = vadd.f32 %v9191_v50, %v9126_v43  ;;  %v4340_v38 = vmul.f32 0.2, %v3917_v25 }
 0x258   : > { %v9195_v51 = vpop.f32.mrf.mxu1  ;;  %v4418_v50 = vmax.f32 %v3864_v57, %v4338_v21  ;;  %v4465_v57 = vmax.f32 %v4457_v19, %v4381_v0 }
 0x259   : > { %v9201_v59 = vpop.f32.mrf.mxu0  ;;  %v3921_v3 = vadd.f32 %v9195_v51, %v9205_v63  ;;  %v4341_v55 = vmul.f32 0.2, %v3919_v42  ;;  %v4401_v51 = vmax.f32 %v3913_v52, %v4321_v13  ;;  %v4420_v34 = vmax.f32 %v3917_v25, %v4340_v38 }
 0x25a   : > { %v9199_v60 = vpop.f32.mrf.mxu1  ;;  %v4460_v18 = vmax.f32 %v4416_v35, %v4418_v50  ;;  %v9556_v52 = vmax.f32 %v9217_v53, %v9241_v61  ;;  %v4322_v35 = vmul.f32 0.2, %v3964_v30  ;;  %v9558_v61 = vmax.f32 %v9233_v22, %v9256_v37 }
 0x25b   : > { %v9207_v5 = vpop.f32.mrf.mxu0  ;;  %v4360_v27 = vmul.f32 0.2, %v3921_v3  ;;  %v3923_v28 = vadd.f32 %v9199_v60, %v9205_v63  ;;  %v4421_v7 = vmax.f32 %v3919_v42, %v4341_v55  ;;  %v3974_v38 = vadd.f32 %v9201_v59, %v9205_v63 }
 0x25c   : > { %6377 = vmatmul.mubr.msk.bf16.gmra.mxu0 %vm554_vm0, %v6472_v47  ;;  %v3911_v47 = vadd.f32 %v3910_v49, %v9221_v14  ;;  %v4461_v60 = vmax.f32 %v9556_v52, %v4419_v40  ;;  %v4402_v37 = vmax.f32 %v3964_v30, %v4322_v35 }
 0x25d   : > { %4707 = vmatprep.mubr.bf16.mxu0 %v9541_v1  ;;  %v3868_v1 = vadd.f32 %v9168_v17, %v9205_v63  ;;  %v4440_v25 = vmax.f32 %v3921_v3, %v4360_v27  ;;  %v4361_v19 = vmul.f32 0.2, %v3923_v28  ;;  %v3972_v3 = vadd.f32 %v9197_v15, %v9126_v43 }
 0x25e   : > { %v4320_v29 = vmul.f32 0.2, %v3911_v47  ;;  %v3976_v15 = vadd.f32 %v9207_v5, %v9205_v63 }
 0x25f   : > { %v4358_v45 = vmul.f32 0.2, %v3868_v1  ;;  %v4441_v22 = vmax.f32 %v3923_v28, %v4361_v19  ;;  %v4343_v55 = vmul.f32 0.2, %v3972_v3 }
 0x261   : > { %v4438_v21 = vmax.f32 %v3868_v1, %v4358_v45 }
 0x264   : > { %6378 = vmatmul.mubr.msk.bf16.gmra.mxu0 %vm554_vm0, %v6474_v20  ;;  %vm4834_vm0 = vcmask 392192  }
 0x282   : > { %v9203_v62 = vpop.f32.mrf.mxu1 }
 0x283   : > { %v4013_v53 = vadd.f32 %v9203_v62, %v9134_v4 }
 0x284   : > { %v9209_v36 = vpop.f32.mrf.mxu1  ;;  %v9211_v48 = vpop.f32.mrf.mxu0 }
 0x286   : > { %v9219_v8 = vpop.f32.mrf.mxu1  ;;  %v9230_v11 = vpop.f32.mrf.mxu0 }
 0x287   : > { %v4068_v59 = vadd.f32 %v9230_v11, %v9134_v4 }
 0x288   : > { %v9243_v12 = vpop.f32.mrf.mxu1  ;;  %v9253_v26 = vpop.f32.mrf.mxu0 }
 0x289   : > { %v4070_v5 = vadd.f32 %v9253_v26, %v9221_v14 }
 0x28a   : > { %v9264_v41 = vpop.f32.mrf.mxu1  ;;  %v9274_v20 = vpop.f32.mrf.mxu0 }
 0x28b   : > { %9551 = vst [vmem:[#allocation11_spill] sm:$0xff] %v9264_v41  ;;  %9552 = vst [vmem:[#allocation12_spill] sm:$0xff] %v9274_v20  ;;  %v4464_v20 = vmax.f32 %v9148_v39, %v4380_v32  ;;  %v4359_v41 = vmul.f32 0.2, %v3870_v33  ;;  %v4459_v39 = vmax.f32 %v4397_v46, %v4399_v31  ;;  %v4469_v31 = vmax.f32 %v4461_v60, %v4421_v7 }
 0x28c   : > { %v9282_v49 = vpop.f32.mrf.mxu1  ;;  %v9291_v17 = vpop.f32.mrf.mxu0  ;;  %v4326_v19 = vmul.f32 0.2, %v4070_v5 }
 0x28d   : > { %9553 = vst [vmem:[#allocation13_spill] sm:$0xff] %v9282_v49  ;;  %9554 = vst [vmem:[#allocation14_spill] sm:$0xff] %v9291_v17  ;;  %v4400_v17 = vmax.f32 %v3911_v47, %v4320_v29  ;;  %v4439_v47 = vmax.f32 %v3870_v33, %v4359_v41  ;;  %v3966_v29 = vadd.f32 %v9189_v56, %v9221_v14 }
 0x28e   : > { %v9295_v49 = vpop.f32.mrf.mxu1  ;;  %v9300_v9 = vpop.f32.mrf.mxu0  ;;  %v4467_v1 = vmax.f32 %v4459_v39, %v4401_v51  ;;  %v9557_v41 = vmax.f32 %v9226_v10, %v9251_v58  ;;  %v4468_v56 = vmax.f32 %v4460_v18, %v4420_v34  ;;  %v4015_v10 = vadd.f32 %v9209_v36, %v9134_v4 }
 0x28f   : > { %9555 = vst [vmem:[#allocation15_spill] sm:$0xff] %v9300_v9  ;;  %v4466_v13 = vmax.f32 %v4458_v24, %v4400_v17  ;;  %v4382_v9 = vmax.f32 %v3960_v54, %v4302_v6  ;;  %v3970_v17 = vadd.f32 %v9193_v23, %v9126_v43  ;;  %v4463_v42 = vmax.f32 %v9558_v61, %v4439_v47 }
 0x290   : > { %v9306_v32 = vpop.f32.mrf.mxu1  ;;  %v9313_v2 = vpop.f32.mrf.mxu0  ;;  %v4462_v33 = vmax.f32 %v9557_v41, %v4438_v21  ;;  %v4383_v54 = vmax.f32 %v3962_v16, %v4303_v44  ;;  %v4323_v24 = vmul.f32 0.2, %v3966_v29  ;;  %v4017_v23 = vadd.f32 %v9219_v8, %v9221_v14 }
 0x291   : > { %v4472_v0 = vmax.f32 %v4464_v20, %v4382_v9  ;;  %v4342_v50 = vmul.f32 0.2, %v3970_v17  ;;  %v4304_v20 = vmul.f32 0.2, %v4013_v53  ;;  %v4066_v36 = vadd.f32 %v9211_v48, %v9134_v4 }
 0x292   : > { %v9333_v58 = vpop.f32.mrf.mxu0  ;;  %v4470_v45 = vmax.f32 %v4462_v33, %v4440_v25  ;;  %v4473_v8 = vmax.f32 %v4465_v57, %v4383_v54  ;;  %v4403_v40 = vmax.f32 %v3966_v29, %v4323_v24  ;;  %v4019_v6 = vadd.f32 %v9243_v12, %v9221_v14  ;;  %v9559_v39 = vld [vmem:[#allocation11_spill] sm:$0xff]  ;;  %v9560_v11 = vld [vmem:[#allocation12_spill] sm:$0xff] }
 0x293   : > { %v4305_v9 = vmul.f32 0.2, %v4015_v10  ;;  %v4324_v51 = vmul.f32 0.2, %v4017_v23  ;;  %v4471_v28 = vmax.f32 %v4463_v42, %v4441_v22  ;;  %v4474_v30 = vmax.f32 %v4466_v13, %v4402_v37 }
 0x294   : > { %v4362_v48 = vmul.f32 0.2, %v3974_v38  ;;  %v4023_v57 = vadd.f32 %v9559_v39, %v9126_v43  ;;  %v4422_v21 = vmax.f32 %v3970_v17, %v4342_v50  ;;  %v4363_v34 = vmul.f32 0.2, %v3976_v15  ;;  %v9561_v33 = vld [vmem:[#allocation13_spill] sm:$0xff] }
 0x295   : > { %v4384_v18 = vmax.f32 %v4013_v53, %v4304_v20  ;;  %v4306_v47 = vmul.f32 0.2, %v4066_v36  ;;  %v4475_v44 = vmax.f32 %v4467_v1, %v4403_v40  ;;  %v4423_v29 = vmax.f32 %v3972_v3, %v4343_v55  ;;  %v9562_v53 = vld [vmem:[#allocation14_spill] sm:$0xff] }
 0x296   : > { %v4325_v52 = vmul.f32 0.2, %v4019_v6  ;;  %v4072_v60 = vadd.f32 %v9560_v11, %v9221_v14  ;;  %v4385_v7 = vmax.f32 %v4015_v10, %v4305_v9  ;;  %v4404_v26 = vmax.f32 %v4017_v23, %v4324_v51 }
 0x297   : > { %v4307_v25 = vmul.f32 0.2, %v4068_v59  ;;  %v4442_v35 = vmax.f32 %v3974_v38, %v4362_v48  ;;  %v4344_v41 = vmul.f32 0.2, %v4023_v57  ;;  %v4025_v17 = vadd.f32 %v9561_v33, %v9126_v43 }
 0x298   : > { %v4076_v61 = vadd.f32 %v9562_v53, %v9126_v43  ;;  %v4476_v42 = vmax.f32 %v4468_v56, %v4422_v21  ;;  %v4443_v1 = vmax.f32 %v3976_v15, %v4363_v34  ;;  %v4480_v54 = vmax.f32 %v4472_v0, %v4384_v18 }
 0x299   : > { %v4386_v24 = vmax.f32 %v4066_v36, %v4306_v47  ;;  %v4477_v22 = vmax.f32 %v4469_v31, %v4423_v29  ;;  %v4405_v37 = vmax.f32 %v4019_v6, %v4325_v52  ;;  %v4327_v10 = vmul.f32 0.2, %v4072_v60 }
 0x29a   : > { %v4027_v23 = vadd.f32 %v9295_v49, %v9205_v63  ;;  %v4481_v50 = vmax.f32 %v4473_v8, %v4385_v7  ;;  %v4482_v38 = vmax.f32 %v4474_v30, %v4404_v26  ;;  %v4387_v20 = vmax.f32 %v4068_v59, %v4307_v25  ;;  %v9563_v59 = vld [vmem:[#allocation15_spill] sm:$0xff] }
 0x29b   : > { %v4406_v40 = vmax.f32 %v4070_v5, %v4326_v19  ;;  %v4478_v9 = vmax.f32 %v4470_v45, %v4442_v35  ;;  %v4424_v51 = vmax.f32 %v4023_v57, %v4344_v41  ;;  %v4345_v48 = vmul.f32 0.2, %v4025_v17 }
 0x29c   : > { %v4346_v39 = vmul.f32 0.2, %v4076_v61  ;;  %v4479_v56 = vmax.f32 %v4471_v28, %v4443_v1  ;;  %v4488_v15 = vmax.f32 %v4480_v54, %v4386_v24  ;;  %v4029_v0 = vadd.f32 %v9306_v32, %v9205_v63 }
 0x29d   : > { %v4483_v6 = vmax.f32 %v4475_v44, %v4405_v37  ;;  %v4407_v49 = vmax.f32 %v4072_v60, %v4327_v10  ;;  %v4364_v8 = vmul.f32 0.2, %v4027_v23  ;;  %v9367_v5 = vadd.f32 %v9563_v59, %v9126_v43 }
 0x29e   : > { %v4489_v45 = vmax.f32 %v4481_v50, %v4387_v20  ;;  %v4490_v30 = vmax.f32 %v4482_v38, %v4406_v40  ;;  %v4484_v32 = vmax.f32 %v4476_v42, %v4424_v51  ;;  %v4425_v34 = vmax.f32 %v4025_v17, %v4345_v48 }
 0x29f   : > { %v4426_v18 = vmax.f32 %v4076_v61, %v4346_v39  ;;  %v4365_v47 = vmul.f32 0.2, %v4029_v0  ;;  %v4082_v44 = vadd.f32 %v9333_v58, %v9205_v63  ;;  %v4491_v60 = vmax.f32 %v4483_v6, %v4407_v49 }
 0x2a0   : > { %v4485_v41 = vmax.f32 %v4477_v22, %v4425_v34 }
 0x2a1   : > { %v4492_v58 = vmax.f32 %v4484_v32, %v4426_v18  ;;  %v4367_v53 = vmul.f32 0.2, %v4082_v44 }
 0x2a3   : > { %v4447_v51 = vmax.f32 %v4082_v44, %v4367_v53 }
 0x2c2   : > { %v9315_v46 = vpop.f32.mrf.mxu1 }
 0x2c3   : > { %v4119_v31 = vadd.f32 %v9315_v46, %v9134_v4  ;;  %v4080_v46 = vadd.f32 %v9313_v2, %v9205_v63 }
 0x2c4   : > { %v9335_v62 = vpop.f32.mrf.mxu1  ;;  %v9343_v16 = vpop.f32.mrf.mxu0 }
 0x2c5   : > { %v4121_v28 = vadd.f32 %v9335_v62, %v9134_v4  ;;  %v4308_v29 = vmul.f32 0.2, %v4119_v31  ;;  %v4172_v52 = vadd.f32 %v9343_v16, %v9134_v4  ;;  %v4444_v62 = vmax.f32 %v4027_v23, %v4364_v8 }
 0x2c6   : > { %v4122_v27 = vpop.f32.mrf.mxu1  ;;  %v4173_v12 = vpop.f32.mrf.mxu0  ;;  %v4366_v33 = vmul.f32 0.2, %v4080_v46  ;;  %v4445_v16 = vmax.f32 %v4029_v0, %v4365_v47 }
 0x2c7   : > { %v4123_v57 = vadd.f32 %v4122_v27, %v9221_v14  ;;  %v4347_v27 = vmul.f32 0.2, %v9367_v5  ;;  %v4309_v26 = vmul.f32 0.2, %v4121_v28  ;;  %v4174_v19 = vadd.f32 %v4173_v12, %v9134_v4 }
 0x2c8   : > { %v4124_v13 = vpop.f32.mrf.mxu1  ;;  %v4175_v3 = vpop.f32.mrf.mxu0  ;;  %v4388_v61 = vmax.f32 %v4119_v31, %v4308_v29  ;;  %v4310_v42 = vmul.f32 0.2, %v4172_v52  ;;  %v4486_v54 = vmax.f32 %v4478_v9, %v4444_v62  ;;  %v4446_v50 = vmax.f32 %v4080_v46, %v4366_v33 }
 0x2c9   : > { %v4125_v7 = vadd.f32 %v4124_v13, %v9221_v14  ;;  %v4328_v25 = vmul.f32 0.2, %v4123_v57  ;;  %v4176_v2 = vadd.f32 %v4175_v3, %v9221_v14  ;;  %v4427_v13 = vmax.f32 %v9367_v5, %v4347_v27 }
 0x2ca   : > { %v4128_v55 = vpop.f32.mrf.mxu1  ;;  %v4177_v36 = vpop.f32.mrf.mxu0  ;;  %v4389_v12 = vmax.f32 %v4121_v28, %v4309_v26  ;;  %v4311_v3 = vmul.f32 0.2, %v4174_v19  ;;  %v4496_v48 = vmax.f32 %v4488_v15, %v4388_v61  ;;  %v4390_v9 = vmax.f32 %v4172_v52, %v4310_v42 }
 0x2cb   : > { %v4129_v17 = vadd.f32 %v4128_v55, %v9126_v43  ;;  %v4329_v24 = vmul.f32 0.2, %v4125_v7  ;;  %v4178_v37 = vadd.f32 %v4177_v36, %v9221_v14  ;;  %v4408_v10 = vmax.f32 %v4123_v57, %v4328_v25 }
 0x2cc   : > { %v4130_v21 = vpop.f32.mrf.mxu1  ;;  %v4181_v11 = vpop.f32.mrf.mxu0  ;;  %v4330_v23 = vmul.f32 0.2, %v4176_v2  ;;  %v4487_v55 = vmax.f32 %v4479_v56, %v4445_v16  ;;  %v4497_v49 = vmax.f32 %v4489_v45, %v4389_v12  ;;  %v4391_v59 = vmax.f32 %v4174_v19, %v4311_v3 }
 0x2cd   : > { %v4348_v38 = vmul.f32 0.2, %v4129_v17  ;;  %v4131_v20 = vadd.f32 %v4130_v21, %v9126_v43  ;;  %v4409_v0 = vmax.f32 %v4125_v7, %v4329_v24  ;;  %v4331_v31 = vmul.f32 0.2, %v4178_v37 }
 0x2ce   : > { %v4132_v35 = vpop.f32.mrf.mxu1  ;;  %v4183_v1 = vpop.f32.mrf.mxu0  ;;  %v9388_v36 = vadd.f32 %v4181_v11, %v9126_v43  ;;  %v4498_v8 = vmax.f32 %v4490_v30, %v4408_v10  ;;  %v4410_v5 = vmax.f32 %v4176_v2, %v4330_v23  ;;  %v4493_v32 = vmax.f32 %v4485_v41, %v4427_v13 }
 0x2cf   : > { %v4133_v40 = vadd.f32 %v4132_v35, %v9205_v63  ;;  %v4428_v28 = vmax.f32 %v4129_v17, %v4348_v38  ;;  %v4349_v57 = vmul.f32 0.2, %v4131_v20  ;;  %v4494_v15 = vmax.f32 %v4486_v54, %v4446_v50 }
 0x2d0   : > { %v4134_v22 = vpop.f32.mrf.mxu1  ;;  %v4185_v39 = vpop.f32.mrf.mxu0  ;;  %v4495_v34 = vmax.f32 %v4487_v55, %v4447_v51  ;;  %v9393_v18 = vadd.f32 %v4183_v1, %v9126_v43  ;;  %v4499_v46 = vmax.f32 %v4491_v60, %v4409_v0  ;;  %v4411_v47 = vmax.f32 %v4178_v37, %v4331_v31 }
 0x2d1   : > { %v4135_v6 = vadd.f32 %v4134_v22, %v9205_v63  ;;  %v4368_v21 = vmul.f32 0.2, %v4133_v40  ;;  %v4186_v56 = vadd.f32 %v4185_v39, %v9205_v63  ;;  %v9396_v44 = vmul.f32 0.2, %v9388_v36 }
 0x2d2   : > { %v4187_v30 = vpop.f32.mrf.mxu0  ;;  %v4504_v52 = vmax.f32 %v4496_v48, %v4390_v9  ;;  %v4505_v11 = vmax.f32 %v4497_v49, %v4391_v59  ;;  %v4506_v62 = vmax.f32 %v4498_v8, %v4410_v5  ;;  %v9399_v7 = vmax.f32 %v4492_v58, %v4428_v28 }
 0x2d3   : > { %v4369_v45 = vmul.f32 0.2, %v4135_v6  ;;  %v4429_v26 = vmax.f32 %v4131_v20, %v4349_v57  ;;  %v4448_v25 = vmax.f32 %v4133_v40, %v4368_v21  ;;  %v4370_v19 = vmul.f32 0.2, %v4186_v56 }
 0x2d4   : > { %v9402_v60 = vmul.f32 0.2, %v9393_v18  ;;  %v4507_v16 = vmax.f32 %v4499_v46, %v4411_v47  ;;  %v4430_v53 = vmax.f32 %v9388_v36, %v9396_v44  ;;  %v9409_v58 = vadd.f32 %v4187_v30, %v9205_v63  ;;  %v6471_v44 = vld [vmem:[%s9531_s8] sm:$0xff]  }
 0x2d5   : > { %v4449_v61 = vmax.f32 %v4135_v6, %v4369_v45  ;;  %v4501_v12 = vmax.f32 %v4493_v32, %v4429_v26  ;;  %v4502_v10 = vmax.f32 %v4494_v15, %v4448_v25  ;;  %v4450_v3 = vmax.f32 %v4186_v56, %v4370_v19 }
 0x2d6   : > { %v4431_v38 = vmax.f32 %v9393_v18, %v9402_v60  ;;  %v4371_v49 = vmul.f32 0.2, %v9409_v58 }
 0x2d7   : > { %v4503_v6 = vmax.f32 %v4495_v34, %v4449_v61  ;;  %v4510_v59 = vmax.f32 %v4502_v10, %v4450_v3 }
 0x302   : > { %v4224_v29 = vpop.f32.mrf.mxu1 }
 0x303   : > { %v4225_v27 = vadd.f32 %v4224_v29, %v9134_v4 }
 0x304   : > { %v4226_v2 = vpop.f32.mrf.mxu1  ;;  %v4277_v35 = vpop.f32.mrf.mxu0 }
 0x305   : > { %v4312_v41 = vmul.f32 0.2, %v4225_v27  ;;  %v4227_v33 = vadd.f32 %v4226_v2, %v9134_v4  ;;  %v4278_v17 = vadd.f32 %v4277_v35, %v9134_v4 }
 0x306   : > { %v4228_v42 = vpop.f32.mrf.mxu1  ;;  %v4279_v1 = vpop.f32.mrf.mxu0 }
 0x307   : > { %v4392_v54 = vmax.f32 %v4225_v27, %v4312_v41  ;;  %v4313_v13 = vmul.f32 0.2, %v4227_v33  ;;  %v4314_v24 = vmul.f32 0.2, %v4278_v17  ;;  %v4229_v37 = vadd.f32 %v4228_v42, %v9221_v14 }
 0x308   : > { %v4280_v23 = vadd.f32 %v4279_v1, %v9134_v4  ;;  %v4230_v22 = vpop.f32.mrf.mxu1  ;;  %v4281_v50 = vpop.f32.mrf.mxu0  ;;  %v4451_v41 = vmax.f32 %v9409_v58, %v4371_v49  ;;  %v4508_v58 = vmax.f32 %v9399_v7, %v4430_v53  ;;  %v9564_v7 = vmov 0   ;;  %v6473_v53 = vld [vmem:[%s9531_s8 + $0x8] sm:$0xff]  }
 0x309   : > { %v4512_v20 = vmax.f32 %v4504_v52, %v4392_v54  ;;  %v4393_v40 = vmax.f32 %v4227_v33, %v4313_v13  ;;  %v4332_v55 = vmul.f32 0.2, %v4229_v37  ;;  %v4394_v51 = vmax.f32 %v4278_v17, %v4314_v24 }
 0x30a   : > { %v4315_v48 = vmul.f32 0.2, %v4280_v23  ;;  %v4231_v9 = vadd.f32 %v4230_v22, %v9221_v14  ;;  %v4282_v39 = vadd.f32 %v4281_v50, %v9221_v14  ;;  %v4234_v0 = vpop.f32.mrf.mxu1  ;;  %v4283_v31 = vpop.f32.mrf.mxu0 }
 0x30b   : > { %v4412_v4 = vmax.f32 %v4229_v37, %v4332_v55  ;;  %v4235_v8 = vadd.f32 %v4234_v0, %v9126_v43  ;;  %v4284_v57 = vadd.f32 %v4283_v31, %v9221_v14  ;;  %v4513_v32 = vmax.f32 %v4505_v11, %v4393_v40 }
 0x30c   : > { %v4333_v5 = vmul.f32 0.2, %v4231_v9  ;;  %v4334_v28 = vmul.f32 0.2, %v4282_v39  ;;  %v4236_v21 = vpop.f32.mrf.mxu1  ;;  %v4287_v56 = vpop.f32.mrf.mxu0  ;;  %v4395_v18 = vmax.f32 %v4280_v23, %v4315_v48  ;;  %v4520_v47 = vmax.f32 %v4512_v20, %v4394_v51 }
 0x30d   : > { %v4514_v15 = vmax.f32 %v4506_v62, %v4412_v4  ;;  %v4237_v46 = vadd.f32 %v4236_v21, %v9126_v43  ;;  %v4335_v30 = vmul.f32 0.2, %v4284_v57  ;;  %v4352_v27 = vmul.f32 0.2, %v4235_v8 }
 0x30e   : > { %v4413_v45 = vmax.f32 %v4231_v9, %v4333_v5  ;;  %v4414_v34 = vmax.f32 %v4282_v39, %v4334_v28  ;;  %v4238_v29 = vpop.f32.mrf.mxu1  ;;  %v4289_v52 = vpop.f32.mrf.mxu0  ;;  %v4288_v25 = vadd.f32 %v4287_v56, %v9126_v43  ;;  %v4521_v33 = vmax.f32 %v4513_v32, %v4395_v18 }
 0x30f   : > { %v4353_v26 = vmul.f32 0.2, %v4237_v46  ;;  %v4239_v19 = vadd.f32 %v4238_v29, %v9205_v63  ;;  %v4415_v35 = vmax.f32 %v4284_v57, %v4335_v30  ;;  %v4290_v11 = vadd.f32 %v4289_v52, %v9126_v43 }
 0x310   : > { %v4515_v14 = vmax.f32 %v4507_v16, %v4413_v45  ;;  %v4522_v2 = vmax.f32 %v4514_v15, %v4414_v34  ;;  %v4240_v62 = vpop.f32.mrf.mxu1  ;;  %v4291_v60 = vpop.f32.mrf.mxu0  ;;  %v4432_v37 = vmax.f32 %v4235_v8, %v4352_v27  ;;  %v4354_v10 = vmul.f32 0.2, %v4288_v25 }
 0x311   : > { %v4433_v17 = vmax.f32 %v4237_v46, %v4353_v26  ;;  %v4372_v61 = vmul.f32 0.2, %v4239_v19  ;;  %v4355_v54 = vmul.f32 0.2, %v4290_v11  ;;  %v4241_v13 = vadd.f32 %v4240_v62, %v9205_v63  ;;  %v4752_v26 = vpop.permute.xlu1 %4751 }
 0x312   : > { %v4528_v42 = vpack.c.bf16 %v4522_v2, %v4520_v47  ;;  %v4523_v1 = vmax.f32 %v4515_v14, %v4415_v35  ;;  %v4293_v24 = vpop.f32.mrf.mxu0  ;;  %v4292_v3 = vadd.f32 %v4291_v60, %v9205_v63  ;;  %v4509_v23 = vmax.f32 %v4501_v12, %v4431_v38 }
 0x313   : > { %v4452_v16 = vmax.f32 %v4239_v19, %v4372_v61  ;;  %v4373_v43 = vmul.f32 0.2, %v4241_v13  ;;  %v4294_v22 = vadd.f32 %v4293_v24, %v9205_v63  ;;  %v4511_v20 = vmax.f32 %v4503_v6, %v4451_v41  ;;  %v6475_v6 = vld [vmem:[%s9531_s8 + $0x10] sm:$0xff]   ;;  %v4747_v19 = vpop.permute.xlu0 %4746 }
 0x314   : > { %v4529_v50 = vpack.c.bf16 %v4523_v1, %v4521_v33  ;;  %v4374_v55 = vmul.f32 0.2, %v4292_v3  ;;  %v4517_v51 = vmax.f32 %v4509_v23, %v4433_v17  ;;  %v4435_v48 = vmax.f32 %v4290_v11, %v4355_v54 }
 0x315   : > { %v4518_v40 = vmax.f32 %v4510_v59, %v4452_v16  ;;  %v4453_v9 = vmax.f32 %v4241_v13, %v4373_v43  ;;  %v4375_v39 = vmul.f32 0.2, %v4294_v22  ;;  %v4516_v0 = vmax.f32 %v4508_v58, %v4432_v37  ;;  %v4689_v59 = vpop.f32.mrf.mxu0  ;;  %v4742_v11 = vpop.permute.xlu1 %4741 }
 0x316   : > { %v4434_v31 = vmax.f32 %v4288_v25, %v4354_v10  ;;  %v4454_v49 = vmax.f32 %v4292_v3, %v4374_v55  ;;  %v4525_v63 = vmax.f32 %v4517_v51, %v4435_v48 }
 0x317   : > { %v4519_v12 = vmax.f32 %v4511_v20, %v4453_v9  ;;  %v4455_v38 = vmax.f32 %v4294_v22, %v4375_v39  ;;  %v4691_v57 = vpop.f32.mrf.mxu0 }
 0x318   : > { %v4526_v4 = vmax.f32 %v4518_v40, %v4454_v49  ;;  %v4524_v5 = vmax.f32 %v4516_v0, %v4434_v31 }
 0x319   : > { %v4527_v8 = vmax.f32 %v4519_v12, %v4455_v38  ;;  %v4693_v21 = vpop.f32.mrf.mxu0  ;;  %v4732_v22 = vpop.permute.xlu1 %4731 }
 0x31a   : > { %v4530_v36 = vpack.c.bf16 %v4526_v4, %v4524_v5 }
 0x31b   : > { %v4531_v28 = vpack.c.bf16 %v4527_v8, %v4525_v63  ;;  %v4695_v56 = vpop.f32.mrf.mxu0 }
 0x31d   : > { %4580 = vmatprep.subr.bf16.mxu1 %v4531_v28  ;;  %v4699_v32 = vpop.f32.mrf.mxu0 }
 0x31e   : > { %4581 = vmatpush1.bf16.msra.mxu1 %v4530_v36 }
 0x31f   : > { %4582 = vmatprep.subr.bf16.mxu1 %v4529_v50  ;;  %v4701_v15 = vpop.f32.mrf.mxu0 }
 0x321   : > { %v4703_v47 = vpop.f32.mrf.mxu0 }
 0x322   : > { %4583 = vmatpush1.bf16.msra.mxu1 %v4528_v42  ;;  %v4737_v42 = vpop.permute.xlu0 %4736 }
 0x323   : > { %v4705_v30 = vpop.f32.mrf.mxu0 }
 0x325   : > { %6370 = vmatmul.mubr.msk.bf16.vlgmr.msra.gmra.mxu1 %vm3759_vm1, %v6471_v44  ;;  %v4709_v27 = vpop.f32.mrf.mxu0 }
 0x326   : > { %4610 = vmatprep.mubr.bf16.mxu1 %v9564_v7  ;;  %v4727_v49 = vpop.permute.xlu0 %4726 }
 0x327   : > { %v4711_v14 = vpop.f32.mrf.mxu0 }
 0x329   : > { %v4713_v60 = vpop.f32.mrf.mxu0 }
 0x32b   : > { %v4715_v23 = vpop.f32.mrf.mxu0 }
 0x32d   : > { %6371 = vmatmul.mubr.msk.bf16.gmra.mxu1 %vm3759_vm1, %v6473_v53 }
 0x32e   : > { %4620 = vmatprep.mubr.bf16.mxu1 %v9564_v7 }
 0x335   : > { %6372 = vmatmul.mubr.msk.bf16.gmra.mxu1 %vm3759_vm1, %v6475_v6 }
 0x336   : > { %4873 = vmatprep.mubr.bf16.mxu1 %v9564_v7 }
 0x3e5   : > { %v4602_v18 = vpop.f32.mrf.mxu1 }
 0x3e6   : > { %v4690_v12 = vadd.f32 %v4689_v59, %v4602_v18 }
 0x3e7   : > { %v4604_v46 = vpop.f32.mrf.mxu1 }
 0x3e8   : > { %v4692_v50 = vadd.f32 %v4691_v57, %v4604_v46 }
 0x3e9   : > { %v4606_v45 = vpop.f32.mrf.mxu1 }
 0x3ea   : > { %v4694_v55 = vadd.f32 %v4693_v21, %v4606_v45  ;;  %v4755_v63 = vadd.f32 %v4727_v49, %v4692_v50 }
 0x3eb   : > { %v4608_v34 = vpop.f32.mrf.mxu1 }
 0x3ec   : > { %v4696_v1 = vadd.f32 %v4695_v56, %v4608_v34  ;;  %v4756_v28 = vadd.f32 %v4732_v22, %v4694_v55  ;;  %v4754_v56 = vadd.f32 %v4727_v49, %v4690_v12  ;;  %v4767_v46 = vmul.f32 0.2, %v4755_v63 }
 0x3ed   : > { %v4612_v29 = vpop.f32.mrf.mxu1 }
 0x3ee   : > { %v4700_v16 = vadd.f32 %v4699_v32, %v4612_v29  ;;  %v4757_v51 = vadd.f32 %v4732_v22, %v4696_v1  ;;  %v4768_v34 = vmul.f32 0.2, %v4756_v28  ;;  %v4812_v1 = vpop.permute.xlu1 %4811 }
 0x3ef   : > { %v4614_v52 = vpop.f32.mrf.mxu1 }
 0x3f0   : > { %v4702_v17 = vadd.f32 %v4701_v15, %v4614_v52  ;;  %v4758_v38 = vadd.f32 %v4737_v42, %v4700_v16  ;;  %v4769_v53 = vmul.f32 0.2, %v4757_v51  ;;  %v4766_v52 = vmul.f32 0.2, %v4754_v56 }
 0x3f1   : > { %v4616_v25 = vpop.f32.mrf.mxu1 }
 0x3f2   : > { %v4704_v54 = vadd.f32 %v4703_v47, %v4616_v25  ;;  %v4759_v58 = vadd.f32 %v4737_v42, %v4702_v17  ;;  %v4770_v32 = vmul.f32 0.2, %v4758_v38  ;;  %v4780_v25 = vmax.f32 %v4756_v28, %v4768_v34 }
 0x3f3   : > { %v4618_v2 = vpop.f32.mrf.mxu1 }
 0x3f4   : > { %v4706_v62 = vadd.f32 %v4705_v30, %v4618_v2  ;;  %v4760_v48 = vadd.f32 %v4742_v11, %v4704_v54  ;;  %v4771_v8 = vmul.f32 0.2, %v4759_v58  ;;  %v4781_v30 = vmax.f32 %v4757_v51, %v4769_v53 }
 0x3f5   : > { %v4622_v35 = vpop.f32.mrf.mxu1  ;;  %v4778_v2 = vmax.f32 %v4754_v56, %v4766_v52 }
 0x3f6   : > { %v4710_v41 = vadd.f32 %v4709_v27, %v4622_v35  ;;  %v4761_v24 = vadd.f32 %v4742_v11, %v4706_v62  ;;  %v4772_v36 = vmul.f32 0.2, %v4760_v48  ;;  %v4783_v47 = vmax.f32 %v4759_v58, %v4771_v8  ;;  %v6476_v11 = vld [vmem:[%s9533_s10] sm:$0xff]   ;;  %v6477_v62 = vld [vmem:[%s9533_s10 + $0x8] sm:$0xff]  }
 0x3f7   : > { %v4624_v33 = vpop.f32.mrf.mxu1  ;;  %v4782_v27 = vmax.f32 %v4758_v38, %v4770_v32  ;;  %v4790_v35 = vpack.c.bf16 %v4780_v25, %v4778_v2 }
 0x3f8   : > { %v4712_v61 = vadd.f32 %v4711_v14, %v4624_v33  ;;  %v4762_v3 = vadd.f32 %v4747_v19, %v4710_v41  ;;  %v4773_v9 = vmul.f32 0.2, %v4761_v24  ;;  %v4784_v59 = vmax.f32 %v4760_v48, %v4772_v36  ;;  %v4822_v48 = vpop.permute.xlu1 %4821 }
 0x3f9   : > { %v4626_v13 = vpop.f32.mrf.mxu1 }
 0x3fa   : > { %v4763_v37 = vadd.f32 %v4747_v19, %v4712_v61  ;;  %v4714_v10 = vadd.f32 %v4713_v60, %v4626_v13  ;;  %v4774_v4 = vmul.f32 0.2, %v4762_v3  ;;  %v4785_v6 = vmax.f32 %v4761_v24, %v4773_v9  ;;  %v4807_v60 = vpop.permute.xlu0 %4806 }
 0x3fb   : > { %v4628_v43 = vpop.f32.mrf.mxu1  ;;  %v4792_v19 = vpack.c.bf16 %v4784_v59, %v4782_v27 }
 0x3fc   : > { %v4764_v20 = vadd.f32 %v4752_v26, %v4714_v10  ;;  %v4716_v40 = vadd.f32 %v4715_v23, %v4628_v43  ;;  %v4775_v39 = vmul.f32 0.2, %v4763_v37  ;;  %v4786_v15 = vmax.f32 %v4762_v3, %v4774_v4 }
 0x3fd   : > { %v4793_v29 = vpack.c.bf16 %v4785_v6, %v4783_v47 }
 0x3fe   : > { %v4776_v0 = vmul.f32 0.2, %v4764_v20  ;;  %v4765_v31 = vadd.f32 %v4752_v26, %v4716_v40  ;;  %v4787_v57 = vmax.f32 %v4763_v37, %v4775_v39  ;;  %v4779_v26 = vmax.f32 %v4755_v63, %v4767_v46  ;;  %v4817_v23 = vpop.permute.xlu0 %4816 }
 0x400   : > { %v4777_v5 = vmul.f32 0.2, %v4765_v31  ;;  %v4788_v44 = vmax.f32 %v4764_v20, %v4776_v0  ;;  %v4791_v14 = vpack.c.bf16 %v4781_v30, %v4779_v26 }
 0x402   : > { %v4789_v21 = vmax.f32 %v4765_v31, %v4777_v5  ;;  %v4794_v18 = vpack.c.bf16 %v4788_v44, %v4786_v15 }
 0x404   : > { %v4795_v45 = vpack.c.bf16 %v4789_v21, %v4787_v57 }
 0x406   : > { %4851 = vmatprep.subr.bf16.mxu1 %v4795_v45 }
 0x407   : > { %4852 = vmatpush1.bf16.msra.mxu1 %v4794_v18 }
 0x408   : > { %4853 = vmatprep.subr.bf16.mxu1 %v4793_v29 }
 0x40b   : > { %4854 = vmatpush1.bf16.msra.mxu1 %v4792_v19 }
 0x40c   : > { %4855 = vmatprep.subr.bf16.mxu1 %v4791_v14 }
 0x40f   : > { %4856 = vmatpush1.bf16.msra.mxu1 %v4790_v35 }
 0x412   : > { %6381 = vmatmul.mubr.msk.bf16.vlgmr.msra.gmra.mxu1 %vm4834_vm0, %v6476_v11 }
 0x413   : > { %4883 = vmatprep.mubr.bf16.mxu1 %v9564_v7 }
 0x41a   : > { %6382 = vmatmul.mubr.msk.bf16.gmra.mxu1 %vm4834_vm0, %v6477_v62 }
 0x4d2   : > { %v4875_v41 = vpop.f32.mrf.mxu1 }
 0x4d3   : > { %v4876_v33 = vadd.f32 %v4875_v41, %v4807_v60 }
 0x4d4   : > { %v4877_v17 = vpop.f32.mrf.mxu1 }
 0x4d5   : > { %v4894_v61 = vmul.f32 0.2, %v4876_v33  ;;  %v4878_v42 = vadd.f32 %v4877_v17, %v4807_v60 }
 0x4d6   : > { %v4879_v54 = vpop.f32.mrf.mxu1 }
 0x4d7   : > { %v4902_v13 = vmax.f32 %v4876_v33, %v4894_v61  ;;  %v4895_v24 = vmul.f32 0.2, %v4878_v42  ;;  %v4880_v37 = vadd.f32 %v4879_v54, %v4812_v1 }
 0x4d8   : > { %v4881_v7 = vpop.f32.mrf.mxu1 }
 0x4d9   : > { %4910 = vst [vmem:[%s9457_s28] sm:$0xff] %v4902_v13  ;;  %v4903_v10 = vmax.f32 %v4878_v42, %v4895_v24  ;;  %v4896_v16 = vmul.f32 0.2, %v4880_v37  ;;  %v4882_v3 = vadd.f32 %v4881_v7, %v4812_v1 }
 0x4da   : > { %v4885_v43 = vpop.f32.mrf.mxu1 }
 0x4db   : > { %4911 = vst [vmem:[%s9457_s28 + $0x8] sm:$0xff] %v4903_v10  ;;  %v4904_v22 = vmax.f32 %v4880_v37, %v4896_v16  ;;  %v4897_v50 = vmul.f32 0.2, %v4882_v3  ;;  %v4886_v58 = vadd.f32 %v4885_v43, %v4817_v23 }
 0x4dc   : > { %v4887_v20 = vpop.f32.mrf.mxu1 }
 0x4dd   : > { %4912 = vst [vmem:[%s9457_s28 + $0x10] sm:$0xff] %v4904_v22  ;;  %v4905_v40 = vmax.f32 %v4882_v3, %v4897_v50  ;;  %v4898_v55 = vmul.f32 0.2, %v4886_v58  ;;  %v4888_v51 = vadd.f32 %v4887_v20, %v4817_v23 }
 0x4de   : > { %v4889_v9 = vpop.f32.mrf.mxu1 }
 0x4df   : > { %4913 = vst [vmem:[%s9457_s28 + $0x18] sm:$0xff] %v4905_v40  ;;  %v4906_v39 = vmax.f32 %v4886_v58, %v4898_v55  ;;  %v4899_v0 = vmul.f32 0.2, %v4888_v51  ;;  %v4890_v31 = vadd.f32 %v4889_v9, %v4822_v48 }
 0x4e0   : > { %v4891_v49 = vpop.f32.mrf.mxu1 }
 0x4e1   : > { %4914 = vst [vmem:[%s9457_s28 + $0x20] sm:$0xff] %v4906_v39  ;;  %v4907_v12 = vmax.f32 %v4888_v51, %v4899_v0  ;;  %v4900_v38 = vmul.f32 0.2, %v4890_v31  ;;  %v4892_v4 = vadd.f32 %v4891_v49, %v4822_v48 }
 0x4e3   : > { %4915 = vst [vmem:[%s9457_s28 + $0x28] sm:$0xff] %v4907_v12  ;;  %v4908_v63 = vmax.f32 %v4890_v31, %v4900_v38  ;;  %v4901_v8 = vmul.f32 0.2, %v4892_v4 }
 0x4e5   : > { %4916 = vst [vmem:[%s9457_s28 + $0x30] sm:$0xff] %v4908_v63  ;;  %v4909_v5 = vmax.f32 %v4892_v4, %v4901_v8 }
 0x4e7   : > { %4917 = vst [vmem:[%s9457_s28 + $0x38] sm:$0xff] %v4909_v5 }
 0x4e8   : > { %6503 = shalt.err (!%p6500_p5)
}
 0x4e9   : > { %s6504_s15 = scalar_lea.hbm %s9470_s19, 1024  ;;  %s6508_s27 = scalar_lea.hbm %s9535_s12, 2048 }
 0x4ea   : > { %p6505_p6 = scmp.ne.s32.totalorder %s9470_s19, %s6504_s15  ;;  %p6509_p10 = scmp.lt.s32.totalorder %s9470_s19, %s9535_s12 }
 0x4eb   : > { %p6510_p11 = scmp.lt.s32.totalorder %s6508_s27, %s6504_s15 }
 0x4ec   : > { %p6506_p7 = pnand %p6505_p6, %p6678_p4 }
 0x4ed   : > { %p6511_p12 = por %p6510_p11, %p6509_p10 }
 0x4ee   : > { %p6507_p9 = pneg %p6506_p7 }
 0x4f0   : > { %p6512_p13 = pnand %p6511_p12, %p6507_p9 }
 0x4f2   : > { %6515 = shalt.err (!%p6512_p13)
}
 0x4f3   : > { %s6571_s14 = smov 256   ;;  %s6572_s18 = smov 16  }
 0x4f4   : > { %6396 = dma.vmem_to_hbm [thread:$0]  (%p6678_p4), %s9472_s21, 1024, %s9470_s19, %s9478_s25, %s6571_s14, %s6571_s14, %s6572_s18  }
 0x4f5 PF: > { %s9565_s24 = sld [smem:[#allocation5_spill]]  ;;  %p6402_p0 = scmp.ge.s32.totalorder %s6566_s26, 2 }
 0x4f7   : > { %p6399_p1 = pnand %p6402_p0, %p6685_p8 }
 0x4f9   : > { %p6400_p2 = pneg %p6399_p1 }
 0x4fb   : > { %s4949_s29 = sand.u32 1, %s9565_s24  }
 0x4fc   : > { %s4950_s16 = scalar_lea.sflag [#allocation3], %s4949_s29 }
 0x4fd   : > { %6541 = dma.done.wait (%p6400_p2), %s4950_s16, 1024  }
 0x4fe   : > { %6543 = vsyncadd (%p6400_p2), %s4950_s16, 4294966272  ;;  %s25_s26 = sadd.s32 1, %s6566_s26   ;;  %s9567_s15 = sld [smem:[#allocation6_spill]] }
 0x4ff   : > { %p22_p3 = scmp.ge.s32.totalorder %s25_s26, 4   ;;  %s9568_s23 = sld [smem:[#allocation10_spill]] }
 0x500   : > { %s9569_s24 = sld [smem:[#allocation7_spill]]  ;;  %s9571_s21 = smov %s6550_s22 }
 0x501   : > { %s9570_s25 = sld [smem:[#allocation8_spill]]  ;;  %24 = sbr.rel (!%p22_p3) target bundleno = 4 (0x4), region = 109 }
 0x504   : > { %s9572_s22 = smov %s9567_s15 }
 0x506   :  { %4955 = vsyncpa [#allocation3], 1 }
 0x507   :  { %4957 = vsyncpa [#allocation3 + $0x1], 1 }

</bundles_post_ra>
